<compile_context>
chip_gen: v6e
topology: v6e:2x2x1
jax: 0.10.0
libtpu: 0.0.40
codegen_flags: <defaults>
</compile_context>

<pallas_src>
import jax
import jax.numpy as jnp
import numpy as np
from jax.experimental import pallas as pl
from jax.experimental.pallas import tpu as pltpu

WINDOW = 80      # nn.Linear(80, 1) implies window_size == 80
FEATURES = 16
BATCH = 8        # B*F = 128 -> exactly one lane width
EPS = 1e-5
NGATES = 4       # LSTM gates


def _vanilla_lstm_kernel(x_ref, gamma_ref, beta_ref, wbd_ref, bvec_ref,
                         whh_ref, fcw_ref, fcb_ref, out_ref):
    W = x_ref.shape[0]
    B = out_ref.shape[1]
    G = NGATES

    # ---- BatchNorm1d (batch statistics over batch x features, per window row) + ReLU
    x = x_ref[...]                                            # (W, B*F), lane-dense
    mean = jnp.mean(x, axis=1, keepdims=True)                 # (W, 1) lane reduce
    var = jnp.mean((x - mean) ** 2, axis=1, keepdims=True)    # biased variance
    scale = gamma_ref[...] * jax.lax.rsqrt(var + EPS)         # fold gamma into per-row scale
    shift = beta_ref[...] - scale * mean
    y = jnp.maximum(x * scale + shift, 0.0)                   # (W, B*F)

    # ---- input-side gate pre-activations for ALL timesteps in one lane-dense matmul:
    # (W, B*F) @ (B*F, 4*B) block-diagonal weights -> columns [i|f|o|g] x batch,
    # with (b_ih + b_hh) folded into the bias row.
    gi = jnp.dot(y, wbd_ref[...], preferred_element_type=jnp.float32) + bvec_ref[...]  # (W, 4B)
    # pack the (pre-broadcast) fc1 weights into the same rows: one row extract per step
    gia = jnp.concatenate([gi, fcw_ref[...]], axis=1)         # (W, 5B), stays in vregs

    whh = whh_ref[...]                                        # (1, 4B) = w_hh per gate, tiled over batch

    h = jnp.zeros((1, B), jnp.float32)
    c = jnp.zeros((1, B), jnp.float32)
    acc = jnp.zeros((1, B), jnp.float32)

    # ---- fully unrolled LSTM recurrence (hidden_size = 1) + ReLU + fused Linear(80,1)
    # static python loop => static slices; EUP work per step: 1 fused sigmoid + 2 tanh
    for t in range(W):
        row = gia[t:t + 1, :]                                 # (1, 5B) static sublane slice
        h4 = jnp.concatenate([h, h, h, h], axis=1)            # replicate h across gate groups
        pre = row[:, 0:G * B] + h4 * whh                      # (1, 4B)
        sig = jax.nn.sigmoid(pre[:, 0:3 * B])                 # fused i / f / o sigmoids
        i_g = sig[:, 0:B]
        f_g = sig[:, B:2 * B]
        o_g = sig[:, 2 * B:3 * B]
        g_g = jnp.tanh(pre[:, 3 * B:4 * B])
        c = f_g * c + i_g * g_g
        h = o_g * jnp.tanh(c)
        acc = acc + jnp.maximum(h, 0.0) * row[:, G * B:]      # fc1 as a running dot over time

    out_ref[...] = acc + fcb_ref[0]                           # (1, B)


@jax.jit
def vanilla_lstm_forward(x, params):
    B, W, F = x.shape

    # glue: time-major, lane-dense (W, B*F)
    xw = jnp.transpose(x, (1, 0, 2)).reshape(W, B * F).astype(jnp.float32)
    gamma = params["bn_gamma"].reshape(W, 1).astype(jnp.float32)
    beta = params["bn_beta"].reshape(W, 1).astype(jnp.float32)

    # PyTorch LSTM gate order [i, f, g, o] -> kernel lane order [i, f, o, g]
    perm = [0, 1, 3, 2]
    w_p = params["w_ih"][perm, :]                              # (4, F)
    whh_p = params["w_hh"].reshape(NGATES)[jnp.array(perm)]    # (4,)
    b_p = (params["b_ih"] + params["b_hh"])[jnp.array(perm)]   # (4,)

    # block-diagonal (batch x gate) weight packing: Wbd[b*F+f, g*B+b] = w_p[g, f]
    wbd = jnp.einsum("gf,bd->bfgd", w_p,
                     jnp.eye(B, dtype=jnp.float32)).reshape(B * F, NGATES * B)
    bvec = jnp.repeat(b_p, B).reshape(1, NGATES * B)           # bias per (gate, batch) lane
    whh_vec = jnp.repeat(whh_p, B).reshape(1, NGATES * B)
    fcw = jnp.broadcast_to(params["fc_w"].reshape(W, 1), (W, B)).astype(jnp.float32)
    fcb = params["fc_b"].reshape(1).astype(jnp.float32)

    vmem = pl.BlockSpec(memory_space=pltpu.MemorySpace.VMEM)
    smem = pl.BlockSpec(memory_space=pltpu.MemorySpace.SMEM)

    out = pl.pallas_call(
        _vanilla_lstm_kernel,
        out_shape=jax.ShapeDtypeStruct((1, B), jnp.float32),
        in_specs=[vmem, vmem, vmem, vmem, vmem, vmem, vmem, smem],
        out_specs=vmem,
    )(xw, gamma, beta, wbd, bvec, whh_vec, fcw, fcb)
    return out.T                                               # (B, 1)


def reference_forward(x, params):
    """Pure-JAX reference mirroring the PyTorch forward (LSTM semantics)."""
    B, W, F = x.shape
    mean = jnp.mean(x, axis=(0, 2), keepdims=True)
    var = jnp.mean((x - mean) ** 2, axis=(0, 2), keepdims=True)
    gamma = params["bn_gamma"].reshape(1, W, 1)
    beta = params["bn_beta"].reshape(1, W, 1)
    y = jnp.maximum(gamma * (x - mean) / jnp.sqrt(var + EPS) + beta, 0.0)

    w_ih, b_ih = params["w_ih"], params["b_ih"]                # (4,F), (4,)  order [i,f,g,o]
    w_hh, b_hh = params["w_hh"], params["b_hh"]                # (4,1), (4,)

    def step(carry, y_t):                                      # y_t (B, F)
        h, c = carry                                           # (B,1), (B,1)
        gates = y_t @ w_ih.T + b_ih + h @ w_hh.T + b_hh        # (B, 4)
        i = jax.nn.sigmoid(gates[:, 0:1])
        f = jax.nn.sigmoid(gates[:, 1:2])
        g = jnp.tanh(gates[:, 2:3])
        o = jax.nn.sigmoid(gates[:, 3:4])
        c_new = f * c + i * g
        h_new = o * jnp.tanh(c_new)
        return (h_new, c_new), jnp.maximum(h_new, 0.0)

    init = (jnp.zeros((B, 1), jnp.float32), jnp.zeros((B, 1), jnp.float32))
    _, hs = jax.lax.scan(step, init, jnp.transpose(y, (1, 0, 2)))  # hs: (W, B, 1)
    hseq = hs[:, :, 0].T                                       # (B, W) == permute(0,2,1)[:,0,:]
    out = hseq @ params["fc_w"].T + params["fc_b"]             # (B, 1)
    return out                                                 # x[:, -1, :] of (B,1,1)


def init_params(key, window, features):
    ks = jax.random.split(key, 8)
    s = 0.5
    return {
        "bn_gamma": 1.0 + 0.1 * jax.random.normal(ks[0], (window,), jnp.float32),
        "bn_beta": 0.1 * jax.random.normal(ks[1], (window,), jnp.float32),
        # PyTorch LSTM layout: (4*hidden, in) with gate order [i, f, g, o]
        "w_ih": s * jax.random.normal(ks[2], (NGATES, features), jnp.float32),
        "w_hh": s * jax.random.normal(ks[3], (NGATES, 1), jnp.float32),
        "b_ih": s * jax.random.normal(ks[4], (NGATES,), jnp.float32),
        "b_hh": s * jax.random.normal(ks[5], (NGATES,), jnp.float32),
        "fc_w": s * jax.random.normal(ks[6], (1, window), jnp.float32),
        "fc_b": s * jax.random.normal(ks[7], (1,), jnp.float32),
    }


if __name__ == "__main__":
    key = jax.random.PRNGKey(0)
    kx, kp = jax.random.split(key)
    x = jax.random.normal(kx, (BATCH, WINDOW, FEATURES), dtype=jnp.float32)
    params = init_params(kp, WINDOW, FEATURES)

    out = vanilla_lstm_forward(x, params)
    out = jax.block_until_ready(out)
    assert out.shape == (BATCH, 1)

    ref = reference_forward(x, params)
    np.testing.assert_allclose(np.asarray(out), np.asarray(ref), rtol=2e-3, atol=2e-3)

    print("KERNEL_OK")
</pallas_src>

<mosaic_0001>
module attributes {stable_mosaic.version = 11 : i64} {
  func.func @_vanilla_lstm_kernel(%arg0: memref<80x128xf32, #tpu.memory_space<vmem>>, %arg1: memref<80x1xf32, #tpu.memory_space<vmem>>, %arg2: memref<80x1xf32, #tpu.memory_space<vmem>>, %arg3: memref<128x32xf32, #tpu.memory_space<vmem>>, %arg4: memref<1x32xf32, #tpu.memory_space<vmem>>, %arg5: memref<1x32xf32, #tpu.memory_space<vmem>>, %arg6: memref<80x8xf32, #tpu.memory_space<vmem>>, %arg7: memref<1xf32, #tpu.memory_space<smem>>, %arg8: memref<1x8xf32, #tpu.memory_space<vmem>>) attributes {dimension_semantics = [], scalar_prefetch = 0 : i64, scratch_operands = 0 : i64, tpu.core_type = #tpu.core_type<tc>} {
    %c0 = arith.constant 0 : index
    %c0_0 = arith.constant 0 : index
    %0 = vector.load %arg0[%c0, %c0_0] : memref<80x128xf32, #tpu.memory_space<vmem>>, vector<80x128xf32>
    %cst = arith.constant dense<0.000000e+00> : vector<80xf32>
    %1 = vector.multi_reduction <add>, %0, %cst [1] : vector<80x128xf32> to vector<80xf32>
    %2 = vector.shape_cast %1 : vector<80xf32> to vector<80x1xf32>
    %cst_1 = arith.constant 1.280000e+02 : f32
    %3 = vector.broadcast %cst_1 : f32 to vector<80x1xf32>
    %4 = arith.divf %2, %3 : vector<80x1xf32>
    %5 = vector.broadcast %4 : vector<80x1xf32> to vector<80x128xf32>
    %6 = arith.subf %0, %5 : vector<80x128xf32>
    %7 = arith.mulf %6, %6 : vector<80x128xf32>
    %cst_2 = arith.constant dense<0.000000e+00> : vector<80xf32>
    %8 = vector.multi_reduction <add>, %7, %cst_2 [1] : vector<80x128xf32> to vector<80xf32>
    %9 = vector.shape_cast %8 : vector<80xf32> to vector<80x1xf32>
    %cst_3 = arith.constant 1.280000e+02 : f32
    %10 = vector.broadcast %cst_3 : f32 to vector<80x1xf32>
    %11 = arith.divf %9, %10 : vector<80x1xf32>
    %c0_4 = arith.constant 0 : index
    %c0_5 = arith.constant 0 : index
    %12 = vector.load %arg1[%c0_4, %c0_5] : memref<80x1xf32, #tpu.memory_space<vmem>>, vector<80x1xf32>
    %cst_6 = arith.constant 9.99999974E-6 : f32
    %13 = vector.broadcast %cst_6 : f32 to vector<80x1xf32>
    %14 = arith.addf %11, %13 : vector<80x1xf32>
    %15 = math.rsqrt %14 : vector<80x1xf32>
    %16 = arith.mulf %12, %15 : vector<80x1xf32>
    %c0_7 = arith.constant 0 : index
    %c0_8 = arith.constant 0 : index
    %17 = vector.load %arg2[%c0_7, %c0_8] : memref<80x1xf32, #tpu.memory_space<vmem>>, vector<80x1xf32>
    %18 = arith.mulf %16, %4 : vector<80x1xf32>
    %19 = arith.subf %17, %18 : vector<80x1xf32>
    %20 = vector.broadcast %16 : vector<80x1xf32> to vector<80x128xf32>
    %21 = arith.mulf %0, %20 : vector<80x128xf32>
    %22 = vector.broadcast %19 : vector<80x1xf32> to vector<80x128xf32>
    %23 = arith.addf %21, %22 : vector<80x128xf32>
    %cst_9 = arith.constant 0.000000e+00 : f32
    %24 = vector.broadcast %cst_9 : f32 to vector<80x128xf32>
    %25 = arith.maximumf %23, %24 : vector<80x128xf32>
    %c0_10 = arith.constant 0 : index
    %c0_11 = arith.constant 0 : index
    %26 = vector.load %arg3[%c0_10, %c0_11] : memref<128x32xf32, #tpu.memory_space<vmem>>, vector<128x32xf32>
    %cst_12 = arith.constant dense<0.000000e+00> : vector<80x32xf32>
    %27 = tpu.matmul %25, %26, %cst_12 {dimension_numbers = #tpu.dot_dimension_numbers<[1], [0], [0], [1], [0, 0, 1, 1], [], []>} : vector<80x128xf32>, vector<128x32xf32>, vector<80x32xf32> -> vector<80x32xf32>
    %c0_13 = arith.constant 0 : index
    %c0_14 = arith.constant 0 : index
    %28 = vector.load %arg4[%c0_13, %c0_14] : memref<1x32xf32, #tpu.memory_space<vmem>>, vector<1x32xf32>
    %29 = vector.broadcast %28 : vector<1x32xf32> to vector<80x32xf32>
    %30 = arith.addf %27, %29 : vector<80x32xf32>
    %c0_15 = arith.constant 0 : index
    %c0_16 = arith.constant 0 : index
    %31 = vector.load %arg6[%c0_15, %c0_16] : memref<80x8xf32, #tpu.memory_space<vmem>>, vector<80x8xf32>
    %32 = tpu.concatenate %30, %31 in 1 : vector<80x32xf32>, vector<80x8xf32> -> vector<80x40xf32>
    %c0_17 = arith.constant 0 : index
    %c0_18 = arith.constant 0 : index
    %33 = vector.load %arg5[%c0_17, %c0_18] : memref<1x32xf32, #tpu.memory_space<vmem>>, vector<1x32xf32>
    %cst_19 = arith.constant 0.000000e+00 : f32
    %34 = vector.broadcast %cst_19 : f32 to vector<1x8xf32>
    %cst_20 = arith.constant 0.000000e+00 : f32
    %35 = vector.broadcast %cst_20 : f32 to vector<1x8xf32>
    %cst_21 = arith.constant 0.000000e+00 : f32
    %36 = vector.broadcast %cst_21 : f32 to vector<1x8xf32>
    %37 = vector.extract_strided_slice %32 {offsets = [0, 0], sizes = [1, 40], strides = [1, 1]} : vector<80x40xf32> to vector<1x40xf32>
    %38 = tpu.concatenate %34, %34, %34, %34 in 1 : vector<1x8xf32>, vector<1x8xf32>, vector<1x8xf32>, vector<1x8xf32> -> vector<1x32xf32>
    %39 = vector.extract_strided_slice %37 {offsets = [0, 0], sizes = [1, 32], strides = [1, 1]} : vector<1x40xf32> to vector<1x32xf32>
    %40 = arith.mulf %38, %33 : vector<1x32xf32>
    %41 = arith.addf %39, %40 : vector<1x32xf32>
    %42 = vector.extract_strided_slice %41 {offsets = [0, 0], sizes = [1, 24], strides = [1, 1]} : vector<1x32xf32> to vector<1x24xf32>
    %43 = arith.negf %42 : vector<1x24xf32>
    %44 = math.exp %43 : vector<1x24xf32>
    %cst_22 = arith.constant 1.000000e+00 : f32
    %45 = vector.broadcast %cst_22 : f32 to vector<1x24xf32>
    %46 = arith.addf %45, %44 : vector<1x24xf32>
    %47 = arith.divf %45, %46 : vector<1x24xf32>
    %48 = vector.extract_strided_slice %47 {offsets = [0, 0], sizes = [1, 8], strides = [1, 1]} : vector<1x24xf32> to vector<1x8xf32>
    %49 = vector.extract_strided_slice %47 {offsets = [0, 8], sizes = [1, 8], strides = [1, 1]} : vector<1x24xf32> to vector<1x8xf32>
    %50 = vector.extract_strided_slice %47 {offsets = [0, 16], sizes = [1, 8], strides = [1, 1]} : vector<1x24xf32> to vector<1x8xf32>
    %51 = vector.extract_strided_slice %41 {offsets = [0, 24], sizes = [1, 8], strides = [1, 1]} : vector<1x32xf32> to vector<1x8xf32>
    %52 = math.tanh %51 : vector<1x8xf32>
    %53 = arith.mulf %49, %35 : vector<1x8xf32>
    %54 = arith.mulf %48, %52 : vector<1x8xf32>
    %55 = arith.addf %53, %54 : vector<1x8xf32>
    %56 = math.tanh %55 : vector<1x8xf32>
    %57 = arith.mulf %50, %56 : vector<1x8xf32>
    %cst_23 = arith.constant 0.000000e+00 : f32
    %58 = vector.broadcast %cst_23 : f32 to vector<1x8xf32>
    %59 = arith.maximumf %57, %58 : vector<1x8xf32>
    %60 = vector.extract_strided_slice %37 {offsets = [0, 32], sizes = [1, 8], strides = [1, 1]} : vector<1x40xf32> to vector<1x8xf32>
    %61 = arith.mulf %59, %60 : vector<1x8xf32>
    %62 = arith.addf %36, %61 : vector<1x8xf32>
    %63 = vector.extract_strided_slice %32 {offsets = [1, 0], sizes = [1, 40], strides = [1, 1]} : vector<80x40xf32> to vector<1x40xf32>
    %64 = tpu.concatenate %57, %57, %57, %57 in 1 : vector<1x8xf32>, vector<1x8xf32>, vector<1x8xf32>, vector<1x8xf32> -> vector<1x32xf32>
    %65 = vector.extract_strided_slice %63 {offsets = [0, 0], sizes = [1, 32], strides = [1, 1]} : vector<1x40xf32> to vector<1x32xf32>
    %66 = arith.mulf %64, %33 : vector<1x32xf32>
    %67 = arith.addf %65, %66 : vector<1x32xf32>
    %68 = vector.extract_strided_slice %67 {offsets = [0, 0], sizes = [1, 24], strides = [1, 1]} : vector<1x32xf32> to vector<1x24xf32>
    %69 = arith.negf %68 : vector<1x24xf32>
    %70 = math.exp %69 : vector<1x24xf32>
    %cst_24 = arith.constant 1.000000e+00 : f32
    %71 = vector.broadcast %cst_24 : f32 to vector<1x24xf32>
    %72 = arith.addf %71, %70 : vector<1x24xf32>
    %73 = arith.divf %71, %72 : vector<1x24xf32>
    %74 = vector.extract_strided_slice %73 {offsets = [0, 0], sizes = [1, 8], strides = [1, 1]} : vector<1x24xf32> to vector<1x8xf32>
    %75 = vector.extract_strided_slice %73 {offsets = [0, 8], sizes = [1, 8], strides = [1, 1]} : vector<1x24xf32> to vector<1x8xf32>
    %76 = vector.extract_strided_slice %73 {offsets = [0, 16], sizes = [1, 8], strides = [1, 1]} : vector<1x24xf32> to vector<1x8xf32>
    %77 = vector.extract_strided_slice %67 {offsets = [0, 24], sizes = [1, 8], strides = [1, 1]} : vector<1x32xf32> to vector<1x8xf32>
    %78 = math.tanh %77 : vector<1x8xf32>
    %79 = arith.mulf %75, %55 : vector<1x8xf32>
    %80 = arith.mulf %74, %78 : vector<1x8xf32>
    %81 = arith.addf %79, %80 : vector<1x8xf32>
    %82 = math.tanh %81 : vector<1x8xf32>
    %83 = arith.mulf %76, %82 : vector<1x8xf32>
    %cst_25 = arith.constant 0.000000e+00 : f32
    %84 = vector.broadcast %cst_25 : f32 to vector<1x8xf32>
    %85 = arith.maximumf %83, %84 : vector<1x8xf32>
    %86 = vector.extract_strided_slice %63 {offsets = [0, 32], sizes = [1, 8], strides = [1, 1]} : vector<1x40xf32> to vector<1x8xf32>
    %87 = arith.mulf %85, %86 : vector<1x8xf32>
    %88 = arith.addf %62, %87 : vector<1x8xf32>
    %89 = vector.extract_strided_slice %32 {offsets = [2, 0], sizes = [1, 40], strides = [1, 1]} : vector<80x40xf32> to vector<1x40xf32>
    %90 = tpu.concatenate %83, %83, %83, %83 in 1 : vector<1x8xf32>, vector<1x8xf32>, vector<1x8xf32>, vector<1x8xf32> -> vector<1x32xf32>
    %91 = vector.extract_strided_slice %89 {offsets = [0, 0], sizes = [1, 32], strides = [1, 1]} : vector<1x40xf32> to vector<1x32xf32>
    %92 = arith.mulf %90, %33 : vector<1x32xf32>
    %93 = arith.addf %91, %92 : vector<1x32xf32>
    %94 = vector.extract_strided_slice %93 {offsets = [0, 0], sizes = [1, 24], strides = [1, 1]} : vector<1x32xf32> to vector<1x24xf32>
    %95 = arith.negf %94 : vector<1x24xf32>
    %96 = math.exp %95 : vector<1x24xf32>
    %cst_26 = arith.constant 1.000000e+00 : f32
    %97 = vector.broadcast %cst_26 : f32 to vector<1x24xf32>
    %98 = arith.addf %97, %96 : vector<1x24xf32>
    %99 = arith.divf %97, %98 : vector<1x24xf32>
    %100 = vector.extract_strided_slice %99 {offsets = [0, 0], sizes = [1, 8], strides = [1, 1]} : vector<1x24xf32> to vector<1x8xf32>
    %101 = vector.extract_strided_slice %99 {offsets = [0, 8], sizes = [1, 8], strides = [1, 1]} : vector<1x24xf32> to vector<1x8xf32>
    %102 = vector.extract_strided_slice %99 {offsets = [0, 16], sizes = [1, 8], strides = [1, 1]} : vector<1x24xf32> to vector<1x8xf32>
    %103 = vector.extract_strided_slice %93 {offsets = [0, 24], sizes = [1, 8], strides = [1, 1]} : vector<1x32xf32> to vector<1x8xf32>
    %104 = math.tanh %103 : vector<1x8xf32>
    %105 = arith.mulf %101, %81 : vector<1x8xf32>
    %106 = arith.mulf %100, %104 : vector<1x8xf32>
    %107 = arith.addf %105, %106 : vector<1x8xf32>
    %108 = math.tanh %107 : vector<1x8xf32>
    %109 = arith.mulf %102, %108 : vector<1x8xf32>
    %cst_27 = arith.constant 0.000000e+00 : f32
    %110 = vector.broadcast %cst_27 : f32 to vector<1x8xf32>
    %111 = arith.maximumf %109, %110 : vector<1x8xf32>
    %112 = vector.extract_strided_slice %89 {offsets = [0, 32], sizes = [1, 8], strides = [1, 1]} : vector<1x40xf32> to vector<1x8xf32>
    %113 = arith.mulf %111, %112 : vector<1x8xf32>
    %114 = arith.addf %88, %113 : vector<1x8xf32>
    %115 = vector.extract_strided_slice %32 {offsets = [3, 0], sizes = [1, 40], strides = [1, 1]} : vector<80x40xf32> to vector<1x40xf32>
    %116 = tpu.concatenate %109, %109, %109, %109 in 1 : vector<1x8xf32>, vector<1x8xf32>, vector<1x8xf32>, vector<1x8xf32> -> vector<1x32xf32>
    %117 = vector.extract_strided_slice %115 {offsets = [0, 0], sizes = [1, 32], strides = [1, 1]} : vector<1x40xf32> to vector<1x32xf32>
    %118 = arith.mulf %116, %33 : vector<1x32xf32>
    %119 = arith.addf %117, %118 : vector<1x32xf32>
    %120 = vector.extract_strided_slice %119 {offsets = [0, 0], sizes = [1, 24], strides = [1, 1]} : vector<1x32xf32> to vector<1x24xf32>
    %121 = arith.negf %120 : vector<1x24xf32>
    %122 = math.exp %121 : vector<1x24xf32>
    %cst_28 = arith.constant 1.000000e+00 : f32
    %123 = vector.broadcast %cst_28 : f32 to vector<1x24xf32>
    %124 = arith.addf %123, %122 : vector<1x24xf32>
    %125 = arith.divf %123, %124 : vector<1x24xf32>
    %126 = vector.extract_strided_slice %125 {offsets = [0, 0], sizes = [1, 8], strides = [1, 1]} : vector<1x24xf32> to vector<1x8xf32>
    %127 = vector.extract_strided_slice %125 {offsets = [0, 8], sizes = [1, 8], strides = [1, 1]} : vector<1x24xf32> to vector<1x8xf32>
    %128 = vector.extract_strided_slice %125 {offsets = [0, 16], sizes = [1, 8], strides = [1, 1]} : vector<1x24xf32> to vector<1x8xf32>
    %129 = vector.extract_strided_slice %119 {offsets = [0, 24], sizes = [1, 8], strides = [1, 1]} : vector<1x32xf32> to vector<1x8xf32>
    %130 = math.tanh %129 : vector<1x8xf32>
    %131 = arith.mulf %127, %107 : vector<1x8xf32>
    %132 = arith.mulf %126, %130 : vector<1x8xf32>
    %133 = arith.addf %131, %132 : vector<1x8xf32>
    %134 = math.tanh %133 : vector<1x8xf32>
    %135 = arith.mulf %128, %134 : vector<1x8xf32>
    %cst_29 = arith.constant 0.000000e+00 : f32
    %136 = vector.broadcast %cst_29 : f32 to vector<1x8xf32>
    %137 = arith.maximumf %135, %136 : vector<1x8xf32>
    %138 = vector.extract_strided_slice %115 {offsets = [0, 32], sizes = [1, 8], strides = [1, 1]} : vector<1x40xf32> to vector<1x8xf32>
    %139 = arith.mulf %137, %138 : vector<1x8xf32>
    %140 = arith.addf %114, %139 : vector<1x8xf32>
    %141 = vector.extract_strided_slice %32 {offsets = [4, 0], sizes = [1, 40], strides = [1, 1]} : vector<80x40xf32> to vector<1x40xf32>
    %142 = tpu.concatenate %135, %135, %135, %135 in 1 : vector<1x8xf32>, vector<1x8xf32>, vector<1x8xf32>, vector<1x8xf32> -> vector<1x32xf32>
    %143 = vector.extract_strided_slice %141 {offsets = [0, 0], sizes = [1, 32], strides = [1, 1]} : vector<1x40xf32> to vector<1x32xf32>
    %144 = arith.mulf %142, %33 : vector<1x32xf32>
    %145 = arith.addf %143, %144 : vector<1x32xf32>
    %146 = vector.extract_strided_slice %145 {offsets = [0, 0], sizes = [1, 24], strides = [1, 1]} : vector<1x32xf32> to vector<1x24xf32>
    %147 = arith.negf %146 : vector<1x24xf32>
    %148 = math.exp %147 : vector<1x24xf32>
    %cst_30 = arith.constant 1.000000e+00 : f32
    %149 = vector.broadcast %cst_30 : f32 to vector<1x24xf32>
    %150 = arith.addf %149, %148 : vector<1x24xf32>
    %151 = arith.divf %149, %150 : vector<1x24xf32>
    %152 = vector.extract_strided_slice %151 {offsets = [0, 0], sizes = [1, 8], strides = [1, 1]} : vector<1x24xf32> to vector<1x8xf32>
    %153 = vector.extract_strided_slice %151 {offsets = [0, 8], sizes = [1, 8], strides = [1, 1]} : vector<1x24xf32> to vector<1x8xf32>
    %154 = vector.extract_strided_slice %151 {offsets = [0, 16], sizes = [1, 8], strides = [1, 1]} : vector<1x24xf32> to vector<1x8xf32>
    %155 = vector.extract_strided_slice %145 {offsets = [0, 24], sizes = [1, 8], strides = [1, 1]} : vector<1x32xf32> to vector<1x8xf32>
    %156 = math.tanh %155 : vector<1x8xf32>
    %157 = arith.mulf %153, %133 : vector<1x8xf32>
    %158 = arith.mulf %152, %156 : vector<1x8xf32>
    %159 = arith.addf %157, %158 : vector<1x8xf32>
    %160 = math.tanh %159 : vector<1x8xf32>
    %161 = arith.mulf %154, %160 : vector<1x8xf32>
    %cst_31 = arith.constant 0.000000e+00 : f32
    %162 = vector.broadcast %cst_31 : f32 to vector<1x8xf32>
    %163 = arith.maximumf %161, %162 : vector<1x8xf32>
    %164 = vector.extract_strided_slice %141 {offsets = [0, 32], sizes = [1, 8], strides = [1, 1]} : vector<1x40xf32> to vector<1x8xf32>
    %165 = arith.mulf %163, %164 : vector<1x8xf32>
    %166 = arith.addf %140, %165 : vector<1x8xf32>
    %167 = vector.extract_strided_slice %32 {offsets = [5, 0], sizes = [1, 40], strides = [1, 1]} : vector<80x40xf32> to vector<1x40xf32>
    %168 = tpu.concatenate %161, %161, %161, %161 in 1 : vector<1x8xf32>, vector<1x8xf32>, vector<1x8xf32>, vector<1x8xf32> -> vector<1x32xf32>
    %169 = vector.extract_strided_slice %167 {offsets = [0, 0], sizes = [1, 32], strides = [1, 1]} : vector<1x40xf32> to vector<1x32xf32>
    %170 = arith.mulf %168, %33 : vector<1x32xf32>
    %171 = arith.addf %169, %170 : vector<1x32xf32>
    %172 = vector.extract_strided_slice %171 {offsets = [0, 0], sizes = [1, 24], strides = [1, 1]} : vector<1x32xf32> to vector<1x24xf32>
    %173 = arith.negf %172 : vector<1x24xf32>
    %174 = math.exp %173 : vector<1x24xf32>
    %cst_32 = arith.constant 1.000000e+00 : f32
    %175 = vector.broadcast %cst_32 : f32 to vector<1x24xf32>
    %176 = arith.addf %175, %174 : vector<1x24xf32>
    %177 = arith.divf %175, %176 : vector<1x24xf32>
    %178 = vector.extract_strided_slice %177 {offsets = [0, 0], sizes = [1, 8], strides = [1, 1]} : vector<1x24xf32> to vector<1x8xf32>
    %179 = vector.extract_strided_slice %177 {offsets = [0, 8], sizes = [1, 8], strides = [1, 1]} : vector<1x24xf32> to vector<1x8xf32>
    %180 = vector.extract_strided_slice %177 {offsets = [0, 16], sizes = [1, 8], strides = [1, 1]} : vector<1x24xf32> to vector<1x8xf32>
    %181 = vector.extract_strided_slice %171 {offsets = [0, 24], sizes = [1, 8], strides = [1, 1]} : vector<1x32xf32> to vector<1x8xf32>
    %182 = math.tanh %181 : vector<1x8xf32>
    %183 = arith.mulf %179, %159 : vector<1x8xf32>
    %184 = arith.mulf %178, %182 : vector<1x8xf32>
    %185 = arith.addf %183, %184 : vector<1x8xf32>
    %186 = math.tanh %185 : vector<1x8xf32>
    %187 = arith.mulf %180, %186 : vector<1x8xf32>
    %cst_33 = arith.constant 0.000000e+00 : f32
    %188 = vector.broadcast %cst_33 : f32 to vector<1x8xf32>
    %189 = arith.maximumf %187, %188 : vector<1x8xf32>
    %190 = vector.extract_strided_slice %167 {offsets = [0, 32], sizes = [1, 8], strides = [1, 1]} : vector<1x40xf32> to vector<1x8xf32>
    %191 = arith.mulf %189, %190 : vector<1x8xf32>
    %192 = arith.addf %166, %191 : vector<1x8xf32>
    %193 = vector.extract_strided_slice %32 {offsets = [6, 0], sizes = [1, 40], strides = [1, 1]} : vector<80x40xf32> to vector<1x40xf32>
    %194 = tpu.concatenate %187, %187, %187, %187 in 1 : vector<1x8xf32>, vector<1x8xf32>, vector<1x8xf32>, vector<1x8xf32> -> vector<1x32xf32>
    %195 = vector.extract_strided_slice %193 {offsets = [0, 0], sizes = [1, 32], strides = [1, 1]} : vector<1x40xf32> to vector<1x32xf32>
    %196 = arith.mulf %194, %33 : vector<1x32xf32>
    %197 = arith.addf %195, %196 : vector<1x32xf32>
    %198 = vector.extract_strided_slice %197 {offsets = [0, 0], sizes = [1, 24], strides = [1, 1]} : vector<1x32xf32> to vector<1x24xf32>
    %199 = arith.negf %198 : vector<1x24xf32>
    %200 = math.exp %199 : vector<1x24xf32>
    %cst_34 = arith.constant 1.000000e+00 : f32
    %201 = vector.broadcast %cst_34 : f32 to vector<1x24xf32>
    %202 = arith.addf %201, %200 : vector<1x24xf32>
    %203 = arith.divf %201, %202 : vector<1x24xf32>
    %204 = vector.extract_strided_slice %203 {offsets = [0, 0], sizes = [1, 8], strides = [1, 1]} : vector<1x24xf32> to vector<1x8xf32>
    %205 = vector.extract_strided_slice %203 {offsets = [0, 8], sizes = [1, 8], strides = [1, 1]} : vector<1x24xf32> to vector<1x8xf32>
    %206 = vector.extract_strided_slice %203 {offsets = [0, 16], sizes = [1, 8], strides = [1, 1]} : vector<1x24xf32> to vector<1x8xf32>
    %207 = vector.extract_strided_slice %197 {offsets = [0, 24], sizes = [1, 8], strides = [1, 1]} : vector<1x32xf32> to vector<1x8xf32>
    %208 = math.tanh %207 : vector<1x8xf32>
    %209 = arith.mulf %205, %185 : vector<1x8xf32>
    %210 = arith.mulf %204, %208 : vector<1x8xf32>
    %211 = arith.addf %209, %210 : vector<1x8xf32>
    %212 = math.tanh %211 : vector<1x8xf32>
    %213 = arith.mulf %206, %212 : vector<1x8xf32>
    %cst_35 = arith.constant 0.000000e+00 : f32
    %214 = vector.broadcast %cst_35 : f32 to vector<1x8xf32>
    %215 = arith.maximumf %213, %214 : vector<1x8xf32>
    %216 = vector.extract_strided_slice %193 {offsets = [0, 32], sizes = [1, 8], strides = [1, 1]} : vector<1x40xf32> to vector<1x8xf32>
    %217 = arith.mulf %215, %216 : vector<1x8xf32>
    %218 = arith.addf %192, %217 : vector<1x8xf32>
    %219 = vector.extract_strided_slice %32 {offsets = [7, 0], sizes = [1, 40], strides = [1, 1]} : vector<80x40xf32> to vector<1x40xf32>
    %220 = tpu.concatenate %213, %213, %213, %213 in 1 : vector<1x8xf32>, vector<1x8xf32>, vector<1x8xf32>, vector<1x8xf32> -> vector<1x32xf32>
    %221 = vector.extract_strided_slice %219 {offsets = [0, 0], sizes = [1, 32], strides = [1, 1]} : vector<1x40xf32> to vector<1x32xf32>
    %222 = arith.mulf %220, %33 : vector<1x32xf32>
    %223 = arith.addf %221, %222 : vector<1x32xf32>
    %224 = vector.extract_strided_slice %223 {offsets = [0, 0], sizes = [1, 24], strides = [1, 1]} : vector<1x32xf32> to vector<1x24xf32>
    %225 = arith.negf %224 : vector<1x24xf32>
    %226 = math.exp %225 : vector<1x24xf32>
    %cst_36 = arith.constant 1.000000e+00 : f32
    %227 = vector.broadcast %cst_36 : f32 to vector<1x24xf32>
    %228 = arith.addf %227, %226 : vector<1x24xf32>
    %229 = arith.divf %227, %228 : vector<1x24xf32>
    %230 = vector.extract_strided_slice %229 {offsets = [0, 0], sizes = [1, 8], strides = [1, 1]} : vector<1x24xf32> to vector<1x8xf32>
    %231 = vector.extract_strided_slice %229 {offsets = [0, 8], sizes = [1, 8], strides = [1, 1]} : vector<1x24xf32> to vector<1x8xf32>
    %232 = vector.extract_strided_slice %229 {offsets = [0, 16], sizes = [1, 8], strides = [1, 1]} : vector<1x24xf32> to vector<1x8xf32>
    %233 = vector.extract_strided_slice %223 {offsets = [0, 24], sizes = [1, 8], strides = [1, 1]} : vector<1x32xf32> to vector<1x8xf32>
    %234 = math.tanh %233 : vector<1x8xf32>
    %235 = arith.mulf %231, %211 : vector<1x8xf32>
    %236 = arith.mulf %230, %234 : vector<1x8xf32>
    %237 = arith.addf %235, %236 : vector<1x8xf32>
    %238 = math.tanh %237 : vector<1x8xf32>
    %239 = arith.mulf %232, %238 : vector<1x8xf32>
    %cst_37 = arith.constant 0.000000e+00 : f32
    %240 = vector.broadcast %cst_37 : f32 to vector<1x8xf32>
    %241 = arith.maximumf %239, %240 : vector<1x8xf32>
    %242 = vector.extract_strided_slice %219 {offsets = [0, 32], sizes = [1, 8], strides = [1, 1]} : vector<1x40xf32> to vector<1x8xf32>
    %243 = arith.mulf %241, %242 : vector<1x8xf32>
    %244 = arith.addf %218, %243 : vector<1x8xf32>
    %245 = vector.extract_strided_slice %32 {offsets = [8, 0], sizes = [1, 40], strides = [1, 1]} : vector<80x40xf32> to vector<1x40xf32>
    %246 = tpu.concatenate %239, %239, %239, %239 in 1 : vector<1x8xf32>, vector<1x8xf32>, vector<1x8xf32>, vector<1x8xf32> -> vector<1x32xf32>
    %247 = vector.extract_strided_slice %245 {offsets = [0, 0], sizes = [1, 32], strides = [1, 1]} : vector<1x40xf32> to vector<1x32xf32>
    %248 = arith.mulf %246, %33 : vector<1x32xf32>
    %249 = arith.addf %247, %248 : vector<1x32xf32>
    %250 = vector.extract_strided_slice %249 {offsets = [0, 0], sizes = [1, 24], strides = [1, 1]} : vector<1x32xf32> to vector<1x24xf32>
    %251 = arith.negf %250 : vector<1x24xf32>
    %252 = math.exp %251 : vector<1x24xf32>
    %cst_38 = arith.constant 1.000000e+00 : f32
    %253 = vector.broadcast %cst_38 : f32 to vector<1x24xf32>
    %254 = arith.addf %253, %252 : vector<1x24xf32>
    %255 = arith.divf %253, %254 : vector<1x24xf32>
    %256 = vector.extract_strided_slice %255 {offsets = [0, 0], sizes = [1, 8], strides = [1, 1]} : vector<1x24xf32> to vector<1x8xf32>
    %257 = vector.extract_strided_slice %255 {offsets = [0, 8], sizes = [1, 8], strides = [1, 1]} : vector<1x24xf32> to vector<1x8xf32>
    %258 = vector.extract_strided_slice %255 {offsets = [0, 16], sizes = [1, 8], strides = [1, 1]} : vector<1x24xf32> to vector<1x8xf32>
    %259 = vector.extract_strided_slice %249 {offsets = [0, 24], sizes = [1, 8], strides = [1, 1]} : vector<1x32xf32> to vector<1x8xf32>
    %260 = math.tanh %259 : vector<1x8xf32>
    %261 = arith.mulf %257, %237 : vector<1x8xf32>
    %262 = arith.mulf %256, %260 : vector<1x8xf32>
    %263 = arith.addf %261, %262 : vector<1x8xf32>
    %264 = math.tanh %263 : vector<1x8xf32>
    %265 = arith.mulf %258, %264 : vector<1x8xf32>
    %cst_39 = arith.constant 0.000000e+00 : f32
    %266 = vector.broadcast %cst_39 : f32 to vector<1x8xf32>
    %267 = arith.maximumf %265, %266 : vector<1x8xf32>
    %268 = vector.extract_strided_slice %245 {offsets = [0, 32], sizes = [1, 8], strides = [1, 1]} : vector<1x40xf32> to vector<1x8xf32>
    %269 = arith.mulf %267, %268 : vector<1x8xf32>
    %270 = arith.addf %244, %269 : vector<1x8xf32>
    %271 = vector.extract_strided_slice %32 {offsets = [9, 0], sizes = [1, 40], strides = [1, 1]} : vector<80x40xf32> to vector<1x40xf32>
    %272 = tpu.concatenate %265, %265, %265, %265 in 1 : vector<1x8xf32>, vector<1x8xf32>, vector<1x8xf32>, vector<1x8xf32> -> vector<1x32xf32>
    %273 = vector.extract_strided_slice %271 {offsets = [0, 0], sizes = [1, 32], strides = [1, 1]} : vector<1x40xf32> to vector<1x32xf32>
    %274 = arith.mulf %272, %33 : vector<1x32xf32>
    %275 = arith.addf %273, %274 : vector<1x32xf32>
    %276 = vector.extract_strided_slice %275 {offsets = [0, 0], sizes = [1, 24], strides = [1, 1]} : vector<1x32xf32> to vector<1x24xf32>
    %277 = arith.negf %276 : vector<1x24xf32>
    %278 = math.exp %277 : vector<1x24xf32>
    %cst_40 = arith.constant 1.000000e+00 : f32
    %279 = vector.broadcast %cst_40 : f32 to vector<1x24xf32>
    %280 = arith.addf %279, %278 : vector<1x24xf32>
    %281 = arith.divf %279, %280 : vector<1x24xf32>
    %282 = vector.extract_strided_slice %281 {offsets = [0, 0], sizes = [1, 8], strides = [1, 1]} : vector<1x24xf32> to vector<1x8xf32>
    %283 = vector.extract_strided_slice %281 {offsets = [0, 8], sizes = [1, 8], strides = [1, 1]} : vector<1x24xf32> to vector<1x8xf32>
    %284 = vector.extract_strided_slice %281 {offsets = [0, 16], sizes = [1, 8], strides = [1, 1]} : vector<1x24xf32> to vector<1x8xf32>
    %285 = vector.extract_strided_slice %275 {offsets = [0, 24], sizes = [1, 8], strides = [1, 1]} : vector<1x32xf32> to vector<1x8xf32>
    %286 = math.tanh %285 : vector<1x8xf32>
    %287 = arith.mulf %283, %263 : vector<1x8xf32>
    %288 = arith.mulf %282, %286 : vector<1x8xf32>
    %289 = arith.addf %287, %288 : vector<1x8xf32>
    %290 = math.tanh %289 : vector<1x8xf32>
    %291 = arith.mulf %284, %290 : vector<1x8xf32>
    %cst_41 = arith.constant 0.000000e+00 : f32
    %292 = vector.broadcast %cst_41 : f32 to vector<1x8xf32>
    %293 = arith.maximumf %291, %292 : vector<1x8xf32>
    %294 = vector.extract_strided_slice %271 {offsets = [0, 32], sizes = [1, 8], strides = [1, 1]} : vector<1x40xf32> to vector<1x8xf32>
    %295 = arith.mulf %293, %294 : vector<1x8xf32>
    %296 = arith.addf %270, %295 : vector<1x8xf32>
    %297 = vector.extract_strided_slice %32 {offsets = [10, 0], sizes = [1, 40], strides = [1, 1]} : vector<80x40xf32> to vector<1x40xf32>
    %298 = tpu.concatenate %291, %291, %291, %291 in 1 : vector<1x8xf32>, vector<1x8xf32>, vector<1x8xf32>, vector<1x8xf32> -> vector<1x32xf32>
    %299 = vector.extract_strided_slice %297 {offsets = [0, 0], sizes = [1, 32], strides = [1, 1]} : vector<1x40xf32> to vector<1x32xf32>
    %300 = arith.mulf %298, %33 : vector<1x32xf32>
    %301 = arith.addf %299, %300 : vector<1x32xf32>
    %302 = vector.extract_strided_slice %301 {offsets = [0, 0], sizes = [1, 24], strides = [1, 1]} : vector<1x32xf32> to vector<1x24xf32>
    %303 = arith.negf %302 : vector<1x24xf32>
    %304 = math.exp %303 : vector<1x24xf32>
    %cst_42 = arith.constant 1.000000e+00 : f32
    %305 = vector.broadcast %cst_42 : f32 to vector<1x24xf32>
    %306 = arith.addf %305, %304 : vector<1x24xf32>
    %307 = arith.divf %305, %306 : vector<1x24xf32>
    %308 = vector.extract_strided_slice %307 {offsets = [0, 0], sizes = [1, 8], strides = [1, 1]} : vector<1x24xf32> to vector<1x8xf32>
    %309 = vector.extract_strided_slice %307 {offsets = [0, 8], sizes = [1, 8], strides = [1, 1]} : vector<1x24xf32> to vector<1x8xf32>
    %310 = vector.extract_strided_slice %307 {offsets = [0, 16], sizes = [1, 8], strides = [1, 1]} : vector<1x24xf32> to vector<1x8xf32>
    %311 = vector.extract_strided_slice %301 {offsets = [0, 24], sizes = [1, 8], strides = [1, 1]} : vector<1x32xf32> to vector<1x8xf32>
    %312 = math.tanh %311 : vector<1x8xf32>
    %313 = arith.mulf %309, %289 : vector<1x8xf32>
    %314 = arith.mulf %308, %312 : vector<1x8xf32>
    %315 = arith.addf %313, %314 : vector<1x8xf32>
    %316 = math.tanh %315 : vector<1x8xf32>
    %317 = arith.mulf %310, %316 : vector<1x8xf32>
    %cst_43 = arith.constant 0.000000e+00 : f32
    %318 = vector.broadcast %cst_43 : f32 to vector<1x8xf32>
    %319 = arith.maximumf %317, %318 : vector<1x8xf32>
    %320 = vector.extract_strided_slice %297 {offsets = [0, 32], sizes = [1, 8], strides = [1, 1]} : vector<1x40xf32> to vector<1x8xf32>
    %321 = arith.mulf %319, %320 : vector<1x8xf32>
    %322 = arith.addf %296, %321 : vector<1x8xf32>
    %323 = vector.extract_strided_slice %32 {offsets = [11, 0], sizes = [1, 40], strides = [1, 1]} : vector<80x40xf32> to vector<1x40xf32>
    %324 = tpu.concatenate %317, %317, %317, %317 in 1 : vector<1x8xf32>, vector<1x8xf32>, vector<1x8xf32>, vector<1x8xf32> -> vector<1x32xf32>
    %325 = vector.extract_strided_slice %323 {offsets = [0, 0], sizes = [1, 32], strides = [1, 1]} : vector<1x40xf32> to vector<1x32xf32>
    %326 = arith.mulf %324, %33 : vector<1x32xf32>
    %327 = arith.addf %325, %326 : vector<1x32xf32>
    %328 = vector.extract_strided_slice %327 {offsets = [0, 0], sizes = [1, 24], strides = [1, 1]} : vector<1x32xf32> to vector<1x24xf32>
    %329 = arith.negf %328 : vector<1x24xf32>
    %330 = math.exp %329 : vector<1x24xf32>
    %cst_44 = arith.constant 1.000000e+00 : f32
    %331 = vector.broadcast %cst_44 : f32 to vector<1x24xf32>
    %332 = arith.addf %331, %330 : vector<1x24xf32>
    %333 = arith.divf %331, %332 : vector<1x24xf32>
    %334 = vector.extract_strided_slice %333 {offsets = [0, 0], sizes = [1, 8], strides = [1, 1]} : vector<1x24xf32> to vector<1x8xf32>
    %335 = vector.extract_strided_slice %333 {offsets = [0, 8], sizes = [1, 8], strides = [1, 1]} : vector<1x24xf32> to vector<1x8xf32>
    %336 = vector.extract_strided_slice %333 {offsets = [0, 16], sizes = [1, 8], strides = [1, 1]} : vector<1x24xf32> to vector<1x8xf32>
    %337 = vector.extract_strided_slice %327 {offsets = [0, 24], sizes = [1, 8], strides = [1, 1]} : vector<1x32xf32> to vector<1x8xf32>
    %338 = math.tanh %337 : vector<1x8xf32>
    %339 = arith.mulf %335, %315 : vector<1x8xf32>
    %340 = arith.mulf %334, %338 : vector<1x8xf32>
    %341 = arith.addf %339, %340 : vector<1x8xf32>
    %342 = math.tanh %341 : vector<1x8xf32>
    %343 = arith.mulf %336, %342 : vector<1x8xf32>
    %cst_45 = arith.constant 0.000000e+00 : f32
    %344 = vector.broadcast %cst_45 : f32 to vector<1x8xf32>
    %345 = arith.maximumf %343, %344 : vector<1x8xf32>
    %346 = vector.extract_strided_slice %323 {offsets = [0, 32], sizes = [1, 8], strides = [1, 1]} : vector<1x40xf32> to vector<1x8xf32>
    %347 = arith.mulf %345, %346 : vector<1x8xf32>
    %348 = arith.addf %322, %347 : vector<1x8xf32>
    %349 = vector.extract_strided_slice %32 {offsets = [12, 0], sizes = [1, 40], strides = [1, 1]} : vector<80x40xf32> to vector<1x40xf32>
    %350 = tpu.concatenate %343, %343, %343, %343 in 1 : vector<1x8xf32>, vector<1x8xf32>, vector<1x8xf32>, vector<1x8xf32> -> vector<1x32xf32>
    %351 = vector.extract_strided_slice %349 {offsets = [0, 0], sizes = [1, 32], strides = [1, 1]} : vector<1x40xf32> to vector<1x32xf32>
    %352 = arith.mulf %350, %33 : vector<1x32xf32>
    %353 = arith.addf %351, %352 : vector<1x32xf32>
    %354 = vector.extract_strided_slice %353 {offsets = [0, 0], sizes = [1, 24], strides = [1, 1]} : vector<1x32xf32> to vector<1x24xf32>
    %355 = arith.negf %354 : vector<1x24xf32>
    %356 = math.exp %355 : vector<1x24xf32>
    %cst_46 = arith.constant 1.000000e+00 : f32
    %357 = vector.broadcast %cst_46 : f32 to vector<1x24xf32>
    %358 = arith.addf %357, %356 : vector<1x24xf32>
    %359 = arith.divf %357, %358 : vector<1x24xf32>
    %360 = vector.extract_strided_slice %359 {offsets = [0, 0], sizes = [1, 8], strides = [1, 1]} : vector<1x24xf32> to vector<1x8xf32>
    %361 = vector.extract_strided_slice %359 {offsets = [0, 8], sizes = [1, 8], strides = [1, 1]} : vector<1x24xf32> to vector<1x8xf32>
    %362 = vector.extract_strided_slice %359 {offsets = [0, 16], sizes = [1, 8], strides = [1, 1]} : vector<1x24xf32> to vector<1x8xf32>
    %363 = vector.extract_strided_slice %353 {offsets = [0, 24], sizes = [1, 8], strides = [1, 1]} : vector<1x32xf32> to vector<1x8xf32>
    %364 = math.tanh %363 : vector<1x8xf32>
    %365 = arith.mulf %361, %341 : vector<1x8xf32>
    %366 = arith.mulf %360, %364 : vector<1x8xf32>
    %367 = arith.addf %365, %366 : vector<1x8xf32>
    %368 = math.tanh %367 : vector<1x8xf32>
    %369 = arith.mulf %362, %368 : vector<1x8xf32>
    %cst_47 = arith.constant 0.000000e+00 : f32
    %370 = vector.broadcast %cst_47 : f32 to vector<1x8xf32>
    %371 = arith.maximumf %369, %370 : vector<1x8xf32>
    %372 = vector.extract_strided_slice %349 {offsets = [0, 32], sizes = [1, 8], strides = [1, 1]} : vector<1x40xf32> to vector<1x8xf32>
    %373 = arith.mulf %371, %372 : vector<1x8xf32>
    %374 = arith.addf %348, %373 : vector<1x8xf32>
    %375 = vector.extract_strided_slice %32 {offsets = [13, 0], sizes = [1, 40], strides = [1, 1]} : vector<80x40xf32> to vector<1x40xf32>
    %376 = tpu.concatenate %369, %369, %369, %369 in 1 : vector<1x8xf32>, vector<1x8xf32>, vector<1x8xf32>, vector<1x8xf32> -> vector<1x32xf32>
    %377 = vector.extract_strided_slice %375 {offsets = [0, 0], sizes = [1, 32], strides = [1, 1]} : vector<1x40xf32> to vector<1x32xf32>
    %378 = arith.mulf %376, %33 : vector<1x32xf32>
    %379 = arith.addf %377, %378 : vector<1x32xf32>
    %380 = vector.extract_strided_slice %379 {offsets = [0, 0], sizes = [1, 24], strides = [1, 1]} : vector<1x32xf32> to vector<1x24xf32>
    %381 = arith.negf %380 : vector<1x24xf32>
    %382 = math.exp %381 : vector<1x24xf32>
    %cst_48 = arith.constant 1.000000e+00 : f32
    %383 = vector.broadcast %cst_48 : f32 to vector<1x24xf32>
    %384 = arith.addf %383, %382 : vector<1x24xf32>
    %385 = arith.divf %383, %384 : vector<1x24xf32>
    %386 = vector.extract_strided_slice %385 {offsets = [0, 0], sizes = [1, 8], strides = [1, 1]} : vector<1x24xf32> to vector<1x8xf32>
    %387 = vector.extract_strided_slice %385 {offsets = [0, 8], sizes = [1, 8], strides = [1, 1]} : vector<1x24xf32> to vector<1x8xf32>
    %388 = vector.extract_strided_slice %385 {offsets = [0, 16], sizes = [1, 8], strides = [1, 1]} : vector<1x24xf32> to vector<1x8xf32>
    %389 = vector.extract_strided_slice %379 {offsets = [0, 24], sizes = [1, 8], strides = [1, 1]} : vector<1x32xf32> to vector<1x8xf32>
    %390 = math.tanh %389 : vector<1x8xf32>
    %391 = arith.mulf %387, %367 : vector<1x8xf32>
    %392 = arith.mulf %386, %390 : vector<1x8xf32>
    %393 = arith.addf %391, %392 : vector<1x8xf32>
    %394 = math.tanh %393 : vector<1x8xf32>
    %395 = arith.mulf %388, %394 : vector<1x8xf32>
    %cst_49 = arith.constant 0.000000e+00 : f32
    %396 = vector.broadcast %cst_49 : f32 to vector<1x8xf32>
    %397 = arith.maximumf %395, %396 : vector<1x8xf32>
    %398 = vector.extract_strided_slice %375 {offsets = [0, 32], sizes = [1, 8], strides = [1, 1]} : vector<1x40xf32> to vector<1x8xf32>
    %399 = arith.mulf %397, %398 : vector<1x8xf32>
    %400 = arith.addf %374, %399 : vector<1x8xf32>
    %401 = vector.extract_strided_slice %32 {offsets = [14, 0], sizes = [1, 40], strides = [1, 1]} : vector<80x40xf32> to vector<1x40xf32>
    %402 = tpu.concatenate %395, %395, %395, %395 in 1 : vector<1x8xf32>, vector<1x8xf32>, vector<1x8xf32>, vector<1x8xf32> -> vector<1x32xf32>
    %403 = vector.extract_strided_slice %401 {offsets = [0, 0], sizes = [1, 32], strides = [1, 1]} : vector<1x40xf32> to vector<1x32xf32>
    %404 = arith.mulf %402, %33 : vector<1x32xf32>
    %405 = arith.addf %403, %404 : vector<1x32xf32>
    %406 = vector.extract_strided_slice %405 {offsets = [0, 0], sizes = [1, 24], strides = [1, 1]} : vector<1x32xf32> to vector<1x24xf32>
    %407 = arith.negf %406 : vector<1x24xf32>
    %408 = math.exp %407 : vector<1x24xf32>
    %cst_50 = arith.constant 1.000000e+00 : f32
    %409 = vector.broadcast %cst_50 : f32 to vector<1x24xf32>
    %410 = arith.addf %409, %408 : vector<1x24xf32>
    %411 = arith.divf %409, %410 : vector<1x24xf32>
    %412 = vector.extract_strided_slice %411 {offsets = [0, 0], sizes = [1, 8], strides = [1, 1]} : vector<1x24xf32> to vector<1x8xf32>
    %413 = vector.extract_strided_slice %411 {offsets = [0, 8], sizes = [1, 8], strides = [1, 1]} : vector<1x24xf32> to vector<1x8xf32>
    %414 = vector.extract_strided_slice %411 {offsets = [0, 16], sizes = [1, 8], strides = [1, 1]} : vector<1x24xf32> to vector<1x8xf32>
    %415 = vector.extract_strided_slice %405 {offsets = [0, 24], sizes = [1, 8], strides = [1, 1]} : vector<1x32xf32> to vector<1x8xf32>
    %416 = math.tanh %415 : vector<1x8xf32>
    %417 = arith.mulf %413, %393 : vector<1x8xf32>
    %418 = arith.mulf %412, %416 : vector<1x8xf32>
    %419 = arith.addf %417, %418 : vector<1x8xf32>
    %420 = math.tanh %419 : vector<1x8xf32>
    %421 = arith.mulf %414, %420 : vector<1x8xf32>
    %cst_51 = arith.constant 0.000000e+00 : f32
    %422 = vector.broadcast %cst_51 : f32 to vector<1x8xf32>
    %423 = arith.maximumf %421, %422 : vector<1x8xf32>
    %424 = vector.extract_strided_slice %401 {offsets = [0, 32], sizes = [1, 8], strides = [1, 1]} : vector<1x40xf32> to vector<1x8xf32>
    %425 = arith.mulf %423, %424 : vector<1x8xf32>
    %426 = arith.addf %400, %425 : vector<1x8xf32>
    %427 = vector.extract_strided_slice %32 {offsets = [15, 0], sizes = [1, 40], strides = [1, 1]} : vector<80x40xf32> to vector<1x40xf32>
    %428 = tpu.concatenate %421, %421, %421, %421 in 1 : vector<1x8xf32>, vector<1x8xf32>, vector<1x8xf32>, vector<1x8xf32> -> vector<1x32xf32>
    %429 = vector.extract_strided_slice %427 {offsets = [0, 0], sizes = [1, 32], strides = [1, 1]} : vector<1x40xf32> to vector<1x32xf32>
    %430 = arith.mulf %428, %33 : vector<1x32xf32>
    %431 = arith.addf %429, %430 : vector<1x32xf32>
    %432 = vector.extract_strided_slice %431 {offsets = [0, 0], sizes = [1, 24], strides = [1, 1]} : vector<1x32xf32> to vector<1x24xf32>
    %433 = arith.negf %432 : vector<1x24xf32>
    %434 = math.exp %433 : vector<1x24xf32>
    %cst_52 = arith.constant 1.000000e+00 : f32
    %435 = vector.broadcast %cst_52 : f32 to vector<1x24xf32>
    %436 = arith.addf %435, %434 : vector<1x24xf32>
    %437 = arith.divf %435, %436 : vector<1x24xf32>
    %438 = vector.extract_strided_slice %437 {offsets = [0, 0], sizes = [1, 8], strides = [1, 1]} : vector<1x24xf32> to vector<1x8xf32>
    %439 = vector.extract_strided_slice %437 {offsets = [0, 8], sizes = [1, 8], strides = [1, 1]} : vector<1x24xf32> to vector<1x8xf32>
    %440 = vector.extract_strided_slice %437 {offsets = [0, 16], sizes = [1, 8], strides = [1, 1]} : vector<1x24xf32> to vector<1x8xf32>
    %441 = vector.extract_strided_slice %431 {offsets = [0, 24], sizes = [1, 8], strides = [1, 1]} : vector<1x32xf32> to vector<1x8xf32>
    %442 = math.tanh %441 : vector<1x8xf32>
    %443 = arith.mulf %439, %419 : vector<1x8xf32>
    %444 = arith.mulf %438, %442 : vector<1x8xf32>
    %445 = arith.addf %443, %444 : vector<1x8xf32>
    %446 = math.tanh %445 : vector<1x8xf32>
    %447 = arith.mulf %440, %446 : vector<1x8xf32>
    %cst_53 = arith.constant 0.000000e+00 : f32
    %448 = vector.broadcast %cst_53 : f32 to vector<1x8xf32>
    %449 = arith.maximumf %447, %448 : vector<1x8xf32>
    %450 = vector.extract_strided_slice %427 {offsets = [0, 32], sizes = [1, 8], strides = [1, 1]} : vector<1x40xf32> to vector<1x8xf32>
    %451 = arith.mulf %449, %450 : vector<1x8xf32>
    %452 = arith.addf %426, %451 : vector<1x8xf32>
    %453 = vector.extract_strided_slice %32 {offsets = [16, 0], sizes = [1, 40], strides = [1, 1]} : vector<80x40xf32> to vector<1x40xf32>
    %454 = tpu.concatenate %447, %447, %447, %447 in 1 : vector<1x8xf32>, vector<1x8xf32>, vector<1x8xf32>, vector<1x8xf32> -> vector<1x32xf32>
    %455 = vector.extract_strided_slice %453 {offsets = [0, 0], sizes = [1, 32], strides = [1, 1]} : vector<1x40xf32> to vector<1x32xf32>
    %456 = arith.mulf %454, %33 : vector<1x32xf32>
    %457 = arith.addf %455, %456 : vector<1x32xf32>
    %458 = vector.extract_strided_slice %457 {offsets = [0, 0], sizes = [1, 24], strides = [1, 1]} : vector<1x32xf32> to vector<1x24xf32>
    %459 = arith.negf %458 : vector<1x24xf32>
    %460 = math.exp %459 : vector<1x24xf32>
    %cst_54 = arith.constant 1.000000e+00 : f32
    %461 = vector.broadcast %cst_54 : f32 to vector<1x24xf32>
    %462 = arith.addf %461, %460 : vector<1x24xf32>
    %463 = arith.divf %461, %462 : vector<1x24xf32>
    %464 = vector.extract_strided_slice %463 {offsets = [0, 0], sizes = [1, 8], strides = [1, 1]} : vector<1x24xf32> to vector<1x8xf32>
    %465 = vector.extract_strided_slice %463 {offsets = [0, 8], sizes = [1, 8], strides = [1, 1]} : vector<1x24xf32> to vector<1x8xf32>
    %466 = vector.extract_strided_slice %463 {offsets = [0, 16], sizes = [1, 8], strides = [1, 1]} : vector<1x24xf32> to vector<1x8xf32>
    %467 = vector.extract_strided_slice %457 {offsets = [0, 24], sizes = [1, 8], strides = [1, 1]} : vector<1x32xf32> to vector<1x8xf32>
    %468 = math.tanh %467 : vector<1x8xf32>
    %469 = arith.mulf %465, %445 : vector<1x8xf32>
    %470 = arith.mulf %464, %468 : vector<1x8xf32>
    %471 = arith.addf %469, %470 : vector<1x8xf32>
    %472 = math.tanh %471 : vector<1x8xf32>
    %473 = arith.mulf %466, %472 : vector<1x8xf32>
    %cst_55 = arith.constant 0.000000e+00 : f32
    %474 = vector.broadcast %cst_55 : f32 to vector<1x8xf32>
    %475 = arith.maximumf %473, %474 : vector<1x8xf32>
    %476 = vector.extract_strided_slice %453 {offsets = [0, 32], sizes = [1, 8], strides = [1, 1]} : vector<1x40xf32> to vector<1x8xf32>
    %477 = arith.mulf %475, %476 : vector<1x8xf32>
    %478 = arith.addf %452, %477 : vector<1x8xf32>
    %479 = vector.extract_strided_slice %32 {offsets = [17, 0], sizes = [1, 40], strides = [1, 1]} : vector<80x40xf32> to vector<1x40xf32>
    %480 = tpu.concatenate %473, %473, %473, %473 in 1 : vector<1x8xf32>, vector<1x8xf32>, vector<1x8xf32>, vector<1x8xf32> -> vector<1x32xf32>
    %481 = vector.extract_strided_slice %479 {offsets = [0, 0], sizes = [1, 32], strides = [1, 1]} : vector<1x40xf32> to vector<1x32xf32>
    %482 = arith.mulf %480, %33 : vector<1x32xf32>
    %483 = arith.addf %481, %482 : vector<1x32xf32>
    %484 = vector.extract_strided_slice %483 {offsets = [0, 0], sizes = [1, 24], strides = [1, 1]} : vector<1x32xf32> to vector<1x24xf32>
    %485 = arith.negf %484 : vector<1x24xf32>
    %486 = math.exp %485 : vector<1x24xf32>
    %cst_56 = arith.constant 1.000000e+00 : f32
    %487 = vector.broadcast %cst_56 : f32 to vector<1x24xf32>
    %488 = arith.addf %487, %486 : vector<1x24xf32>
    %489 = arith.divf %487, %488 : vector<1x24xf32>
    %490 = vector.extract_strided_slice %489 {offsets = [0, 0], sizes = [1, 8], strides = [1, 1]} : vector<1x24xf32> to vector<1x8xf32>
    %491 = vector.extract_strided_slice %489 {offsets = [0, 8], sizes = [1, 8], strides = [1, 1]} : vector<1x24xf32> to vector<1x8xf32>
    %492 = vector.extract_strided_slice %489 {offsets = [0, 16], sizes = [1, 8], strides = [1, 1]} : vector<1x24xf32> to vector<1x8xf32>
    %493 = vector.extract_strided_slice %483 {offsets = [0, 24], sizes = [1, 8], strides = [1, 1]} : vector<1x32xf32> to vector<1x8xf32>
    %494 = math.tanh %493 : vector<1x8xf32>
    %495 = arith.mulf %491, %471 : vector<1x8xf32>
    %496 = arith.mulf %490, %494 : vector<1x8xf32>
    %497 = arith.addf %495, %496 : vector<1x8xf32>
    %498 = math.tanh %497 : vector<1x8xf32>
    %499 = arith.mulf %492, %498 : vector<1x8xf32>
    %cst_57 = arith.constant 0.000000e+00 : f32
    %500 = vector.broadcast %cst_57 : f32 to vector<1x8xf32>
    %501 = arith.maximumf %499, %500 : vector<1x8xf32>
    %502 = vector.extract_strided_slice %479 {offsets = [0, 32], sizes = [1, 8], strides = [1, 1]} : vector<1x40xf32> to vector<1x8xf32>
    %503 = arith.mulf %501, %502 : vector<1x8xf32>
    %504 = arith.addf %478, %503 : vector<1x8xf32>
    %505 = vector.extract_strided_slice %32 {offsets = [18, 0], sizes = [1, 40], strides = [1, 1]} : vector<80x40xf32> to vector<1x40xf32>
    %506 = tpu.concatenate %499, %499, %499, %499 in 1 : vector<1x8xf32>, vector<1x8xf32>, vector<1x8xf32>, vector<1x8xf32> -> vector<1x32xf32>
    %507 = vector.extract_strided_slice %505 {offsets = [0, 0], sizes = [1, 32], strides = [1, 1]} : vector<1x40xf32> to vector<1x32xf32>
    %508 = arith.mulf %506, %33 : vector<1x32xf32>
    %509 = arith.addf %507, %508 : vector<1x32xf32>
    %510 = vector.extract_strided_slice %509 {offsets = [0, 0], sizes = [1, 24], strides = [1, 1]} : vector<1x32xf32> to vector<1x24xf32>
    %511 = arith.negf %510 : vector<1x24xf32>
    %512 = math.exp %511 : vector<1x24xf32>
    %cst_58 = arith.constant 1.000000e+00 : f32
    %513 = vector.broadcast %cst_58 : f32 to vector<1x24xf32>
    %514 = arith.addf %513, %512 : vector<1x24xf32>
    %515 = arith.divf %513, %514 : vector<1x24xf32>
    %516 = vector.extract_strided_slice %515 {offsets = [0, 0], sizes = [1, 8], strides = [1, 1]} : vector<1x24xf32> to vector<1x8xf32>
    %517 = vector.extract_strided_slice %515 {offsets = [0, 8], sizes = [1, 8], strides = [1, 1]} : vector<1x24xf32> to vector<1x8xf32>
    %518 = vector.extract_strided_slice %515 {offsets = [0, 16], sizes = [1, 8], strides = [1, 1]} : vector<1x24xf32> to vector<1x8xf32>
    %519 = vector.extract_strided_slice %509 {offsets = [0, 24], sizes = [1, 8], strides = [1, 1]} : vector<1x32xf32> to vector<1x8xf32>
    %520 = math.tanh %519 : vector<1x8xf32>
    %521 = arith.mulf %517, %497 : vector<1x8xf32>
    %522 = arith.mulf %516, %520 : vector<1x8xf32>
    %523 = arith.addf %521, %522 : vector<1x8xf32>
    %524 = math.tanh %523 : vector<1x8xf32>
    %525 = arith.mulf %518, %524 : vector<1x8xf32>
    %cst_59 = arith.constant 0.000000e+00 : f32
    %526 = vector.broadcast %cst_59 : f32 to vector<1x8xf32>
    %527 = arith.maximumf %525, %526 : vector<1x8xf32>
    %528 = vector.extract_strided_slice %505 {offsets = [0, 32], sizes = [1, 8], strides = [1, 1]} : vector<1x40xf32> to vector<1x8xf32>
    %529 = arith.mulf %527, %528 : vector<1x8xf32>
    %530 = arith.addf %504, %529 : vector<1x8xf32>
    %531 = vector.extract_strided_slice %32 {offsets = [19, 0], sizes = [1, 40], strides = [1, 1]} : vector<80x40xf32> to vector<1x40xf32>
    %532 = tpu.concatenate %525, %525, %525, %525 in 1 : vector<1x8xf32>, vector<1x8xf32>, vector<1x8xf32>, vector<1x8xf32> -> vector<1x32xf32>
    %533 = vector.extract_strided_slice %531 {offsets = [0, 0], sizes = [1, 32], strides = [1, 1]} : vector<1x40xf32> to vector<1x32xf32>
    %534 = arith.mulf %532, %33 : vector<1x32xf32>
    %535 = arith.addf %533, %534 : vector<1x32xf32>
    %536 = vector.extract_strided_slice %535 {offsets = [0, 0], sizes = [1, 24], strides = [1, 1]} : vector<1x32xf32> to vector<1x24xf32>
    %537 = arith.negf %536 : vector<1x24xf32>
    %538 = math.exp %537 : vector<1x24xf32>
    %cst_60 = arith.constant 1.000000e+00 : f32
    %539 = vector.broadcast %cst_60 : f32 to vector<1x24xf32>
    %540 = arith.addf %539, %538 : vector<1x24xf32>
    %541 = arith.divf %539, %540 : vector<1x24xf32>
    %542 = vector.extract_strided_slice %541 {offsets = [0, 0], sizes = [1, 8], strides = [1, 1]} : vector<1x24xf32> to vector<1x8xf32>
    %543 = vector.extract_strided_slice %541 {offsets = [0, 8], sizes = [1, 8], strides = [1, 1]} : vector<1x24xf32> to vector<1x8xf32>
    %544 = vector.extract_strided_slice %541 {offsets = [0, 16], sizes = [1, 8], strides = [1, 1]} : vector<1x24xf32> to vector<1x8xf32>
    %545 = vector.extract_strided_slice %535 {offsets = [0, 24], sizes = [1, 8], strides = [1, 1]} : vector<1x32xf32> to vector<1x8xf32>
    %546 = math.tanh %545 : vector<1x8xf32>
    %547 = arith.mulf %543, %523 : vector<1x8xf32>
    %548 = arith.mulf %542, %546 : vector<1x8xf32>
    %549 = arith.addf %547, %548 : vector<1x8xf32>
    %550 = math.tanh %549 : vector<1x8xf32>
    %551 = arith.mulf %544, %550 : vector<1x8xf32>
    %cst_61 = arith.constant 0.000000e+00 : f32
    %552 = vector.broadcast %cst_61 : f32 to vector<1x8xf32>
    %553 = arith.maximumf %551, %552 : vector<1x8xf32>
    %554 = vector.extract_strided_slice %531 {offsets = [0, 32], sizes = [1, 8], strides = [1, 1]} : vector<1x40xf32> to vector<1x8xf32>
    %555 = arith.mulf %553, %554 : vector<1x8xf32>
    %556 = arith.addf %530, %555 : vector<1x8xf32>
    %557 = vector.extract_strided_slice %32 {offsets = [20, 0], sizes = [1, 40], strides = [1, 1]} : vector<80x40xf32> to vector<1x40xf32>
    %558 = tpu.concatenate %551, %551, %551, %551 in 1 : vector<1x8xf32>, vector<1x8xf32>, vector<1x8xf32>, vector<1x8xf32> -> vector<1x32xf32>
    %559 = vector.extract_strided_slice %557 {offsets = [0, 0], sizes = [1, 32], strides = [1, 1]} : vector<1x40xf32> to vector<1x32xf32>
    %560 = arith.mulf %558, %33 : vector<1x32xf32>
    %561 = arith.addf %559, %560 : vector<1x32xf32>
    %562 = vector.extract_strided_slice %561 {offsets = [0, 0], sizes = [1, 24], strides = [1, 1]} : vector<1x32xf32> to vector<1x24xf32>
    %563 = arith.negf %562 : vector<1x24xf32>
    %564 = math.exp %563 : vector<1x24xf32>
    %cst_62 = arith.constant 1.000000e+00 : f32
    %565 = vector.broadcast %cst_62 : f32 to vector<1x24xf32>
    %566 = arith.addf %565, %564 : vector<1x24xf32>
    %567 = arith.divf %565, %566 : vector<1x24xf32>
    %568 = vector.extract_strided_slice %567 {offsets = [0, 0], sizes = [1, 8], strides = [1, 1]} : vector<1x24xf32> to vector<1x8xf32>
    %569 = vector.extract_strided_slice %567 {offsets = [0, 8], sizes = [1, 8], strides = [1, 1]} : vector<1x24xf32> to vector<1x8xf32>
    %570 = vector.extract_strided_slice %567 {offsets = [0, 16], sizes = [1, 8], strides = [1, 1]} : vector<1x24xf32> to vector<1x8xf32>
    %571 = vector.extract_strided_slice %561 {offsets = [0, 24], sizes = [1, 8], strides = [1, 1]} : vector<1x32xf32> to vector<1x8xf32>
    %572 = math.tanh %571 : vector<1x8xf32>
    %573 = arith.mulf %569, %549 : vector<1x8xf32>
    %574 = arith.mulf %568, %572 : vector<1x8xf32>
    %575 = arith.addf %573, %574 : vector<1x8xf32>
    %576 = math.tanh %575 : vector<1x8xf32>
    %577 = arith.mulf %570, %576 : vector<1x8xf32>
    %cst_63 = arith.constant 0.000000e+00 : f32
    %578 = vector.broadcast %cst_63 : f32 to vector<1x8xf32>
    %579 = arith.maximumf %577, %578 : vector<1x8xf32>
    %580 = vector.extract_strided_slice %557 {offsets = [0, 32], sizes = [1, 8], strides = [1, 1]} : vector<1x40xf32> to vector<1x8xf32>
    %581 = arith.mulf %579, %580 : vector<1x8xf32>
    %582 = arith.addf %556, %581 : vector<1x8xf32>
    %583 = vector.extract_strided_slice %32 {offsets = [21, 0], sizes = [1, 40], strides = [1, 1]} : vector<80x40xf32> to vector<1x40xf32>
    %584 = tpu.concatenate %577, %577, %577, %577 in 1 : vector<1x8xf32>, vector<1x8xf32>, vector<1x8xf32>, vector<1x8xf32> -> vector<1x32xf32>
    %585 = vector.extract_strided_slice %583 {offsets = [0, 0], sizes = [1, 32], strides = [1, 1]} : vector<1x40xf32> to vector<1x32xf32>
    %586 = arith.mulf %584, %33 : vector<1x32xf32>
    %587 = arith.addf %585, %586 : vector<1x32xf32>
    %588 = vector.extract_strided_slice %587 {offsets = [0, 0], sizes = [1, 24], strides = [1, 1]} : vector<1x32xf32> to vector<1x24xf32>
    %589 = arith.negf %588 : vector<1x24xf32>
    %590 = math.exp %589 : vector<1x24xf32>
    %cst_64 = arith.constant 1.000000e+00 : f32
    %591 = vector.broadcast %cst_64 : f32 to vector<1x24xf32>
    %592 = arith.addf %591, %590 : vector<1x24xf32>
    %593 = arith.divf %591, %592 : vector<1x24xf32>
    %594 = vector.extract_strided_slice %593 {offsets = [0, 0], sizes = [1, 8], strides = [1, 1]} : vector<1x24xf32> to vector<1x8xf32>
    %595 = vector.extract_strided_slice %593 {offsets = [0, 8], sizes = [1, 8], strides = [1, 1]} : vector<1x24xf32> to vector<1x8xf32>
    %596 = vector.extract_strided_slice %593 {offsets = [0, 16], sizes = [1, 8], strides = [1, 1]} : vector<1x24xf32> to vector<1x8xf32>
    %597 = vector.extract_strided_slice %587 {offsets = [0, 24], sizes = [1, 8], strides = [1, 1]} : vector<1x32xf32> to vector<1x8xf32>
    %598 = math.tanh %597 : vector<1x8xf32>
    %599 = arith.mulf %595, %575 : vector<1x8xf32>
    %600 = arith.mulf %594, %598 : vector<1x8xf32>
    %601 = arith.addf %599, %600 : vector<1x8xf32>
    %602 = math.tanh %601 : vector<1x8xf32>
    %603 = arith.mulf %596, %602 : vector<1x8xf32>
    %cst_65 = arith.constant 0.000000e+00 : f32
    %604 = vector.broadcast %cst_65 : f32 to vector<1x8xf32>
    %605 = arith.maximumf %603, %604 : vector<1x8xf32>
    %606 = vector.extract_strided_slice %583 {offsets = [0, 32], sizes = [1, 8], strides = [1, 1]} : vector<1x40xf32> to vector<1x8xf32>
    %607 = arith.mulf %605, %606 : vector<1x8xf32>
    %608 = arith.addf %582, %607 : vector<1x8xf32>
    %609 = vector.extract_strided_slice %32 {offsets = [22, 0], sizes = [1, 40], strides = [1, 1]} : vector<80x40xf32> to vector<1x40xf32>
    %610 = tpu.concatenate %603, %603, %603, %603 in 1 : vector<1x8xf32>, vector<1x8xf32>, vector<1x8xf32>, vector<1x8xf32> -> vector<1x32xf32>
    %611 = vector.extract_strided_slice %609 {offsets = [0, 0], sizes = [1, 32], strides = [1, 1]} : vector<1x40xf32> to vector<1x32xf32>
    %612 = arith.mulf %610, %33 : vector<1x32xf32>
    %613 = arith.addf %611, %612 : vector<1x32xf32>
    %614 = vector.extract_strided_slice %613 {offsets = [0, 0], sizes = [1, 24], strides = [1, 1]} : vector<1x32xf32> to vector<1x24xf32>
    %615 = arith.negf %614 : vector<1x24xf32>
    %616 = math.exp %615 : vector<1x24xf32>
    %cst_66 = arith.constant 1.000000e+00 : f32
    %617 = vector.broadcast %cst_66 : f32 to vector<1x24xf32>
    %618 = arith.addf %617, %616 : vector<1x24xf32>
    %619 = arith.divf %617, %618 : vector<1x24xf32>
    %620 = vector.extract_strided_slice %619 {offsets = [0, 0], sizes = [1, 8], strides = [1, 1]} : vector<1x24xf32> to vector<1x8xf32>
    %621 = vector.extract_strided_slice %619 {offsets = [0, 8], sizes = [1, 8], strides = [1, 1]} : vector<1x24xf32> to vector<1x8xf32>
    %622 = vector.extract_strided_slice %619 {offsets = [0, 16], sizes = [1, 8], strides = [1, 1]} : vector<1x24xf32> to vector<1x8xf32>
    %623 = vector.extract_strided_slice %613 {offsets = [0, 24], sizes = [1, 8], strides = [1, 1]} : vector<1x32xf32> to vector<1x8xf32>
    %624 = math.tanh %623 : vector<1x8xf32>
    %625 = arith.mulf %621, %601 : vector<1x8xf32>
    %626 = arith.mulf %620, %624 : vector<1x8xf32>
    %627 = arith.addf %625, %626 : vector<1x8xf32>
    %628 = math.tanh %627 : vector<1x8xf32>
    %629 = arith.mulf %622, %628 : vector<1x8xf32>
    %cst_67 = arith.constant 0.000000e+00 : f32
    %630 = vector.broadcast %cst_67 : f32 to vector<1x8xf32>
    %631 = arith.maximumf %629, %630 : vector<1x8xf32>
    %632 = vector.extract_strided_slice %609 {offsets = [0, 32], sizes = [1, 8], strides = [1, 1]} : vector<1x40xf32> to vector<1x8xf32>
    %633 = arith.mulf %631, %632 : vector<1x8xf32>
    %634 = arith.addf %608, %633 : vector<1x8xf32>
    %635 = vector.extract_strided_slice %32 {offsets = [23, 0], sizes = [1, 40], strides = [1, 1]} : vector<80x40xf32> to vector<1x40xf32>
    %636 = tpu.concatenate %629, %629, %629, %629 in 1 : vector<1x8xf32>, vector<1x8xf32>, vector<1x8xf32>, vector<1x8xf32> -> vector<1x32xf32>
    %637 = vector.extract_strided_slice %635 {offsets = [0, 0], sizes = [1, 32], strides = [1, 1]} : vector<1x40xf32> to vector<1x32xf32>
    %638 = arith.mulf %636, %33 : vector<1x32xf32>
    %639 = arith.addf %637, %638 : vector<1x32xf32>
    %640 = vector.extract_strided_slice %639 {offsets = [0, 0], sizes = [1, 24], strides = [1, 1]} : vector<1x32xf32> to vector<1x24xf32>
    %641 = arith.negf %640 : vector<1x24xf32>
    %642 = math.exp %641 : vector<1x24xf32>
    %cst_68 = arith.constant 1.000000e+00 : f32
    %643 = vector.broadcast %cst_68 : f32 to vector<1x24xf32>
    %644 = arith.addf %643, %642 : vector<1x24xf32>
    %645 = arith.divf %643, %644 : vector<1x24xf32>
    %646 = vector.extract_strided_slice %645 {offsets = [0, 0], sizes = [1, 8], strides = [1, 1]} : vector<1x24xf32> to vector<1x8xf32>
    %647 = vector.extract_strided_slice %645 {offsets = [0, 8], sizes = [1, 8], strides = [1, 1]} : vector<1x24xf32> to vector<1x8xf32>
    %648 = vector.extract_strided_slice %645 {offsets = [0, 16], sizes = [1, 8], strides = [1, 1]} : vector<1x24xf32> to vector<1x8xf32>
    %649 = vector.extract_strided_slice %639 {offsets = [0, 24], sizes = [1, 8], strides = [1, 1]} : vector<1x32xf32> to vector<1x8xf32>
    %650 = math.tanh %649 : vector<1x8xf32>
    %651 = arith.mulf %647, %627 : vector<1x8xf32>
    %652 = arith.mulf %646, %650 : vector<1x8xf32>
    %653 = arith.addf %651, %652 : vector<1x8xf32>
    %654 = math.tanh %653 : vector<1x8xf32>
    %655 = arith.mulf %648, %654 : vector<1x8xf32>
    %cst_69 = arith.constant 0.000000e+00 : f32
    %656 = vector.broadcast %cst_69 : f32 to vector<1x8xf32>
    %657 = arith.maximumf %655, %656 : vector<1x8xf32>
    %658 = vector.extract_strided_slice %635 {offsets = [0, 32], sizes = [1, 8], strides = [1, 1]} : vector<1x40xf32> to vector<1x8xf32>
    %659 = arith.mulf %657, %658 : vector<1x8xf32>
    %660 = arith.addf %634, %659 : vector<1x8xf32>
    %661 = vector.extract_strided_slice %32 {offsets = [24, 0], sizes = [1, 40], strides = [1, 1]} : vector<80x40xf32> to vector<1x40xf32>
    %662 = tpu.concatenate %655, %655, %655, %655 in 1 : vector<1x8xf32>, vector<1x8xf32>, vector<1x8xf32>, vector<1x8xf32> -> vector<1x32xf32>
    %663 = vector.extract_strided_slice %661 {offsets = [0, 0], sizes = [1, 32], strides = [1, 1]} : vector<1x40xf32> to vector<1x32xf32>
    %664 = arith.mulf %662, %33 : vector<1x32xf32>
    %665 = arith.addf %663, %664 : vector<1x32xf32>
    %666 = vector.extract_strided_slice %665 {offsets = [0, 0], sizes = [1, 24], strides = [1, 1]} : vector<1x32xf32> to vector<1x24xf32>
    %667 = arith.negf %666 : vector<1x24xf32>
    %668 = math.exp %667 : vector<1x24xf32>
    %cst_70 = arith.constant 1.000000e+00 : f32
    %669 = vector.broadcast %cst_70 : f32 to vector<1x24xf32>
    %670 = arith.addf %669, %668 : vector<1x24xf32>
    %671 = arith.divf %669, %670 : vector<1x24xf32>
    %672 = vector.extract_strided_slice %671 {offsets = [0, 0], sizes = [1, 8], strides = [1, 1]} : vector<1x24xf32> to vector<1x8xf32>
    %673 = vector.extract_strided_slice %671 {offsets = [0, 8], sizes = [1, 8], strides = [1, 1]} : vector<1x24xf32> to vector<1x8xf32>
    %674 = vector.extract_strided_slice %671 {offsets = [0, 16], sizes = [1, 8], strides = [1, 1]} : vector<1x24xf32> to vector<1x8xf32>
    %675 = vector.extract_strided_slice %665 {offsets = [0, 24], sizes = [1, 8], strides = [1, 1]} : vector<1x32xf32> to vector<1x8xf32>
    %676 = math.tanh %675 : vector<1x8xf32>
    %677 = arith.mulf %673, %653 : vector<1x8xf32>
    %678 = arith.mulf %672, %676 : vector<1x8xf32>
    %679 = arith.addf %677, %678 : vector<1x8xf32>
    %680 = math.tanh %679 : vector<1x8xf32>
    %681 = arith.mulf %674, %680 : vector<1x8xf32>
    %cst_71 = arith.constant 0.000000e+00 : f32
    %682 = vector.broadcast %cst_71 : f32 to vector<1x8xf32>
    %683 = arith.maximumf %681, %682 : vector<1x8xf32>
    %684 = vector.extract_strided_slice %661 {offsets = [0, 32], sizes = [1, 8], strides = [1, 1]} : vector<1x40xf32> to vector<1x8xf32>
    %685 = arith.mulf %683, %684 : vector<1x8xf32>
    %686 = arith.addf %660, %685 : vector<1x8xf32>
    %687 = vector.extract_strided_slice %32 {offsets = [25, 0], sizes = [1, 40], strides = [1, 1]} : vector<80x40xf32> to vector<1x40xf32>
    %688 = tpu.concatenate %681, %681, %681, %681 in 1 : vector<1x8xf32>, vector<1x8xf32>, vector<1x8xf32>, vector<1x8xf32> -> vector<1x32xf32>
    %689 = vector.extract_strided_slice %687 {offsets = [0, 0], sizes = [1, 32], strides = [1, 1]} : vector<1x40xf32> to vector<1x32xf32>
    %690 = arith.mulf %688, %33 : vector<1x32xf32>
    %691 = arith.addf %689, %690 : vector<1x32xf32>
    %692 = vector.extract_strided_slice %691 {offsets = [0, 0], sizes = [1, 24], strides = [1, 1]} : vector<1x32xf32> to vector<1x24xf32>
    %693 = arith.negf %692 : vector<1x24xf32>
    %694 = math.exp %693 : vector<1x24xf32>
    %cst_72 = arith.constant 1.000000e+00 : f32
    %695 = vector.broadcast %cst_72 : f32 to vector<1x24xf32>
    %696 = arith.addf %695, %694 : vector<1x24xf32>
    %697 = arith.divf %695, %696 : vector<1x24xf32>
    %698 = vector.extract_strided_slice %697 {offsets = [0, 0], sizes = [1, 8], strides = [1, 1]} : vector<1x24xf32> to vector<1x8xf32>
    %699 = vector.extract_strided_slice %697 {offsets = [0, 8], sizes = [1, 8], strides = [1, 1]} : vector<1x24xf32> to vector<1x8xf32>
    %700 = vector.extract_strided_slice %697 {offsets = [0, 16], sizes = [1, 8], strides = [1, 1]} : vector<1x24xf32> to vector<1x8xf32>
    %701 = vector.extract_strided_slice %691 {offsets = [0, 24], sizes = [1, 8], strides = [1, 1]} : vector<1x32xf32> to vector<1x8xf32>
    %702 = math.tanh %701 : vector<1x8xf32>
    %703 = arith.mulf %699, %679 : vector<1x8xf32>
    %704 = arith.mulf %698, %702 : vector<1x8xf32>
    %705 = arith.addf %703, %704 : vector<1x8xf32>
    %706 = math.tanh %705 : vector<1x8xf32>
    %707 = arith.mulf %700, %706 : vector<1x8xf32>
    %cst_73 = arith.constant 0.000000e+00 : f32
    %708 = vector.broadcast %cst_73 : f32 to vector<1x8xf32>
    %709 = arith.maximumf %707, %708 : vector<1x8xf32>
    %710 = vector.extract_strided_slice %687 {offsets = [0, 32], sizes = [1, 8], strides = [1, 1]} : vector<1x40xf32> to vector<1x8xf32>
    %711 = arith.mulf %709, %710 : vector<1x8xf32>
    %712 = arith.addf %686, %711 : vector<1x8xf32>
    %713 = vector.extract_strided_slice %32 {offsets = [26, 0], sizes = [1, 40], strides = [1, 1]} : vector<80x40xf32> to vector<1x40xf32>
    %714 = tpu.concatenate %707, %707, %707, %707 in 1 : vector<1x8xf32>, vector<1x8xf32>, vector<1x8xf32>, vector<1x8xf32> -> vector<1x32xf32>
    %715 = vector.extract_strided_slice %713 {offsets = [0, 0], sizes = [1, 32], strides = [1, 1]} : vector<1x40xf32> to vector<1x32xf32>
    %716 = arith.mulf %714, %33 : vector<1x32xf32>
    %717 = arith.addf %715, %716 : vector<1x32xf32>
    %718 = vector.extract_strided_slice %717 {offsets = [0, 0], sizes = [1, 24], strides = [1, 1]} : vector<1x32xf32> to vector<1x24xf32>
    %719 = arith.negf %718 : vector<1x24xf32>
    %720 = math.exp %719 : vector<1x24xf32>
    %cst_74 = arith.constant 1.000000e+00 : f32
    %721 = vector.broadcast %cst_74 : f32 to vector<1x24xf32>
    %722 = arith.addf %721, %720 : vector<1x24xf32>
    %723 = arith.divf %721, %722 : vector<1x24xf32>
    %724 = vector.extract_strided_slice %723 {offsets = [0, 0], sizes = [1, 8], strides = [1, 1]} : vector<1x24xf32> to vector<1x8xf32>
    %725 = vector.extract_strided_slice %723 {offsets = [0, 8], sizes = [1, 8], strides = [1, 1]} : vector<1x24xf32> to vector<1x8xf32>
    %726 = vector.extract_strided_slice %723 {offsets = [0, 16], sizes = [1, 8], strides = [1, 1]} : vector<1x24xf32> to vector<1x8xf32>
    %727 = vector.extract_strided_slice %717 {offsets = [0, 24], sizes = [1, 8], strides = [1, 1]} : vector<1x32xf32> to vector<1x8xf32>
    %728 = math.tanh %727 : vector<1x8xf32>
    %729 = arith.mulf %725, %705 : vector<1x8xf32>
    %730 = arith.mulf %724, %728 : vector<1x8xf32>
    %731 = arith.addf %729, %730 : vector<1x8xf32>
    %732 = math.tanh %731 : vector<1x8xf32>
    %733 = arith.mulf %726, %732 : vector<1x8xf32>
    %cst_75 = arith.constant 0.000000e+00 : f32
    %734 = vector.broadcast %cst_75 : f32 to vector<1x8xf32>
    %735 = arith.maximumf %733, %734 : vector<1x8xf32>
    %736 = vector.extract_strided_slice %713 {offsets = [0, 32], sizes = [1, 8], strides = [1, 1]} : vector<1x40xf32> to vector<1x8xf32>
    %737 = arith.mulf %735, %736 : vector<1x8xf32>
    %738 = arith.addf %712, %737 : vector<1x8xf32>
    %739 = vector.extract_strided_slice %32 {offsets = [27, 0], sizes = [1, 40], strides = [1, 1]} : vector<80x40xf32> to vector<1x40xf32>
    %740 = tpu.concatenate %733, %733, %733, %733 in 1 : vector<1x8xf32>, vector<1x8xf32>, vector<1x8xf32>, vector<1x8xf32> -> vector<1x32xf32>
    %741 = vector.extract_strided_slice %739 {offsets = [0, 0], sizes = [1, 32], strides = [1, 1]} : vector<1x40xf32> to vector<1x32xf32>
    %742 = arith.mulf %740, %33 : vector<1x32xf32>
    %743 = arith.addf %741, %742 : vector<1x32xf32>
    %744 = vector.extract_strided_slice %743 {offsets = [0, 0], sizes = [1, 24], strides = [1, 1]} : vector<1x32xf32> to vector<1x24xf32>
    %745 = arith.negf %744 : vector<1x24xf32>
    %746 = math.exp %745 : vector<1x24xf32>
    %cst_76 = arith.constant 1.000000e+00 : f32
    %747 = vector.broadcast %cst_76 : f32 to vector<1x24xf32>
    %748 = arith.addf %747, %746 : vector<1x24xf32>
    %749 = arith.divf %747, %748 : vector<1x24xf32>
    %750 = vector.extract_strided_slice %749 {offsets = [0, 0], sizes = [1, 8], strides = [1, 1]} : vector<1x24xf32> to vector<1x8xf32>
    %751 = vector.extract_strided_slice %749 {offsets = [0, 8], sizes = [1, 8], strides = [1, 1]} : vector<1x24xf32> to vector<1x8xf32>
    %752 = vector.extract_strided_slice %749 {offsets = [0, 16], sizes = [1, 8], strides = [1, 1]} : vector<1x24xf32> to vector<1x8xf32>
    %753 = vector.extract_strided_slice %743 {offsets = [0, 24], sizes = [1, 8], strides = [1, 1]} : vector<1x32xf32> to vector<1x8xf32>
    %754 = math.tanh %753 : vector<1x8xf32>
    %755 = arith.mulf %751, %731 : vector<1x8xf32>
    %756 = arith.mulf %750, %754 : vector<1x8xf32>
    %757 = arith.addf %755, %756 : vector<1x8xf32>
    %758 = math.tanh %757 : vector<1x8xf32>
    %759 = arith.mulf %752, %758 : vector<1x8xf32>
    %cst_77 = arith.constant 0.000000e+00 : f32
    %760 = vector.broadcast %cst_77 : f32 to vector<1x8xf32>
    %761 = arith.maximumf %759, %760 : vector<1x8xf32>
    %762 = vector.extract_strided_slice %739 {offsets = [0, 32], sizes = [1, 8], strides = [1, 1]} : vector<1x40xf32> to vector<1x8xf32>
    %763 = arith.mulf %761, %762 : vector<1x8xf32>
    %764 = arith.addf %738, %763 : vector<1x8xf32>
    %765 = vector.extract_strided_slice %32 {offsets = [28, 0], sizes = [1, 40], strides = [1, 1]} : vector<80x40xf32> to vector<1x40xf32>
    %766 = tpu.concatenate %759, %759, %759, %759 in 1 : vector<1x8xf32>, vector<1x8xf32>, vector<1x8xf32>, vector<1x8xf32> -> vector<1x32xf32>
    %767 = vector.extract_strided_slice %765 {offsets = [0, 0], sizes = [1, 32], strides = [1, 1]} : vector<1x40xf32> to vector<1x32xf32>
    %768 = arith.mulf %766, %33 : vector<1x32xf32>
    %769 = arith.addf %767, %768 : vector<1x32xf32>
    %770 = vector.extract_strided_slice %769 {offsets = [0, 0], sizes = [1, 24], strides = [1, 1]} : vector<1x32xf32> to vector<1x24xf32>
    %771 = arith.negf %770 : vector<1x24xf32>
    %772 = math.exp %771 : vector<1x24xf32>
    %cst_78 = arith.constant 1.000000e+00 : f32
    %773 = vector.broadcast %cst_78 : f32 to vector<1x24xf32>
    %774 = arith.addf %773, %772 : vector<1x24xf32>
    %775 = arith.divf %773, %774 : vector<1x24xf32>
    %776 = vector.extract_strided_slice %775 {offsets = [0, 0], sizes = [1, 8], strides = [1, 1]} : vector<1x24xf32> to vector<1x8xf32>
    %777 = vector.extract_strided_slice %775 {offsets = [0, 8], sizes = [1, 8], strides = [1, 1]} : vector<1x24xf32> to vector<1x8xf32>
    %778 = vector.extract_strided_slice %775 {offsets = [0, 16], sizes = [1, 8], strides = [1, 1]} : vector<1x24xf32> to vector<1x8xf32>
    %779 = vector.extract_strided_slice %769 {offsets = [0, 24], sizes = [1, 8], strides = [1, 1]} : vector<1x32xf32> to vector<1x8xf32>
    %780 = math.tanh %779 : vector<1x8xf32>
    %781 = arith.mulf %777, %757 : vector<1x8xf32>
    %782 = arith.mulf %776, %780 : vector<1x8xf32>
    %783 = arith.addf %781, %782 : vector<1x8xf32>
    %784 = math.tanh %783 : vector<1x8xf32>
    %785 = arith.mulf %778, %784 : vector<1x8xf32>
    %cst_79 = arith.constant 0.000000e+00 : f32
    %786 = vector.broadcast %cst_79 : f32 to vector<1x8xf32>
    %787 = arith.maximumf %785, %786 : vector<1x8xf32>
    %788 = vector.extract_strided_slice %765 {offsets = [0, 32], sizes = [1, 8], strides = [1, 1]} : vector<1x40xf32> to vector<1x8xf32>
    %789 = arith.mulf %787, %788 : vector<1x8xf32>
    %790 = arith.addf %764, %789 : vector<1x8xf32>
    %791 = vector.extract_strided_slice %32 {offsets = [29, 0], sizes = [1, 40], strides = [1, 1]} : vector<80x40xf32> to vector<1x40xf32>
    %792 = tpu.concatenate %785, %785, %785, %785 in 1 : vector<1x8xf32>, vector<1x8xf32>, vector<1x8xf32>, vector<1x8xf32> -> vector<1x32xf32>
    %793 = vector.extract_strided_slice %791 {offsets = [0, 0], sizes = [1, 32], strides = [1, 1]} : vector<1x40xf32> to vector<1x32xf32>
    %794 = arith.mulf %792, %33 : vector<1x32xf32>
    %795 = arith.addf %793, %794 : vector<1x32xf32>
    %796 = vector.extract_strided_slice %795 {offsets = [0, 0], sizes = [1, 24], strides = [1, 1]} : vector<1x32xf32> to vector<1x24xf32>
    %797 = arith.negf %796 : vector<1x24xf32>
    %798 = math.exp %797 : vector<1x24xf32>
    %cst_80 = arith.constant 1.000000e+00 : f32
    %799 = vector.broadcast %cst_80 : f32 to vector<1x24xf32>
    %800 = arith.addf %799, %798 : vector<1x24xf32>
    %801 = arith.divf %799, %800 : vector<1x24xf32>
    %802 = vector.extract_strided_slice %801 {offsets = [0, 0], sizes = [1, 8], strides = [1, 1]} : vector<1x24xf32> to vector<1x8xf32>
    %803 = vector.extract_strided_slice %801 {offsets = [0, 8], sizes = [1, 8], strides = [1, 1]} : vector<1x24xf32> to vector<1x8xf32>
    %804 = vector.extract_strided_slice %801 {offsets = [0, 16], sizes = [1, 8], strides = [1, 1]} : vector<1x24xf32> to vector<1x8xf32>
    %805 = vector.extract_strided_slice %795 {offsets = [0, 24], sizes = [1, 8], strides = [1, 1]} : vector<1x32xf32> to vector<1x8xf32>
    %806 = math.tanh %805 : vector<1x8xf32>
    %807 = arith.mulf %803, %783 : vector<1x8xf32>
    %808 = arith.mulf %802, %806 : vector<1x8xf32>
    %809 = arith.addf %807, %808 : vector<1x8xf32>
    %810 = math.tanh %809 : vector<1x8xf32>
    %811 = arith.mulf %804, %810 : vector<1x8xf32>
    %cst_81 = arith.constant 0.000000e+00 : f32
    %812 = vector.broadcast %cst_81 : f32 to vector<1x8xf32>
    %813 = arith.maximumf %811, %812 : vector<1x8xf32>
    %814 = vector.extract_strided_slice %791 {offsets = [0, 32], sizes = [1, 8], strides = [1, 1]} : vector<1x40xf32> to vector<1x8xf32>
    %815 = arith.mulf %813, %814 : vector<1x8xf32>
    %816 = arith.addf %790, %815 : vector<1x8xf32>
    %817 = vector.extract_strided_slice %32 {offsets = [30, 0], sizes = [1, 40], strides = [1, 1]} : vector<80x40xf32> to vector<1x40xf32>
    %818 = tpu.concatenate %811, %811, %811, %811 in 1 : vector<1x8xf32>, vector<1x8xf32>, vector<1x8xf32>, vector<1x8xf32> -> vector<1x32xf32>
    %819 = vector.extract_strided_slice %817 {offsets = [0, 0], sizes = [1, 32], strides = [1, 1]} : vector<1x40xf32> to vector<1x32xf32>
    %820 = arith.mulf %818, %33 : vector<1x32xf32>
    %821 = arith.addf %819, %820 : vector<1x32xf32>
    %822 = vector.extract_strided_slice %821 {offsets = [0, 0], sizes = [1, 24], strides = [1, 1]} : vector<1x32xf32> to vector<1x24xf32>
    %823 = arith.negf %822 : vector<1x24xf32>
    %824 = math.exp %823 : vector<1x24xf32>
    %cst_82 = arith.constant 1.000000e+00 : f32
    %825 = vector.broadcast %cst_82 : f32 to vector<1x24xf32>
    %826 = arith.addf %825, %824 : vector<1x24xf32>
    %827 = arith.divf %825, %826 : vector<1x24xf32>
    %828 = vector.extract_strided_slice %827 {offsets = [0, 0], sizes = [1, 8], strides = [1, 1]} : vector<1x24xf32> to vector<1x8xf32>
    %829 = vector.extract_strided_slice %827 {offsets = [0, 8], sizes = [1, 8], strides = [1, 1]} : vector<1x24xf32> to vector<1x8xf32>
    %830 = vector.extract_strided_slice %827 {offsets = [0, 16], sizes = [1, 8], strides = [1, 1]} : vector<1x24xf32> to vector<1x8xf32>
    %831 = vector.extract_strided_slice %821 {offsets = [0, 24], sizes = [1, 8], strides = [1, 1]} : vector<1x32xf32> to vector<1x8xf32>
    %832 = math.tanh %831 : vector<1x8xf32>
    %833 = arith.mulf %829, %809 : vector<1x8xf32>
    %834 = arith.mulf %828, %832 : vector<1x8xf32>
    %835 = arith.addf %833, %834 : vector<1x8xf32>
    %836 = math.tanh %835 : vector<1x8xf32>
    %837 = arith.mulf %830, %836 : vector<1x8xf32>
    %cst_83 = arith.constant 0.000000e+00 : f32
    %838 = vector.broadcast %cst_83 : f32 to vector<1x8xf32>
    %839 = arith.maximumf %837, %838 : vector<1x8xf32>
    %840 = vector.extract_strided_slice %817 {offsets = [0, 32], sizes = [1, 8], strides = [1, 1]} : vector<1x40xf32> to vector<1x8xf32>
    %841 = arith.mulf %839, %840 : vector<1x8xf32>
    %842 = arith.addf %816, %841 : vector<1x8xf32>
    %843 = vector.extract_strided_slice %32 {offsets = [31, 0], sizes = [1, 40], strides = [1, 1]} : vector<80x40xf32> to vector<1x40xf32>
    %844 = tpu.concatenate %837, %837, %837, %837 in 1 : vector<1x8xf32>, vector<1x8xf32>, vector<1x8xf32>, vector<1x8xf32> -> vector<1x32xf32>
    %845 = vector.extract_strided_slice %843 {offsets = [0, 0], sizes = [1, 32], strides = [1, 1]} : vector<1x40xf32> to vector<1x32xf32>
    %846 = arith.mulf %844, %33 : vector<1x32xf32>
    %847 = arith.addf %845, %846 : vector<1x32xf32>
    %848 = vector.extract_strided_slice %847 {offsets = [0, 0], sizes = [1, 24], strides = [1, 1]} : vector<1x32xf32> to vector<1x24xf32>
    %849 = arith.negf %848 : vector<1x24xf32>
    %850 = math.exp %849 : vector<1x24xf32>
    %cst_84 = arith.constant 1.000000e+00 : f32
    %851 = vector.broadcast %cst_84 : f32 to vector<1x24xf32>
    %852 = arith.addf %851, %850 : vector<1x24xf32>
    %853 = arith.divf %851, %852 : vector<1x24xf32>
    %854 = vector.extract_strided_slice %853 {offsets = [0, 0], sizes = [1, 8], strides = [1, 1]} : vector<1x24xf32> to vector<1x8xf32>
    %855 = vector.extract_strided_slice %853 {offsets = [0, 8], sizes = [1, 8], strides = [1, 1]} : vector<1x24xf32> to vector<1x8xf32>
    %856 = vector.extract_strided_slice %853 {offsets = [0, 16], sizes = [1, 8], strides = [1, 1]} : vector<1x24xf32> to vector<1x8xf32>
    %857 = vector.extract_strided_slice %847 {offsets = [0, 24], sizes = [1, 8], strides = [1, 1]} : vector<1x32xf32> to vector<1x8xf32>
    %858 = math.tanh %857 : vector<1x8xf32>
    %859 = arith.mulf %855, %835 : vector<1x8xf32>
    %860 = arith.mulf %854, %858 : vector<1x8xf32>
    %861 = arith.addf %859, %860 : vector<1x8xf32>
    %862 = math.tanh %861 : vector<1x8xf32>
    %863 = arith.mulf %856, %862 : vector<1x8xf32>
    %cst_85 = arith.constant 0.000000e+00 : f32
    %864 = vector.broadcast %cst_85 : f32 to vector<1x8xf32>
    %865 = arith.maximumf %863, %864 : vector<1x8xf32>
    %866 = vector.extract_strided_slice %843 {offsets = [0, 32], sizes = [1, 8], strides = [1, 1]} : vector<1x40xf32> to vector<1x8xf32>
    %867 = arith.mulf %865, %866 : vector<1x8xf32>
    %868 = arith.addf %842, %867 : vector<1x8xf32>
    %869 = vector.extract_strided_slice %32 {offsets = [32, 0], sizes = [1, 40], strides = [1, 1]} : vector<80x40xf32> to vector<1x40xf32>
    %870 = tpu.concatenate %863, %863, %863, %863 in 1 : vector<1x8xf32>, vector<1x8xf32>, vector<1x8xf32>, vector<1x8xf32> -> vector<1x32xf32>
    %871 = vector.extract_strided_slice %869 {offsets = [0, 0], sizes = [1, 32], strides = [1, 1]} : vector<1x40xf32> to vector<1x32xf32>
    %872 = arith.mulf %870, %33 : vector<1x32xf32>
    %873 = arith.addf %871, %872 : vector<1x32xf32>
    %874 = vector.extract_strided_slice %873 {offsets = [0, 0], sizes = [1, 24], strides = [1, 1]} : vector<1x32xf32> to vector<1x24xf32>
    %875 = arith.negf %874 : vector<1x24xf32>
    %876 = math.exp %875 : vector<1x24xf32>
    %cst_86 = arith.constant 1.000000e+00 : f32
    %877 = vector.broadcast %cst_86 : f32 to vector<1x24xf32>
    %878 = arith.addf %877, %876 : vector<1x24xf32>
    %879 = arith.divf %877, %878 : vector<1x24xf32>
    %880 = vector.extract_strided_slice %879 {offsets = [0, 0], sizes = [1, 8], strides = [1, 1]} : vector<1x24xf32> to vector<1x8xf32>
    %881 = vector.extract_strided_slice %879 {offsets = [0, 8], sizes = [1, 8], strides = [1, 1]} : vector<1x24xf32> to vector<1x8xf32>
    %882 = vector.extract_strided_slice %879 {offsets = [0, 16], sizes = [1, 8], strides = [1, 1]} : vector<1x24xf32> to vector<1x8xf32>
    %883 = vector.extract_strided_slice %873 {offsets = [0, 24], sizes = [1, 8], strides = [1, 1]} : vector<1x32xf32> to vector<1x8xf32>
    %884 = math.tanh %883 : vector<1x8xf32>
    %885 = arith.mulf %881, %861 : vector<1x8xf32>
    %886 = arith.mulf %880, %884 : vector<1x8xf32>
    %887 = arith.addf %885, %886 : vector<1x8xf32>
    %888 = math.tanh %887 : vector<1x8xf32>
    %889 = arith.mulf %882, %888 : vector<1x8xf32>
    %cst_87 = arith.constant 0.000000e+00 : f32
    %890 = vector.broadcast %cst_87 : f32 to vector<1x8xf32>
    %891 = arith.maximumf %889, %890 : vector<1x8xf32>
    %892 = vector.extract_strided_slice %869 {offsets = [0, 32], sizes = [1, 8], strides = [1, 1]} : vector<1x40xf32> to vector<1x8xf32>
    %893 = arith.mulf %891, %892 : vector<1x8xf32>
    %894 = arith.addf %868, %893 : vector<1x8xf32>
    %895 = vector.extract_strided_slice %32 {offsets = [33, 0], sizes = [1, 40], strides = [1, 1]} : vector<80x40xf32> to vector<1x40xf32>
    %896 = tpu.concatenate %889, %889, %889, %889 in 1 : vector<1x8xf32>, vector<1x8xf32>, vector<1x8xf32>, vector<1x8xf32> -> vector<1x32xf32>
    %897 = vector.extract_strided_slice %895 {offsets = [0, 0], sizes = [1, 32], strides = [1, 1]} : vector<1x40xf32> to vector<1x32xf32>
    %898 = arith.mulf %896, %33 : vector<1x32xf32>
    %899 = arith.addf %897, %898 : vector<1x32xf32>
    %900 = vector.extract_strided_slice %899 {offsets = [0, 0], sizes = [1, 24], strides = [1, 1]} : vector<1x32xf32> to vector<1x24xf32>
    %901 = arith.negf %900 : vector<1x24xf32>
    %902 = math.exp %901 : vector<1x24xf32>
    %cst_88 = arith.constant 1.000000e+00 : f32
    %903 = vector.broadcast %cst_88 : f32 to vector<1x24xf32>
    %904 = arith.addf %903, %902 : vector<1x24xf32>
    %905 = arith.divf %903, %904 : vector<1x24xf32>
    %906 = vector.extract_strided_slice %905 {offsets = [0, 0], sizes = [1, 8], strides = [1, 1]} : vector<1x24xf32> to vector<1x8xf32>
    %907 = vector.extract_strided_slice %905 {offsets = [0, 8], sizes = [1, 8], strides = [1, 1]} : vector<1x24xf32> to vector<1x8xf32>
    %908 = vector.extract_strided_slice %905 {offsets = [0, 16], sizes = [1, 8], strides = [1, 1]} : vector<1x24xf32> to vector<1x8xf32>
    %909 = vector.extract_strided_slice %899 {offsets = [0, 24], sizes = [1, 8], strides = [1, 1]} : vector<1x32xf32> to vector<1x8xf32>
    %910 = math.tanh %909 : vector<1x8xf32>
    %911 = arith.mulf %907, %887 : vector<1x8xf32>
    %912 = arith.mulf %906, %910 : vector<1x8xf32>
    %913 = arith.addf %911, %912 : vector<1x8xf32>
    %914 = math.tanh %913 : vector<1x8xf32>
    %915 = arith.mulf %908, %914 : vector<1x8xf32>
    %cst_89 = arith.constant 0.000000e+00 : f32
    %916 = vector.broadcast %cst_89 : f32 to vector<1x8xf32>
    %917 = arith.maximumf %915, %916 : vector<1x8xf32>
    %918 = vector.extract_strided_slice %895 {offsets = [0, 32], sizes = [1, 8], strides = [1, 1]} : vector<1x40xf32> to vector<1x8xf32>
    %919 = arith.mulf %917, %918 : vector<1x8xf32>
    %920 = arith.addf %894, %919 : vector<1x8xf32>
    %921 = vector.extract_strided_slice %32 {offsets = [34, 0], sizes = [1, 40], strides = [1, 1]} : vector<80x40xf32> to vector<1x40xf32>
    %922 = tpu.concatenate %915, %915, %915, %915 in 1 : vector<1x8xf32>, vector<1x8xf32>, vector<1x8xf32>, vector<1x8xf32> -> vector<1x32xf32>
    %923 = vector.extract_strided_slice %921 {offsets = [0, 0], sizes = [1, 32], strides = [1, 1]} : vector<1x40xf32> to vector<1x32xf32>
    %924 = arith.mulf %922, %33 : vector<1x32xf32>
    %925 = arith.addf %923, %924 : vector<1x32xf32>
    %926 = vector.extract_strided_slice %925 {offsets = [0, 0], sizes = [1, 24], strides = [1, 1]} : vector<1x32xf32> to vector<1x24xf32>
    %927 = arith.negf %926 : vector<1x24xf32>
    %928 = math.exp %927 : vector<1x24xf32>
    %cst_90 = arith.constant 1.000000e+00 : f32
    %929 = vector.broadcast %cst_90 : f32 to vector<1x24xf32>
    %930 = arith.addf %929, %928 : vector<1x24xf32>
    %931 = arith.divf %929, %930 : vector<1x24xf32>
    %932 = vector.extract_strided_slice %931 {offsets = [0, 0], sizes = [1, 8], strides = [1, 1]} : vector<1x24xf32> to vector<1x8xf32>
    %933 = vector.extract_strided_slice %931 {offsets = [0, 8], sizes = [1, 8], strides = [1, 1]} : vector<1x24xf32> to vector<1x8xf32>
    %934 = vector.extract_strided_slice %931 {offsets = [0, 16], sizes = [1, 8], strides = [1, 1]} : vector<1x24xf32> to vector<1x8xf32>
    %935 = vector.extract_strided_slice %925 {offsets = [0, 24], sizes = [1, 8], strides = [1, 1]} : vector<1x32xf32> to vector<1x8xf32>
    %936 = math.tanh %935 : vector<1x8xf32>
    %937 = arith.mulf %933, %913 : vector<1x8xf32>
    %938 = arith.mulf %932, %936 : vector<1x8xf32>
    %939 = arith.addf %937, %938 : vector<1x8xf32>
    %940 = math.tanh %939 : vector<1x8xf32>
    %941 = arith.mulf %934, %940 : vector<1x8xf32>
    %cst_91 = arith.constant 0.000000e+00 : f32
    %942 = vector.broadcast %cst_91 : f32 to vector<1x8xf32>
    %943 = arith.maximumf %941, %942 : vector<1x8xf32>
    %944 = vector.extract_strided_slice %921 {offsets = [0, 32], sizes = [1, 8], strides = [1, 1]} : vector<1x40xf32> to vector<1x8xf32>
    %945 = arith.mulf %943, %944 : vector<1x8xf32>
    %946 = arith.addf %920, %945 : vector<1x8xf32>
    %947 = vector.extract_strided_slice %32 {offsets = [35, 0], sizes = [1, 40], strides = [1, 1]} : vector<80x40xf32> to vector<1x40xf32>
    %948 = tpu.concatenate %941, %941, %941, %941 in 1 : vector<1x8xf32>, vector<1x8xf32>, vector<1x8xf32>, vector<1x8xf32> -> vector<1x32xf32>
    %949 = vector.extract_strided_slice %947 {offsets = [0, 0], sizes = [1, 32], strides = [1, 1]} : vector<1x40xf32> to vector<1x32xf32>
    %950 = arith.mulf %948, %33 : vector<1x32xf32>
    %951 = arith.addf %949, %950 : vector<1x32xf32>
    %952 = vector.extract_strided_slice %951 {offsets = [0, 0], sizes = [1, 24], strides = [1, 1]} : vector<1x32xf32> to vector<1x24xf32>
    %953 = arith.negf %952 : vector<1x24xf32>
    %954 = math.exp %953 : vector<1x24xf32>
    %cst_92 = arith.constant 1.000000e+00 : f32
    %955 = vector.broadcast %cst_92 : f32 to vector<1x24xf32>
    %956 = arith.addf %955, %954 : vector<1x24xf32>
    %957 = arith.divf %955, %956 : vector<1x24xf32>
    %958 = vector.extract_strided_slice %957 {offsets = [0, 0], sizes = [1, 8], strides = [1, 1]} : vector<1x24xf32> to vector<1x8xf32>
    %959 = vector.extract_strided_slice %957 {offsets = [0, 8], sizes = [1, 8], strides = [1, 1]} : vector<1x24xf32> to vector<1x8xf32>
    %960 = vector.extract_strided_slice %957 {offsets = [0, 16], sizes = [1, 8], strides = [1, 1]} : vector<1x24xf32> to vector<1x8xf32>
    %961 = vector.extract_strided_slice %951 {offsets = [0, 24], sizes = [1, 8], strides = [1, 1]} : vector<1x32xf32> to vector<1x8xf32>
    %962 = math.tanh %961 : vector<1x8xf32>
    %963 = arith.mulf %959, %939 : vector<1x8xf32>
    %964 = arith.mulf %958, %962 : vector<1x8xf32>
    %965 = arith.addf %963, %964 : vector<1x8xf32>
    %966 = math.tanh %965 : vector<1x8xf32>
    %967 = arith.mulf %960, %966 : vector<1x8xf32>
    %cst_93 = arith.constant 0.000000e+00 : f32
    %968 = vector.broadcast %cst_93 : f32 to vector<1x8xf32>
    %969 = arith.maximumf %967, %968 : vector<1x8xf32>
    %970 = vector.extract_strided_slice %947 {offsets = [0, 32], sizes = [1, 8], strides = [1, 1]} : vector<1x40xf32> to vector<1x8xf32>
    %971 = arith.mulf %969, %970 : vector<1x8xf32>
    %972 = arith.addf %946, %971 : vector<1x8xf32>
    %973 = vector.extract_strided_slice %32 {offsets = [36, 0], sizes = [1, 40], strides = [1, 1]} : vector<80x40xf32> to vector<1x40xf32>
    %974 = tpu.concatenate %967, %967, %967, %967 in 1 : vector<1x8xf32>, vector<1x8xf32>, vector<1x8xf32>, vector<1x8xf32> -> vector<1x32xf32>
    %975 = vector.extract_strided_slice %973 {offsets = [0, 0], sizes = [1, 32], strides = [1, 1]} : vector<1x40xf32> to vector<1x32xf32>
    %976 = arith.mulf %974, %33 : vector<1x32xf32>
    %977 = arith.addf %975, %976 : vector<1x32xf32>
    %978 = vector.extract_strided_slice %977 {offsets = [0, 0], sizes = [1, 24], strides = [1, 1]} : vector<1x32xf32> to vector<1x24xf32>
    %979 = arith.negf %978 : vector<1x24xf32>
    %980 = math.exp %979 : vector<1x24xf32>
    %cst_94 = arith.constant 1.000000e+00 : f32
    %981 = vector.broadcast %cst_94 : f32 to vector<1x24xf32>
    %982 = arith.addf %981, %980 : vector<1x24xf32>
    %983 = arith.divf %981, %982 : vector<1x24xf32>
    %984 = vector.extract_strided_slice %983 {offsets = [0, 0], sizes = [1, 8], strides = [1, 1]} : vector<1x24xf32> to vector<1x8xf32>
    %985 = vector.extract_strided_slice %983 {offsets = [0, 8], sizes = [1, 8], strides = [1, 1]} : vector<1x24xf32> to vector<1x8xf32>
    %986 = vector.extract_strided_slice %983 {offsets = [0, 16], sizes = [1, 8], strides = [1, 1]} : vector<1x24xf32> to vector<1x8xf32>
    %987 = vector.extract_strided_slice %977 {offsets = [0, 24], sizes = [1, 8], strides = [1, 1]} : vector<1x32xf32> to vector<1x8xf32>
    %988 = math.tanh %987 : vector<1x8xf32>
    %989 = arith.mulf %985, %965 : vector<1x8xf32>
    %990 = arith.mulf %984, %988 : vector<1x8xf32>
    %991 = arith.addf %989, %990 : vector<1x8xf32>
    %992 = math.tanh %991 : vector<1x8xf32>
    %993 = arith.mulf %986, %992 : vector<1x8xf32>
    %cst_95 = arith.constant 0.000000e+00 : f32
    %994 = vector.broadcast %cst_95 : f32 to vector<1x8xf32>
    %995 = arith.maximumf %993, %994 : vector<1x8xf32>
    %996 = vector.extract_strided_slice %973 {offsets = [0, 32], sizes = [1, 8], strides = [1, 1]} : vector<1x40xf32> to vector<1x8xf32>
    %997 = arith.mulf %995, %996 : vector<1x8xf32>
    %998 = arith.addf %972, %997 : vector<1x8xf32>
    %999 = vector.extract_strided_slice %32 {offsets = [37, 0], sizes = [1, 40], strides = [1, 1]} : vector<80x40xf32> to vector<1x40xf32>
    %1000 = tpu.concatenate %993, %993, %993, %993 in 1 : vector<1x8xf32>, vector<1x8xf32>, vector<1x8xf32>, vector<1x8xf32> -> vector<1x32xf32>
    %1001 = vector.extract_strided_slice %999 {offsets = [0, 0], sizes = [1, 32], strides = [1, 1]} : vector<1x40xf32> to vector<1x32xf32>
    %1002 = arith.mulf %1000, %33 : vector<1x32xf32>
    %1003 = arith.addf %1001, %1002 : vector<1x32xf32>
    %1004 = vector.extract_strided_slice %1003 {offsets = [0, 0], sizes = [1, 24], strides = [1, 1]} : vector<1x32xf32> to vector<1x24xf32>
    %1005 = arith.negf %1004 : vector<1x24xf32>
    %1006 = math.exp %1005 : vector<1x24xf32>
    %cst_96 = arith.constant 1.000000e+00 : f32
    %1007 = vector.broadcast %cst_96 : f32 to vector<1x24xf32>
    %1008 = arith.addf %1007, %1006 : vector<1x24xf32>
    %1009 = arith.divf %1007, %1008 : vector<1x24xf32>
    %1010 = vector.extract_strided_slice %1009 {offsets = [0, 0], sizes = [1, 8], strides = [1, 1]} : vector<1x24xf32> to vector<1x8xf32>
    %1011 = vector.extract_strided_slice %1009 {offsets = [0, 8], sizes = [1, 8], strides = [1, 1]} : vector<1x24xf32> to vector<1x8xf32>
    %1012 = vector.extract_strided_slice %1009 {offsets = [0, 16], sizes = [1, 8], strides = [1, 1]} : vector<1x24xf32> to vector<1x8xf32>
    %1013 = vector.extract_strided_slice %1003 {offsets = [0, 24], sizes = [1, 8], strides = [1, 1]} : vector<1x32xf32> to vector<1x8xf32>
    %1014 = math.tanh %1013 : vector<1x8xf32>
    %1015 = arith.mulf %1011, %991 : vector<1x8xf32>
    %1016 = arith.mulf %1010, %1014 : vector<1x8xf32>
    %1017 = arith.addf %1015, %1016 : vector<1x8xf32>
    %1018 = math.tanh %1017 : vector<1x8xf32>
    %1019 = arith.mulf %1012, %1018 : vector<1x8xf32>
    %cst_97 = arith.constant 0.000000e+00 : f32
    %1020 = vector.broadcast %cst_97 : f32 to vector<1x8xf32>
    %1021 = arith.maximumf %1019, %1020 : vector<1x8xf32>
    %1022 = vector.extract_strided_slice %999 {offsets = [0, 32], sizes = [1, 8], strides = [1, 1]} : vector<1x40xf32> to vector<1x8xf32>
    %1023 = arith.mulf %1021, %1022 : vector<1x8xf32>
    %1024 = arith.addf %998, %1023 : vector<1x8xf32>
    %1025 = vector.extract_strided_slice %32 {offsets = [38, 0], sizes = [1, 40], strides = [1, 1]} : vector<80x40xf32> to vector<1x40xf32>
    %1026 = tpu.concatenate %1019, %1019, %1019, %1019 in 1 : vector<1x8xf32>, vector<1x8xf32>, vector<1x8xf32>, vector<1x8xf32> -> vector<1x32xf32>
    %1027 = vector.extract_strided_slice %1025 {offsets = [0, 0], sizes = [1, 32], strides = [1, 1]} : vector<1x40xf32> to vector<1x32xf32>
    %1028 = arith.mulf %1026, %33 : vector<1x32xf32>
    %1029 = arith.addf %1027, %1028 : vector<1x32xf32>
    %1030 = vector.extract_strided_slice %1029 {offsets = [0, 0], sizes = [1, 24], strides = [1, 1]} : vector<1x32xf32> to vector<1x24xf32>
    %1031 = arith.negf %1030 : vector<1x24xf32>
    %1032 = math.exp %1031 : vector<1x24xf32>
    %cst_98 = arith.constant 1.000000e+00 : f32
    %1033 = vector.broadcast %cst_98 : f32 to vector<1x24xf32>
    %1034 = arith.addf %1033, %1032 : vector<1x24xf32>
    %1035 = arith.divf %1033, %1034 : vector<1x24xf32>
    %1036 = vector.extract_strided_slice %1035 {offsets = [0, 0], sizes = [1, 8], strides = [1, 1]} : vector<1x24xf32> to vector<1x8xf32>
    %1037 = vector.extract_strided_slice %1035 {offsets = [0, 8], sizes = [1, 8], strides = [1, 1]} : vector<1x24xf32> to vector<1x8xf32>
    %1038 = vector.extract_strided_slice %1035 {offsets = [0, 16], sizes = [1, 8], strides = [1, 1]} : vector<1x24xf32> to vector<1x8xf32>
    %1039 = vector.extract_strided_slice %1029 {offsets = [0, 24], sizes = [1, 8], strides = [1, 1]} : vector<1x32xf32> to vector<1x8xf32>
    %1040 = math.tanh %1039 : vector<1x8xf32>
    %1041 = arith.mulf %1037, %1017 : vector<1x8xf32>
    %1042 = arith.mulf %1036, %1040 : vector<1x8xf32>
    %1043 = arith.addf %1041, %1042 : vector<1x8xf32>
    %1044 = math.tanh %1043 : vector<1x8xf32>
    %1045 = arith.mulf %1038, %1044 : vector<1x8xf32>
    %cst_99 = arith.constant 0.000000e+00 : f32
    %1046 = vector.broadcast %cst_99 : f32 to vector<1x8xf32>
    %1047 = arith.maximumf %1045, %1046 : vector<1x8xf32>
    %1048 = vector.extract_strided_slice %1025 {offsets = [0, 32], sizes = [1, 8], strides = [1, 1]} : vector<1x40xf32> to vector<1x8xf32>
    %1049 = arith.mulf %1047, %1048 : vector<1x8xf32>
    %1050 = arith.addf %1024, %1049 : vector<1x8xf32>
    %1051 = vector.extract_strided_slice %32 {offsets = [39, 0], sizes = [1, 40], strides = [1, 1]} : vector<80x40xf32> to vector<1x40xf32>
    %1052 = tpu.concatenate %1045, %1045, %1045, %1045 in 1 : vector<1x8xf32>, vector<1x8xf32>, vector<1x8xf32>, vector<1x8xf32> -> vector<1x32xf32>
    %1053 = vector.extract_strided_slice %1051 {offsets = [0, 0], sizes = [1, 32], strides = [1, 1]} : vector<1x40xf32> to vector<1x32xf32>
    %1054 = arith.mulf %1052, %33 : vector<1x32xf32>
    %1055 = arith.addf %1053, %1054 : vector<1x32xf32>
    %1056 = vector.extract_strided_slice %1055 {offsets = [0, 0], sizes = [1, 24], strides = [1, 1]} : vector<1x32xf32> to vector<1x24xf32>
    %1057 = arith.negf %1056 : vector<1x24xf32>
    %1058 = math.exp %1057 : vector<1x24xf32>
    %cst_100 = arith.constant 1.000000e+00 : f32
    %1059 = vector.broadcast %cst_100 : f32 to vector<1x24xf32>
    %1060 = arith.addf %1059, %1058 : vector<1x24xf32>
    %1061 = arith.divf %1059, %1060 : vector<1x24xf32>
    %1062 = vector.extract_strided_slice %1061 {offsets = [0, 0], sizes = [1, 8], strides = [1, 1]} : vector<1x24xf32> to vector<1x8xf32>
    %1063 = vector.extract_strided_slice %1061 {offsets = [0, 8], sizes = [1, 8], strides = [1, 1]} : vector<1x24xf32> to vector<1x8xf32>
    %1064 = vector.extract_strided_slice %1061 {offsets = [0, 16], sizes = [1, 8], strides = [1, 1]} : vector<1x24xf32> to vector<1x8xf32>
    %1065 = vector.extract_strided_slice %1055 {offsets = [0, 24], sizes = [1, 8], strides = [1, 1]} : vector<1x32xf32> to vector<1x8xf32>
    %1066 = math.tanh %1065 : vector<1x8xf32>
    %1067 = arith.mulf %1063, %1043 : vector<1x8xf32>
    %1068 = arith.mulf %1062, %1066 : vector<1x8xf32>
    %1069 = arith.addf %1067, %1068 : vector<1x8xf32>
    %1070 = math.tanh %1069 : vector<1x8xf32>
    %1071 = arith.mulf %1064, %1070 : vector<1x8xf32>
    %cst_101 = arith.constant 0.000000e+00 : f32
    %1072 = vector.broadcast %cst_101 : f32 to vector<1x8xf32>
    %1073 = arith.maximumf %1071, %1072 : vector<1x8xf32>
    %1074 = vector.extract_strided_slice %1051 {offsets = [0, 32], sizes = [1, 8], strides = [1, 1]} : vector<1x40xf32> to vector<1x8xf32>
    %1075 = arith.mulf %1073, %1074 : vector<1x8xf32>
    %1076 = arith.addf %1050, %1075 : vector<1x8xf32>
    %1077 = vector.extract_strided_slice %32 {offsets = [40, 0], sizes = [1, 40], strides = [1, 1]} : vector<80x40xf32> to vector<1x40xf32>
    %1078 = tpu.concatenate %1071, %1071, %1071, %1071 in 1 : vector<1x8xf32>, vector<1x8xf32>, vector<1x8xf32>, vector<1x8xf32> -> vector<1x32xf32>
    %1079 = vector.extract_strided_slice %1077 {offsets = [0, 0], sizes = [1, 32], strides = [1, 1]} : vector<1x40xf32> to vector<1x32xf32>
    %1080 = arith.mulf %1078, %33 : vector<1x32xf32>
    %1081 = arith.addf %1079, %1080 : vector<1x32xf32>
    %1082 = vector.extract_strided_slice %1081 {offsets = [0, 0], sizes = [1, 24], strides = [1, 1]} : vector<1x32xf32> to vector<1x24xf32>
    %1083 = arith.negf %1082 : vector<1x24xf32>
    %1084 = math.exp %1083 : vector<1x24xf32>
    %cst_102 = arith.constant 1.000000e+00 : f32
    %1085 = vector.broadcast %cst_102 : f32 to vector<1x24xf32>
    %1086 = arith.addf %1085, %1084 : vector<1x24xf32>
    %1087 = arith.divf %1085, %1086 : vector<1x24xf32>
    %1088 = vector.extract_strided_slice %1087 {offsets = [0, 0], sizes = [1, 8], strides = [1, 1]} : vector<1x24xf32> to vector<1x8xf32>
    %1089 = vector.extract_strided_slice %1087 {offsets = [0, 8], sizes = [1, 8], strides = [1, 1]} : vector<1x24xf32> to vector<1x8xf32>
    %1090 = vector.extract_strided_slice %1087 {offsets = [0, 16], sizes = [1, 8], strides = [1, 1]} : vector<1x24xf32> to vector<1x8xf32>
    %1091 = vector.extract_strided_slice %1081 {offsets = [0, 24], sizes = [1, 8], strides = [1, 1]} : vector<1x32xf32> to vector<1x8xf32>
    %1092 = math.tanh %1091 : vector<1x8xf32>
    %1093 = arith.mulf %1089, %1069 : vector<1x8xf32>
    %1094 = arith.mulf %1088, %1092 : vector<1x8xf32>
    %1095 = arith.addf %1093, %1094 : vector<1x8xf32>
    %1096 = math.tanh %1095 : vector<1x8xf32>
    %1097 = arith.mulf %1090, %1096 : vector<1x8xf32>
    %cst_103 = arith.constant 0.000000e+00 : f32
    %1098 = vector.broadcast %cst_103 : f32 to vector<1x8xf32>
    %1099 = arith.maximumf %1097, %1098 : vector<1x8xf32>
    %1100 = vector.extract_strided_slice %1077 {offsets = [0, 32], sizes = [1, 8], strides = [1, 1]} : vector<1x40xf32> to vector<1x8xf32>
    %1101 = arith.mulf %1099, %1100 : vector<1x8xf32>
    %1102 = arith.addf %1076, %1101 : vector<1x8xf32>
    %1103 = vector.extract_strided_slice %32 {offsets = [41, 0], sizes = [1, 40], strides = [1, 1]} : vector<80x40xf32> to vector<1x40xf32>
    %1104 = tpu.concatenate %1097, %1097, %1097, %1097 in 1 : vector<1x8xf32>, vector<1x8xf32>, vector<1x8xf32>, vector<1x8xf32> -> vector<1x32xf32>
    %1105 = vector.extract_strided_slice %1103 {offsets = [0, 0], sizes = [1, 32], strides = [1, 1]} : vector<1x40xf32> to vector<1x32xf32>
    %1106 = arith.mulf %1104, %33 : vector<1x32xf32>
    %1107 = arith.addf %1105, %1106 : vector<1x32xf32>
    %1108 = vector.extract_strided_slice %1107 {offsets = [0, 0], sizes = [1, 24], strides = [1, 1]} : vector<1x32xf32> to vector<1x24xf32>
    %1109 = arith.negf %1108 : vector<1x24xf32>
    %1110 = math.exp %1109 : vector<1x24xf32>
    %cst_104 = arith.constant 1.000000e+00 : f32
    %1111 = vector.broadcast %cst_104 : f32 to vector<1x24xf32>
    %1112 = arith.addf %1111, %1110 : vector<1x24xf32>
    %1113 = arith.divf %1111, %1112 : vector<1x24xf32>
    %1114 = vector.extract_strided_slice %1113 {offsets = [0, 0], sizes = [1, 8], strides = [1, 1]} : vector<1x24xf32> to vector<1x8xf32>
    %1115 = vector.extract_strided_slice %1113 {offsets = [0, 8], sizes = [1, 8], strides = [1, 1]} : vector<1x24xf32> to vector<1x8xf32>
    %1116 = vector.extract_strided_slice %1113 {offsets = [0, 16], sizes = [1, 8], strides = [1, 1]} : vector<1x24xf32> to vector<1x8xf32>
    %1117 = vector.extract_strided_slice %1107 {offsets = [0, 24], sizes = [1, 8], strides = [1, 1]} : vector<1x32xf32> to vector<1x8xf32>
    %1118 = math.tanh %1117 : vector<1x8xf32>
    %1119 = arith.mulf %1115, %1095 : vector<1x8xf32>
    %1120 = arith.mulf %1114, %1118 : vector<1x8xf32>
    %1121 = arith.addf %1119, %1120 : vector<1x8xf32>
    %1122 = math.tanh %1121 : vector<1x8xf32>
    %1123 = arith.mulf %1116, %1122 : vector<1x8xf32>
    %cst_105 = arith.constant 0.000000e+00 : f32
    %1124 = vector.broadcast %cst_105 : f32 to vector<1x8xf32>
    %1125 = arith.maximumf %1123, %1124 : vector<1x8xf32>
    %1126 = vector.extract_strided_slice %1103 {offsets = [0, 32], sizes = [1, 8], strides = [1, 1]} : vector<1x40xf32> to vector<1x8xf32>
    %1127 = arith.mulf %1125, %1126 : vector<1x8xf32>
    %1128 = arith.addf %1102, %1127 : vector<1x8xf32>
    %1129 = vector.extract_strided_slice %32 {offsets = [42, 0], sizes = [1, 40], strides = [1, 1]} : vector<80x40xf32> to vector<1x40xf32>
    %1130 = tpu.concatenate %1123, %1123, %1123, %1123 in 1 : vector<1x8xf32>, vector<1x8xf32>, vector<1x8xf32>, vector<1x8xf32> -> vector<1x32xf32>
    %1131 = vector.extract_strided_slice %1129 {offsets = [0, 0], sizes = [1, 32], strides = [1, 1]} : vector<1x40xf32> to vector<1x32xf32>
    %1132 = arith.mulf %1130, %33 : vector<1x32xf32>
    %1133 = arith.addf %1131, %1132 : vector<1x32xf32>
    %1134 = vector.extract_strided_slice %1133 {offsets = [0, 0], sizes = [1, 24], strides = [1, 1]} : vector<1x32xf32> to vector<1x24xf32>
    %1135 = arith.negf %1134 : vector<1x24xf32>
    %1136 = math.exp %1135 : vector<1x24xf32>
    %cst_106 = arith.constant 1.000000e+00 : f32
    %1137 = vector.broadcast %cst_106 : f32 to vector<1x24xf32>
    %1138 = arith.addf %1137, %1136 : vector<1x24xf32>
    %1139 = arith.divf %1137, %1138 : vector<1x24xf32>
    %1140 = vector.extract_strided_slice %1139 {offsets = [0, 0], sizes = [1, 8], strides = [1, 1]} : vector<1x24xf32> to vector<1x8xf32>
    %1141 = vector.extract_strided_slice %1139 {offsets = [0, 8], sizes = [1, 8], strides = [1, 1]} : vector<1x24xf32> to vector<1x8xf32>
    %1142 = vector.extract_strided_slice %1139 {offsets = [0, 16], sizes = [1, 8], strides = [1, 1]} : vector<1x24xf32> to vector<1x8xf32>
    %1143 = vector.extract_strided_slice %1133 {offsets = [0, 24], sizes = [1, 8], strides = [1, 1]} : vector<1x32xf32> to vector<1x8xf32>
    %1144 = math.tanh %1143 : vector<1x8xf32>
    %1145 = arith.mulf %1141, %1121 : vector<1x8xf32>
    %1146 = arith.mulf %1140, %1144 : vector<1x8xf32>
    %1147 = arith.addf %1145, %1146 : vector<1x8xf32>
    %1148 = math.tanh %1147 : vector<1x8xf32>
    %1149 = arith.mulf %1142, %1148 : vector<1x8xf32>
    %cst_107 = arith.constant 0.000000e+00 : f32
    %1150 = vector.broadcast %cst_107 : f32 to vector<1x8xf32>
    %1151 = arith.maximumf %1149, %1150 : vector<1x8xf32>
    %1152 = vector.extract_strided_slice %1129 {offsets = [0, 32], sizes = [1, 8], strides = [1, 1]} : vector<1x40xf32> to vector<1x8xf32>
    %1153 = arith.mulf %1151, %1152 : vector<1x8xf32>
    %1154 = arith.addf %1128, %1153 : vector<1x8xf32>
    %1155 = vector.extract_strided_slice %32 {offsets = [43, 0], sizes = [1, 40], strides = [1, 1]} : vector<80x40xf32> to vector<1x40xf32>
    %1156 = tpu.concatenate %1149, %1149, %1149, %1149 in 1 : vector<1x8xf32>, vector<1x8xf32>, vector<1x8xf32>, vector<1x8xf32> -> vector<1x32xf32>
    %1157 = vector.extract_strided_slice %1155 {offsets = [0, 0], sizes = [1, 32], strides = [1, 1]} : vector<1x40xf32> to vector<1x32xf32>
    %1158 = arith.mulf %1156, %33 : vector<1x32xf32>
    %1159 = arith.addf %1157, %1158 : vector<1x32xf32>
    %1160 = vector.extract_strided_slice %1159 {offsets = [0, 0], sizes = [1, 24], strides = [1, 1]} : vector<1x32xf32> to vector<1x24xf32>
    %1161 = arith.negf %1160 : vector<1x24xf32>
    %1162 = math.exp %1161 : vector<1x24xf32>
    %cst_108 = arith.constant 1.000000e+00 : f32
    %1163 = vector.broadcast %cst_108 : f32 to vector<1x24xf32>
    %1164 = arith.addf %1163, %1162 : vector<1x24xf32>
    %1165 = arith.divf %1163, %1164 : vector<1x24xf32>
    %1166 = vector.extract_strided_slice %1165 {offsets = [0, 0], sizes = [1, 8], strides = [1, 1]} : vector<1x24xf32> to vector<1x8xf32>
    %1167 = vector.extract_strided_slice %1165 {offsets = [0, 8], sizes = [1, 8], strides = [1, 1]} : vector<1x24xf32> to vector<1x8xf32>
    %1168 = vector.extract_strided_slice %1165 {offsets = [0, 16], sizes = [1, 8], strides = [1, 1]} : vector<1x24xf32> to vector<1x8xf32>
    %1169 = vector.extract_strided_slice %1159 {offsets = [0, 24], sizes = [1, 8], strides = [1, 1]} : vector<1x32xf32> to vector<1x8xf32>
    %1170 = math.tanh %1169 : vector<1x8xf32>
    %1171 = arith.mulf %1167, %1147 : vector<1x8xf32>
    %1172 = arith.mulf %1166, %1170 : vector<1x8xf32>
    %1173 = arith.addf %1171, %1172 : vector<1x8xf32>
    %1174 = math.tanh %1173 : vector<1x8xf32>
    %1175 = arith.mulf %1168, %1174 : vector<1x8xf32>
    %cst_109 = arith.constant 0.000000e+00 : f32
    %1176 = vector.broadcast %cst_109 : f32 to vector<1x8xf32>
    %1177 = arith.maximumf %1175, %1176 : vector<1x8xf32>
    %1178 = vector.extract_strided_slice %1155 {offsets = [0, 32], sizes = [1, 8], strides = [1, 1]} : vector<1x40xf32> to vector<1x8xf32>
    %1179 = arith.mulf %1177, %1178 : vector<1x8xf32>
    %1180 = arith.addf %1154, %1179 : vector<1x8xf32>
    %1181 = vector.extract_strided_slice %32 {offsets = [44, 0], sizes = [1, 40], strides = [1, 1]} : vector<80x40xf32> to vector<1x40xf32>
    %1182 = tpu.concatenate %1175, %1175, %1175, %1175 in 1 : vector<1x8xf32>, vector<1x8xf32>, vector<1x8xf32>, vector<1x8xf32> -> vector<1x32xf32>
    %1183 = vector.extract_strided_slice %1181 {offsets = [0, 0], sizes = [1, 32], strides = [1, 1]} : vector<1x40xf32> to vector<1x32xf32>
    %1184 = arith.mulf %1182, %33 : vector<1x32xf32>
    %1185 = arith.addf %1183, %1184 : vector<1x32xf32>
    %1186 = vector.extract_strided_slice %1185 {offsets = [0, 0], sizes = [1, 24], strides = [1, 1]} : vector<1x32xf32> to vector<1x24xf32>
    %1187 = arith.negf %1186 : vector<1x24xf32>
    %1188 = math.exp %1187 : vector<1x24xf32>
    %cst_110 = arith.constant 1.000000e+00 : f32
    %1189 = vector.broadcast %cst_110 : f32 to vector<1x24xf32>
    %1190 = arith.addf %1189, %1188 : vector<1x24xf32>
    %1191 = arith.divf %1189, %1190 : vector<1x24xf32>
    %1192 = vector.extract_strided_slice %1191 {offsets = [0, 0], sizes = [1, 8], strides = [1, 1]} : vector<1x24xf32> to vector<1x8xf32>
    %1193 = vector.extract_strided_slice %1191 {offsets = [0, 8], sizes = [1, 8], strides = [1, 1]} : vector<1x24xf32> to vector<1x8xf32>
    %1194 = vector.extract_strided_slice %1191 {offsets = [0, 16], sizes = [1, 8], strides = [1, 1]} : vector<1x24xf32> to vector<1x8xf32>
    %1195 = vector.extract_strided_slice %1185 {offsets = [0, 24], sizes = [1, 8], strides = [1, 1]} : vector<1x32xf32> to vector<1x8xf32>
    %1196 = math.tanh %1195 : vector<1x8xf32>
    %1197 = arith.mulf %1193, %1173 : vector<1x8xf32>
    %1198 = arith.mulf %1192, %1196 : vector<1x8xf32>
    %1199 = arith.addf %1197, %1198 : vector<1x8xf32>
    %1200 = math.tanh %1199 : vector<1x8xf32>
    %1201 = arith.mulf %1194, %1200 : vector<1x8xf32>
    %cst_111 = arith.constant 0.000000e+00 : f32
    %1202 = vector.broadcast %cst_111 : f32 to vector<1x8xf32>
    %1203 = arith.maximumf %1201, %1202 : vector<1x8xf32>
    %1204 = vector.extract_strided_slice %1181 {offsets = [0, 32], sizes = [1, 8], strides = [1, 1]} : vector<1x40xf32> to vector<1x8xf32>
    %1205 = arith.mulf %1203, %1204 : vector<1x8xf32>
    %1206 = arith.addf %1180, %1205 : vector<1x8xf32>
    %1207 = vector.extract_strided_slice %32 {offsets = [45, 0], sizes = [1, 40], strides = [1, 1]} : vector<80x40xf32> to vector<1x40xf32>
    %1208 = tpu.concatenate %1201, %1201, %1201, %1201 in 1 : vector<1x8xf32>, vector<1x8xf32>, vector<1x8xf32>, vector<1x8xf32> -> vector<1x32xf32>
    %1209 = vector.extract_strided_slice %1207 {offsets = [0, 0], sizes = [1, 32], strides = [1, 1]} : vector<1x40xf32> to vector<1x32xf32>
    %1210 = arith.mulf %1208, %33 : vector<1x32xf32>
    %1211 = arith.addf %1209, %1210 : vector<1x32xf32>
    %1212 = vector.extract_strided_slice %1211 {offsets = [0, 0], sizes = [1, 24], strides = [1, 1]} : vector<1x32xf32> to vector<1x24xf32>
    %1213 = arith.negf %1212 : vector<1x24xf32>
    %1214 = math.exp %1213 : vector<1x24xf32>
    %cst_112 = arith.constant 1.000000e+00 : f32
    %1215 = vector.broadcast %cst_112 : f32 to vector<1x24xf32>
    %1216 = arith.addf %1215, %1214 : vector<1x24xf32>
    %1217 = arith.divf %1215, %1216 : vector<1x24xf32>
    %1218 = vector.extract_strided_slice %1217 {offsets = [0, 0], sizes = [1, 8], strides = [1, 1]} : vector<1x24xf32> to vector<1x8xf32>
    %1219 = vector.extract_strided_slice %1217 {offsets = [0, 8], sizes = [1, 8], strides = [1, 1]} : vector<1x24xf32> to vector<1x8xf32>
    %1220 = vector.extract_strided_slice %1217 {offsets = [0, 16], sizes = [1, 8], strides = [1, 1]} : vector<1x24xf32> to vector<1x8xf32>
    %1221 = vector.extract_strided_slice %1211 {offsets = [0, 24], sizes = [1, 8], strides = [1, 1]} : vector<1x32xf32> to vector<1x8xf32>
    %1222 = math.tanh %1221 : vector<1x8xf32>
    %1223 = arith.mulf %1219, %1199 : vector<1x8xf32>
    %1224 = arith.mulf %1218, %1222 : vector<1x8xf32>
    %1225 = arith.addf %1223, %1224 : vector<1x8xf32>
    %1226 = math.tanh %1225 : vector<1x8xf32>
    %1227 = arith.mulf %1220, %1226 : vector<1x8xf32>
    %cst_113 = arith.constant 0.000000e+00 : f32
    %1228 = vector.broadcast %cst_113 : f32 to vector<1x8xf32>
    %1229 = arith.maximumf %1227, %1228 : vector<1x8xf32>
    %1230 = vector.extract_strided_slice %1207 {offsets = [0, 32], sizes = [1, 8], strides = [1, 1]} : vector<1x40xf32> to vector<1x8xf32>
    %1231 = arith.mulf %1229, %1230 : vector<1x8xf32>
    %1232 = arith.addf %1206, %1231 : vector<1x8xf32>
    %1233 = vector.extract_strided_slice %32 {offsets = [46, 0], sizes = [1, 40], strides = [1, 1]} : vector<80x40xf32> to vector<1x40xf32>
    %1234 = tpu.concatenate %1227, %1227, %1227, %1227 in 1 : vector<1x8xf32>, vector<1x8xf32>, vector<1x8xf32>, vector<1x8xf32> -> vector<1x32xf32>
    %1235 = vector.extract_strided_slice %1233 {offsets = [0, 0], sizes = [1, 32], strides = [1, 1]} : vector<1x40xf32> to vector<1x32xf32>
    %1236 = arith.mulf %1234, %33 : vector<1x32xf32>
    %1237 = arith.addf %1235, %1236 : vector<1x32xf32>
    %1238 = vector.extract_strided_slice %1237 {offsets = [0, 0], sizes = [1, 24], strides = [1, 1]} : vector<1x32xf32> to vector<1x24xf32>
    %1239 = arith.negf %1238 : vector<1x24xf32>
    %1240 = math.exp %1239 : vector<1x24xf32>
    %cst_114 = arith.constant 1.000000e+00 : f32
    %1241 = vector.broadcast %cst_114 : f32 to vector<1x24xf32>
    %1242 = arith.addf %1241, %1240 : vector<1x24xf32>
    %1243 = arith.divf %1241, %1242 : vector<1x24xf32>
    %1244 = vector.extract_strided_slice %1243 {offsets = [0, 0], sizes = [1, 8], strides = [1, 1]} : vector<1x24xf32> to vector<1x8xf32>
    %1245 = vector.extract_strided_slice %1243 {offsets = [0, 8], sizes = [1, 8], strides = [1, 1]} : vector<1x24xf32> to vector<1x8xf32>
    %1246 = vector.extract_strided_slice %1243 {offsets = [0, 16], sizes = [1, 8], strides = [1, 1]} : vector<1x24xf32> to vector<1x8xf32>
    %1247 = vector.extract_strided_slice %1237 {offsets = [0, 24], sizes = [1, 8], strides = [1, 1]} : vector<1x32xf32> to vector<1x8xf32>
    %1248 = math.tanh %1247 : vector<1x8xf32>
    %1249 = arith.mulf %1245, %1225 : vector<1x8xf32>
    %1250 = arith.mulf %1244, %1248 : vector<1x8xf32>
    %1251 = arith.addf %1249, %1250 : vector<1x8xf32>
    %1252 = math.tanh %1251 : vector<1x8xf32>
    %1253 = arith.mulf %1246, %1252 : vector<1x8xf32>
    %cst_115 = arith.constant 0.000000e+00 : f32
    %1254 = vector.broadcast %cst_115 : f32 to vector<1x8xf32>
    %1255 = arith.maximumf %1253, %1254 : vector<1x8xf32>
    %1256 = vector.extract_strided_slice %1233 {offsets = [0, 32], sizes = [1, 8], strides = [1, 1]} : vector<1x40xf32> to vector<1x8xf32>
    %1257 = arith.mulf %1255, %1256 : vector<1x8xf32>
    %1258 = arith.addf %1232, %1257 : vector<1x8xf32>
    %1259 = vector.extract_strided_slice %32 {offsets = [47, 0], sizes = [1, 40], strides = [1, 1]} : vector<80x40xf32> to vector<1x40xf32>
    %1260 = tpu.concatenate %1253, %1253, %1253, %1253 in 1 : vector<1x8xf32>, vector<1x8xf32>, vector<1x8xf32>, vector<1x8xf32> -> vector<1x32xf32>
    %1261 = vector.extract_strided_slice %1259 {offsets = [0, 0], sizes = [1, 32], strides = [1, 1]} : vector<1x40xf32> to vector<1x32xf32>
    %1262 = arith.mulf %1260, %33 : vector<1x32xf32>
    %1263 = arith.addf %1261, %1262 : vector<1x32xf32>
    %1264 = vector.extract_strided_slice %1263 {offsets = [0, 0], sizes = [1, 24], strides = [1, 1]} : vector<1x32xf32> to vector<1x24xf32>
    %1265 = arith.negf %1264 : vector<1x24xf32>
    %1266 = math.exp %1265 : vector<1x24xf32>
    %cst_116 = arith.constant 1.000000e+00 : f32
    %1267 = vector.broadcast %cst_116 : f32 to vector<1x24xf32>
    %1268 = arith.addf %1267, %1266 : vector<1x24xf32>
    %1269 = arith.divf %1267, %1268 : vector<1x24xf32>
    %1270 = vector.extract_strided_slice %1269 {offsets = [0, 0], sizes = [1, 8], strides = [1, 1]} : vector<1x24xf32> to vector<1x8xf32>
    %1271 = vector.extract_strided_slice %1269 {offsets = [0, 8], sizes = [1, 8], strides = [1, 1]} : vector<1x24xf32> to vector<1x8xf32>
    %1272 = vector.extract_strided_slice %1269 {offsets = [0, 16], sizes = [1, 8], strides = [1, 1]} : vector<1x24xf32> to vector<1x8xf32>
    %1273 = vector.extract_strided_slice %1263 {offsets = [0, 24], sizes = [1, 8], strides = [1, 1]} : vector<1x32xf32> to vector<1x8xf32>
    %1274 = math.tanh %1273 : vector<1x8xf32>
    %1275 = arith.mulf %1271, %1251 : vector<1x8xf32>
    %1276 = arith.mulf %1270, %1274 : vector<1x8xf32>
    %1277 = arith.addf %1275, %1276 : vector<1x8xf32>
    %1278 = math.tanh %1277 : vector<1x8xf32>
    %1279 = arith.mulf %1272, %1278 : vector<1x8xf32>
    %cst_117 = arith.constant 0.000000e+00 : f32
    %1280 = vector.broadcast %cst_117 : f32 to vector<1x8xf32>
    %1281 = arith.maximumf %1279, %1280 : vector<1x8xf32>
    %1282 = vector.extract_strided_slice %1259 {offsets = [0, 32], sizes = [1, 8], strides = [1, 1]} : vector<1x40xf32> to vector<1x8xf32>
    %1283 = arith.mulf %1281, %1282 : vector<1x8xf32>
    %1284 = arith.addf %1258, %1283 : vector<1x8xf32>
    %1285 = vector.extract_strided_slice %32 {offsets = [48, 0], sizes = [1, 40], strides = [1, 1]} : vector<80x40xf32> to vector<1x40xf32>
    %1286 = tpu.concatenate %1279, %1279, %1279, %1279 in 1 : vector<1x8xf32>, vector<1x8xf32>, vector<1x8xf32>, vector<1x8xf32> -> vector<1x32xf32>
    %1287 = vector.extract_strided_slice %1285 {offsets = [0, 0], sizes = [1, 32], strides = [1, 1]} : vector<1x40xf32> to vector<1x32xf32>
    %1288 = arith.mulf %1286, %33 : vector<1x32xf32>
    %1289 = arith.addf %1287, %1288 : vector<1x32xf32>
    %1290 = vector.extract_strided_slice %1289 {offsets = [0, 0], sizes = [1, 24], strides = [1, 1]} : vector<1x32xf32> to vector<1x24xf32>
    %1291 = arith.negf %1290 : vector<1x24xf32>
    %1292 = math.exp %1291 : vector<1x24xf32>
    %cst_118 = arith.constant 1.000000e+00 : f32
    %1293 = vector.broadcast %cst_118 : f32 to vector<1x24xf32>
    %1294 = arith.addf %1293, %1292 : vector<1x24xf32>
    %1295 = arith.divf %1293, %1294 : vector<1x24xf32>
    %1296 = vector.extract_strided_slice %1295 {offsets = [0, 0], sizes = [1, 8], strides = [1, 1]} : vector<1x24xf32> to vector<1x8xf32>
    %1297 = vector.extract_strided_slice %1295 {offsets = [0, 8], sizes = [1, 8], strides = [1, 1]} : vector<1x24xf32> to vector<1x8xf32>
    %1298 = vector.extract_strided_slice %1295 {offsets = [0, 16], sizes = [1, 8], strides = [1, 1]} : vector<1x24xf32> to vector<1x8xf32>
    %1299 = vector.extract_strided_slice %1289 {offsets = [0, 24], sizes = [1, 8], strides = [1, 1]} : vector<1x32xf32> to vector<1x8xf32>
    %1300 = math.tanh %1299 : vector<1x8xf32>
    %1301 = arith.mulf %1297, %1277 : vector<1x8xf32>
    %1302 = arith.mulf %1296, %1300 : vector<1x8xf32>
    %1303 = arith.addf %1301, %1302 : vector<1x8xf32>
    %1304 = math.tanh %1303 : vector<1x8xf32>
    %1305 = arith.mulf %1298, %1304 : vector<1x8xf32>
    %cst_119 = arith.constant 0.000000e+00 : f32
    %1306 = vector.broadcast %cst_119 : f32 to vector<1x8xf32>
    %1307 = arith.maximumf %1305, %1306 : vector<1x8xf32>
    %1308 = vector.extract_strided_slice %1285 {offsets = [0, 32], sizes = [1, 8], strides = [1, 1]} : vector<1x40xf32> to vector<1x8xf32>
    %1309 = arith.mulf %1307, %1308 : vector<1x8xf32>
    %1310 = arith.addf %1284, %1309 : vector<1x8xf32>
    %1311 = vector.extract_strided_slice %32 {offsets = [49, 0], sizes = [1, 40], strides = [1, 1]} : vector<80x40xf32> to vector<1x40xf32>
    %1312 = tpu.concatenate %1305, %1305, %1305, %1305 in 1 : vector<1x8xf32>, vector<1x8xf32>, vector<1x8xf32>, vector<1x8xf32> -> vector<1x32xf32>
    %1313 = vector.extract_strided_slice %1311 {offsets = [0, 0], sizes = [1, 32], strides = [1, 1]} : vector<1x40xf32> to vector<1x32xf32>
    %1314 = arith.mulf %1312, %33 : vector<1x32xf32>
    %1315 = arith.addf %1313, %1314 : vector<1x32xf32>
    %1316 = vector.extract_strided_slice %1315 {offsets = [0, 0], sizes = [1, 24], strides = [1, 1]} : vector<1x32xf32> to vector<1x24xf32>
    %1317 = arith.negf %1316 : vector<1x24xf32>
    %1318 = math.exp %1317 : vector<1x24xf32>
    %cst_120 = arith.constant 1.000000e+00 : f32
    %1319 = vector.broadcast %cst_120 : f32 to vector<1x24xf32>
    %1320 = arith.addf %1319, %1318 : vector<1x24xf32>
    %1321 = arith.divf %1319, %1320 : vector<1x24xf32>
    %1322 = vector.extract_strided_slice %1321 {offsets = [0, 0], sizes = [1, 8], strides = [1, 1]} : vector<1x24xf32> to vector<1x8xf32>
    %1323 = vector.extract_strided_slice %1321 {offsets = [0, 8], sizes = [1, 8], strides = [1, 1]} : vector<1x24xf32> to vector<1x8xf32>
    %1324 = vector.extract_strided_slice %1321 {offsets = [0, 16], sizes = [1, 8], strides = [1, 1]} : vector<1x24xf32> to vector<1x8xf32>
    %1325 = vector.extract_strided_slice %1315 {offsets = [0, 24], sizes = [1, 8], strides = [1, 1]} : vector<1x32xf32> to vector<1x8xf32>
    %1326 = math.tanh %1325 : vector<1x8xf32>
    %1327 = arith.mulf %1323, %1303 : vector<1x8xf32>
    %1328 = arith.mulf %1322, %1326 : vector<1x8xf32>
    %1329 = arith.addf %1327, %1328 : vector<1x8xf32>
    %1330 = math.tanh %1329 : vector<1x8xf32>
    %1331 = arith.mulf %1324, %1330 : vector<1x8xf32>
    %cst_121 = arith.constant 0.000000e+00 : f32
    %1332 = vector.broadcast %cst_121 : f32 to vector<1x8xf32>
    %1333 = arith.maximumf %1331, %1332 : vector<1x8xf32>
    %1334 = vector.extract_strided_slice %1311 {offsets = [0, 32], sizes = [1, 8], strides = [1, 1]} : vector<1x40xf32> to vector<1x8xf32>
    %1335 = arith.mulf %1333, %1334 : vector<1x8xf32>
    %1336 = arith.addf %1310, %1335 : vector<1x8xf32>
    %1337 = vector.extract_strided_slice %32 {offsets = [50, 0], sizes = [1, 40], strides = [1, 1]} : vector<80x40xf32> to vector<1x40xf32>
    %1338 = tpu.concatenate %1331, %1331, %1331, %1331 in 1 : vector<1x8xf32>, vector<1x8xf32>, vector<1x8xf32>, vector<1x8xf32> -> vector<1x32xf32>
    %1339 = vector.extract_strided_slice %1337 {offsets = [0, 0], sizes = [1, 32], strides = [1, 1]} : vector<1x40xf32> to vector<1x32xf32>
    %1340 = arith.mulf %1338, %33 : vector<1x32xf32>
    %1341 = arith.addf %1339, %1340 : vector<1x32xf32>
    %1342 = vector.extract_strided_slice %1341 {offsets = [0, 0], sizes = [1, 24], strides = [1, 1]} : vector<1x32xf32> to vector<1x24xf32>
    %1343 = arith.negf %1342 : vector<1x24xf32>
    %1344 = math.exp %1343 : vector<1x24xf32>
    %cst_122 = arith.constant 1.000000e+00 : f32
    %1345 = vector.broadcast %cst_122 : f32 to vector<1x24xf32>
    %1346 = arith.addf %1345, %1344 : vector<1x24xf32>
    %1347 = arith.divf %1345, %1346 : vector<1x24xf32>
    %1348 = vector.extract_strided_slice %1347 {offsets = [0, 0], sizes = [1, 8], strides = [1, 1]} : vector<1x24xf32> to vector<1x8xf32>
    %1349 = vector.extract_strided_slice %1347 {offsets = [0, 8], sizes = [1, 8], strides = [1, 1]} : vector<1x24xf32> to vector<1x8xf32>
    %1350 = vector.extract_strided_slice %1347 {offsets = [0, 16], sizes = [1, 8], strides = [1, 1]} : vector<1x24xf32> to vector<1x8xf32>
    %1351 = vector.extract_strided_slice %1341 {offsets = [0, 24], sizes = [1, 8], strides = [1, 1]} : vector<1x32xf32> to vector<1x8xf32>
    %1352 = math.tanh %1351 : vector<1x8xf32>
    %1353 = arith.mulf %1349, %1329 : vector<1x8xf32>
    %1354 = arith.mulf %1348, %1352 : vector<1x8xf32>
    %1355 = arith.addf %1353, %1354 : vector<1x8xf32>
    %1356 = math.tanh %1355 : vector<1x8xf32>
    %1357 = arith.mulf %1350, %1356 : vector<1x8xf32>
    %cst_123 = arith.constant 0.000000e+00 : f32
    %1358 = vector.broadcast %cst_123 : f32 to vector<1x8xf32>
    %1359 = arith.maximumf %1357, %1358 : vector<1x8xf32>
    %1360 = vector.extract_strided_slice %1337 {offsets = [0, 32], sizes = [1, 8], strides = [1, 1]} : vector<1x40xf32> to vector<1x8xf32>
    %1361 = arith.mulf %1359, %1360 : vector<1x8xf32>
    %1362 = arith.addf %1336, %1361 : vector<1x8xf32>
    %1363 = vector.extract_strided_slice %32 {offsets = [51, 0], sizes = [1, 40], strides = [1, 1]} : vector<80x40xf32> to vector<1x40xf32>
    %1364 = tpu.concatenate %1357, %1357, %1357, %1357 in 1 : vector<1x8xf32>, vector<1x8xf32>, vector<1x8xf32>, vector<1x8xf32> -> vector<1x32xf32>
    %1365 = vector.extract_strided_slice %1363 {offsets = [0, 0], sizes = [1, 32], strides = [1, 1]} : vector<1x40xf32> to vector<1x32xf32>
    %1366 = arith.mulf %1364, %33 : vector<1x32xf32>
    %1367 = arith.addf %1365, %1366 : vector<1x32xf32>
    %1368 = vector.extract_strided_slice %1367 {offsets = [0, 0], sizes = [1, 24], strides = [1, 1]} : vector<1x32xf32> to vector<1x24xf32>
    %1369 = arith.negf %1368 : vector<1x24xf32>
    %1370 = math.exp %1369 : vector<1x24xf32>
    %cst_124 = arith.constant 1.000000e+00 : f32
    %1371 = vector.broadcast %cst_124 : f32 to vector<1x24xf32>
    %1372 = arith.addf %1371, %1370 : vector<1x24xf32>
    %1373 = arith.divf %1371, %1372 : vector<1x24xf32>
    %1374 = vector.extract_strided_slice %1373 {offsets = [0, 0], sizes = [1, 8], strides = [1, 1]} : vector<1x24xf32> to vector<1x8xf32>
    %1375 = vector.extract_strided_slice %1373 {offsets = [0, 8], sizes = [1, 8], strides = [1, 1]} : vector<1x24xf32> to vector<1x8xf32>
    %1376 = vector.extract_strided_slice %1373 {offsets = [0, 16], sizes = [1, 8], strides = [1, 1]} : vector<1x24xf32> to vector<1x8xf32>
    %1377 = vector.extract_strided_slice %1367 {offsets = [0, 24], sizes = [1, 8], strides = [1, 1]} : vector<1x32xf32> to vector<1x8xf32>
    %1378 = math.tanh %1377 : vector<1x8xf32>
    %1379 = arith.mulf %1375, %1355 : vector<1x8xf32>
    %1380 = arith.mulf %1374, %1378 : vector<1x8xf32>
    %1381 = arith.addf %1379, %1380 : vector<1x8xf32>
    %1382 = math.tanh %1381 : vector<1x8xf32>
    %1383 = arith.mulf %1376, %1382 : vector<1x8xf32>
    %cst_125 = arith.constant 0.000000e+00 : f32
    %1384 = vector.broadcast %cst_125 : f32 to vector<1x8xf32>
    %1385 = arith.maximumf %1383, %1384 : vector<1x8xf32>
    %1386 = vector.extract_strided_slice %1363 {offsets = [0, 32], sizes = [1, 8], strides = [1, 1]} : vector<1x40xf32> to vector<1x8xf32>
    %1387 = arith.mulf %1385, %1386 : vector<1x8xf32>
    %1388 = arith.addf %1362, %1387 : vector<1x8xf32>
    %1389 = vector.extract_strided_slice %32 {offsets = [52, 0], sizes = [1, 40], strides = [1, 1]} : vector<80x40xf32> to vector<1x40xf32>
    %1390 = tpu.concatenate %1383, %1383, %1383, %1383 in 1 : vector<1x8xf32>, vector<1x8xf32>, vector<1x8xf32>, vector<1x8xf32> -> vector<1x32xf32>
    %1391 = vector.extract_strided_slice %1389 {offsets = [0, 0], sizes = [1, 32], strides = [1, 1]} : vector<1x40xf32> to vector<1x32xf32>
    %1392 = arith.mulf %1390, %33 : vector<1x32xf32>
    %1393 = arith.addf %1391, %1392 : vector<1x32xf32>
    %1394 = vector.extract_strided_slice %1393 {offsets = [0, 0], sizes = [1, 24], strides = [1, 1]} : vector<1x32xf32> to vector<1x24xf32>
    %1395 = arith.negf %1394 : vector<1x24xf32>
    %1396 = math.exp %1395 : vector<1x24xf32>
    %cst_126 = arith.constant 1.000000e+00 : f32
    %1397 = vector.broadcast %cst_126 : f32 to vector<1x24xf32>
    %1398 = arith.addf %1397, %1396 : vector<1x24xf32>
    %1399 = arith.divf %1397, %1398 : vector<1x24xf32>
    %1400 = vector.extract_strided_slice %1399 {offsets = [0, 0], sizes = [1, 8], strides = [1, 1]} : vector<1x24xf32> to vector<1x8xf32>
    %1401 = vector.extract_strided_slice %1399 {offsets = [0, 8], sizes = [1, 8], strides = [1, 1]} : vector<1x24xf32> to vector<1x8xf32>
    %1402 = vector.extract_strided_slice %1399 {offsets = [0, 16], sizes = [1, 8], strides = [1, 1]} : vector<1x24xf32> to vector<1x8xf32>
    %1403 = vector.extract_strided_slice %1393 {offsets = [0, 24], sizes = [1, 8], strides = [1, 1]} : vector<1x32xf32> to vector<1x8xf32>
    %1404 = math.tanh %1403 : vector<1x8xf32>
    %1405 = arith.mulf %1401, %1381 : vector<1x8xf32>
    %1406 = arith.mulf %1400, %1404 : vector<1x8xf32>
    %1407 = arith.addf %1405, %1406 : vector<1x8xf32>
    %1408 = math.tanh %1407 : vector<1x8xf32>
    %1409 = arith.mulf %1402, %1408 : vector<1x8xf32>
    %cst_127 = arith.constant 0.000000e+00 : f32
    %1410 = vector.broadcast %cst_127 : f32 to vector<1x8xf32>
    %1411 = arith.maximumf %1409, %1410 : vector<1x8xf32>
    %1412 = vector.extract_strided_slice %1389 {offsets = [0, 32], sizes = [1, 8], strides = [1, 1]} : vector<1x40xf32> to vector<1x8xf32>
    %1413 = arith.mulf %1411, %1412 : vector<1x8xf32>
    %1414 = arith.addf %1388, %1413 : vector<1x8xf32>
    %1415 = vector.extract_strided_slice %32 {offsets = [53, 0], sizes = [1, 40], strides = [1, 1]} : vector<80x40xf32> to vector<1x40xf32>
    %1416 = tpu.concatenate %1409, %1409, %1409, %1409 in 1 : vector<1x8xf32>, vector<1x8xf32>, vector<1x8xf32>, vector<1x8xf32> -> vector<1x32xf32>
    %1417 = vector.extract_strided_slice %1415 {offsets = [0, 0], sizes = [1, 32], strides = [1, 1]} : vector<1x40xf32> to vector<1x32xf32>
    %1418 = arith.mulf %1416, %33 : vector<1x32xf32>
    %1419 = arith.addf %1417, %1418 : vector<1x32xf32>
    %1420 = vector.extract_strided_slice %1419 {offsets = [0, 0], sizes = [1, 24], strides = [1, 1]} : vector<1x32xf32> to vector<1x24xf32>
    %1421 = arith.negf %1420 : vector<1x24xf32>
    %1422 = math.exp %1421 : vector<1x24xf32>
    %cst_128 = arith.constant 1.000000e+00 : f32
    %1423 = vector.broadcast %cst_128 : f32 to vector<1x24xf32>
    %1424 = arith.addf %1423, %1422 : vector<1x24xf32>
    %1425 = arith.divf %1423, %1424 : vector<1x24xf32>
    %1426 = vector.extract_strided_slice %1425 {offsets = [0, 0], sizes = [1, 8], strides = [1, 1]} : vector<1x24xf32> to vector<1x8xf32>
    %1427 = vector.extract_strided_slice %1425 {offsets = [0, 8], sizes = [1, 8], strides = [1, 1]} : vector<1x24xf32> to vector<1x8xf32>
    %1428 = vector.extract_strided_slice %1425 {offsets = [0, 16], sizes = [1, 8], strides = [1, 1]} : vector<1x24xf32> to vector<1x8xf32>
    %1429 = vector.extract_strided_slice %1419 {offsets = [0, 24], sizes = [1, 8], strides = [1, 1]} : vector<1x32xf32> to vector<1x8xf32>
    %1430 = math.tanh %1429 : vector<1x8xf32>
    %1431 = arith.mulf %1427, %1407 : vector<1x8xf32>
    %1432 = arith.mulf %1426, %1430 : vector<1x8xf32>
    %1433 = arith.addf %1431, %1432 : vector<1x8xf32>
    %1434 = math.tanh %1433 : vector<1x8xf32>
    %1435 = arith.mulf %1428, %1434 : vector<1x8xf32>
    %cst_129 = arith.constant 0.000000e+00 : f32
    %1436 = vector.broadcast %cst_129 : f32 to vector<1x8xf32>
    %1437 = arith.maximumf %1435, %1436 : vector<1x8xf32>
    %1438 = vector.extract_strided_slice %1415 {offsets = [0, 32], sizes = [1, 8], strides = [1, 1]} : vector<1x40xf32> to vector<1x8xf32>
    %1439 = arith.mulf %1437, %1438 : vector<1x8xf32>
    %1440 = arith.addf %1414, %1439 : vector<1x8xf32>
    %1441 = vector.extract_strided_slice %32 {offsets = [54, 0], sizes = [1, 40], strides = [1, 1]} : vector<80x40xf32> to vector<1x40xf32>
    %1442 = tpu.concatenate %1435, %1435, %1435, %1435 in 1 : vector<1x8xf32>, vector<1x8xf32>, vector<1x8xf32>, vector<1x8xf32> -> vector<1x32xf32>
    %1443 = vector.extract_strided_slice %1441 {offsets = [0, 0], sizes = [1, 32], strides = [1, 1]} : vector<1x40xf32> to vector<1x32xf32>
    %1444 = arith.mulf %1442, %33 : vector<1x32xf32>
    %1445 = arith.addf %1443, %1444 : vector<1x32xf32>
    %1446 = vector.extract_strided_slice %1445 {offsets = [0, 0], sizes = [1, 24], strides = [1, 1]} : vector<1x32xf32> to vector<1x24xf32>
    %1447 = arith.negf %1446 : vector<1x24xf32>
    %1448 = math.exp %1447 : vector<1x24xf32>
    %cst_130 = arith.constant 1.000000e+00 : f32
    %1449 = vector.broadcast %cst_130 : f32 to vector<1x24xf32>
    %1450 = arith.addf %1449, %1448 : vector<1x24xf32>
    %1451 = arith.divf %1449, %1450 : vector<1x24xf32>
    %1452 = vector.extract_strided_slice %1451 {offsets = [0, 0], sizes = [1, 8], strides = [1, 1]} : vector<1x24xf32> to vector<1x8xf32>
    %1453 = vector.extract_strided_slice %1451 {offsets = [0, 8], sizes = [1, 8], strides = [1, 1]} : vector<1x24xf32> to vector<1x8xf32>
    %1454 = vector.extract_strided_slice %1451 {offsets = [0, 16], sizes = [1, 8], strides = [1, 1]} : vector<1x24xf32> to vector<1x8xf32>
    %1455 = vector.extract_strided_slice %1445 {offsets = [0, 24], sizes = [1, 8], strides = [1, 1]} : vector<1x32xf32> to vector<1x8xf32>
    %1456 = math.tanh %1455 : vector<1x8xf32>
    %1457 = arith.mulf %1453, %1433 : vector<1x8xf32>
    %1458 = arith.mulf %1452, %1456 : vector<1x8xf32>
    %1459 = arith.addf %1457, %1458 : vector<1x8xf32>
    %1460 = math.tanh %1459 : vector<1x8xf32>
    %1461 = arith.mulf %1454, %1460 : vector<1x8xf32>
    %cst_131 = arith.constant 0.000000e+00 : f32
    %1462 = vector.broadcast %cst_131 : f32 to vector<1x8xf32>
    %1463 = arith.maximumf %1461, %1462 : vector<1x8xf32>
    %1464 = vector.extract_strided_slice %1441 {offsets = [0, 32], sizes = [1, 8], strides = [1, 1]} : vector<1x40xf32> to vector<1x8xf32>
    %1465 = arith.mulf %1463, %1464 : vector<1x8xf32>
    %1466 = arith.addf %1440, %1465 : vector<1x8xf32>
    %1467 = vector.extract_strided_slice %32 {offsets = [55, 0], sizes = [1, 40], strides = [1, 1]} : vector<80x40xf32> to vector<1x40xf32>
    %1468 = tpu.concatenate %1461, %1461, %1461, %1461 in 1 : vector<1x8xf32>, vector<1x8xf32>, vector<1x8xf32>, vector<1x8xf32> -> vector<1x32xf32>
    %1469 = vector.extract_strided_slice %1467 {offsets = [0, 0], sizes = [1, 32], strides = [1, 1]} : vector<1x40xf32> to vector<1x32xf32>
    %1470 = arith.mulf %1468, %33 : vector<1x32xf32>
    %1471 = arith.addf %1469, %1470 : vector<1x32xf32>
    %1472 = vector.extract_strided_slice %1471 {offsets = [0, 0], sizes = [1, 24], strides = [1, 1]} : vector<1x32xf32> to vector<1x24xf32>
    %1473 = arith.negf %1472 : vector<1x24xf32>
    %1474 = math.exp %1473 : vector<1x24xf32>
    %cst_132 = arith.constant 1.000000e+00 : f32
    %1475 = vector.broadcast %cst_132 : f32 to vector<1x24xf32>
    %1476 = arith.addf %1475, %1474 : vector<1x24xf32>
    %1477 = arith.divf %1475, %1476 : vector<1x24xf32>
    %1478 = vector.extract_strided_slice %1477 {offsets = [0, 0], sizes = [1, 8], strides = [1, 1]} : vector<1x24xf32> to vector<1x8xf32>
    %1479 = vector.extract_strided_slice %1477 {offsets = [0, 8], sizes = [1, 8], strides = [1, 1]} : vector<1x24xf32> to vector<1x8xf32>
    %1480 = vector.extract_strided_slice %1477 {offsets = [0, 16], sizes = [1, 8], strides = [1, 1]} : vector<1x24xf32> to vector<1x8xf32>
    %1481 = vector.extract_strided_slice %1471 {offsets = [0, 24], sizes = [1, 8], strides = [1, 1]} : vector<1x32xf32> to vector<1x8xf32>
    %1482 = math.tanh %1481 : vector<1x8xf32>
    %1483 = arith.mulf %1479, %1459 : vector<1x8xf32>
    %1484 = arith.mulf %1478, %1482 : vector<1x8xf32>
    %1485 = arith.addf %1483, %1484 : vector<1x8xf32>
    %1486 = math.tanh %1485 : vector<1x8xf32>
    %1487 = arith.mulf %1480, %1486 : vector<1x8xf32>
    %cst_133 = arith.constant 0.000000e+00 : f32
    %1488 = vector.broadcast %cst_133 : f32 to vector<1x8xf32>
    %1489 = arith.maximumf %1487, %1488 : vector<1x8xf32>
    %1490 = vector.extract_strided_slice %1467 {offsets = [0, 32], sizes = [1, 8], strides = [1, 1]} : vector<1x40xf32> to vector<1x8xf32>
    %1491 = arith.mulf %1489, %1490 : vector<1x8xf32>
    %1492 = arith.addf %1466, %1491 : vector<1x8xf32>
    %1493 = vector.extract_strided_slice %32 {offsets = [56, 0], sizes = [1, 40], strides = [1, 1]} : vector<80x40xf32> to vector<1x40xf32>
    %1494 = tpu.concatenate %1487, %1487, %1487, %1487 in 1 : vector<1x8xf32>, vector<1x8xf32>, vector<1x8xf32>, vector<1x8xf32> -> vector<1x32xf32>
    %1495 = vector.extract_strided_slice %1493 {offsets = [0, 0], sizes = [1, 32], strides = [1, 1]} : vector<1x40xf32> to vector<1x32xf32>
    %1496 = arith.mulf %1494, %33 : vector<1x32xf32>
    %1497 = arith.addf %1495, %1496 : vector<1x32xf32>
    %1498 = vector.extract_strided_slice %1497 {offsets = [0, 0], sizes = [1, 24], strides = [1, 1]} : vector<1x32xf32> to vector<1x24xf32>
    %1499 = arith.negf %1498 : vector<1x24xf32>
    %1500 = math.exp %1499 : vector<1x24xf32>
    %cst_134 = arith.constant 1.000000e+00 : f32
    %1501 = vector.broadcast %cst_134 : f32 to vector<1x24xf32>
    %1502 = arith.addf %1501, %1500 : vector<1x24xf32>
    %1503 = arith.divf %1501, %1502 : vector<1x24xf32>
    %1504 = vector.extract_strided_slice %1503 {offsets = [0, 0], sizes = [1, 8], strides = [1, 1]} : vector<1x24xf32> to vector<1x8xf32>
    %1505 = vector.extract_strided_slice %1503 {offsets = [0, 8], sizes = [1, 8], strides = [1, 1]} : vector<1x24xf32> to vector<1x8xf32>
    %1506 = vector.extract_strided_slice %1503 {offsets = [0, 16], sizes = [1, 8], strides = [1, 1]} : vector<1x24xf32> to vector<1x8xf32>
    %1507 = vector.extract_strided_slice %1497 {offsets = [0, 24], sizes = [1, 8], strides = [1, 1]} : vector<1x32xf32> to vector<1x8xf32>
    %1508 = math.tanh %1507 : vector<1x8xf32>
    %1509 = arith.mulf %1505, %1485 : vector<1x8xf32>
    %1510 = arith.mulf %1504, %1508 : vector<1x8xf32>
    %1511 = arith.addf %1509, %1510 : vector<1x8xf32>
    %1512 = math.tanh %1511 : vector<1x8xf32>
    %1513 = arith.mulf %1506, %1512 : vector<1x8xf32>
    %cst_135 = arith.constant 0.000000e+00 : f32
    %1514 = vector.broadcast %cst_135 : f32 to vector<1x8xf32>
    %1515 = arith.maximumf %1513, %1514 : vector<1x8xf32>
    %1516 = vector.extract_strided_slice %1493 {offsets = [0, 32], sizes = [1, 8], strides = [1, 1]} : vector<1x40xf32> to vector<1x8xf32>
    %1517 = arith.mulf %1515, %1516 : vector<1x8xf32>
    %1518 = arith.addf %1492, %1517 : vector<1x8xf32>
    %1519 = vector.extract_strided_slice %32 {offsets = [57, 0], sizes = [1, 40], strides = [1, 1]} : vector<80x40xf32> to vector<1x40xf32>
    %1520 = tpu.concatenate %1513, %1513, %1513, %1513 in 1 : vector<1x8xf32>, vector<1x8xf32>, vector<1x8xf32>, vector<1x8xf32> -> vector<1x32xf32>
    %1521 = vector.extract_strided_slice %1519 {offsets = [0, 0], sizes = [1, 32], strides = [1, 1]} : vector<1x40xf32> to vector<1x32xf32>
    %1522 = arith.mulf %1520, %33 : vector<1x32xf32>
    %1523 = arith.addf %1521, %1522 : vector<1x32xf32>
    %1524 = vector.extract_strided_slice %1523 {offsets = [0, 0], sizes = [1, 24], strides = [1, 1]} : vector<1x32xf32> to vector<1x24xf32>
    %1525 = arith.negf %1524 : vector<1x24xf32>
    %1526 = math.exp %1525 : vector<1x24xf32>
    %cst_136 = arith.constant 1.000000e+00 : f32
    %1527 = vector.broadcast %cst_136 : f32 to vector<1x24xf32>
    %1528 = arith.addf %1527, %1526 : vector<1x24xf32>
    %1529 = arith.divf %1527, %1528 : vector<1x24xf32>
    %1530 = vector.extract_strided_slice %1529 {offsets = [0, 0], sizes = [1, 8], strides = [1, 1]} : vector<1x24xf32> to vector<1x8xf32>
    %1531 = vector.extract_strided_slice %1529 {offsets = [0, 8], sizes = [1, 8], strides = [1, 1]} : vector<1x24xf32> to vector<1x8xf32>
    %1532 = vector.extract_strided_slice %1529 {offsets = [0, 16], sizes = [1, 8], strides = [1, 1]} : vector<1x24xf32> to vector<1x8xf32>
    %1533 = vector.extract_strided_slice %1523 {offsets = [0, 24], sizes = [1, 8], strides = [1, 1]} : vector<1x32xf32> to vector<1x8xf32>
    %1534 = math.tanh %1533 : vector<1x8xf32>
    %1535 = arith.mulf %1531, %1511 : vector<1x8xf32>
    %1536 = arith.mulf %1530, %1534 : vector<1x8xf32>
    %1537 = arith.addf %1535, %1536 : vector<1x8xf32>
    %1538 = math.tanh %1537 : vector<1x8xf32>
    %1539 = arith.mulf %1532, %1538 : vector<1x8xf32>
    %cst_137 = arith.constant 0.000000e+00 : f32
    %1540 = vector.broadcast %cst_137 : f32 to vector<1x8xf32>
    %1541 = arith.maximumf %1539, %1540 : vector<1x8xf32>
    %1542 = vector.extract_strided_slice %1519 {offsets = [0, 32], sizes = [1, 8], strides = [1, 1]} : vector<1x40xf32> to vector<1x8xf32>
    %1543 = arith.mulf %1541, %1542 : vector<1x8xf32>
    %1544 = arith.addf %1518, %1543 : vector<1x8xf32>
    %1545 = vector.extract_strided_slice %32 {offsets = [58, 0], sizes = [1, 40], strides = [1, 1]} : vector<80x40xf32> to vector<1x40xf32>
    %1546 = tpu.concatenate %1539, %1539, %1539, %1539 in 1 : vector<1x8xf32>, vector<1x8xf32>, vector<1x8xf32>, vector<1x8xf32> -> vector<1x32xf32>
    %1547 = vector.extract_strided_slice %1545 {offsets = [0, 0], sizes = [1, 32], strides = [1, 1]} : vector<1x40xf32> to vector<1x32xf32>
    %1548 = arith.mulf %1546, %33 : vector<1x32xf32>
    %1549 = arith.addf %1547, %1548 : vector<1x32xf32>
    %1550 = vector.extract_strided_slice %1549 {offsets = [0, 0], sizes = [1, 24], strides = [1, 1]} : vector<1x32xf32> to vector<1x24xf32>
    %1551 = arith.negf %1550 : vector<1x24xf32>
    %1552 = math.exp %1551 : vector<1x24xf32>
    %cst_138 = arith.constant 1.000000e+00 : f32
    %1553 = vector.broadcast %cst_138 : f32 to vector<1x24xf32>
    %1554 = arith.addf %1553, %1552 : vector<1x24xf32>
    %1555 = arith.divf %1553, %1554 : vector<1x24xf32>
    %1556 = vector.extract_strided_slice %1555 {offsets = [0, 0], sizes = [1, 8], strides = [1, 1]} : vector<1x24xf32> to vector<1x8xf32>
    %1557 = vector.extract_strided_slice %1555 {offsets = [0, 8], sizes = [1, 8], strides = [1, 1]} : vector<1x24xf32> to vector<1x8xf32>
    %1558 = vector.extract_strided_slice %1555 {offsets = [0, 16], sizes = [1, 8], strides = [1, 1]} : vector<1x24xf32> to vector<1x8xf32>
    %1559 = vector.extract_strided_slice %1549 {offsets = [0, 24], sizes = [1, 8], strides = [1, 1]} : vector<1x32xf32> to vector<1x8xf32>
    %1560 = math.tanh %1559 : vector<1x8xf32>
    %1561 = arith.mulf %1557, %1537 : vector<1x8xf32>
    %1562 = arith.mulf %1556, %1560 : vector<1x8xf32>
    %1563 = arith.addf %1561, %1562 : vector<1x8xf32>
    %1564 = math.tanh %1563 : vector<1x8xf32>
    %1565 = arith.mulf %1558, %1564 : vector<1x8xf32>
    %cst_139 = arith.constant 0.000000e+00 : f32
    %1566 = vector.broadcast %cst_139 : f32 to vector<1x8xf32>
    %1567 = arith.maximumf %1565, %1566 : vector<1x8xf32>
    %1568 = vector.extract_strided_slice %1545 {offsets = [0, 32], sizes = [1, 8], strides = [1, 1]} : vector<1x40xf32> to vector<1x8xf32>
    %1569 = arith.mulf %1567, %1568 : vector<1x8xf32>
    %1570 = arith.addf %1544, %1569 : vector<1x8xf32>
    %1571 = vector.extract_strided_slice %32 {offsets = [59, 0], sizes = [1, 40], strides = [1, 1]} : vector<80x40xf32> to vector<1x40xf32>
    %1572 = tpu.concatenate %1565, %1565, %1565, %1565 in 1 : vector<1x8xf32>, vector<1x8xf32>, vector<1x8xf32>, vector<1x8xf32> -> vector<1x32xf32>
    %1573 = vector.extract_strided_slice %1571 {offsets = [0, 0], sizes = [1, 32], strides = [1, 1]} : vector<1x40xf32> to vector<1x32xf32>
    %1574 = arith.mulf %1572, %33 : vector<1x32xf32>
    %1575 = arith.addf %1573, %1574 : vector<1x32xf32>
    %1576 = vector.extract_strided_slice %1575 {offsets = [0, 0], sizes = [1, 24], strides = [1, 1]} : vector<1x32xf32> to vector<1x24xf32>
    %1577 = arith.negf %1576 : vector<1x24xf32>
    %1578 = math.exp %1577 : vector<1x24xf32>
    %cst_140 = arith.constant 1.000000e+00 : f32
    %1579 = vector.broadcast %cst_140 : f32 to vector<1x24xf32>
    %1580 = arith.addf %1579, %1578 : vector<1x24xf32>
    %1581 = arith.divf %1579, %1580 : vector<1x24xf32>
    %1582 = vector.extract_strided_slice %1581 {offsets = [0, 0], sizes = [1, 8], strides = [1, 1]} : vector<1x24xf32> to vector<1x8xf32>
    %1583 = vector.extract_strided_slice %1581 {offsets = [0, 8], sizes = [1, 8], strides = [1, 1]} : vector<1x24xf32> to vector<1x8xf32>
    %1584 = vector.extract_strided_slice %1581 {offsets = [0, 16], sizes = [1, 8], strides = [1, 1]} : vector<1x24xf32> to vector<1x8xf32>
    %1585 = vector.extract_strided_slice %1575 {offsets = [0, 24], sizes = [1, 8], strides = [1, 1]} : vector<1x32xf32> to vector<1x8xf32>
    %1586 = math.tanh %1585 : vector<1x8xf32>
    %1587 = arith.mulf %1583, %1563 : vector<1x8xf32>
    %1588 = arith.mulf %1582, %1586 : vector<1x8xf32>
    %1589 = arith.addf %1587, %1588 : vector<1x8xf32>
    %1590 = math.tanh %1589 : vector<1x8xf32>
    %1591 = arith.mulf %1584, %1590 : vector<1x8xf32>
    %cst_141 = arith.constant 0.000000e+00 : f32
    %1592 = vector.broadcast %cst_141 : f32 to vector<1x8xf32>
    %1593 = arith.maximumf %1591, %1592 : vector<1x8xf32>
    %1594 = vector.extract_strided_slice %1571 {offsets = [0, 32], sizes = [1, 8], strides = [1, 1]} : vector<1x40xf32> to vector<1x8xf32>
    %1595 = arith.mulf %1593, %1594 : vector<1x8xf32>
    %1596 = arith.addf %1570, %1595 : vector<1x8xf32>
    %1597 = vector.extract_strided_slice %32 {offsets = [60, 0], sizes = [1, 40], strides = [1, 1]} : vector<80x40xf32> to vector<1x40xf32>
    %1598 = tpu.concatenate %1591, %1591, %1591, %1591 in 1 : vector<1x8xf32>, vector<1x8xf32>, vector<1x8xf32>, vector<1x8xf32> -> vector<1x32xf32>
    %1599 = vector.extract_strided_slice %1597 {offsets = [0, 0], sizes = [1, 32], strides = [1, 1]} : vector<1x40xf32> to vector<1x32xf32>
    %1600 = arith.mulf %1598, %33 : vector<1x32xf32>
    %1601 = arith.addf %1599, %1600 : vector<1x32xf32>
    %1602 = vector.extract_strided_slice %1601 {offsets = [0, 0], sizes = [1, 24], strides = [1, 1]} : vector<1x32xf32> to vector<1x24xf32>
    %1603 = arith.negf %1602 : vector<1x24xf32>
    %1604 = math.exp %1603 : vector<1x24xf32>
    %cst_142 = arith.constant 1.000000e+00 : f32
    %1605 = vector.broadcast %cst_142 : f32 to vector<1x24xf32>
    %1606 = arith.addf %1605, %1604 : vector<1x24xf32>
    %1607 = arith.divf %1605, %1606 : vector<1x24xf32>
    %1608 = vector.extract_strided_slice %1607 {offsets = [0, 0], sizes = [1, 8], strides = [1, 1]} : vector<1x24xf32> to vector<1x8xf32>
    %1609 = vector.extract_strided_slice %1607 {offsets = [0, 8], sizes = [1, 8], strides = [1, 1]} : vector<1x24xf32> to vector<1x8xf32>
    %1610 = vector.extract_strided_slice %1607 {offsets = [0, 16], sizes = [1, 8], strides = [1, 1]} : vector<1x24xf32> to vector<1x8xf32>
    %1611 = vector.extract_strided_slice %1601 {offsets = [0, 24], sizes = [1, 8], strides = [1, 1]} : vector<1x32xf32> to vector<1x8xf32>
    %1612 = math.tanh %1611 : vector<1x8xf32>
    %1613 = arith.mulf %1609, %1589 : vector<1x8xf32>
    %1614 = arith.mulf %1608, %1612 : vector<1x8xf32>
    %1615 = arith.addf %1613, %1614 : vector<1x8xf32>
    %1616 = math.tanh %1615 : vector<1x8xf32>
    %1617 = arith.mulf %1610, %1616 : vector<1x8xf32>
    %cst_143 = arith.constant 0.000000e+00 : f32
    %1618 = vector.broadcast %cst_143 : f32 to vector<1x8xf32>
    %1619 = arith.maximumf %1617, %1618 : vector<1x8xf32>
    %1620 = vector.extract_strided_slice %1597 {offsets = [0, 32], sizes = [1, 8], strides = [1, 1]} : vector<1x40xf32> to vector<1x8xf32>
    %1621 = arith.mulf %1619, %1620 : vector<1x8xf32>
    %1622 = arith.addf %1596, %1621 : vector<1x8xf32>
    %1623 = vector.extract_strided_slice %32 {offsets = [61, 0], sizes = [1, 40], strides = [1, 1]} : vector<80x40xf32> to vector<1x40xf32>
    %1624 = tpu.concatenate %1617, %1617, %1617, %1617 in 1 : vector<1x8xf32>, vector<1x8xf32>, vector<1x8xf32>, vector<1x8xf32> -> vector<1x32xf32>
    %1625 = vector.extract_strided_slice %1623 {offsets = [0, 0], sizes = [1, 32], strides = [1, 1]} : vector<1x40xf32> to vector<1x32xf32>
    %1626 = arith.mulf %1624, %33 : vector<1x32xf32>
    %1627 = arith.addf %1625, %1626 : vector<1x32xf32>
    %1628 = vector.extract_strided_slice %1627 {offsets = [0, 0], sizes = [1, 24], strides = [1, 1]} : vector<1x32xf32> to vector<1x24xf32>
    %1629 = arith.negf %1628 : vector<1x24xf32>
    %1630 = math.exp %1629 : vector<1x24xf32>
    %cst_144 = arith.constant 1.000000e+00 : f32
    %1631 = vector.broadcast %cst_144 : f32 to vector<1x24xf32>
    %1632 = arith.addf %1631, %1630 : vector<1x24xf32>
    %1633 = arith.divf %1631, %1632 : vector<1x24xf32>
    %1634 = vector.extract_strided_slice %1633 {offsets = [0, 0], sizes = [1, 8], strides = [1, 1]} : vector<1x24xf32> to vector<1x8xf32>
    %1635 = vector.extract_strided_slice %1633 {offsets = [0, 8], sizes = [1, 8], strides = [1, 1]} : vector<1x24xf32> to vector<1x8xf32>
    %1636 = vector.extract_strided_slice %1633 {offsets = [0, 16], sizes = [1, 8], strides = [1, 1]} : vector<1x24xf32> to vector<1x8xf32>
    %1637 = vector.extract_strided_slice %1627 {offsets = [0, 24], sizes = [1, 8], strides = [1, 1]} : vector<1x32xf32> to vector<1x8xf32>
    %1638 = math.tanh %1637 : vector<1x8xf32>
    %1639 = arith.mulf %1635, %1615 : vector<1x8xf32>
    %1640 = arith.mulf %1634, %1638 : vector<1x8xf32>
    %1641 = arith.addf %1639, %1640 : vector<1x8xf32>
    %1642 = math.tanh %1641 : vector<1x8xf32>
    %1643 = arith.mulf %1636, %1642 : vector<1x8xf32>
    %cst_145 = arith.constant 0.000000e+00 : f32
    %1644 = vector.broadcast %cst_145 : f32 to vector<1x8xf32>
    %1645 = arith.maximumf %1643, %1644 : vector<1x8xf32>
    %1646 = vector.extract_strided_slice %1623 {offsets = [0, 32], sizes = [1, 8], strides = [1, 1]} : vector<1x40xf32> to vector<1x8xf32>
    %1647 = arith.mulf %1645, %1646 : vector<1x8xf32>
    %1648 = arith.addf %1622, %1647 : vector<1x8xf32>
    %1649 = vector.extract_strided_slice %32 {offsets = [62, 0], sizes = [1, 40], strides = [1, 1]} : vector<80x40xf32> to vector<1x40xf32>
    %1650 = tpu.concatenate %1643, %1643, %1643, %1643 in 1 : vector<1x8xf32>, vector<1x8xf32>, vector<1x8xf32>, vector<1x8xf32> -> vector<1x32xf32>
    %1651 = vector.extract_strided_slice %1649 {offsets = [0, 0], sizes = [1, 32], strides = [1, 1]} : vector<1x40xf32> to vector<1x32xf32>
    %1652 = arith.mulf %1650, %33 : vector<1x32xf32>
    %1653 = arith.addf %1651, %1652 : vector<1x32xf32>
    %1654 = vector.extract_strided_slice %1653 {offsets = [0, 0], sizes = [1, 24], strides = [1, 1]} : vector<1x32xf32> to vector<1x24xf32>
    %1655 = arith.negf %1654 : vector<1x24xf32>
    %1656 = math.exp %1655 : vector<1x24xf32>
    %cst_146 = arith.constant 1.000000e+00 : f32
    %1657 = vector.broadcast %cst_146 : f32 to vector<1x24xf32>
    %1658 = arith.addf %1657, %1656 : vector<1x24xf32>
    %1659 = arith.divf %1657, %1658 : vector<1x24xf32>
    %1660 = vector.extract_strided_slice %1659 {offsets = [0, 0], sizes = [1, 8], strides = [1, 1]} : vector<1x24xf32> to vector<1x8xf32>
    %1661 = vector.extract_strided_slice %1659 {offsets = [0, 8], sizes = [1, 8], strides = [1, 1]} : vector<1x24xf32> to vector<1x8xf32>
    %1662 = vector.extract_strided_slice %1659 {offsets = [0, 16], sizes = [1, 8], strides = [1, 1]} : vector<1x24xf32> to vector<1x8xf32>
    %1663 = vector.extract_strided_slice %1653 {offsets = [0, 24], sizes = [1, 8], strides = [1, 1]} : vector<1x32xf32> to vector<1x8xf32>
    %1664 = math.tanh %1663 : vector<1x8xf32>
    %1665 = arith.mulf %1661, %1641 : vector<1x8xf32>
    %1666 = arith.mulf %1660, %1664 : vector<1x8xf32>
    %1667 = arith.addf %1665, %1666 : vector<1x8xf32>
    %1668 = math.tanh %1667 : vector<1x8xf32>
    %1669 = arith.mulf %1662, %1668 : vector<1x8xf32>
    %cst_147 = arith.constant 0.000000e+00 : f32
    %1670 = vector.broadcast %cst_147 : f32 to vector<1x8xf32>
    %1671 = arith.maximumf %1669, %1670 : vector<1x8xf32>
    %1672 = vector.extract_strided_slice %1649 {offsets = [0, 32], sizes = [1, 8], strides = [1, 1]} : vector<1x40xf32> to vector<1x8xf32>
    %1673 = arith.mulf %1671, %1672 : vector<1x8xf32>
    %1674 = arith.addf %1648, %1673 : vector<1x8xf32>
    %1675 = vector.extract_strided_slice %32 {offsets = [63, 0], sizes = [1, 40], strides = [1, 1]} : vector<80x40xf32> to vector<1x40xf32>
    %1676 = tpu.concatenate %1669, %1669, %1669, %1669 in 1 : vector<1x8xf32>, vector<1x8xf32>, vector<1x8xf32>, vector<1x8xf32> -> vector<1x32xf32>
    %1677 = vector.extract_strided_slice %1675 {offsets = [0, 0], sizes = [1, 32], strides = [1, 1]} : vector<1x40xf32> to vector<1x32xf32>
    %1678 = arith.mulf %1676, %33 : vector<1x32xf32>
    %1679 = arith.addf %1677, %1678 : vector<1x32xf32>
    %1680 = vector.extract_strided_slice %1679 {offsets = [0, 0], sizes = [1, 24], strides = [1, 1]} : vector<1x32xf32> to vector<1x24xf32>
    %1681 = arith.negf %1680 : vector<1x24xf32>
    %1682 = math.exp %1681 : vector<1x24xf32>
    %cst_148 = arith.constant 1.000000e+00 : f32
    %1683 = vector.broadcast %cst_148 : f32 to vector<1x24xf32>
    %1684 = arith.addf %1683, %1682 : vector<1x24xf32>
    %1685 = arith.divf %1683, %1684 : vector<1x24xf32>
    %1686 = vector.extract_strided_slice %1685 {offsets = [0, 0], sizes = [1, 8], strides = [1, 1]} : vector<1x24xf32> to vector<1x8xf32>
    %1687 = vector.extract_strided_slice %1685 {offsets = [0, 8], sizes = [1, 8], strides = [1, 1]} : vector<1x24xf32> to vector<1x8xf32>
    %1688 = vector.extract_strided_slice %1685 {offsets = [0, 16], sizes = [1, 8], strides = [1, 1]} : vector<1x24xf32> to vector<1x8xf32>
    %1689 = vector.extract_strided_slice %1679 {offsets = [0, 24], sizes = [1, 8], strides = [1, 1]} : vector<1x32xf32> to vector<1x8xf32>
    %1690 = math.tanh %1689 : vector<1x8xf32>
    %1691 = arith.mulf %1687, %1667 : vector<1x8xf32>
    %1692 = arith.mulf %1686, %1690 : vector<1x8xf32>
    %1693 = arith.addf %1691, %1692 : vector<1x8xf32>
    %1694 = math.tanh %1693 : vector<1x8xf32>
    %1695 = arith.mulf %1688, %1694 : vector<1x8xf32>
    %cst_149 = arith.constant 0.000000e+00 : f32
    %1696 = vector.broadcast %cst_149 : f32 to vector<1x8xf32>
    %1697 = arith.maximumf %1695, %1696 : vector<1x8xf32>
    %1698 = vector.extract_strided_slice %1675 {offsets = [0, 32], sizes = [1, 8], strides = [1, 1]} : vector<1x40xf32> to vector<1x8xf32>
    %1699 = arith.mulf %1697, %1698 : vector<1x8xf32>
    %1700 = arith.addf %1674, %1699 : vector<1x8xf32>
    %1701 = vector.extract_strided_slice %32 {offsets = [64, 0], sizes = [1, 40], strides = [1, 1]} : vector<80x40xf32> to vector<1x40xf32>
    %1702 = tpu.concatenate %1695, %1695, %1695, %1695 in 1 : vector<1x8xf32>, vector<1x8xf32>, vector<1x8xf32>, vector<1x8xf32> -> vector<1x32xf32>
    %1703 = vector.extract_strided_slice %1701 {offsets = [0, 0], sizes = [1, 32], strides = [1, 1]} : vector<1x40xf32> to vector<1x32xf32>
    %1704 = arith.mulf %1702, %33 : vector<1x32xf32>
    %1705 = arith.addf %1703, %1704 : vector<1x32xf32>
    %1706 = vector.extract_strided_slice %1705 {offsets = [0, 0], sizes = [1, 24], strides = [1, 1]} : vector<1x32xf32> to vector<1x24xf32>
    %1707 = arith.negf %1706 : vector<1x24xf32>
    %1708 = math.exp %1707 : vector<1x24xf32>
    %cst_150 = arith.constant 1.000000e+00 : f32
    %1709 = vector.broadcast %cst_150 : f32 to vector<1x24xf32>
    %1710 = arith.addf %1709, %1708 : vector<1x24xf32>
    %1711 = arith.divf %1709, %1710 : vector<1x24xf32>
    %1712 = vector.extract_strided_slice %1711 {offsets = [0, 0], sizes = [1, 8], strides = [1, 1]} : vector<1x24xf32> to vector<1x8xf32>
    %1713 = vector.extract_strided_slice %1711 {offsets = [0, 8], sizes = [1, 8], strides = [1, 1]} : vector<1x24xf32> to vector<1x8xf32>
    %1714 = vector.extract_strided_slice %1711 {offsets = [0, 16], sizes = [1, 8], strides = [1, 1]} : vector<1x24xf32> to vector<1x8xf32>
    %1715 = vector.extract_strided_slice %1705 {offsets = [0, 24], sizes = [1, 8], strides = [1, 1]} : vector<1x32xf32> to vector<1x8xf32>
    %1716 = math.tanh %1715 : vector<1x8xf32>
    %1717 = arith.mulf %1713, %1693 : vector<1x8xf32>
    %1718 = arith.mulf %1712, %1716 : vector<1x8xf32>
    %1719 = arith.addf %1717, %1718 : vector<1x8xf32>
    %1720 = math.tanh %1719 : vector<1x8xf32>
    %1721 = arith.mulf %1714, %1720 : vector<1x8xf32>
    %cst_151 = arith.constant 0.000000e+00 : f32
    %1722 = vector.broadcast %cst_151 : f32 to vector<1x8xf32>
    %1723 = arith.maximumf %1721, %1722 : vector<1x8xf32>
    %1724 = vector.extract_strided_slice %1701 {offsets = [0, 32], sizes = [1, 8], strides = [1, 1]} : vector<1x40xf32> to vector<1x8xf32>
    %1725 = arith.mulf %1723, %1724 : vector<1x8xf32>
    %1726 = arith.addf %1700, %1725 : vector<1x8xf32>
    %1727 = vector.extract_strided_slice %32 {offsets = [65, 0], sizes = [1, 40], strides = [1, 1]} : vector<80x40xf32> to vector<1x40xf32>
    %1728 = tpu.concatenate %1721, %1721, %1721, %1721 in 1 : vector<1x8xf32>, vector<1x8xf32>, vector<1x8xf32>, vector<1x8xf32> -> vector<1x32xf32>
    %1729 = vector.extract_strided_slice %1727 {offsets = [0, 0], sizes = [1, 32], strides = [1, 1]} : vector<1x40xf32> to vector<1x32xf32>
    %1730 = arith.mulf %1728, %33 : vector<1x32xf32>
    %1731 = arith.addf %1729, %1730 : vector<1x32xf32>
    %1732 = vector.extract_strided_slice %1731 {offsets = [0, 0], sizes = [1, 24], strides = [1, 1]} : vector<1x32xf32> to vector<1x24xf32>
    %1733 = arith.negf %1732 : vector<1x24xf32>
    %1734 = math.exp %1733 : vector<1x24xf32>
    %cst_152 = arith.constant 1.000000e+00 : f32
    %1735 = vector.broadcast %cst_152 : f32 to vector<1x24xf32>
    %1736 = arith.addf %1735, %1734 : vector<1x24xf32>
    %1737 = arith.divf %1735, %1736 : vector<1x24xf32>
    %1738 = vector.extract_strided_slice %1737 {offsets = [0, 0], sizes = [1, 8], strides = [1, 1]} : vector<1x24xf32> to vector<1x8xf32>
    %1739 = vector.extract_strided_slice %1737 {offsets = [0, 8], sizes = [1, 8], strides = [1, 1]} : vector<1x24xf32> to vector<1x8xf32>
    %1740 = vector.extract_strided_slice %1737 {offsets = [0, 16], sizes = [1, 8], strides = [1, 1]} : vector<1x24xf32> to vector<1x8xf32>
    %1741 = vector.extract_strided_slice %1731 {offsets = [0, 24], sizes = [1, 8], strides = [1, 1]} : vector<1x32xf32> to vector<1x8xf32>
    %1742 = math.tanh %1741 : vector<1x8xf32>
    %1743 = arith.mulf %1739, %1719 : vector<1x8xf32>
    %1744 = arith.mulf %1738, %1742 : vector<1x8xf32>
    %1745 = arith.addf %1743, %1744 : vector<1x8xf32>
    %1746 = math.tanh %1745 : vector<1x8xf32>
    %1747 = arith.mulf %1740, %1746 : vector<1x8xf32>
    %cst_153 = arith.constant 0.000000e+00 : f32
    %1748 = vector.broadcast %cst_153 : f32 to vector<1x8xf32>
    %1749 = arith.maximumf %1747, %1748 : vector<1x8xf32>
    %1750 = vector.extract_strided_slice %1727 {offsets = [0, 32], sizes = [1, 8], strides = [1, 1]} : vector<1x40xf32> to vector<1x8xf32>
    %1751 = arith.mulf %1749, %1750 : vector<1x8xf32>
    %1752 = arith.addf %1726, %1751 : vector<1x8xf32>
    %1753 = vector.extract_strided_slice %32 {offsets = [66, 0], sizes = [1, 40], strides = [1, 1]} : vector<80x40xf32> to vector<1x40xf32>
    %1754 = tpu.concatenate %1747, %1747, %1747, %1747 in 1 : vector<1x8xf32>, vector<1x8xf32>, vector<1x8xf32>, vector<1x8xf32> -> vector<1x32xf32>
    %1755 = vector.extract_strided_slice %1753 {offsets = [0, 0], sizes = [1, 32], strides = [1, 1]} : vector<1x40xf32> to vector<1x32xf32>
    %1756 = arith.mulf %1754, %33 : vector<1x32xf32>
    %1757 = arith.addf %1755, %1756 : vector<1x32xf32>
    %1758 = vector.extract_strided_slice %1757 {offsets = [0, 0], sizes = [1, 24], strides = [1, 1]} : vector<1x32xf32> to vector<1x24xf32>
    %1759 = arith.negf %1758 : vector<1x24xf32>
    %1760 = math.exp %1759 : vector<1x24xf32>
    %cst_154 = arith.constant 1.000000e+00 : f32
    %1761 = vector.broadcast %cst_154 : f32 to vector<1x24xf32>
    %1762 = arith.addf %1761, %1760 : vector<1x24xf32>
    %1763 = arith.divf %1761, %1762 : vector<1x24xf32>
    %1764 = vector.extract_strided_slice %1763 {offsets = [0, 0], sizes = [1, 8], strides = [1, 1]} : vector<1x24xf32> to vector<1x8xf32>
    %1765 = vector.extract_strided_slice %1763 {offsets = [0, 8], sizes = [1, 8], strides = [1, 1]} : vector<1x24xf32> to vector<1x8xf32>
    %1766 = vector.extract_strided_slice %1763 {offsets = [0, 16], sizes = [1, 8], strides = [1, 1]} : vector<1x24xf32> to vector<1x8xf32>
    %1767 = vector.extract_strided_slice %1757 {offsets = [0, 24], sizes = [1, 8], strides = [1, 1]} : vector<1x32xf32> to vector<1x8xf32>
    %1768 = math.tanh %1767 : vector<1x8xf32>
    %1769 = arith.mulf %1765, %1745 : vector<1x8xf32>
    %1770 = arith.mulf %1764, %1768 : vector<1x8xf32>
    %1771 = arith.addf %1769, %1770 : vector<1x8xf32>
    %1772 = math.tanh %1771 : vector<1x8xf32>
    %1773 = arith.mulf %1766, %1772 : vector<1x8xf32>
    %cst_155 = arith.constant 0.000000e+00 : f32
    %1774 = vector.broadcast %cst_155 : f32 to vector<1x8xf32>
    %1775 = arith.maximumf %1773, %1774 : vector<1x8xf32>
    %1776 = vector.extract_strided_slice %1753 {offsets = [0, 32], sizes = [1, 8], strides = [1, 1]} : vector<1x40xf32> to vector<1x8xf32>
    %1777 = arith.mulf %1775, %1776 : vector<1x8xf32>
    %1778 = arith.addf %1752, %1777 : vector<1x8xf32>
    %1779 = vector.extract_strided_slice %32 {offsets = [67, 0], sizes = [1, 40], strides = [1, 1]} : vector<80x40xf32> to vector<1x40xf32>
    %1780 = tpu.concatenate %1773, %1773, %1773, %1773 in 1 : vector<1x8xf32>, vector<1x8xf32>, vector<1x8xf32>, vector<1x8xf32> -> vector<1x32xf32>
    %1781 = vector.extract_strided_slice %1779 {offsets = [0, 0], sizes = [1, 32], strides = [1, 1]} : vector<1x40xf32> to vector<1x32xf32>
    %1782 = arith.mulf %1780, %33 : vector<1x32xf32>
    %1783 = arith.addf %1781, %1782 : vector<1x32xf32>
    %1784 = vector.extract_strided_slice %1783 {offsets = [0, 0], sizes = [1, 24], strides = [1, 1]} : vector<1x32xf32> to vector<1x24xf32>
    %1785 = arith.negf %1784 : vector<1x24xf32>
    %1786 = math.exp %1785 : vector<1x24xf32>
    %cst_156 = arith.constant 1.000000e+00 : f32
    %1787 = vector.broadcast %cst_156 : f32 to vector<1x24xf32>
    %1788 = arith.addf %1787, %1786 : vector<1x24xf32>
    %1789 = arith.divf %1787, %1788 : vector<1x24xf32>
    %1790 = vector.extract_strided_slice %1789 {offsets = [0, 0], sizes = [1, 8], strides = [1, 1]} : vector<1x24xf32> to vector<1x8xf32>
    %1791 = vector.extract_strided_slice %1789 {offsets = [0, 8], sizes = [1, 8], strides = [1, 1]} : vector<1x24xf32> to vector<1x8xf32>
    %1792 = vector.extract_strided_slice %1789 {offsets = [0, 16], sizes = [1, 8], strides = [1, 1]} : vector<1x24xf32> to vector<1x8xf32>
    %1793 = vector.extract_strided_slice %1783 {offsets = [0, 24], sizes = [1, 8], strides = [1, 1]} : vector<1x32xf32> to vector<1x8xf32>
    %1794 = math.tanh %1793 : vector<1x8xf32>
    %1795 = arith.mulf %1791, %1771 : vector<1x8xf32>
    %1796 = arith.mulf %1790, %1794 : vector<1x8xf32>
    %1797 = arith.addf %1795, %1796 : vector<1x8xf32>
    %1798 = math.tanh %1797 : vector<1x8xf32>
    %1799 = arith.mulf %1792, %1798 : vector<1x8xf32>
    %cst_157 = arith.constant 0.000000e+00 : f32
    %1800 = vector.broadcast %cst_157 : f32 to vector<1x8xf32>
    %1801 = arith.maximumf %1799, %1800 : vector<1x8xf32>
    %1802 = vector.extract_strided_slice %1779 {offsets = [0, 32], sizes = [1, 8], strides = [1, 1]} : vector<1x40xf32> to vector<1x8xf32>
    %1803 = arith.mulf %1801, %1802 : vector<1x8xf32>
    %1804 = arith.addf %1778, %1803 : vector<1x8xf32>
    %1805 = vector.extract_strided_slice %32 {offsets = [68, 0], sizes = [1, 40], strides = [1, 1]} : vector<80x40xf32> to vector<1x40xf32>
    %1806 = tpu.concatenate %1799, %1799, %1799, %1799 in 1 : vector<1x8xf32>, vector<1x8xf32>, vector<1x8xf32>, vector<1x8xf32> -> vector<1x32xf32>
    %1807 = vector.extract_strided_slice %1805 {offsets = [0, 0], sizes = [1, 32], strides = [1, 1]} : vector<1x40xf32> to vector<1x32xf32>
    %1808 = arith.mulf %1806, %33 : vector<1x32xf32>
    %1809 = arith.addf %1807, %1808 : vector<1x32xf32>
    %1810 = vector.extract_strided_slice %1809 {offsets = [0, 0], sizes = [1, 24], strides = [1, 1]} : vector<1x32xf32> to vector<1x24xf32>
    %1811 = arith.negf %1810 : vector<1x24xf32>
    %1812 = math.exp %1811 : vector<1x24xf32>
    %cst_158 = arith.constant 1.000000e+00 : f32
    %1813 = vector.broadcast %cst_158 : f32 to vector<1x24xf32>
    %1814 = arith.addf %1813, %1812 : vector<1x24xf32>
    %1815 = arith.divf %1813, %1814 : vector<1x24xf32>
    %1816 = vector.extract_strided_slice %1815 {offsets = [0, 0], sizes = [1, 8], strides = [1, 1]} : vector<1x24xf32> to vector<1x8xf32>
    %1817 = vector.extract_strided_slice %1815 {offsets = [0, 8], sizes = [1, 8], strides = [1, 1]} : vector<1x24xf32> to vector<1x8xf32>
    %1818 = vector.extract_strided_slice %1815 {offsets = [0, 16], sizes = [1, 8], strides = [1, 1]} : vector<1x24xf32> to vector<1x8xf32>
    %1819 = vector.extract_strided_slice %1809 {offsets = [0, 24], sizes = [1, 8], strides = [1, 1]} : vector<1x32xf32> to vector<1x8xf32>
    %1820 = math.tanh %1819 : vector<1x8xf32>
    %1821 = arith.mulf %1817, %1797 : vector<1x8xf32>
    %1822 = arith.mulf %1816, %1820 : vector<1x8xf32>
    %1823 = arith.addf %1821, %1822 : vector<1x8xf32>
    %1824 = math.tanh %1823 : vector<1x8xf32>
    %1825 = arith.mulf %1818, %1824 : vector<1x8xf32>
    %cst_159 = arith.constant 0.000000e+00 : f32
    %1826 = vector.broadcast %cst_159 : f32 to vector<1x8xf32>
    %1827 = arith.maximumf %1825, %1826 : vector<1x8xf32>
    %1828 = vector.extract_strided_slice %1805 {offsets = [0, 32], sizes = [1, 8], strides = [1, 1]} : vector<1x40xf32> to vector<1x8xf32>
    %1829 = arith.mulf %1827, %1828 : vector<1x8xf32>
    %1830 = arith.addf %1804, %1829 : vector<1x8xf32>
    %1831 = vector.extract_strided_slice %32 {offsets = [69, 0], sizes = [1, 40], strides = [1, 1]} : vector<80x40xf32> to vector<1x40xf32>
    %1832 = tpu.concatenate %1825, %1825, %1825, %1825 in 1 : vector<1x8xf32>, vector<1x8xf32>, vector<1x8xf32>, vector<1x8xf32> -> vector<1x32xf32>
    %1833 = vector.extract_strided_slice %1831 {offsets = [0, 0], sizes = [1, 32], strides = [1, 1]} : vector<1x40xf32> to vector<1x32xf32>
    %1834 = arith.mulf %1832, %33 : vector<1x32xf32>
    %1835 = arith.addf %1833, %1834 : vector<1x32xf32>
    %1836 = vector.extract_strided_slice %1835 {offsets = [0, 0], sizes = [1, 24], strides = [1, 1]} : vector<1x32xf32> to vector<1x24xf32>
    %1837 = arith.negf %1836 : vector<1x24xf32>
    %1838 = math.exp %1837 : vector<1x24xf32>
    %cst_160 = arith.constant 1.000000e+00 : f32
    %1839 = vector.broadcast %cst_160 : f32 to vector<1x24xf32>
    %1840 = arith.addf %1839, %1838 : vector<1x24xf32>
    %1841 = arith.divf %1839, %1840 : vector<1x24xf32>
    %1842 = vector.extract_strided_slice %1841 {offsets = [0, 0], sizes = [1, 8], strides = [1, 1]} : vector<1x24xf32> to vector<1x8xf32>
    %1843 = vector.extract_strided_slice %1841 {offsets = [0, 8], sizes = [1, 8], strides = [1, 1]} : vector<1x24xf32> to vector<1x8xf32>
    %1844 = vector.extract_strided_slice %1841 {offsets = [0, 16], sizes = [1, 8], strides = [1, 1]} : vector<1x24xf32> to vector<1x8xf32>
    %1845 = vector.extract_strided_slice %1835 {offsets = [0, 24], sizes = [1, 8], strides = [1, 1]} : vector<1x32xf32> to vector<1x8xf32>
    %1846 = math.tanh %1845 : vector<1x8xf32>
    %1847 = arith.mulf %1843, %1823 : vector<1x8xf32>
    %1848 = arith.mulf %1842, %1846 : vector<1x8xf32>
    %1849 = arith.addf %1847, %1848 : vector<1x8xf32>
    %1850 = math.tanh %1849 : vector<1x8xf32>
    %1851 = arith.mulf %1844, %1850 : vector<1x8xf32>
    %cst_161 = arith.constant 0.000000e+00 : f32
    %1852 = vector.broadcast %cst_161 : f32 to vector<1x8xf32>
    %1853 = arith.maximumf %1851, %1852 : vector<1x8xf32>
    %1854 = vector.extract_strided_slice %1831 {offsets = [0, 32], sizes = [1, 8], strides = [1, 1]} : vector<1x40xf32> to vector<1x8xf32>
    %1855 = arith.mulf %1853, %1854 : vector<1x8xf32>
    %1856 = arith.addf %1830, %1855 : vector<1x8xf32>
    %1857 = vector.extract_strided_slice %32 {offsets = [70, 0], sizes = [1, 40], strides = [1, 1]} : vector<80x40xf32> to vector<1x40xf32>
    %1858 = tpu.concatenate %1851, %1851, %1851, %1851 in 1 : vector<1x8xf32>, vector<1x8xf32>, vector<1x8xf32>, vector<1x8xf32> -> vector<1x32xf32>
    %1859 = vector.extract_strided_slice %1857 {offsets = [0, 0], sizes = [1, 32], strides = [1, 1]} : vector<1x40xf32> to vector<1x32xf32>
    %1860 = arith.mulf %1858, %33 : vector<1x32xf32>
    %1861 = arith.addf %1859, %1860 : vector<1x32xf32>
    %1862 = vector.extract_strided_slice %1861 {offsets = [0, 0], sizes = [1, 24], strides = [1, 1]} : vector<1x32xf32> to vector<1x24xf32>
    %1863 = arith.negf %1862 : vector<1x24xf32>
    %1864 = math.exp %1863 : vector<1x24xf32>
    %cst_162 = arith.constant 1.000000e+00 : f32
    %1865 = vector.broadcast %cst_162 : f32 to vector<1x24xf32>
    %1866 = arith.addf %1865, %1864 : vector<1x24xf32>
    %1867 = arith.divf %1865, %1866 : vector<1x24xf32>
    %1868 = vector.extract_strided_slice %1867 {offsets = [0, 0], sizes = [1, 8], strides = [1, 1]} : vector<1x24xf32> to vector<1x8xf32>
    %1869 = vector.extract_strided_slice %1867 {offsets = [0, 8], sizes = [1, 8], strides = [1, 1]} : vector<1x24xf32> to vector<1x8xf32>
    %1870 = vector.extract_strided_slice %1867 {offsets = [0, 16], sizes = [1, 8], strides = [1, 1]} : vector<1x24xf32> to vector<1x8xf32>
    %1871 = vector.extract_strided_slice %1861 {offsets = [0, 24], sizes = [1, 8], strides = [1, 1]} : vector<1x32xf32> to vector<1x8xf32>
    %1872 = math.tanh %1871 : vector<1x8xf32>
    %1873 = arith.mulf %1869, %1849 : vector<1x8xf32>
    %1874 = arith.mulf %1868, %1872 : vector<1x8xf32>
    %1875 = arith.addf %1873, %1874 : vector<1x8xf32>
    %1876 = math.tanh %1875 : vector<1x8xf32>
    %1877 = arith.mulf %1870, %1876 : vector<1x8xf32>
    %cst_163 = arith.constant 0.000000e+00 : f32
    %1878 = vector.broadcast %cst_163 : f32 to vector<1x8xf32>
    %1879 = arith.maximumf %1877, %1878 : vector<1x8xf32>
    %1880 = vector.extract_strided_slice %1857 {offsets = [0, 32], sizes = [1, 8], strides = [1, 1]} : vector<1x40xf32> to vector<1x8xf32>
    %1881 = arith.mulf %1879, %1880 : vector<1x8xf32>
    %1882 = arith.addf %1856, %1881 : vector<1x8xf32>
    %1883 = vector.extract_strided_slice %32 {offsets = [71, 0], sizes = [1, 40], strides = [1, 1]} : vector<80x40xf32> to vector<1x40xf32>
    %1884 = tpu.concatenate %1877, %1877, %1877, %1877 in 1 : vector<1x8xf32>, vector<1x8xf32>, vector<1x8xf32>, vector<1x8xf32> -> vector<1x32xf32>
    %1885 = vector.extract_strided_slice %1883 {offsets = [0, 0], sizes = [1, 32], strides = [1, 1]} : vector<1x40xf32> to vector<1x32xf32>
    %1886 = arith.mulf %1884, %33 : vector<1x32xf32>
    %1887 = arith.addf %1885, %1886 : vector<1x32xf32>
    %1888 = vector.extract_strided_slice %1887 {offsets = [0, 0], sizes = [1, 24], strides = [1, 1]} : vector<1x32xf32> to vector<1x24xf32>
    %1889 = arith.negf %1888 : vector<1x24xf32>
    %1890 = math.exp %1889 : vector<1x24xf32>
    %cst_164 = arith.constant 1.000000e+00 : f32
    %1891 = vector.broadcast %cst_164 : f32 to vector<1x24xf32>
    %1892 = arith.addf %1891, %1890 : vector<1x24xf32>
    %1893 = arith.divf %1891, %1892 : vector<1x24xf32>
    %1894 = vector.extract_strided_slice %1893 {offsets = [0, 0], sizes = [1, 8], strides = [1, 1]} : vector<1x24xf32> to vector<1x8xf32>
    %1895 = vector.extract_strided_slice %1893 {offsets = [0, 8], sizes = [1, 8], strides = [1, 1]} : vector<1x24xf32> to vector<1x8xf32>
    %1896 = vector.extract_strided_slice %1893 {offsets = [0, 16], sizes = [1, 8], strides = [1, 1]} : vector<1x24xf32> to vector<1x8xf32>
    %1897 = vector.extract_strided_slice %1887 {offsets = [0, 24], sizes = [1, 8], strides = [1, 1]} : vector<1x32xf32> to vector<1x8xf32>
    %1898 = math.tanh %1897 : vector<1x8xf32>
    %1899 = arith.mulf %1895, %1875 : vector<1x8xf32>
    %1900 = arith.mulf %1894, %1898 : vector<1x8xf32>
    %1901 = arith.addf %1899, %1900 : vector<1x8xf32>
    %1902 = math.tanh %1901 : vector<1x8xf32>
    %1903 = arith.mulf %1896, %1902 : vector<1x8xf32>
    %cst_165 = arith.constant 0.000000e+00 : f32
    %1904 = vector.broadcast %cst_165 : f32 to vector<1x8xf32>
    %1905 = arith.maximumf %1903, %1904 : vector<1x8xf32>
    %1906 = vector.extract_strided_slice %1883 {offsets = [0, 32], sizes = [1, 8], strides = [1, 1]} : vector<1x40xf32> to vector<1x8xf32>
    %1907 = arith.mulf %1905, %1906 : vector<1x8xf32>
    %1908 = arith.addf %1882, %1907 : vector<1x8xf32>
    %1909 = vector.extract_strided_slice %32 {offsets = [72, 0], sizes = [1, 40], strides = [1, 1]} : vector<80x40xf32> to vector<1x40xf32>
    %1910 = tpu.concatenate %1903, %1903, %1903, %1903 in 1 : vector<1x8xf32>, vector<1x8xf32>, vector<1x8xf32>, vector<1x8xf32> -> vector<1x32xf32>
    %1911 = vector.extract_strided_slice %1909 {offsets = [0, 0], sizes = [1, 32], strides = [1, 1]} : vector<1x40xf32> to vector<1x32xf32>
    %1912 = arith.mulf %1910, %33 : vector<1x32xf32>
    %1913 = arith.addf %1911, %1912 : vector<1x32xf32>
    %1914 = vector.extract_strided_slice %1913 {offsets = [0, 0], sizes = [1, 24], strides = [1, 1]} : vector<1x32xf32> to vector<1x24xf32>
    %1915 = arith.negf %1914 : vector<1x24xf32>
    %1916 = math.exp %1915 : vector<1x24xf32>
    %cst_166 = arith.constant 1.000000e+00 : f32
    %1917 = vector.broadcast %cst_166 : f32 to vector<1x24xf32>
    %1918 = arith.addf %1917, %1916 : vector<1x24xf32>
    %1919 = arith.divf %1917, %1918 : vector<1x24xf32>
    %1920 = vector.extract_strided_slice %1919 {offsets = [0, 0], sizes = [1, 8], strides = [1, 1]} : vector<1x24xf32> to vector<1x8xf32>
    %1921 = vector.extract_strided_slice %1919 {offsets = [0, 8], sizes = [1, 8], strides = [1, 1]} : vector<1x24xf32> to vector<1x8xf32>
    %1922 = vector.extract_strided_slice %1919 {offsets = [0, 16], sizes = [1, 8], strides = [1, 1]} : vector<1x24xf32> to vector<1x8xf32>
    %1923 = vector.extract_strided_slice %1913 {offsets = [0, 24], sizes = [1, 8], strides = [1, 1]} : vector<1x32xf32> to vector<1x8xf32>
    %1924 = math.tanh %1923 : vector<1x8xf32>
    %1925 = arith.mulf %1921, %1901 : vector<1x8xf32>
    %1926 = arith.mulf %1920, %1924 : vector<1x8xf32>
    %1927 = arith.addf %1925, %1926 : vector<1x8xf32>
    %1928 = math.tanh %1927 : vector<1x8xf32>
    %1929 = arith.mulf %1922, %1928 : vector<1x8xf32>
    %cst_167 = arith.constant 0.000000e+00 : f32
    %1930 = vector.broadcast %cst_167 : f32 to vector<1x8xf32>
    %1931 = arith.maximumf %1929, %1930 : vector<1x8xf32>
    %1932 = vector.extract_strided_slice %1909 {offsets = [0, 32], sizes = [1, 8], strides = [1, 1]} : vector<1x40xf32> to vector<1x8xf32>
    %1933 = arith.mulf %1931, %1932 : vector<1x8xf32>
    %1934 = arith.addf %1908, %1933 : vector<1x8xf32>
    %1935 = vector.extract_strided_slice %32 {offsets = [73, 0], sizes = [1, 40], strides = [1, 1]} : vector<80x40xf32> to vector<1x40xf32>
    %1936 = tpu.concatenate %1929, %1929, %1929, %1929 in 1 : vector<1x8xf32>, vector<1x8xf32>, vector<1x8xf32>, vector<1x8xf32> -> vector<1x32xf32>
    %1937 = vector.extract_strided_slice %1935 {offsets = [0, 0], sizes = [1, 32], strides = [1, 1]} : vector<1x40xf32> to vector<1x32xf32>
    %1938 = arith.mulf %1936, %33 : vector<1x32xf32>
    %1939 = arith.addf %1937, %1938 : vector<1x32xf32>
    %1940 = vector.extract_strided_slice %1939 {offsets = [0, 0], sizes = [1, 24], strides = [1, 1]} : vector<1x32xf32> to vector<1x24xf32>
    %1941 = arith.negf %1940 : vector<1x24xf32>
    %1942 = math.exp %1941 : vector<1x24xf32>
    %cst_168 = arith.constant 1.000000e+00 : f32
    %1943 = vector.broadcast %cst_168 : f32 to vector<1x24xf32>
    %1944 = arith.addf %1943, %1942 : vector<1x24xf32>
    %1945 = arith.divf %1943, %1944 : vector<1x24xf32>
    %1946 = vector.extract_strided_slice %1945 {offsets = [0, 0], sizes = [1, 8], strides = [1, 1]} : vector<1x24xf32> to vector<1x8xf32>
    %1947 = vector.extract_strided_slice %1945 {offsets = [0, 8], sizes = [1, 8], strides = [1, 1]} : vector<1x24xf32> to vector<1x8xf32>
    %1948 = vector.extract_strided_slice %1945 {offsets = [0, 16], sizes = [1, 8], strides = [1, 1]} : vector<1x24xf32> to vector<1x8xf32>
    %1949 = vector.extract_strided_slice %1939 {offsets = [0, 24], sizes = [1, 8], strides = [1, 1]} : vector<1x32xf32> to vector<1x8xf32>
    %1950 = math.tanh %1949 : vector<1x8xf32>
    %1951 = arith.mulf %1947, %1927 : vector<1x8xf32>
    %1952 = arith.mulf %1946, %1950 : vector<1x8xf32>
    %1953 = arith.addf %1951, %1952 : vector<1x8xf32>
    %1954 = math.tanh %1953 : vector<1x8xf32>
    %1955 = arith.mulf %1948, %1954 : vector<1x8xf32>
    %cst_169 = arith.constant 0.000000e+00 : f32
    %1956 = vector.broadcast %cst_169 : f32 to vector<1x8xf32>
    %1957 = arith.maximumf %1955, %1956 : vector<1x8xf32>
    %1958 = vector.extract_strided_slice %1935 {offsets = [0, 32], sizes = [1, 8], strides = [1, 1]} : vector<1x40xf32> to vector<1x8xf32>
    %1959 = arith.mulf %1957, %1958 : vector<1x8xf32>
    %1960 = arith.addf %1934, %1959 : vector<1x8xf32>
    %1961 = vector.extract_strided_slice %32 {offsets = [74, 0], sizes = [1, 40], strides = [1, 1]} : vector<80x40xf32> to vector<1x40xf32>
    %1962 = tpu.concatenate %1955, %1955, %1955, %1955 in 1 : vector<1x8xf32>, vector<1x8xf32>, vector<1x8xf32>, vector<1x8xf32> -> vector<1x32xf32>
    %1963 = vector.extract_strided_slice %1961 {offsets = [0, 0], sizes = [1, 32], strides = [1, 1]} : vector<1x40xf32> to vector<1x32xf32>
    %1964 = arith.mulf %1962, %33 : vector<1x32xf32>
    %1965 = arith.addf %1963, %1964 : vector<1x32xf32>
    %1966 = vector.extract_strided_slice %1965 {offsets = [0, 0], sizes = [1, 24], strides = [1, 1]} : vector<1x32xf32> to vector<1x24xf32>
    %1967 = arith.negf %1966 : vector<1x24xf32>
    %1968 = math.exp %1967 : vector<1x24xf32>
    %cst_170 = arith.constant 1.000000e+00 : f32
    %1969 = vector.broadcast %cst_170 : f32 to vector<1x24xf32>
    %1970 = arith.addf %1969, %1968 : vector<1x24xf32>
    %1971 = arith.divf %1969, %1970 : vector<1x24xf32>
    %1972 = vector.extract_strided_slice %1971 {offsets = [0, 0], sizes = [1, 8], strides = [1, 1]} : vector<1x24xf32> to vector<1x8xf32>
    %1973 = vector.extract_strided_slice %1971 {offsets = [0, 8], sizes = [1, 8], strides = [1, 1]} : vector<1x24xf32> to vector<1x8xf32>
    %1974 = vector.extract_strided_slice %1971 {offsets = [0, 16], sizes = [1, 8], strides = [1, 1]} : vector<1x24xf32> to vector<1x8xf32>
    %1975 = vector.extract_strided_slice %1965 {offsets = [0, 24], sizes = [1, 8], strides = [1, 1]} : vector<1x32xf32> to vector<1x8xf32>
    %1976 = math.tanh %1975 : vector<1x8xf32>
    %1977 = arith.mulf %1973, %1953 : vector<1x8xf32>
    %1978 = arith.mulf %1972, %1976 : vector<1x8xf32>
    %1979 = arith.addf %1977, %1978 : vector<1x8xf32>
    %1980 = math.tanh %1979 : vector<1x8xf32>
    %1981 = arith.mulf %1974, %1980 : vector<1x8xf32>
    %cst_171 = arith.constant 0.000000e+00 : f32
    %1982 = vector.broadcast %cst_171 : f32 to vector<1x8xf32>
    %1983 = arith.maximumf %1981, %1982 : vector<1x8xf32>
    %1984 = vector.extract_strided_slice %1961 {offsets = [0, 32], sizes = [1, 8], strides = [1, 1]} : vector<1x40xf32> to vector<1x8xf32>
    %1985 = arith.mulf %1983, %1984 : vector<1x8xf32>
    %1986 = arith.addf %1960, %1985 : vector<1x8xf32>
    %1987 = vector.extract_strided_slice %32 {offsets = [75, 0], sizes = [1, 40], strides = [1, 1]} : vector<80x40xf32> to vector<1x40xf32>
    %1988 = tpu.concatenate %1981, %1981, %1981, %1981 in 1 : vector<1x8xf32>, vector<1x8xf32>, vector<1x8xf32>, vector<1x8xf32> -> vector<1x32xf32>
    %1989 = vector.extract_strided_slice %1987 {offsets = [0, 0], sizes = [1, 32], strides = [1, 1]} : vector<1x40xf32> to vector<1x32xf32>
    %1990 = arith.mulf %1988, %33 : vector<1x32xf32>
    %1991 = arith.addf %1989, %1990 : vector<1x32xf32>
    %1992 = vector.extract_strided_slice %1991 {offsets = [0, 0], sizes = [1, 24], strides = [1, 1]} : vector<1x32xf32> to vector<1x24xf32>
    %1993 = arith.negf %1992 : vector<1x24xf32>
    %1994 = math.exp %1993 : vector<1x24xf32>
    %cst_172 = arith.constant 1.000000e+00 : f32
    %1995 = vector.broadcast %cst_172 : f32 to vector<1x24xf32>
    %1996 = arith.addf %1995, %1994 : vector<1x24xf32>
    %1997 = arith.divf %1995, %1996 : vector<1x24xf32>
    %1998 = vector.extract_strided_slice %1997 {offsets = [0, 0], sizes = [1, 8], strides = [1, 1]} : vector<1x24xf32> to vector<1x8xf32>
    %1999 = vector.extract_strided_slice %1997 {offsets = [0, 8], sizes = [1, 8], strides = [1, 1]} : vector<1x24xf32> to vector<1x8xf32>
    %2000 = vector.extract_strided_slice %1997 {offsets = [0, 16], sizes = [1, 8], strides = [1, 1]} : vector<1x24xf32> to vector<1x8xf32>
    %2001 = vector.extract_strided_slice %1991 {offsets = [0, 24], sizes = [1, 8], strides = [1, 1]} : vector<1x32xf32> to vector<1x8xf32>
    %2002 = math.tanh %2001 : vector<1x8xf32>
    %2003 = arith.mulf %1999, %1979 : vector<1x8xf32>
    %2004 = arith.mulf %1998, %2002 : vector<1x8xf32>
    %2005 = arith.addf %2003, %2004 : vector<1x8xf32>
    %2006 = math.tanh %2005 : vector<1x8xf32>
    %2007 = arith.mulf %2000, %2006 : vector<1x8xf32>
    %cst_173 = arith.constant 0.000000e+00 : f32
    %2008 = vector.broadcast %cst_173 : f32 to vector<1x8xf32>
    %2009 = arith.maximumf %2007, %2008 : vector<1x8xf32>
    %2010 = vector.extract_strided_slice %1987 {offsets = [0, 32], sizes = [1, 8], strides = [1, 1]} : vector<1x40xf32> to vector<1x8xf32>
    %2011 = arith.mulf %2009, %2010 : vector<1x8xf32>
    %2012 = arith.addf %1986, %2011 : vector<1x8xf32>
    %2013 = vector.extract_strided_slice %32 {offsets = [76, 0], sizes = [1, 40], strides = [1, 1]} : vector<80x40xf32> to vector<1x40xf32>
    %2014 = tpu.concatenate %2007, %2007, %2007, %2007 in 1 : vector<1x8xf32>, vector<1x8xf32>, vector<1x8xf32>, vector<1x8xf32> -> vector<1x32xf32>
    %2015 = vector.extract_strided_slice %2013 {offsets = [0, 0], sizes = [1, 32], strides = [1, 1]} : vector<1x40xf32> to vector<1x32xf32>
    %2016 = arith.mulf %2014, %33 : vector<1x32xf32>
    %2017 = arith.addf %2015, %2016 : vector<1x32xf32>
    %2018 = vector.extract_strided_slice %2017 {offsets = [0, 0], sizes = [1, 24], strides = [1, 1]} : vector<1x32xf32> to vector<1x24xf32>
    %2019 = arith.negf %2018 : vector<1x24xf32>
    %2020 = math.exp %2019 : vector<1x24xf32>
    %cst_174 = arith.constant 1.000000e+00 : f32
    %2021 = vector.broadcast %cst_174 : f32 to vector<1x24xf32>
    %2022 = arith.addf %2021, %2020 : vector<1x24xf32>
    %2023 = arith.divf %2021, %2022 : vector<1x24xf32>
    %2024 = vector.extract_strided_slice %2023 {offsets = [0, 0], sizes = [1, 8], strides = [1, 1]} : vector<1x24xf32> to vector<1x8xf32>
    %2025 = vector.extract_strided_slice %2023 {offsets = [0, 8], sizes = [1, 8], strides = [1, 1]} : vector<1x24xf32> to vector<1x8xf32>
    %2026 = vector.extract_strided_slice %2023 {offsets = [0, 16], sizes = [1, 8], strides = [1, 1]} : vector<1x24xf32> to vector<1x8xf32>
    %2027 = vector.extract_strided_slice %2017 {offsets = [0, 24], sizes = [1, 8], strides = [1, 1]} : vector<1x32xf32> to vector<1x8xf32>
    %2028 = math.tanh %2027 : vector<1x8xf32>
    %2029 = arith.mulf %2025, %2005 : vector<1x8xf32>
    %2030 = arith.mulf %2024, %2028 : vector<1x8xf32>
    %2031 = arith.addf %2029, %2030 : vector<1x8xf32>
    %2032 = math.tanh %2031 : vector<1x8xf32>
    %2033 = arith.mulf %2026, %2032 : vector<1x8xf32>
    %cst_175 = arith.constant 0.000000e+00 : f32
    %2034 = vector.broadcast %cst_175 : f32 to vector<1x8xf32>
    %2035 = arith.maximumf %2033, %2034 : vector<1x8xf32>
    %2036 = vector.extract_strided_slice %2013 {offsets = [0, 32], sizes = [1, 8], strides = [1, 1]} : vector<1x40xf32> to vector<1x8xf32>
    %2037 = arith.mulf %2035, %2036 : vector<1x8xf32>
    %2038 = arith.addf %2012, %2037 : vector<1x8xf32>
    %2039 = vector.extract_strided_slice %32 {offsets = [77, 0], sizes = [1, 40], strides = [1, 1]} : vector<80x40xf32> to vector<1x40xf32>
    %2040 = tpu.concatenate %2033, %2033, %2033, %2033 in 1 : vector<1x8xf32>, vector<1x8xf32>, vector<1x8xf32>, vector<1x8xf32> -> vector<1x32xf32>
    %2041 = vector.extract_strided_slice %2039 {offsets = [0, 0], sizes = [1, 32], strides = [1, 1]} : vector<1x40xf32> to vector<1x32xf32>
    %2042 = arith.mulf %2040, %33 : vector<1x32xf32>
    %2043 = arith.addf %2041, %2042 : vector<1x32xf32>
    %2044 = vector.extract_strided_slice %2043 {offsets = [0, 0], sizes = [1, 24], strides = [1, 1]} : vector<1x32xf32> to vector<1x24xf32>
    %2045 = arith.negf %2044 : vector<1x24xf32>
    %2046 = math.exp %2045 : vector<1x24xf32>
    %cst_176 = arith.constant 1.000000e+00 : f32
    %2047 = vector.broadcast %cst_176 : f32 to vector<1x24xf32>
    %2048 = arith.addf %2047, %2046 : vector<1x24xf32>
    %2049 = arith.divf %2047, %2048 : vector<1x24xf32>
    %2050 = vector.extract_strided_slice %2049 {offsets = [0, 0], sizes = [1, 8], strides = [1, 1]} : vector<1x24xf32> to vector<1x8xf32>
    %2051 = vector.extract_strided_slice %2049 {offsets = [0, 8], sizes = [1, 8], strides = [1, 1]} : vector<1x24xf32> to vector<1x8xf32>
    %2052 = vector.extract_strided_slice %2049 {offsets = [0, 16], sizes = [1, 8], strides = [1, 1]} : vector<1x24xf32> to vector<1x8xf32>
    %2053 = vector.extract_strided_slice %2043 {offsets = [0, 24], sizes = [1, 8], strides = [1, 1]} : vector<1x32xf32> to vector<1x8xf32>
    %2054 = math.tanh %2053 : vector<1x8xf32>
    %2055 = arith.mulf %2051, %2031 : vector<1x8xf32>
    %2056 = arith.mulf %2050, %2054 : vector<1x8xf32>
    %2057 = arith.addf %2055, %2056 : vector<1x8xf32>
    %2058 = math.tanh %2057 : vector<1x8xf32>
    %2059 = arith.mulf %2052, %2058 : vector<1x8xf32>
    %cst_177 = arith.constant 0.000000e+00 : f32
    %2060 = vector.broadcast %cst_177 : f32 to vector<1x8xf32>
    %2061 = arith.maximumf %2059, %2060 : vector<1x8xf32>
    %2062 = vector.extract_strided_slice %2039 {offsets = [0, 32], sizes = [1, 8], strides = [1, 1]} : vector<1x40xf32> to vector<1x8xf32>
    %2063 = arith.mulf %2061, %2062 : vector<1x8xf32>
    %2064 = arith.addf %2038, %2063 : vector<1x8xf32>
    %2065 = vector.extract_strided_slice %32 {offsets = [78, 0], sizes = [1, 40], strides = [1, 1]} : vector<80x40xf32> to vector<1x40xf32>
    %2066 = tpu.concatenate %2059, %2059, %2059, %2059 in 1 : vector<1x8xf32>, vector<1x8xf32>, vector<1x8xf32>, vector<1x8xf32> -> vector<1x32xf32>
    %2067 = vector.extract_strided_slice %2065 {offsets = [0, 0], sizes = [1, 32], strides = [1, 1]} : vector<1x40xf32> to vector<1x32xf32>
    %2068 = arith.mulf %2066, %33 : vector<1x32xf32>
    %2069 = arith.addf %2067, %2068 : vector<1x32xf32>
    %2070 = vector.extract_strided_slice %2069 {offsets = [0, 0], sizes = [1, 24], strides = [1, 1]} : vector<1x32xf32> to vector<1x24xf32>
    %2071 = arith.negf %2070 : vector<1x24xf32>
    %2072 = math.exp %2071 : vector<1x24xf32>
    %cst_178 = arith.constant 1.000000e+00 : f32
    %2073 = vector.broadcast %cst_178 : f32 to vector<1x24xf32>
    %2074 = arith.addf %2073, %2072 : vector<1x24xf32>
    %2075 = arith.divf %2073, %2074 : vector<1x24xf32>
    %2076 = vector.extract_strided_slice %2075 {offsets = [0, 0], sizes = [1, 8], strides = [1, 1]} : vector<1x24xf32> to vector<1x8xf32>
    %2077 = vector.extract_strided_slice %2075 {offsets = [0, 8], sizes = [1, 8], strides = [1, 1]} : vector<1x24xf32> to vector<1x8xf32>
    %2078 = vector.extract_strided_slice %2075 {offsets = [0, 16], sizes = [1, 8], strides = [1, 1]} : vector<1x24xf32> to vector<1x8xf32>
    %2079 = vector.extract_strided_slice %2069 {offsets = [0, 24], sizes = [1, 8], strides = [1, 1]} : vector<1x32xf32> to vector<1x8xf32>
    %2080 = math.tanh %2079 : vector<1x8xf32>
    %2081 = arith.mulf %2077, %2057 : vector<1x8xf32>
    %2082 = arith.mulf %2076, %2080 : vector<1x8xf32>
    %2083 = arith.addf %2081, %2082 : vector<1x8xf32>
    %2084 = math.tanh %2083 : vector<1x8xf32>
    %2085 = arith.mulf %2078, %2084 : vector<1x8xf32>
    %cst_179 = arith.constant 0.000000e+00 : f32
    %2086 = vector.broadcast %cst_179 : f32 to vector<1x8xf32>
    %2087 = arith.maximumf %2085, %2086 : vector<1x8xf32>
    %2088 = vector.extract_strided_slice %2065 {offsets = [0, 32], sizes = [1, 8], strides = [1, 1]} : vector<1x40xf32> to vector<1x8xf32>
    %2089 = arith.mulf %2087, %2088 : vector<1x8xf32>
    %2090 = arith.addf %2064, %2089 : vector<1x8xf32>
    %2091 = vector.extract_strided_slice %32 {offsets = [79, 0], sizes = [1, 40], strides = [1, 1]} : vector<80x40xf32> to vector<1x40xf32>
    %2092 = tpu.concatenate %2085, %2085, %2085, %2085 in 1 : vector<1x8xf32>, vector<1x8xf32>, vector<1x8xf32>, vector<1x8xf32> -> vector<1x32xf32>
    %2093 = vector.extract_strided_slice %2091 {offsets = [0, 0], sizes = [1, 32], strides = [1, 1]} : vector<1x40xf32> to vector<1x32xf32>
    %2094 = arith.mulf %2092, %33 : vector<1x32xf32>
    %2095 = arith.addf %2093, %2094 : vector<1x32xf32>
    %2096 = vector.extract_strided_slice %2095 {offsets = [0, 0], sizes = [1, 24], strides = [1, 1]} : vector<1x32xf32> to vector<1x24xf32>
    %2097 = arith.negf %2096 : vector<1x24xf32>
    %2098 = math.exp %2097 : vector<1x24xf32>
    %cst_180 = arith.constant 1.000000e+00 : f32
    %2099 = vector.broadcast %cst_180 : f32 to vector<1x24xf32>
    %2100 = arith.addf %2099, %2098 : vector<1x24xf32>
    %2101 = arith.divf %2099, %2100 : vector<1x24xf32>
    %2102 = vector.extract_strided_slice %2101 {offsets = [0, 0], sizes = [1, 8], strides = [1, 1]} : vector<1x24xf32> to vector<1x8xf32>
    %2103 = vector.extract_strided_slice %2101 {offsets = [0, 8], sizes = [1, 8], strides = [1, 1]} : vector<1x24xf32> to vector<1x8xf32>
    %2104 = vector.extract_strided_slice %2101 {offsets = [0, 16], sizes = [1, 8], strides = [1, 1]} : vector<1x24xf32> to vector<1x8xf32>
    %2105 = vector.extract_strided_slice %2095 {offsets = [0, 24], sizes = [1, 8], strides = [1, 1]} : vector<1x32xf32> to vector<1x8xf32>
    %2106 = math.tanh %2105 : vector<1x8xf32>
    %2107 = arith.mulf %2103, %2083 : vector<1x8xf32>
    %2108 = arith.mulf %2102, %2106 : vector<1x8xf32>
    %2109 = arith.addf %2107, %2108 : vector<1x8xf32>
    %2110 = math.tanh %2109 : vector<1x8xf32>
    %2111 = arith.mulf %2104, %2110 : vector<1x8xf32>
    %cst_181 = arith.constant 0.000000e+00 : f32
    %2112 = vector.broadcast %cst_181 : f32 to vector<1x8xf32>
    %2113 = arith.maximumf %2111, %2112 : vector<1x8xf32>
    %2114 = vector.extract_strided_slice %2091 {offsets = [0, 32], sizes = [1, 8], strides = [1, 1]} : vector<1x40xf32> to vector<1x8xf32>
    %2115 = arith.mulf %2113, %2114 : vector<1x8xf32>
    %2116 = arith.addf %2090, %2115 : vector<1x8xf32>
    %c0_182 = arith.constant 0 : index
    %2117 = memref.load %arg7[%c0_182] : memref<1xf32, #tpu.memory_space<smem>>
    %2118 = vector.broadcast %2117 : f32 to vector<1x8xf32>
    %2119 = arith.addf %2116, %2118 : vector<1x8xf32>
    %c0_183 = arith.constant 0 : index
    %c0_184 = arith.constant 0 : index
    %2120 = vector.load %arg8[%c0_183, %c0_184] : memref<1x8xf32, #tpu.memory_space<vmem>>, vector<1x8xf32>
    tpu.vector_store %arg8[%c0_183, %c0_184], %2119 {strides = array<i32>} : memref<1x8xf32, #tpu.memory_space<vmem>>, vector<1x8xf32>,
    return
  }
}

</mosaic_0001>

<bundles_post_ra>
// kernel: vanilla_lstm_forward.1
= control target key start
LH: loop header
LB: loop body
LE: loop exit
PB: predicated region body
PF: predicated region fallthrough
CT: control target
= control target key end

     0   :  { %s7385_s0 = inlined_call_operand.vmem [shape: f32[80,128], index: 0, kind: input, shape index: {}]   ;;  %s7386_s1 = inlined_call_operand.vmem [shape: f32[80,1], index: 1, kind: input, shape index: {}]   ;;  %s7387_s2 = inlined_call_operand.vmem [shape: f32[80,1], index: 2, kind: input, shape index: {}]   ;;  %s7388_s3 = inlined_call_operand.vmem [shape: f32[128,32], index: 3, kind: input, shape index: {}]   ;;  %s7389_s4 = inlined_call_operand.vmem [shape: f32[1,32], index: 4, kind: input, shape index: {}]   ;;  %s7390_s5 = inlined_call_operand.vmem [shape: f32[1,32], index: 5, kind: input, shape index: {}]   ;;  %s7391_s6 = inlined_call_operand.vmem [shape: f32[80,8], index: 6, kind: input, shape index: {}]   ;;  %s7392_s7 = inlined_call_operand.<no memory space> [shape: f32[1], index: 7, kind: input, shape index: {}]   ;;  %s7393_s8 = inlined_call_operand.hbm [shape: f32[1,8], index: 8, kind: output, shape index: {}]  }
   0x1   :  { %v5565_v0 = vld [vmem:[%s7385_s0] sm:$0xff] }
   0x2   :  { %14 = vsyncpa [#allocation4], 0  ;;  %41 = vadd.xlane.f32.xlu0 %v5565_v0  ;;  %v5571_v1 = vld [vmem:[%s7385_s0 + $0x8] sm:$0xff]  ;;  %v5510_v10 = vmov 0   ;;  %v337_v11 = vld [vmem:[%s7388_s3 + $0x78] sm:$0xff]  ;;  %s5511_s29 = smov 32  }
   0x3   :  { %4818 = vset.pattern.permute.xlu0 %v5510_v10  ;;  %4819 = vset.pattern.permute.xlu1 %v5510_v10  ;;  %v336_v12 = vld [vmem:[%s7388_s3 + $0x70] sm:$0xff]  ;;  %v335_v13 = vld [vmem:[%s7388_s3 + $0x68] sm:$0xff]  ;;  %v334_v14 = vld [vmem:[%s7388_s3 + $0x60] sm:$0xff]  ;;  %vm510_vm0 = vcmask 261120   ;;  %s5512_s11 = smov 104   ;;  %s5513_s12 = smov 8  }
   0x4   :  { %4732 = vmatprep.subr.mxu0 %v337_v11  ;;  %4779 = vmatprep.subr.mxu1 %v337_v11  ;;  %v333_v15 = vld [vmem:[%s7388_s3 + $0x58] sm:$0xff]  ;;  %v332_v16 = vld [vmem:[%s7388_s3 + $0x50] sm:$0xff]  ;;  %v331_v17 = vld [vmem:[%s7388_s3 + $0x48] sm:$0xff]  ;;  %s5514_s13 = smov 120   ;;  %s5515_s14 = smov 112   ;;  %vm565_vm1 = vcmask 64512  }
   0x5   :  { %4733 = vmatpush3.msra.mxu0 %v337_v11  ;;  %4795 = vmatpush3.msra.mxu1 %v337_v11  ;;  %v330_v18 = vld [vmem:[%s7388_s3 + $0x40] sm:$0xff]  ;;  %v329_v26 = vld [vmem:[%s7388_s3 + $0x38] sm:$0xff]  ;;  %v328_v27 = vld [vmem:[%s7388_s3 + $0x30] sm:$0xff]  ;;  %vm567_vm2 = vcmask 130048   ;;  %vm569_vm3 = vcmask 195584   ;;  %vm4609_vm4 = vcmask 57344  }
   0x6   :  { %43 = vadd.xlane.f32.xlu0 %v5571_v1  ;;  %4734 = vmatprep.subr.mxu0 %v336_v12  ;;  %v122_v25 = vld [vmem:[%s7386_s1] sm:$0xff]  ;;  %v123_v30 = vld [vmem:[%s7386_s1 + $0x8] sm:$0xff]  ;;  %v325_v37 = vld [vmem:[%s7388_s3 + $0x18] sm:$0xff] }
   0x7   :  { %4780 = vmatprep.subr.mxu1 %v336_v12  ;;  %4735 = vmatpush3.msra.mxu0 %v336_v12  ;;  %v327_v31 = vld [vmem:[%s7388_s3 + $0x28] sm:$0xff]  ;;  %v326_v32 = vld [vmem:[%s7388_s3 + $0x20] sm:$0xff]  ;;  %v324_v38 = vld [vmem:[%s7388_s3 + $0x10] sm:$0xff] }
   0x8   :  { %4796 = vmatpush3.msra.mxu1 %v336_v12  ;;  %4736 = vmatprep.subr.mxu0 %v335_v13  ;;  %v162_v36 = vld [vmem:[%s7387_s2] sm:$0xff]  ;;  %v163_v41 = vld [vmem:[%s7387_s2 + $0x8] sm:$0xff] }
   0x9   :  { %4781 = vmatprep.subr.mxu1 %v335_v13  ;;  %4737 = vmatpush3.msra.mxu0 %v335_v13  ;;  %v323_v42 = vld [vmem:[%s7388_s3 + $0x8] sm:$0xff]  ;;  %v322_v43 = vld [vmem:[%s7388_s3] sm:$0xff] }
   0xa   :  { %4797 = vmatpush3.msra.mxu1 %v335_v13  ;;  %4738 = vmatprep.subr.mxu0 %v334_v14  ;;  %v460_v45 = vld [vmem:[%s7391_s6] sm:$0xff] }
   0xb   :  { %4782 = vmatprep.subr.mxu1 %v334_v14  ;;  %4739 = vmatpush3.msra.mxu0 %v334_v14  ;;  %v5653_v56 = vld [vmem:[%s7390_s5] sm:$0x1] }
   0xc   :  { %4798 = vmatpush3.msra.mxu1 %v334_v14  ;;  %4740 = vmatprep.subr.mxu0 %v333_v15  ;;  %v5660_v58 = vld [vmem:[%s7389_s4] ss:$0 sm:$0xff]  ;;  %v522_v60 = vmul.f32 0.0, %v5653_v56 }
   0xd   :  { %4783 = vmatprep.subr.mxu1 %v333_v15  ;;  %4741 = vmatpush3.msra.mxu0 %v333_v15 }
   0xe   :  { %4799 = vmatpush3.msra.mxu1 %v333_v15  ;;  %4742 = vmatprep.subr.mxu0 %v332_v16 }
   0xf   :  { %4784 = vmatprep.subr.mxu1 %v332_v16  ;;  %4743 = vmatpush3.msra.mxu0 %v332_v16 }
  0x10   :  { %4800 = vmatpush3.msra.mxu1 %v332_v16  ;;  %4744 = vmatprep.subr.mxu0 %v331_v17 }
  0x11   :  { %4785 = vmatprep.subr.mxu1 %v331_v17  ;;  %4745 = vmatpush3.msra.mxu0 %v331_v17 }
  0x12   :  { %4801 = vmatpush3.msra.mxu1 %v331_v17  ;;  %4746 = vmatprep.subr.mxu0 %v330_v18 }
  0x13   :  { %4786 = vmatprep.subr.mxu1 %v330_v18  ;;  %4747 = vmatpush3.msra.mxu0 %v330_v18 }
  0x14   :  { %4802 = vmatpush3.msra.mxu1 %v330_v18  ;;  %4748 = vmatprep.subr.mxu0 %v329_v26 }
  0x15   :  { %4787 = vmatprep.subr.mxu1 %v329_v26  ;;  %4749 = vmatpush3.msra.mxu0 %v329_v26 }
  0x16   :  { %4803 = vmatpush3.msra.mxu1 %v329_v26  ;;  %4750 = vmatprep.subr.mxu0 %v328_v27 }
  0x17   :  { %4788 = vmatprep.subr.mxu1 %v328_v27  ;;  %4751 = vmatpush3.msra.mxu0 %v328_v27 }
  0x18   :  { %4804 = vmatpush3.msra.mxu1 %v328_v27  ;;  %4752 = vmatprep.subr.mxu0 %v327_v31 }
  0x19   :  { %4753 = vmatpush3.msra.mxu0 %v327_v31  ;;  %4789 = vmatprep.subr.mxu1 %v327_v31 }
  0x1a   :  { %4754 = vmatprep.subr.mxu0 %v326_v32  ;;  %4805 = vmatpush3.msra.mxu1 %v327_v31 }
  0x1b   :  { %4755 = vmatpush3.msra.mxu0 %v326_v32  ;;  %4790 = vmatprep.subr.mxu1 %v326_v32 }
  0x1c   :  { %4756 = vmatprep.subr.mxu0 %v325_v37  ;;  %4806 = vmatpush3.msra.mxu1 %v326_v32 }
  0x1d   :  { %4757 = vmatpush3.msra.mxu0 %v325_v37  ;;  %4791 = vmatprep.subr.mxu1 %v325_v37 }
  0x1e   :  { %4758 = vmatprep.subr.mxu0 %v324_v38  ;;  %4807 = vmatpush3.msra.mxu1 %v325_v37  ;;  %v623_v37 = vlaneseq }
  0x1f   :  { %4759 = vmatpush3.msra.mxu0 %v324_v38  ;;  %4792 = vmatprep.subr.mxu1 %v324_v38 }
  0x20   :  { %4760 = vmatprep.subr.mxu0 %v323_v42  ;;  %4808 = vmatpush3.msra.mxu1 %v324_v38  ;;  %v624_v38 = vshrl.u32 %v623_v37, 7 }
  0x21   :  { %4761 = vmatpush3.msra.mxu0 %v323_v42  ;;  %4793 = vmatprep.subr.mxu1 %v323_v42 }
  0x22   :  { %4762 = vmatprep.subr.mxu0 %v322_v43  ;;  %4809 = vmatpush3.msra.mxu1 %v323_v42 }
  0x23   :  { %4763 = vmatpush3.msra.mxu0 %v322_v43  ;;  %4794 = vmatprep.subr.mxu1 %v322_v43 }
  0x24   :  { %4810 = vmatpush3.msra.mxu1 %v322_v43 }
  0x8b   :  { %v42_v2 = vpop.xlane.xlu0 %41 }
  0x8c   :  { %v5574_v3 = vmul.f32 0.0078125, %v42_v2 }
  0x8e   :  { %v72_v4 = vsub.f32 %v5565_v0, %v5574_v3 }
  0x8f   :  { %v44_v5 = vpop.xlane.xlu0 %43 }
  0x90   :  { %v5578_v6 = vmul.f32 0.0078125, %v44_v5  ;;  %v82_v7 = vmul.f32 %v72_v4, %v72_v4 }
  0x92   :  { %92 = vadd.xlane.f32.xlu1 %v82_v7  ;;  %v73_v8 = vsub.f32 %v5571_v1, %v5578_v6 }
  0x94   :  { %v83_v9 = vmul.f32 %v73_v8, %v73_v8 }
  0x96   :  { %94 = vadd.xlane.f32.xlu1 %v83_v9 }
 0x11b   :  { %v93_v19 = vpop.xlane.xlu1 %92 }
 0x11c   :  { %v112_v20 = vmul.f32 0.0078125, %v93_v19 }
 0x11e   :  { %v132_v21 = vadd.f32 1e-05, %v112_v20 }
 0x11f   :  { %v95_v22 = vpop.xlane.xlu1 %94 }
 0x120   :  { %4820 = vrsqrt.f32 %v132_v21  ;;  %v113_v23 = vmul.f32 0.0078125, %v95_v22 }
 0x122   :  { %v133_v24 = vadd.f32 1e-05, %v113_v23 }
 0x124   :  { %4822 = vrsqrt.f32 %v133_v24 }
 0x12d   :  { %v4821_v28 = vpop.eup %4820 }
 0x12e   :  { %v152_v29 = vmul.f32 %v4821_v28, %v122_v25 }
 0x130   :  { %194 = vperm.xlu0 %4818, %v152_v29   ;;  %v172_v35 = vmul.f32 %v152_v29, %v5574_v3 }
 0x131   :  { %v4823_v33 = vpop.eup %4822 }
 0x132   :  { %v153_v34 = vmul.f32 %v4823_v33, %v123_v30  ;;  %v182_v39 = vsub.f32 %v162_v36, %v172_v35 }
 0x134   :  { %199 = vperm.xlu1 %4819, %v153_v34   ;;  %v173_v40 = vmul.f32 %v153_v34, %v5578_v6 }
 0x136   :  { %v183_v44 = vsub.f32 %v163_v41, %v173_v40 }
 0x138   :  { %254 = vperm.xlu1 %4819, %v182_v39   ;;  %v625_v39 = vsub.s32 0, %v624_v38 }
 0x13a   :  { %v5698_v43 = vrot.slane %v5653_v56, %v625_v39 }
 0x13c   :  { %259 = vperm.xlu1 %4819, %v183_v44  }
 0x140   :  { %480 = vrot.lane.b32.xlu1 %v460_v45, %s5511_s29 }
 0x1ab   :  { %v195_v46 = vpop.permute.xlu0 %194 }
 0x1ac   :  { %v242_v48 = vmul.f32 %v195_v46, %v5565_v0 }
 0x1af   :  { %v200_v47 = vpop.permute.xlu1 %199 }
 0x1b0   :  { %v243_v51 = vmul.f32 %v200_v47, %v5571_v1 }
 0x1b3   :  { %v255_v49 = vpop.permute.xlu1 %254 }
 0x1b4   :  { %v302_v50 = vadd.f32 %v255_v49, %v242_v48 }
 0x1b6   :  { %v312_v52 = vmax.f32 %v302_v50, 0.0 }
 0x1b7   :  { %v260_v53 = vpop.permute.xlu1 %259 }
 0x1b8   :  { %v303_v54 = vadd.f32 %v260_v53, %v243_v51  ;;  %4764 = vmatprep.mubr.f32.mxu0 %v312_v52 }
 0x1ba   :  { %v313_v55 = vmax.f32 %v303_v54, 0.0 }
 0x1bb   :  { %v481_v61 = vpop.permute.xlu1 %480 }
 0x1bc   :  { %4765 = vmatmul.mubr.f32.vlgmr.msra.gmra.mxu0 %v313_v55 }
 0x27c   :  { %v5655_v57 = vpop.f32.mrf.mxu0 }
 0x27e   :  { %v411_v59 = vpop.f32.mrf.mxu0 }
 0x27f   :  { %v412_v62 = vadd.f32 %v5660_v58, %v411_v59 }
 0x281   :  { %v5665_v63 = vsel %vm510_vm0, %v412_v62, %v481_v61 }
 0x282   :  { %v523_v0 = vadd.f32 %v522_v60, %v5665_v63 }
 0x284   :  { %4824 = vtanh.f32 %v523_v0  ;;  %v4626_v2 = vmul.f32 -1.442695, %v523_v0 }
 0x286   :  { %4826 = vpow2.f32 %v4626_v2 }
 0x291   :  { %v4825_v1 = vpop.eup %4824 }
 0x292   :  { %533 = vrot.lane.b32.xlu1 %v4825_v1, %s5512_s11 }
 0x293   :  { %v4827_v3 = vpop.eup %4826 }
 0x294   :  { %v527_v4 = vadd.f32 1.0, %v4827_v3 }
 0x296   :  { %4828 = vrcp.f32 %v527_v4 }
 0x2a3   :  { %v4829_v5 = vpop.eup %4828 }
 0x2a4   :  { %v531_v8 = vmul.f32 0.0, %v4829_v5 }
 0x304   :  { %v534_v6 = vpop.permute.xlu1 %533 }
 0x305   :  { %v536_v7 = vmul.f32 %v4829_v5, %v534_v6 }
 0x307   :  { %538 = vrot.lane.b32.xlu1 %v536_v7, %s5513_s12 }
 0x379   :  { %v539_v9 = vpop.permute.xlu1 %538 }
 0x37a   :  { %v541_v10 = vadd.f32 %v539_v9, %v531_v8 }
 0x37c   :  { %4830 = vtanh.f32 %v541_v10  ;;  %v584_v30 = vrot.slane %v541_v10, 7 }
 0x389   :  { %v4831_v11 = vpop.eup %4830 }
 0x38a   :  { %544 = vrot.lane.b32.xlu1 %v4831_v11, %s5513_s12 }
 0x3fc   :  { %v545_v12 = vpop.permute.xlu1 %544 }
 0x3fd   :  { %v5671_v13 = vmul.f32 %v4829_v5, %v545_v12 }
 0x3ff   :  { %559 = vrot.lane.b32.xlu0 %v5671_v13, %s5514_s13  ;;  %556 = vrot.lane.b32.xlu1 %v5671_v13, %s5515_s14 }
 0x403   :  { %562 = vrot.lane.b32.xlu1 %v5671_v13, %s5513_s12 }
 0x471   :  { %v560_v14 = vpop.permute.xlu0 %559  ;;  %v557_v15 = vpop.permute.xlu1 %556 }
 0x472   :  { %v566_v16 = vsel %vm565_vm1, %v557_v15, %v560_v14 }
 0x473   :  { %v568_v17 = vsel %vm567_vm2, %v566_v16, %v5671_v13 }
 0x475   :  { %v563_v18 = vpop.permute.xlu1 %562 }
 0x476   :  { %v570_v19 = vsel %vm569_vm3, %v568_v17, %v563_v18 }
 0x477   :  { %v571_v20 = vmul.f32 %v570_v19, %v5653_v56 }
 0x479   :  { %v573_v21 = vrot.slane %v571_v20, 7 }
 0x47b   :  { %v575_v22 = vadd.f32 %v573_v21, %v5665_v63 }
 0x47d   :  { %4832 = vtanh.f32 %v575_v22  ;;  %v4627_v24 = vmul.f32 -1.442695, %v575_v22 }
 0x47f   :  { %4834 = vpow2.f32 %v4627_v24 }
 0x48a   :  { %v4833_v23 = vpop.eup %4832 }
 0x48b   :  { %588 = vrot.lane.b32.xlu0 %v4833_v23, %s5512_s11 }
 0x48c   :  { %v4835_v25 = vpop.eup %4834 }
 0x48d   :  { %v579_v26 = vadd.f32 1.0, %v4835_v25 }
 0x48f   :  { %4836 = vrcp.f32 %v579_v26 }
 0x49c   :  { %v4837_v27 = vpop.eup %4836 }
 0x49d   :  { %v586_v31 = vmul.f32 %v4837_v27, %v584_v30 }
 0x4fd   :  { %v589_v28 = vpop.permute.xlu0 %588 }
 0x4fe   :  { %v591_v29 = vmul.f32 %v4837_v27, %v589_v28 }
 0x500   :  { %593 = vrot.lane.b32.xlu1 %v591_v29, %s5513_s12 }
 0x572   :  { %v594_v32 = vpop.permute.xlu1 %593 }
 0x573   :  { %v596_v33 = vadd.f32 %v594_v32, %v586_v31 }
 0x575   :  { %4838 = vtanh.f32 %v596_v33  ;;  %v641_v60 = vrot.slane %v596_v33, 7 }
 0x582   :  { %v4839_v34 = vpop.eup %4838 }
 0x583   :  { %599 = vrot.lane.b32.xlu0 %v4839_v34, %s5513_s12 }
 0x5f5   :  { %v600_v35 = vpop.permute.xlu0 %599 }
 0x5f6   :  { %v5688_v36 = vmul.f32 %v4837_v27, %v600_v35 }
 0x5f8   :  { %613 = vrot.lane.b32.xlu0 %v5688_v36, %s5514_s13  ;;  %610 = vrot.lane.b32.xlu1 %v5688_v36, %s5515_s14 }
 0x5fc   :  { %616 = vrot.lane.b32.xlu1 %v5688_v36, %s5513_s12 }
 0x66a   :  { %v614_v40 = vpop.permute.xlu0 %613  ;;  %v611_v41 = vpop.permute.xlu1 %610 }
 0x66b   :  { %v619_v42 = vsel %vm565_vm1, %v611_v41, %v614_v40 }
 0x66c   :  { %v620_v44 = vsel %vm567_vm2, %v619_v42, %v5688_v36 }
 0x66e   :  { %v617_v45 = vpop.permute.xlu1 %616 }
 0x66f   :  { %v621_v46 = vsel %vm569_vm3, %v620_v44, %v617_v45 }
 0x670   :  { %v628_v47 = vmul.f32 %v5698_v43, %v621_v46 }
 0x672   :  { %v630_v48 = vrot.slane %v628_v47, 7 }
 0x674   :  { %v632_v49 = vadd.f32 %v630_v48, %v5665_v63 }
 0x676   :  { %4840 = vtanh.f32 %v632_v49  ;;  %v4628_v51 = vmul.f32 -1.442695, %v632_v49 }
 0x678   :  { %4842 = vpow2.f32 %v4628_v51 }
 0x683   :  { %v4841_v50 = vpop.eup %4840 }
 0x684   :  { %645 = vrot.lane.b32.xlu0 %v4841_v50, %s5512_s11 }
 0x685   :  { %v4843_v52 = vpop.eup %4842 }
 0x686   :  { %v636_v53 = vadd.f32 1.0, %v4843_v52 }
 0x688   :  { %4844 = vrcp.f32 %v636_v53 }
 0x695   :  { %v4845_v54 = vpop.eup %4844 }
 0x696   :  { %v643_v61 = vmul.f32 %v4845_v54, %v641_v60 }
 0x6f6   :  { %v646_v55 = vpop.permute.xlu0 %645 }
 0x6f7   :  { %v648_v59 = vmul.f32 %v4845_v54, %v646_v55 }
 0x6f9   :  { %650 = vrot.lane.b32.xlu1 %v648_v59, %s5513_s12 }
 0x76b   :  { %v651_v62 = vpop.permute.xlu1 %650 }
 0x76c   :  { %v653_v0 = vadd.f32 %v651_v62, %v643_v61 }
 0x76e   :  { %4846 = vtanh.f32 %v653_v0  ;;  %v692_v21 = vrot.slane %v653_v0, 7 }
 0x77b   :  { %v4847_v1 = vpop.eup %4846 }
 0x77c   :  { %656 = vrot.lane.b32.xlu0 %v4847_v1, %s5513_s12 }
 0x7ee   :  { %v657_v2 = vpop.permute.xlu0 %656 }
 0x7ef   :  { %v5708_v3 = vmul.f32 %v4845_v54, %v657_v2 }
 0x7f1   :  { %670 = vrot.lane.b32.xlu0 %v5708_v3, %s5514_s13  ;;  %667 = vrot.lane.b32.xlu1 %v5708_v3, %s5515_s14 }
 0x7f5   :  { %673 = vrot.lane.b32.xlu1 %v5708_v3, %s5513_s12 }
 0x863   :  { %v671_v4 = vpop.permute.xlu0 %670  ;;  %v668_v5 = vpop.permute.xlu1 %667 }
 0x864   :  { %v676_v6 = vsel %vm565_vm1, %v668_v5, %v671_v4 }
 0x865   :  { %v677_v7 = vsel %vm567_vm2, %v676_v6, %v5708_v3 }
 0x867   :  { %v674_v8 = vpop.permute.xlu1 %673 }
 0x868   :  { %v678_v9 = vsel %vm569_vm3, %v677_v7, %v674_v8 }
 0x869   :  { %v679_v10 = vmul.f32 %v678_v9, %v5698_v43 }
 0x86b   :  { %v681_v11 = vrot.slane %v679_v10, 7 }
 0x86d   :  { %v683_v12 = vadd.f32 %v681_v11, %v5665_v63 }
 0x86f   :  { %4848 = vtanh.f32 %v683_v12  ;;  %v4629_v15 = vmul.f32 -1.442695, %v683_v12 }
 0x871   :  { %4850 = vpow2.f32 %v4629_v15 }
 0x87c   :  { %v4849_v14 = vpop.eup %4848 }
 0x87d   :  { %696 = vrot.lane.b32.xlu0 %v4849_v14, %s5512_s11 }
 0x87e   :  { %v4851_v16 = vpop.eup %4850 }
 0x87f   :  { %v687_v17 = vadd.f32 1.0, %v4851_v16 }
 0x881   :  { %4852 = vrcp.f32 %v687_v17 }
 0x88e   :  { %v4853_v18 = vpop.eup %4852 }
 0x88f   :  { %v694_v22 = vmul.f32 %v4853_v18, %v692_v21 }
 0x8ef   :  { %v697_v19 = vpop.permute.xlu0 %696 }
 0x8f0   :  { %v699_v20 = vmul.f32 %v4853_v18, %v697_v19 }
 0x8f2   :  { %701 = vrot.lane.b32.xlu1 %v699_v20, %s5513_s12 }
 0x964   :  { %v702_v23 = vpop.permute.xlu1 %701 }
 0x965   :  { %v704_v24 = vadd.f32 %v702_v23, %v694_v22 }
 0x967   :  { %4854 = vtanh.f32 %v704_v24  ;;  %v743_v46 = vrot.slane %v704_v24, 7 }
 0x974   :  { %v4855_v25 = vpop.eup %4854 }
 0x975   :  { %707 = vrot.lane.b32.xlu0 %v4855_v25, %s5513_s12 }
 0x9e7   :  { %v708_v26 = vpop.permute.xlu0 %707 }
 0x9e8   :  { %v5725_v27 = vmul.f32 %v4853_v18, %v708_v26 }
 0x9ea   :  { %721 = vrot.lane.b32.xlu0 %v5725_v27, %s5514_s13  ;;  %718 = vrot.lane.b32.xlu1 %v5725_v27, %s5515_s14 }
 0x9ee   :  { %724 = vrot.lane.b32.xlu1 %v5725_v27, %s5513_s12 }
 0xa5c   :  { %v722_v28 = vpop.permute.xlu0 %721  ;;  %v719_v29 = vpop.permute.xlu1 %718 }
 0xa5d   :  { %v727_v30 = vsel %vm565_vm1, %v719_v29, %v722_v28 }
 0xa5e   :  { %v728_v31 = vsel %vm567_vm2, %v727_v30, %v5725_v27 }
 0xa60   :  { %v725_v32 = vpop.permute.xlu1 %724 }
 0xa61   :  { %v729_v33 = vsel %vm569_vm3, %v728_v31, %v725_v32 }
 0xa62   :  { %v730_v34 = vmul.f32 %v729_v33, %v5698_v43 }
 0xa64   :  { %v732_v35 = vrot.slane %v730_v34, 7 }
 0xa66   :  { %v734_v37 = vadd.f32 %v732_v35, %v5665_v63 }
 0xa68   :  { %4856 = vtanh.f32 %v734_v37  ;;  %v4630_v39 = vmul.f32 -1.442695, %v734_v37 }
 0xa6a   :  { %4858 = vpow2.f32 %v4630_v39 }
 0xa75   :  { %v4857_v38 = vpop.eup %4856 }
 0xa76   :  { %747 = vrot.lane.b32.xlu0 %v4857_v38, %s5512_s11 }
 0xa77   :  { %v4859_v40 = vpop.eup %4858 }
 0xa78   :  { %v738_v41 = vadd.f32 1.0, %v4859_v40 }
 0xa7a   :  { %4860 = vrcp.f32 %v738_v41 }
 0xa87   :  { %v4861_v42 = vpop.eup %4860 }
 0xa88   :  { %v745_v47 = vmul.f32 %v4861_v42, %v743_v46 }
 0xae8   :  { %v748_v44 = vpop.permute.xlu0 %747 }
 0xae9   :  { %v750_v45 = vmul.f32 %v4861_v42, %v748_v44 }
 0xaeb   :  { %752 = vrot.lane.b32.xlu1 %v750_v45, %s5513_s12 }
 0xb5d   :  { %v753_v48 = vpop.permute.xlu1 %752 }
 0xb5e   :  { %v755_v49 = vadd.f32 %v753_v48, %v745_v47 }
 0xb60   :  { %4862 = vtanh.f32 %v755_v49  ;;  %v794_v10 = vrot.slane %v755_v49, 7 }
 0xb6d   :  { %v4863_v50 = vpop.eup %4862 }
 0xb6e   :  { %758 = vrot.lane.b32.xlu0 %v4863_v50, %s5513_s12 }
 0xbe0   :  { %v759_v51 = vpop.permute.xlu0 %758 }
 0xbe1   :  { %v5742_v52 = vmul.f32 %v4861_v42, %v759_v51 }
 0xbe3   :  { %772 = vrot.lane.b32.xlu0 %v5742_v52, %s5514_s13  ;;  %769 = vrot.lane.b32.xlu1 %v5742_v52, %s5515_s14 }
 0xbe7   :  { %775 = vrot.lane.b32.xlu1 %v5742_v52, %s5513_s12 }
 0xc55   :  { %v773_v53 = vpop.permute.xlu0 %772  ;;  %v770_v54 = vpop.permute.xlu1 %769 }
 0xc56   :  { %v778_v55 = vsel %vm565_vm1, %v770_v54, %v773_v53 }
 0xc57   :  { %v779_v59 = vsel %vm567_vm2, %v778_v55, %v5742_v52 }
 0xc59   :  { %v776_v60 = vpop.permute.xlu1 %775 }
 0xc5a   :  { %v780_v61 = vsel %vm569_vm3, %v779_v59, %v776_v60 }
 0xc5b   :  { %v781_v62 = vmul.f32 %v780_v61, %v5698_v43 }
 0xc5d   :  { %v783_v0 = vrot.slane %v781_v62, 7 }
 0xc5f   :  { %v785_v1 = vadd.f32 %v783_v0, %v5665_v63 }
 0xc61   :  { %4864 = vtanh.f32 %v785_v1  ;;  %v4631_v4 = vmul.f32 -1.442695, %v785_v1 }
 0xc63   :  { %4866 = vpow2.f32 %v4631_v4 }
 0xc6e   :  { %v4865_v2 = vpop.eup %4864 }
 0xc6f   :  { %798 = vrot.lane.b32.xlu0 %v4865_v2, %s5512_s11 }
 0xc70   :  { %v4867_v5 = vpop.eup %4866 }
 0xc71   :  { %v789_v6 = vadd.f32 1.0, %v4867_v5 }
 0xc73   :  { %4868 = vrcp.f32 %v789_v6 }
 0xc80   :  { %v4869_v7 = vpop.eup %4868 }
 0xc81   :  { %v796_v11 = vmul.f32 %v4869_v7, %v794_v10 }
 0xce1   :  { %v799_v8 = vpop.permute.xlu0 %798 }
 0xce2   :  { %v801_v9 = vmul.f32 %v4869_v7, %v799_v8 }
 0xce4   :  { %803 = vrot.lane.b32.xlu1 %v801_v9, %s5513_s12  ;;  %v461_v9 = vld [vmem:[%s7391_s6 + $0x8] sm:$0xff] }
 0xd56   :  { %v804_v12 = vpop.permute.xlu1 %803 }
 0xd57   :  { %v806_v14 = vadd.f32 %v804_v12, %v796_v11 }
 0xd59   :  { %4870 = vtanh.f32 %v806_v14  ;;  %v845_v35 = vrot.slane %v806_v14, 7 }
 0xd66   :  { %v4871_v15 = vpop.eup %4870 }
 0xd67   :  { %809 = vrot.lane.b32.xlu0 %v4871_v15, %s5513_s12 }
 0xdd9   :  { %v810_v16 = vpop.permute.xlu0 %809 }
 0xdda   :  { %v5759_v17 = vmul.f32 %v4869_v7, %v810_v16 }
 0xddc   :  { %823 = vrot.lane.b32.xlu0 %v5759_v17, %s5514_s13  ;;  %820 = vrot.lane.b32.xlu1 %v5759_v17, %s5515_s14 }
 0xde0   :  { %826 = vrot.lane.b32.xlu1 %v5759_v17, %s5513_s12 }
 0xe4e   :  { %v824_v18 = vpop.permute.xlu0 %823  ;;  %v821_v19 = vpop.permute.xlu1 %820 }
 0xe4f   :  { %v829_v20 = vsel %vm565_vm1, %v821_v19, %v824_v18 }
 0xe50   :  { %v830_v21 = vsel %vm567_vm2, %v829_v20, %v5759_v17  ;;  %v417_v20 = vadd.f32 %v5655_v57, %v5660_v58 }
 0xe52   :  { %v827_v22 = vpop.permute.xlu1 %826 }
 0xe53   :  { %v831_v23 = vsel %vm569_vm3, %v830_v21, %v827_v22 }
 0xe54   :  { %v832_v24 = vmul.f32 %v831_v23, %v5698_v43 }
 0xe56   :  { %v834_v25 = vrot.slane %v832_v24, 7 }
 0xe58   :  { %v836_v26 = vadd.f32 %v834_v25, %v5665_v63 }
 0xe5a   :  { %4872 = vtanh.f32 %v836_v26  ;;  %v4632_v29 = vmul.f32 -1.442695, %v836_v26 }
 0xe5c   :  { %4874 = vpow2.f32 %v4632_v29 }
 0xe67   :  { %v4873_v28 = vpop.eup %4872 }
 0xe68   :  { %849 = vrot.lane.b32.xlu0 %v4873_v28, %s5512_s11 }
 0xe69   :  { %v4875_v30 = vpop.eup %4874 }
 0xe6a   :  { %v840_v31 = vadd.f32 1.0, %v4875_v30 }
 0xe6c   :  { %4876 = vrcp.f32 %v840_v31 }
 0xe79   :  { %v4877_v32 = vpop.eup %4876 }
 0xe7a   :  { %v847_v37 = vmul.f32 %v4877_v32, %v845_v35 }
 0xeda   :  { %v850_v33 = vpop.permute.xlu0 %849 }
 0xedb   :  { %v852_v34 = vmul.f32 %v4877_v32, %v850_v33 }
 0xedd   :  { %854 = vrot.lane.b32.xlu1 %v852_v34, %s5513_s12 }
 0xf4f   :  { %v855_v38 = vpop.permute.xlu1 %854 }
 0xf50   :  { %v857_v39 = vadd.f32 %v855_v38, %v847_v37 }
 0xf52   :  { %4878 = vtanh.f32 %v857_v39  ;;  %v896_v1 = vrot.slane %v857_v39, 7 }
 0xf5f   :  { %v4879_v40 = vpop.eup %4878 }
 0xf60   :  { %860 = vrot.lane.b32.xlu0 %v4879_v40, %s5513_s12 }
 0xfd2   :  { %v861_v41 = vpop.permute.xlu0 %860 }
 0xfd3   :  { %v5776_v42 = vmul.f32 %v4877_v32, %v861_v41 }
 0xfd5   :  { %874 = vrot.lane.b32.xlu0 %v5776_v42, %s5514_s13  ;;  %871 = vrot.lane.b32.xlu1 %v5776_v42, %s5515_s14 }
 0xfd9   :  { %877 = vrot.lane.b32.xlu1 %v5776_v42, %s5513_s12 }
0x1047   :  { %v875_v44 = vpop.permute.xlu0 %874  ;;  %v872_v45 = vpop.permute.xlu1 %871 }
0x1048   :  { %v880_v46 = vsel %vm565_vm1, %v872_v45, %v875_v44 }
0x1049   :  { %v881_v47 = vsel %vm567_vm2, %v880_v46, %v5776_v42 }
0x104b   :  { %v878_v48 = vpop.permute.xlu1 %877 }
0x104c   :  { %v882_v49 = vsel %vm569_vm3, %v881_v47, %v878_v48 }
0x104d   :  { %v883_v50 = vmul.f32 %v882_v49, %v5698_v43 }
0x104f   :  { %v885_v51 = vrot.slane %v883_v50, 7 }
0x1051   :  { %v887_v53 = vadd.f32 %v885_v51, %v5665_v63 }
0x1053   :  { %4880 = vtanh.f32 %v887_v53  ;;  %v4633_v55 = vmul.f32 -1.442695, %v887_v53 }
0x1055   :  { %4882 = vpow2.f32 %v4633_v55 }
0x1060   :  { %v4881_v54 = vpop.eup %4880 }
0x1061   :  { %900 = vrot.lane.b32.xlu0 %v4881_v54, %s5512_s11 }
0x1062   :  { %v4883_v59 = vpop.eup %4882 }
0x1063   :  { %v891_v60 = vadd.f32 1.0, %v4883_v59 }
0x1065   :  { %4884 = vrcp.f32 %v891_v60 }
0x1072   :  { %v4885_v61 = vpop.eup %4884 }
0x1073   :  { %v898_v2 = vmul.f32 %v4885_v61, %v896_v1 }
0x10d3   :  { %v901_v62 = vpop.permute.xlu0 %900 }
0x10d4   :  { %v903_v0 = vmul.f32 %v4885_v61, %v901_v62 }
0x10d6   :  { %905 = vrot.lane.b32.xlu1 %v903_v0, %s5513_s12 }
0x1148   :  { %v906_v4 = vpop.permute.xlu1 %905 }
0x1149   :  { %v908_v5 = vadd.f32 %v906_v4, %v898_v2 }
0x114b   :  { %4886 = vtanh.f32 %v908_v5  ;;  %v947_v57 = vrot.slane %v908_v5, 7 }
0x1158   :  { %v4887_v6 = vpop.eup %4886 }
0x1159   :  { %911 = vrot.lane.b32.xlu0 %v4887_v6, %s5513_s12 }
0x11cb   :  { %v912_v7 = vpop.permute.xlu0 %911 }
0x11cc   :  { %v5793_v8 = vmul.f32 %v4885_v61, %v912_v7 }
0x11ce   :  { %925 = vrot.lane.b32.xlu0 %v5793_v8, %s5514_s13  ;;  %922 = vrot.lane.b32.xlu1 %v5793_v8, %s5515_s14 }
0x11d2   :  { %482 = vrot.lane.b32.xlu0 %v461_v9, %s5511_s29  ;;  %928 = vrot.lane.b32.xlu1 %v5793_v8, %s5513_s12 }
0x1240   :  { %v926_v10 = vpop.permute.xlu0 %925  ;;  %v923_v11 = vpop.permute.xlu1 %922 }
0x1241   :  { %v931_v12 = vsel %vm565_vm1, %v923_v11, %v926_v10 }
0x1242   :  { %v932_v14 = vsel %vm567_vm2, %v931_v12, %v5793_v8 }
0x1244   :  { %v929_v15 = vpop.permute.xlu1 %928  ;;  %v483_v18 = vpop.permute.xlu0 %482 }
0x1245   :  { %v933_v16 = vsel %vm569_vm3, %v932_v14, %v929_v15  ;;  %v5813_v22 = vsel %vm510_vm0, %v417_v20, %v483_v18 }
0x1246   :  { %v934_v19 = vmul.f32 %v933_v16, %v5698_v43 }
0x1248   :  { %v936_v21 = vrot.slane %v934_v19, 7 }
0x124a   :  { %v938_v23 = vadd.f32 %v936_v21, %v5813_v22 }
0x124c   :  { %4888 = vtanh.f32 %v938_v23  ;;  %v4634_v25 = vmul.f32 -1.442695, %v938_v23 }
0x124e   :  { %4890 = vpow2.f32 %v4634_v25 }
0x1259   :  { %v4889_v24 = vpop.eup %4888 }
0x125a   :  { %951 = vrot.lane.b32.xlu1 %v4889_v24, %s5512_s11 }
0x125b   :  { %v4891_v26 = vpop.eup %4890 }
0x125c   :  { %v942_v28 = vadd.f32 1.0, %v4891_v26 }
0x125e   :  { %4892 = vrcp.f32 %v942_v28 }
0x126b   :  { %v4893_v29 = vpop.eup %4892 }
0x126c   :  { %v949_v58 = vmul.f32 %v4893_v29, %v947_v57 }
0x12cc   :  { %v952_v30 = vpop.permute.xlu1 %951 }
0x12cd   :  { %v954_v31 = vmul.f32 %v4893_v29, %v952_v30 }
0x12cf   :  { %956 = vrot.lane.b32.xlu0 %v954_v31, %s5513_s12 }
0x1341   :  { %v957_v32 = vpop.permute.xlu0 %956 }
0x1342   :  { %v959_v33 = vadd.f32 %v957_v32, %v949_v58 }
0x1344   :  { %4894 = vtanh.f32 %v959_v33  ;;  %v999_v60 = vrot.slane %v959_v33, 7 }
0x1351   :  { %v4895_v34 = vpop.eup %4894 }
0x1352   :  { %962 = vrot.lane.b32.xlu1 %v4895_v34, %s5513_s12 }
0x13c4   :  { %v963_v35 = vpop.permute.xlu1 %962 }
0x13c5   :  { %v5819_v37 = vmul.f32 %v4893_v29, %v963_v35 }
0x13c7   :  { %977 = vrot.lane.b32.xlu1 %v5819_v37, %s5514_s13  ;;  %974 = vrot.lane.b32.xlu0 %v5819_v37, %s5515_s14 }
0x13cb   :  { %980 = vrot.lane.b32.xlu0 %v5819_v37, %s5513_s12 }
0x1439   :  { %v978_v38 = vpop.permute.xlu1 %977  ;;  %v975_v39 = vpop.permute.xlu0 %974 }
0x143a   :  { %v983_v40 = vsel %vm565_vm1, %v975_v39, %v978_v38 }
0x143b   :  { %v984_v41 = vsel %vm567_vm2, %v983_v40, %v5819_v37 }
0x143d   :  { %v981_v44 = vpop.permute.xlu0 %980 }
0x143e   :  { %v985_v45 = vsel %vm569_vm3, %v984_v41, %v981_v44 }
0x143f   :  { %v986_v46 = vmul.f32 %v985_v45, %v5653_v56 }
0x1441   :  { %v988_v47 = vrot.slane %v986_v46, 7 }
0x1443   :  { %v990_v48 = vadd.f32 %v988_v47, %v5813_v22 }
0x1445   :  { %4896 = vtanh.f32 %v990_v48  ;;  %v4635_v50 = vmul.f32 -1.442695, %v990_v48 }
0x1447   :  { %4898 = vpow2.f32 %v4635_v50 }
0x1452   :  { %v4897_v49 = vpop.eup %4896 }
0x1453   :  { %1003 = vrot.lane.b32.xlu1 %v4897_v49, %s5512_s11 }
0x1454   :  { %v4899_v51 = vpop.eup %4898 }
0x1455   :  { %v994_v53 = vadd.f32 1.0, %v4899_v51 }
0x1457   :  { %4900 = vrcp.f32 %v994_v53 }
0x1464   :  { %v4901_v54 = vpop.eup %4900 }
0x1465   :  { %v1001_v61 = vmul.f32 %v4901_v54, %v999_v60 }
0x14c5   :  { %v1004_v55 = vpop.permute.xlu1 %1003 }
0x14c6   :  { %v1006_v59 = vmul.f32 %v4901_v54, %v1004_v55 }
0x14c8   :  { %1008 = vrot.lane.b32.xlu0 %v1006_v59, %s5513_s12 }
0x153a   :  { %v1009_v56 = vpop.permute.xlu0 %1008 }
0x153b   :  { %v1011_v62 = vadd.f32 %v1009_v56, %v1001_v61 }
0x153d   :  { %4902 = vtanh.f32 %v1011_v62  ;;  %v1050_v24 = vrot.slane %v1011_v62, 7 }
0x154a   :  { %v4903_v0 = vpop.eup %4902 }
0x154b   :  { %1014 = vrot.lane.b32.xlu1 %v4903_v0, %s5513_s12 }
0x15bd   :  { %v1015_v1 = vpop.permute.xlu1 %1014 }
0x15be   :  { %v5836_v2 = vmul.f32 %v4901_v54, %v1015_v1 }
0x15c0   :  { %1028 = vrot.lane.b32.xlu1 %v5836_v2, %s5514_s13  ;;  %1025 = vrot.lane.b32.xlu0 %v5836_v2, %s5515_s14 }
0x15c4   :  { %1031 = vrot.lane.b32.xlu0 %v5836_v2, %s5513_s12 }
0x1632   :  { %v1029_v4 = vpop.permute.xlu1 %1028  ;;  %v1026_v5 = vpop.permute.xlu0 %1025 }
0x1633   :  { %v1034_v6 = vsel %vm565_vm1, %v1026_v5, %v1029_v4 }
0x1634   :  { %v1035_v7 = vsel %vm567_vm2, %v1034_v6, %v5836_v2 }
0x1636   :  { %v1032_v9 = vpop.permute.xlu0 %1031 }
0x1637   :  { %v1036_v10 = vsel %vm569_vm3, %v1035_v7, %v1032_v9 }
0x1638   :  { %v1037_v11 = vmul.f32 %v1036_v10, %v5698_v43 }
0x163a   :  { %v1039_v12 = vrot.slane %v1037_v11, 7 }
0x163c   :  { %v1041_v14 = vadd.f32 %v1039_v12, %v5813_v22 }
0x163e   :  { %4904 = vtanh.f32 %v1041_v14  ;;  %v4636_v16 = vmul.f32 -1.442695, %v1041_v14 }
0x1640   :  { %4906 = vpow2.f32 %v4636_v16 }
0x164b   :  { %v4905_v15 = vpop.eup %4904 }
0x164c   :  { %1054 = vrot.lane.b32.xlu1 %v4905_v15, %s5512_s11 }
0x164d   :  { %v4907_v18 = vpop.eup %4906 }
0x164e   :  { %v1045_v19 = vadd.f32 1.0, %v4907_v18 }
0x1650   :  { %4908 = vrcp.f32 %v1045_v19 }
0x165d   :  { %v4909_v20 = vpop.eup %4908 }
0x165e   :  { %v1052_v25 = vmul.f32 %v4909_v20, %v1050_v24 }
0x16be   :  { %v1055_v21 = vpop.permute.xlu1 %1054 }
0x16bf   :  { %v1057_v23 = vmul.f32 %v4909_v20, %v1055_v21 }
0x16c1   :  { %1059 = vrot.lane.b32.xlu0 %v1057_v23, %s5513_s12 }
0x1733   :  { %v1060_v26 = vpop.permute.xlu0 %1059 }
0x1734   :  { %v1062_v28 = vadd.f32 %v1060_v26, %v1052_v25 }
0x1736   :  { %4910 = vtanh.f32 %v1062_v28  ;;  %v1101_v50 = vrot.slane %v1062_v28, 7 }
0x1743   :  { %v4911_v29 = vpop.eup %4910 }
0x1744   :  { %1065 = vrot.lane.b32.xlu1 %v4911_v29, %s5513_s12 }
0x17b6   :  { %v1066_v30 = vpop.permute.xlu1 %1065 }
0x17b7   :  { %v5853_v31 = vmul.f32 %v4909_v20, %v1066_v30 }
0x17b9   :  { %1079 = vrot.lane.b32.xlu1 %v5853_v31, %s5514_s13  ;;  %1076 = vrot.lane.b32.xlu0 %v5853_v31, %s5515_s14 }
0x17bd   :  { %1082 = vrot.lane.b32.xlu0 %v5853_v31, %s5513_s12 }
0x182b   :  { %v1080_v57 = vpop.permute.xlu1 %1079  ;;  %v1077_v58 = vpop.permute.xlu0 %1076 }
0x182c   :  { %v1085_v32 = vsel %vm565_vm1, %v1077_v58, %v1080_v57 }
0x182d   :  { %v1086_v33 = vsel %vm567_vm2, %v1085_v32, %v5853_v31 }
0x182f   :  { %v1083_v34 = vpop.permute.xlu0 %1082 }
0x1830   :  { %v1087_v35 = vsel %vm569_vm3, %v1086_v33, %v1083_v34 }
0x1831   :  { %v1088_v38 = vmul.f32 %v1087_v35, %v5698_v43 }
0x1833   :  { %v1090_v39 = vrot.slane %v1088_v38, 7 }
0x1835   :  { %v1092_v40 = vadd.f32 %v1090_v39, %v5813_v22 }
0x1837   :  { %4912 = vtanh.f32 %v1092_v40  ;;  %v4637_v44 = vmul.f32 -1.442695, %v1092_v40 }
0x1839   :  { %4914 = vpow2.f32 %v4637_v44 }
0x1844   :  { %v4913_v41 = vpop.eup %4912 }
0x1845   :  { %1105 = vrot.lane.b32.xlu1 %v4913_v41, %s5512_s11 }
0x1846   :  { %v4915_v45 = vpop.eup %4914 }
0x1847   :  { %v1096_v46 = vadd.f32 1.0, %v4915_v45 }
0x1849   :  { %4916 = vrcp.f32 %v1096_v46 }
0x1856   :  { %v4917_v47 = vpop.eup %4916 }
0x1857   :  { %v1103_v51 = vmul.f32 %v4917_v47, %v1101_v50 }
0x18b7   :  { %v1106_v48 = vpop.permute.xlu1 %1105 }
0x18b8   :  { %v1108_v49 = vmul.f32 %v4917_v47, %v1106_v48 }
0x18ba   :  { %1110 = vrot.lane.b32.xlu0 %v1108_v49, %s5513_s12 }
0x192c   :  { %v1111_v53 = vpop.permute.xlu0 %1110 }
0x192d   :  { %v1113_v54 = vadd.f32 %v1111_v53, %v1103_v51 }
0x192f   :  { %4918 = vtanh.f32 %v1113_v54  ;;  %v1152_v18 = vrot.slane %v1113_v54, 7 }
0x193c   :  { %v4919_v55 = vpop.eup %4918 }
0x193d   :  { %1116 = vrot.lane.b32.xlu1 %v4919_v55, %s5513_s12 }
0x19af   :  { %v1117_v59 = vpop.permute.xlu1 %1116 }
0x19b0   :  { %v5870_v60 = vmul.f32 %v4917_v47, %v1117_v59 }
0x19b2   :  { %1130 = vrot.lane.b32.xlu1 %v5870_v60, %s5514_s13  ;;  %1127 = vrot.lane.b32.xlu0 %v5870_v60, %s5515_s14 }
0x19b6   :  { %1133 = vrot.lane.b32.xlu0 %v5870_v60, %s5513_s12 }
0x1a24   :  { %v1131_v61 = vpop.permute.xlu1 %1130  ;;  %v1128_v56 = vpop.permute.xlu0 %1127 }
0x1a25   :  { %v1136_v62 = vsel %vm565_vm1, %v1128_v56, %v1131_v61 }
0x1a26   :  { %v1137_v0 = vsel %vm567_vm2, %v1136_v62, %v5870_v60 }
0x1a28   :  { %v1134_v1 = vpop.permute.xlu0 %1133 }
0x1a29   :  { %v1138_v4 = vsel %vm569_vm3, %v1137_v0, %v1134_v1 }
0x1a2a   :  { %v1139_v5 = vmul.f32 %v1138_v4, %v5698_v43 }
0x1a2c   :  { %v1141_v6 = vrot.slane %v1139_v5, 7 }
0x1a2e   :  { %v1143_v7 = vadd.f32 %v1141_v6, %v5813_v22  ;;  %v5922_v6 = vld [vmem:[%s7385_s0 + $0x10] sm:$0xff] }
0x1a30   :  { %4920 = vtanh.f32 %v1143_v7  ;;  %v4638_v10 = vmul.f32 -1.442695, %v1143_v7 }
0x1a32   :  { %4922 = vpow2.f32 %v4638_v10 }
0x1a3d   :  { %v4921_v9 = vpop.eup %4920 }
0x1a3e   :  { %1156 = vrot.lane.b32.xlu1 %v4921_v9, %s5512_s11 }
0x1a3f   :  { %v4923_v11 = vpop.eup %4922 }
0x1a40   :  { %v1147_v12 = vadd.f32 1.0, %v4923_v11 }
0x1a42   :  { %4924 = vrcp.f32 %v1147_v12 }
0x1a4f   :  { %v4925_v14 = vpop.eup %4924 }
0x1a50   :  { %v1154_v19 = vmul.f32 %v4925_v14, %v1152_v18 }
0x1ab0   :  { %v1157_v15 = vpop.permute.xlu1 %1156 }
0x1ab1   :  { %v1159_v16 = vmul.f32 %v4925_v14, %v1157_v15  ;;  %v5929_v15 = vld [vmem:[%s7385_s0 + $0x18] sm:$0xff] }
0x1ab3   :  { %1161 = vrot.lane.b32.xlu0 %v1159_v16, %s5513_s12 }
0x1b25   :  { %v1162_v20 = vpop.permute.xlu0 %1161 }
0x1b26   :  { %v1164_v21 = vadd.f32 %v1162_v20, %v1154_v19 }
0x1b28   :  { %4926 = vtanh.f32 %v1164_v21  ;;  %v1203_v46 = vrot.slane %v1164_v21, 7 }
0x1b35   :  { %v4927_v23 = vpop.eup %4926 }
0x1b36   :  { %1167 = vrot.lane.b32.xlu1 %v4927_v23, %s5513_s12 }
0x1ba8   :  { %v1168_v24 = vpop.permute.xlu1 %1167 }
0x1ba9   :  { %v5887_v25 = vmul.f32 %v4925_v14, %v1168_v24 }
0x1bab   :  { %1181 = vrot.lane.b32.xlu1 %v5887_v25, %s5514_s13  ;;  %1178 = vrot.lane.b32.xlu0 %v5887_v25, %s5515_s14 }
0x1baf   :  { %1184 = vrot.lane.b32.xlu0 %v5887_v25, %s5513_s12 }
0x1c1d   :  { %v1182_v26 = vpop.permute.xlu1 %1181  ;;  %v1179_v28 = vpop.permute.xlu0 %1178 }
0x1c1e   :  { %v1187_v29 = vsel %vm565_vm1, %v1179_v28, %v1182_v26 }
0x1c1f   :  { %v1188_v30 = vsel %vm567_vm2, %v1187_v29, %v5887_v25 }
0x1c21   :  { %v1185_v57 = vpop.permute.xlu0 %1184 }
0x1c22   :  { %v1189_v58 = vsel %vm569_vm3, %v1188_v30, %v1185_v57 }
0x1c23   :  { %v1190_v32 = vmul.f32 %v1189_v58, %v5698_v43 }
0x1c25   :  { %v1192_v33 = vrot.slane %v1190_v32, 7 }
0x1c27   :  { %v1194_v34 = vadd.f32 %v1192_v33, %v5813_v22 }
0x1c29   :  { %4928 = vtanh.f32 %v1194_v34  ;;  %v4639_v38 = vmul.f32 -1.442695, %v1194_v34 }
0x1c2b   :  { %4930 = vpow2.f32 %v4639_v38  ;;  %v124_v38 = vld [vmem:[%s7386_s1 + $0x10] sm:$0xff] }
0x1c36   :  { %v4929_v35 = vpop.eup %4928 }
0x1c37   :  { %1207 = vrot.lane.b32.xlu1 %v4929_v35, %s5512_s11 }
0x1c38   :  { %v4931_v39 = vpop.eup %4930 }
0x1c39   :  { %v1198_v40 = vadd.f32 1.0, %v4931_v39 }
0x1c3b   :  { %4932 = vrcp.f32 %v1198_v40 }
0x1c48   :  { %v4933_v41 = vpop.eup %4932 }
0x1c49   :  { %v1205_v47 = vmul.f32 %v4933_v41, %v1203_v46 }
0x1ca9   :  { %v1208_v44 = vpop.permute.xlu1 %1207 }
0x1caa   :  { %v1210_v45 = vmul.f32 %v4933_v41, %v1208_v44 }
0x1cac   :  { %1212 = vrot.lane.b32.xlu0 %v1210_v45, %s5513_s12  ;;  %v164_v45 = vld [vmem:[%s7387_s2 + $0x10] sm:$0xff] }
0x1d1e   :  { %v1213_v48 = vpop.permute.xlu0 %1212 }
0x1d1f   :  { %v1215_v49 = vadd.f32 %v1213_v48, %v1205_v47 }
0x1d21   :  { %4934 = vtanh.f32 %v1215_v49  ;;  %v1254_v21 = vrot.slane %v1215_v49, 7 }
0x1d2e   :  { %v4935_v50 = vpop.eup %4934 }
0x1d2f   :  { %1218 = vrot.lane.b32.xlu1 %v4935_v50, %s5513_s12  ;;  %v125_v50 = vld [vmem:[%s7386_s1 + $0x18] sm:$0xff] }
0x1da1   :  { %v1219_v51 = vpop.permute.xlu1 %1218 }
0x1da2   :  { %v5904_v53 = vmul.f32 %v4933_v41, %v1219_v51 }
0x1da4   :  { %1232 = vrot.lane.b32.xlu1 %v5904_v53, %s5514_s13  ;;  %1229 = vrot.lane.b32.xlu0 %v5904_v53, %s5515_s14 }
0x1da8   :  { %1235 = vrot.lane.b32.xlu0 %v5904_v53, %s5513_s12 }
0x1e16   :  { %v1233_v54 = vpop.permute.xlu1 %1232  ;;  %v1230_v55 = vpop.permute.xlu0 %1229 }
0x1e17   :  { %v1238_v59 = vsel %vm565_vm1, %v1230_v55, %v1233_v54  ;;  %v165_v55 = vld [vmem:[%s7387_s2 + $0x18] sm:$0xff] }
0x1e18   :  { %v1239_v61 = vsel %vm567_vm2, %v1238_v59, %v5904_v53 }
0x1e1a   :  { %v1236_v56 = vpop.permute.xlu0 %1235 }
0x1e1b   :  { %v1240_v62 = vsel %vm569_vm3, %v1239_v61, %v1236_v56 }
0x1e1c   :  { %v1241_v0 = vmul.f32 %v1240_v62, %v5698_v43 }
0x1e1e   :  { %v1243_v1 = vrot.slane %v1241_v0, 7 }
0x1e20   :  { %v1245_v4 = vadd.f32 %v1243_v1, %v5813_v22 }
0x1e22   :  { %4936 = vtanh.f32 %v1245_v4  ;;  %v4640_v7 = vmul.f32 -1.442695, %v1245_v4 }
0x1e24   :  { %4938 = vpow2.f32 %v4640_v7 }
0x1e2f   :  { %v4937_v5 = vpop.eup %4936 }
0x1e30   :  { %1258 = vrot.lane.b32.xlu1 %v4937_v5, %s5512_s11 }
0x1e31   :  { %v4939_v9 = vpop.eup %4938 }
0x1e32   :  { %v1249_v10 = vadd.f32 1.0, %v4939_v9 }
0x1e34   :  { %4940 = vrcp.f32 %v1249_v10 }
0x1e41   :  { %v4941_v11 = vpop.eup %4940 }
0x1e42   :  { %v1256_v23 = vmul.f32 %v4941_v11, %v1254_v21 }
0x1e54   :  { %45 = vadd.xlane.f32.xlu1 %v5922_v6 }
0x1ea2   :  { %v1259_v12 = vpop.permute.xlu1 %1258 }
0x1ea3   :  { %v1261_v14 = vmul.f32 %v4941_v11, %v1259_v12 }
0x1ea5   :  { %1263 = vrot.lane.b32.xlu0 %v1261_v14, %s5513_s12 }
0x1ec4   :  { %47 = vadd.xlane.f32.xlu0 %v5929_v15 }
0x1edd   :  { %v46_v16 = vpop.xlane.xlu1 %45 }
0x1ede   :  { %v64_v18 = vmul.f32 0.0078125, %v46_v16 }
0x1ee0   :  { %v74_v19 = vsub.f32 %v5922_v6, %v64_v18 }
0x1ee2   :  { %v84_v20 = vmul.f32 %v74_v19, %v74_v19 }
0x1ee4   :  { %96 = vadd.xlane.f32.xlu1 %v84_v20 }
0x1f17   :  { %v1264_v24 = vpop.permute.xlu0 %1263 }
0x1f18   :  { %v5933_v26 = vadd.f32 %v1264_v24, %v1256_v23 }
0x1f1a   :  { %4942 = vtanh.f32 %v5933_v26 }
0x1f27   :  { %v4943_v28 = vpop.eup %4942 }
0x1f28   :  { %1269 = vrot.lane.b32.xlu0 %v4943_v28, %s5513_s12 }
0x1f4d   :  { %v48_v29 = vpop.xlane.xlu0 %47 }
0x1f4e   :  { %v65_v30 = vmul.f32 0.0078125, %v48_v29 }
0x1f50   :  { %v75_v57 = vsub.f32 %v5929_v15, %v65_v30 }
0x1f52   :  { %v85_v58 = vmul.f32 %v75_v57, %v75_v57 }
0x1f54   :  { %98 = vadd.xlane.f32.xlu1 %v85_v58 }
0x1f6d   :  { %v97_v32 = vpop.xlane.xlu1 %96 }
0x1f6e   :  { %v114_v33 = vmul.f32 0.0078125, %v97_v32 }
0x1f70   :  { %v134_v34 = vadd.f32 1e-05, %v114_v33  ;;  %v1305_v33 = vrot.slane %v5933_v26, 7  ;;  %v462_v26 = vld [vmem:[%s7391_s6 + $0x10] sm:$0xff] }
0x1f72   :  { %4944 = vrsqrt.f32 %v134_v34 }
0x1f7f   :  { %v4945_v35 = vpop.eup %4944 }
0x1f80   :  { %v154_v41 = vmul.f32 %v4945_v35, %v124_v38 }
0x1f82   :  { %v174_v44 = vmul.f32 %v154_v41, %v64_v18 }
0x1f84   :  { %v184_v46 = vsub.f32 %v164_v45, %v174_v44 }
0x1f9a   :  { %v1270_v39 = vpop.permute.xlu0 %1269 }
0x1f9b   :  { %v5941_v40 = vmul.f32 %v4941_v11, %v1270_v39 }
0x1f9d   :  { %1283 = vrot.lane.b32.xlu0 %v5941_v40, %s5514_s13  ;;  %1280 = vrot.lane.b32.xlu1 %v5941_v40, %s5515_s14 }
0x1fa1   :  { %1286 = vrot.lane.b32.xlu0 %v5941_v40, %s5513_s12  ;;  %204 = vperm.xlu1 %4819, %v154_v41  }
0x1fa5   :  { %264 = vperm.xlu1 %4819, %v184_v46  }
0x1fdd   :  { %v99_v47 = vpop.xlane.xlu1 %98 }
0x1fde   :  { %v115_v48 = vmul.f32 0.0078125, %v99_v47 }
0x1fe0   :  { %v135_v49 = vadd.f32 1e-05, %v115_v48 }
0x1fe2   :  { %4946 = vrsqrt.f32 %v135_v49 }
0x1fef   :  { %v4947_v51 = vpop.eup %4946 }
0x1ff0   :  { %v155_v54 = vmul.f32 %v4947_v51, %v125_v50 }
0x1ff2   :  { %209 = vperm.xlu0 %4818, %v155_v54   ;;  %v175_v59 = vmul.f32 %v155_v54, %v65_v30 }
0x1ff4   :  { %v185_v61 = vsub.f32 %v165_v55, %v175_v59  ;;  %v5992_v59 = vld [vmem:[%s7389_s4] ss:$0 sm:$0xff] }
0x1ff6   :  { %269 = vperm.xlu0 %4818, %v185_v61  }
0x200f   :  { %v1284_v56 = vpop.permute.xlu0 %1283  ;;  %v1281_v62 = vpop.permute.xlu1 %1280 }
0x2010   :  { %v1289_v0 = vsel %vm565_vm1, %v1281_v62, %v1284_v56 }
0x2011   :  { %v1290_v4 = vsel %vm567_vm2, %v1289_v0, %v5941_v40 }
0x2013   :  { %v1287_v1 = vpop.permute.xlu0 %1286 }
0x2014   :  { %v1291_v5 = vsel %vm569_vm3, %v1290_v4, %v1287_v1 }
0x2015   :  { %v1292_v7 = vmul.f32 %v1291_v5, %v5698_v43 }
0x2017   :  { %v1294_v9 = vrot.slane %v1292_v7, 7 }
0x2019   :  { %v1296_v10 = vadd.f32 %v1294_v9, %v5813_v22 }
0x201b   :  { %4948 = vtanh.f32 %v1296_v10  ;;  %v4641_v29 = vmul.f32 -1.442695, %v1296_v10 }
0x201c   :  { %v205_v11 = vpop.permute.xlu1 %204 }
0x201d   :  { %v244_v12 = vmul.f32 %v205_v11, %v5922_v6  ;;  %4950 = vpow2.f32 %v4641_v29 }
0x2020   :  { %v265_v14 = vpop.permute.xlu1 %264 }
0x2021   :  { %v304_v16 = vadd.f32 %v265_v14, %v244_v12 }
0x2023   :  { %v314_v18 = vmax.f32 %v304_v16, 0.0 }
0x2025   :  { %4767 = vmatprep.mubr.f32.mxu0 %v314_v18 }
0x2028   :  { %v4949_v19 = vpop.eup %4948 }
0x2029   :  { %1309 = vrot.lane.b32.xlu1 %v4949_v19, %s5512_s11 }
0x202a   :  { %v4951_v30 = vpop.eup %4950 }
0x202b   :  { %v1300_v57 = vadd.f32 1.0, %v4951_v30 }
0x202d   :  { %4952 = vrcp.f32 %v1300_v57 }
0x203a   :  { %v4953_v6 = vpop.eup %4952 }
0x203b   :  { %v1307_v34 = vmul.f32 %v4953_v6, %v1305_v33 }
0x206d   :  { %v210_v20 = vpop.permute.xlu0 %209 }
0x206e   :  { %v245_v21 = vmul.f32 %v210_v20, %v5929_v15 }
0x2071   :  { %v270_v23 = vpop.permute.xlu0 %269 }
0x2072   :  { %v305_v24 = vadd.f32 %v270_v23, %v245_v21 }
0x2074   :  { %v315_v28 = vmax.f32 %v305_v24, 0.0 }
0x2076   :  { %4768 = vmatmul.mubr.f32.gmra.mxu0 %v315_v28 }
0x209b   :  { %v1310_v58 = vpop.permute.xlu1 %1309 }
0x209c   :  { %v1312_v32 = vmul.f32 %v4953_v6, %v1310_v58 }
0x209e   :  { %1314 = vrot.lane.b32.xlu0 %v1312_v32, %s5513_s12 }
0x2110   :  { %v1315_v35 = vpop.permute.xlu0 %1314 }
0x2111   :  { %v1317_v38 = vadd.f32 %v1315_v35, %v1307_v34 }
0x2113   :  { %4954 = vtanh.f32 %v1317_v38  ;;  %v1356_v12 = vrot.slane %v1317_v38, 7 }
0x2120   :  { %v4955_v15 = vpop.eup %4954 }
0x2121   :  { %1320 = vrot.lane.b32.xlu1 %v4955_v15, %s5513_s12 }
0x2136   :  { %v5982_v44 = vpop.f32.mrf.mxu0 }
0x2138   :  { %v421_v48 = vpop.f32.mrf.mxu0 }
0x2139   :  { %v422_v61 = vadd.f32 %v5992_v59, %v421_v48 }
0x2193   :  { %v1321_v39 = vpop.permute.xlu1 %1320 }
0x2194   :  { %v5970_v41 = vmul.f32 %v4953_v6, %v1321_v39  ;;  %v6017_v6 = vld [vmem:[%s7390_s5] sm:$0x1] }
0x2196   :  { %1334 = vrot.lane.b32.xlu1 %v5970_v41, %s5514_s13  ;;  %1331 = vrot.lane.b32.xlu0 %v5970_v41, %s5515_s14 }
0x219a   :  { %484 = vrot.lane.b32.xlu1 %v462_v26, %s5511_s29  ;;  %1337 = vrot.lane.b32.xlu0 %v5970_v41, %s5513_s12 }
0x2208   :  { %v1335_v45 = vpop.permute.xlu1 %1334  ;;  %v1332_v46 = vpop.permute.xlu0 %1331 }
0x2209   :  { %v1340_v47 = vsel %vm565_vm1, %v1332_v46, %v1335_v45 }
0x220a   :  { %v1341_v49 = vsel %vm567_vm2, %v1340_v47, %v5970_v41 }
0x220c   :  { %v1338_v50 = vpop.permute.xlu0 %1337  ;;  %v485_v54 = vpop.permute.xlu1 %484 }
0x220d   :  { %v1342_v51 = vsel %vm569_vm3, %v1341_v49, %v1338_v50  ;;  %v5996_v62 = vsel %vm510_vm0, %v422_v61, %v485_v54 }
0x220e   :  { %v1343_v55 = vmul.f32 %v1342_v51, %v5698_v43 }
0x2210   :  { %v1345_v56 = vrot.slane %v1343_v55, 7 }
0x2212   :  { %v1347_v0 = vadd.f32 %v1345_v56, %v5996_v62 }
0x2214   :  { %4956 = vtanh.f32 %v1347_v0  ;;  %v4642_v4 = vmul.f32 -1.442695, %v1347_v0 }
0x2216   :  { %4958 = vpow2.f32 %v4642_v4 }
0x2221   :  { %v4957_v1 = vpop.eup %4956 }
0x2222   :  { %1360 = vrot.lane.b32.xlu0 %v4957_v1, %s5512_s11 }
0x2223   :  { %v4959_v5 = vpop.eup %4958 }
0x2224   :  { %v1351_v7 = vadd.f32 1.0, %v4959_v5 }
0x2226   :  { %4960 = vrcp.f32 %v1351_v7 }
0x2233   :  { %v4961_v9 = vpop.eup %4960 }
0x2234   :  { %v1358_v14 = vmul.f32 %v4961_v9, %v1356_v12 }
0x2294   :  { %v1361_v10 = vpop.permute.xlu0 %1360 }
0x2295   :  { %v1363_v11 = vmul.f32 %v4961_v9, %v1361_v10 }
0x2297   :  { %1365 = vrot.lane.b32.xlu1 %v1363_v11, %s5513_s12 }
0x2309   :  { %v1366_v16 = vpop.permute.xlu1 %1365 }
0x230a   :  { %v1368_v18 = vadd.f32 %v1366_v16, %v1358_v14 }
0x230c   :  { %4962 = vtanh.f32 %v1368_v18  ;;  %v1408_v46 = vrot.slane %v1368_v18, 7 }
0x2319   :  { %v4963_v19 = vpop.eup %4962 }
0x231a   :  { %1371 = vrot.lane.b32.xlu0 %v4963_v19, %s5513_s12 }
0x238c   :  { %v1372_v20 = vpop.permute.xlu0 %1371 }
0x238d   :  { %v6002_v21 = vmul.f32 %v4961_v9, %v1372_v20 }
0x238f   :  { %1386 = vrot.lane.b32.xlu0 %v6002_v21, %s5514_s13  ;;  %1383 = vrot.lane.b32.xlu1 %v6002_v21, %s5515_s14 }
0x2393   :  { %1389 = vrot.lane.b32.xlu1 %v6002_v21, %s5513_s12 }
0x2401   :  { %v1387_v23 = vpop.permute.xlu0 %1386  ;;  %v1384_v24 = vpop.permute.xlu1 %1383 }
0x2402   :  { %v1392_v28 = vsel %vm565_vm1, %v1384_v24, %v1387_v23 }
0x2403   :  { %v1393_v29 = vsel %vm567_vm2, %v1392_v28, %v6002_v21 }
0x2405   :  { %v1390_v30 = vpop.permute.xlu1 %1389 }
0x2406   :  { %v1394_v57 = vsel %vm569_vm3, %v1393_v29, %v1390_v30 }
0x2407   :  { %v1395_v58 = vmul.f32 %v6017_v6, %v1394_v57 }
0x2409   :  { %v1397_v32 = vrot.slane %v1395_v58, 7 }
0x240b   :  { %v1399_v33 = vadd.f32 %v1397_v32, %v5996_v62 }
0x240d   :  { %4964 = vtanh.f32 %v1399_v33  ;;  %v4643_v35 = vmul.f32 -1.442695, %v1399_v33 }
0x240f   :  { %4966 = vpow2.f32 %v4643_v35 }
0x241a   :  { %v4965_v34 = vpop.eup %4964 }
0x241b   :  { %1412 = vrot.lane.b32.xlu0 %v4965_v34, %s5512_s11 }
0x241c   :  { %v4967_v38 = vpop.eup %4966 }
0x241d   :  { %v1403_v15 = vadd.f32 1.0, %v4967_v38 }
0x241f   :  { %4968 = vrcp.f32 %v1403_v15 }
0x242c   :  { %v4969_v39 = vpop.eup %4968 }
0x242d   :  { %v1410_v47 = vmul.f32 %v4969_v39, %v1408_v46 }
0x248d   :  { %v1413_v26 = vpop.permute.xlu0 %1412 }
0x248e   :  { %v1415_v45 = vmul.f32 %v4969_v39, %v1413_v26 }
0x2490   :  { %1417 = vrot.lane.b32.xlu1 %v1415_v45, %s5513_s12 }
0x2502   :  { %v1418_v48 = vpop.permute.xlu1 %1417 }
0x2503   :  { %v1420_v49 = vadd.f32 %v1418_v48, %v1410_v47 }
0x2505   :  { %4970 = vtanh.f32 %v1420_v49  ;;  %v1459_v20 = vrot.slane %v1420_v49, 7 }
0x2512   :  { %v4971_v50 = vpop.eup %4970 }
0x2513   :  { %1423 = vrot.lane.b32.xlu0 %v4971_v50, %s5513_s12 }
0x2585   :  { %v1424_v51 = vpop.permute.xlu0 %1423 }
0x2586   :  { %v6024_v54 = vmul.f32 %v4969_v39, %v1424_v51 }
0x2588   :  { %1437 = vrot.lane.b32.xlu0 %v6024_v54, %s5514_s13  ;;  %1434 = vrot.lane.b32.xlu1 %v6024_v54, %s5515_s14 }
0x258c   :  { %1440 = vrot.lane.b32.xlu1 %v6024_v54, %s5513_s12 }
0x25fa   :  { %v1438_v55 = vpop.permute.xlu0 %1437  ;;  %v1435_v61 = vpop.permute.xlu1 %1434 }
0x25fb   :  { %v1443_v56 = vsel %vm565_vm1, %v1435_v61, %v1438_v55 }
0x25fc   :  { %v1444_v0 = vsel %vm567_vm2, %v1443_v56, %v6024_v54 }
0x25fe   :  { %v1441_v1 = vpop.permute.xlu1 %1440 }
0x25ff   :  { %v1445_v4 = vsel %vm569_vm3, %v1444_v0, %v1441_v1 }
0x2600   :  { %v1446_v5 = vmul.f32 %v1445_v4, %v5698_v43 }
0x2602   :  { %v1448_v7 = vrot.slane %v1446_v5, 7 }
0x2604   :  { %v1450_v9 = vadd.f32 %v1448_v7, %v5996_v62 }
0x2606   :  { %4972 = vtanh.f32 %v1450_v9  ;;  %v4644_v11 = vmul.f32 -1.442695, %v1450_v9 }
0x2608   :  { %4974 = vpow2.f32 %v4644_v11 }
0x2613   :  { %v4973_v10 = vpop.eup %4972 }
0x2614   :  { %1463 = vrot.lane.b32.xlu0 %v4973_v10, %s5512_s11 }
0x2615   :  { %v4975_v12 = vpop.eup %4974 }
0x2616   :  { %v1454_v14 = vadd.f32 1.0, %v4975_v12 }
0x2618   :  { %4976 = vrcp.f32 %v1454_v14 }
0x2625   :  { %v4977_v16 = vpop.eup %4976 }
0x2626   :  { %v1461_v23 = vmul.f32 %v4977_v16, %v1459_v20 }
0x2686   :  { %v1464_v18 = vpop.permute.xlu0 %1463 }
0x2687   :  { %v1466_v19 = vmul.f32 %v4977_v16, %v1464_v18 }
0x2689   :  { %1468 = vrot.lane.b32.xlu1 %v1466_v19, %s5513_s12 }
0x26fb   :  { %v1469_v24 = vpop.permute.xlu1 %1468 }
0x26fc   :  { %v1471_v28 = vadd.f32 %v1469_v24, %v1461_v23 }
0x26fe   :  { %4978 = vtanh.f32 %v1471_v28  ;;  %v1510_v55 = vrot.slane %v1471_v28, 7 }
0x270b   :  { %v4979_v29 = vpop.eup %4978 }
0x270c   :  { %1474 = vrot.lane.b32.xlu0 %v4979_v29, %s5513_s12 }
0x277e   :  { %v1475_v30 = vpop.permute.xlu0 %1474 }
0x277f   :  { %v6041_v57 = vmul.f32 %v4977_v16, %v1475_v30 }
0x2781   :  { %1488 = vrot.lane.b32.xlu0 %v6041_v57, %s5514_s13  ;;  %1485 = vrot.lane.b32.xlu1 %v6041_v57, %s5515_s14 }
0x2785   :  { %1491 = vrot.lane.b32.xlu1 %v6041_v57, %s5513_s12 }
0x27f3   :  { %v1489_v58 = vpop.permute.xlu0 %1488  ;;  %v1486_v32 = vpop.permute.xlu1 %1485 }
0x27f4   :  { %v1494_v33 = vsel %vm565_vm1, %v1486_v32, %v1489_v58 }
0x27f5   :  { %v1495_v34 = vsel %vm567_vm2, %v1494_v33, %v6041_v57 }
0x27f7   :  { %v1492_v35 = vpop.permute.xlu1 %1491 }
0x27f8   :  { %v1496_v38 = vsel %vm569_vm3, %v1495_v34, %v1492_v35 }
0x27f9   :  { %v1497_v15 = vmul.f32 %v1496_v38, %v5698_v43 }
0x27fb   :  { %v1499_v39 = vrot.slane %v1497_v15, 7 }
0x27fd   :  { %v1501_v26 = vadd.f32 %v1499_v39, %v5996_v62 }
0x27ff   :  { %4980 = vtanh.f32 %v1501_v26  ;;  %v4645_v46 = vmul.f32 -1.442695, %v1501_v26 }
0x2801   :  { %4982 = vpow2.f32 %v4645_v46 }
0x280c   :  { %v4981_v45 = vpop.eup %4980 }
0x280d   :  { %1514 = vrot.lane.b32.xlu0 %v4981_v45, %s5512_s11 }
0x280e   :  { %v4983_v47 = vpop.eup %4982 }
0x280f   :  { %v1505_v48 = vadd.f32 1.0, %v4983_v47 }
0x2811   :  { %4984 = vrcp.f32 %v1505_v48 }
0x281e   :  { %v4985_v49 = vpop.eup %4984 }
0x281f   :  { %v1512_v61 = vmul.f32 %v4985_v49, %v1510_v55 }
0x287f   :  { %v1515_v50 = vpop.permute.xlu0 %1514 }
0x2880   :  { %v1517_v51 = vmul.f32 %v4985_v49, %v1515_v50 }
0x2882   :  { %1519 = vrot.lane.b32.xlu1 %v1517_v51, %s5513_s12 }
0x28f4   :  { %v1520_v56 = vpop.permute.xlu1 %1519 }
0x28f5   :  { %v1522_v0 = vadd.f32 %v1520_v56, %v1512_v61 }
0x28f7   :  { %4986 = vtanh.f32 %v1522_v0  ;;  %v1561_v32 = vrot.slane %v1522_v0, 7 }
0x2904   :  { %v4987_v1 = vpop.eup %4986 }
0x2905   :  { %1525 = vrot.lane.b32.xlu0 %v4987_v1, %s5513_s12 }
0x2977   :  { %v1526_v4 = vpop.permute.xlu0 %1525 }
0x2978   :  { %v6058_v5 = vmul.f32 %v4985_v49, %v1526_v4 }
0x297a   :  { %1539 = vrot.lane.b32.xlu0 %v6058_v5, %s5514_s13  ;;  %1536 = vrot.lane.b32.xlu1 %v6058_v5, %s5515_s14 }
0x297e   :  { %1542 = vrot.lane.b32.xlu1 %v6058_v5, %s5513_s12 }
0x29ec   :  { %v1540_v7 = vpop.permute.xlu0 %1539  ;;  %v1537_v9 = vpop.permute.xlu1 %1536 }
0x29ed   :  { %v1545_v10 = vsel %vm565_vm1, %v1537_v9, %v1540_v7 }
0x29ee   :  { %v1546_v11 = vsel %vm567_vm2, %v1545_v10, %v6058_v5 }
0x29f0   :  { %v1543_v12 = vpop.permute.xlu1 %1542 }
0x29f1   :  { %v1547_v14 = vsel %vm569_vm3, %v1546_v11, %v1543_v12 }
0x29f2   :  { %v1548_v16 = vmul.f32 %v1547_v14, %v5698_v43 }
0x29f4   :  { %v1550_v18 = vrot.slane %v1548_v16, 7 }
0x29f6   :  { %v1552_v19 = vadd.f32 %v1550_v18, %v5996_v62 }
0x29f8   :  { %4988 = vtanh.f32 %v1552_v19  ;;  %v4646_v23 = vmul.f32 -1.442695, %v1552_v19 }
0x29fa   :  { %4990 = vpow2.f32 %v4646_v23 }
0x2a05   :  { %v4989_v20 = vpop.eup %4988 }
0x2a06   :  { %1565 = vrot.lane.b32.xlu0 %v4989_v20, %s5512_s11 }
0x2a07   :  { %v4991_v24 = vpop.eup %4990 }
0x2a08   :  { %v1556_v28 = vadd.f32 1.0, %v4991_v24 }
0x2a0a   :  { %4992 = vrcp.f32 %v1556_v28 }
0x2a17   :  { %v4993_v29 = vpop.eup %4992 }
0x2a18   :  { %v1563_v33 = vmul.f32 %v4993_v29, %v1561_v32 }
0x2a78   :  { %v1566_v30 = vpop.permute.xlu0 %1565 }
0x2a79   :  { %v1568_v58 = vmul.f32 %v4993_v29, %v1566_v30 }
0x2a7b   :  { %1570 = vrot.lane.b32.xlu1 %v1568_v58, %s5513_s12 }
0x2aed   :  { %v1571_v34 = vpop.permute.xlu1 %1570 }
0x2aee   :  { %v1573_v35 = vadd.f32 %v1571_v34, %v1563_v33 }
0x2af0   :  { %4994 = vtanh.f32 %v1573_v35  ;;  %v1612_v10 = vrot.slane %v1573_v35, 7 }
0x2afd   :  { %v4995_v38 = vpop.eup %4994 }
0x2afe   :  { %1576 = vrot.lane.b32.xlu0 %v4995_v38, %s5513_s12 }
0x2b70   :  { %v1577_v15 = vpop.permute.xlu0 %1576 }
0x2b71   :  { %v6075_v39 = vmul.f32 %v4993_v29, %v1577_v15 }
0x2b73   :  { %1590 = vrot.lane.b32.xlu0 %v6075_v39, %s5514_s13  ;;  %1587 = vrot.lane.b32.xlu1 %v6075_v39, %s5515_s14 }
0x2b77   :  { %1593 = vrot.lane.b32.xlu1 %v6075_v39, %s5513_s12 }
0x2be5   :  { %v1591_v26 = vpop.permute.xlu0 %1590  ;;  %v1588_v45 = vpop.permute.xlu1 %1587 }
0x2be6   :  { %v1596_v46 = vsel %vm565_vm1, %v1588_v45, %v1591_v26 }
0x2be7   :  { %v1597_v47 = vsel %vm567_vm2, %v1596_v46, %v6075_v39 }
0x2be9   :  { %v1594_v48 = vpop.permute.xlu1 %1593 }
0x2bea   :  { %v1598_v49 = vsel %vm569_vm3, %v1597_v47, %v1594_v48 }
0x2beb   :  { %v1599_v50 = vmul.f32 %v1598_v49, %v5698_v43 }
0x2bed   :  { %v1601_v51 = vrot.slane %v1599_v50, 7 }
0x2bef   :  { %v1603_v55 = vadd.f32 %v1601_v51, %v5996_v62 }
0x2bf1   :  { %4996 = vtanh.f32 %v1603_v55  ;;  %v4647_v56 = vmul.f32 -1.442695, %v1603_v55 }
0x2bf3   :  { %4998 = vpow2.f32 %v4647_v56 }
0x2bfe   :  { %v4997_v61 = vpop.eup %4996 }
0x2bff   :  { %1616 = vrot.lane.b32.xlu0 %v4997_v61, %s5512_s11 }
0x2c00   :  { %v4999_v0 = vpop.eup %4998 }
0x2c01   :  { %v1607_v1 = vadd.f32 1.0, %v4999_v0 }
0x2c03   :  { %5000 = vrcp.f32 %v1607_v1 }
0x2c10   :  { %v5001_v4 = vpop.eup %5000 }
0x2c11   :  { %v1614_v11 = vmul.f32 %v5001_v4, %v1612_v10 }
0x2c71   :  { %v1617_v7 = vpop.permute.xlu0 %1616 }
0x2c72   :  { %v1619_v9 = vmul.f32 %v5001_v4, %v1617_v7 }
0x2c74   :  { %1621 = vrot.lane.b32.xlu1 %v1619_v9, %s5513_s12 }
0x2ce6   :  { %v1622_v12 = vpop.permute.xlu1 %1621 }
0x2ce7   :  { %v1624_v14 = vadd.f32 %v1622_v12, %v1614_v11 }
0x2ce9   :  { %5002 = vtanh.f32 %v1624_v14  ;;  %v1663_v47 = vrot.slane %v1624_v14, 7 }
0x2cf6   :  { %v5003_v16 = vpop.eup %5002 }
0x2cf7   :  { %1627 = vrot.lane.b32.xlu0 %v5003_v16, %s5513_s12 }
0x2d69   :  { %v1628_v18 = vpop.permute.xlu0 %1627 }
0x2d6a   :  { %v6092_v19 = vmul.f32 %v5001_v4, %v1628_v18 }
0x2d6c   :  { %1641 = vrot.lane.b32.xlu0 %v6092_v19, %s5514_s13  ;;  %1638 = vrot.lane.b32.xlu1 %v6092_v19, %s5515_s14 }
0x2d70   :  { %1644 = vrot.lane.b32.xlu1 %v6092_v19, %s5513_s12 }
0x2dde   :  { %v1642_v20 = vpop.permute.xlu0 %1641  ;;  %v1639_v23 = vpop.permute.xlu1 %1638 }
0x2ddf   :  { %v1647_v24 = vsel %vm565_vm1, %v1639_v23, %v1642_v20 }
0x2de0   :  { %v1648_v28 = vsel %vm567_vm2, %v1647_v24, %v6092_v19 }
0x2de2   :  { %v1645_v29 = vpop.permute.xlu1 %1644 }
0x2de3   :  { %v1649_v30 = vsel %vm569_vm3, %v1648_v28, %v1645_v29 }
0x2de4   :  { %v1650_v58 = vmul.f32 %v1649_v30, %v5698_v43 }
0x2de6   :  { %v1652_v32 = vrot.slane %v1650_v58, 7 }
0x2de8   :  { %v1654_v33 = vadd.f32 %v1652_v32, %v5996_v62 }
0x2dea   :  { %5004 = vtanh.f32 %v1654_v33  ;;  %v4648_v35 = vmul.f32 -1.442695, %v1654_v33 }
0x2dec   :  { %5006 = vpow2.f32 %v4648_v35 }
0x2df7   :  { %v5005_v34 = vpop.eup %5004 }
0x2df8   :  { %1667 = vrot.lane.b32.xlu0 %v5005_v34, %s5512_s11 }
0x2df9   :  { %v5007_v38 = vpop.eup %5006 }
0x2dfa   :  { %v1658_v15 = vadd.f32 1.0, %v5007_v38  ;;  %v463_v38 = vld [vmem:[%s7391_s6 + $0x18] sm:$0xff] }
0x2dfc   :  { %5008 = vrcp.f32 %v1658_v15 }
0x2e09   :  { %v5009_v26 = vpop.eup %5008 }
0x2e0a   :  { %v1665_v48 = vmul.f32 %v5009_v26, %v1663_v47 }
0x2e6a   :  { %v1668_v45 = vpop.permute.xlu0 %1667 }
0x2e6b   :  { %v1670_v46 = vmul.f32 %v5009_v26, %v1668_v45 }
0x2e6d   :  { %1672 = vrot.lane.b32.xlu1 %v1670_v46, %s5513_s12 }
0x2edf   :  { %v1673_v49 = vpop.permute.xlu1 %1672 }
0x2ee0   :  { %v1675_v50 = vadd.f32 %v1673_v49, %v1665_v48 }
0x2ee2   :  { %5010 = vtanh.f32 %v1675_v50  ;;  %v1714_v29 = vrot.slane %v1675_v50, 7 }
0x2eef   :  { %v5011_v51 = vpop.eup %5010 }
0x2ef0   :  { %1678 = vrot.lane.b32.xlu0 %v5011_v51, %s5513_s12  ;;  %v427_v51 = vadd.f32 %v5992_v59, %v5982_v44 }
0x2f62   :  { %v1679_v55 = vpop.permute.xlu0 %1678 }
0x2f63   :  { %v6109_v61 = vmul.f32 %v5009_v26, %v1679_v55 }
0x2f65   :  { %1692 = vrot.lane.b32.xlu0 %v6109_v61, %s5514_s13  ;;  %1689 = vrot.lane.b32.xlu1 %v6109_v61, %s5515_s14 }
0x2f69   :  { %1695 = vrot.lane.b32.xlu1 %v6109_v61, %s5513_s12 }
0x2fd7   :  { %v1693_v56 = vpop.permute.xlu0 %1692  ;;  %v1690_v0 = vpop.permute.xlu1 %1689 }
0x2fd8   :  { %v1698_v1 = vsel %vm565_vm1, %v1690_v0, %v1693_v56 }
0x2fd9   :  { %v1699_v4 = vsel %vm567_vm2, %v1698_v1, %v6109_v61 }
0x2fdb   :  { %v1696_v7 = vpop.permute.xlu1 %1695 }
0x2fdc   :  { %v1700_v9 = vsel %vm569_vm3, %v1699_v4, %v1696_v7 }
0x2fdd   :  { %v1701_v10 = vmul.f32 %v1700_v9, %v5698_v43 }
0x2fdf   :  { %v1703_v11 = vrot.slane %v1701_v10, 7 }
0x2fe1   :  { %v1705_v12 = vadd.f32 %v1703_v11, %v5996_v62 }
0x2fe3   :  { %5012 = vtanh.f32 %v1705_v12  ;;  %v4649_v16 = vmul.f32 -1.442695, %v1705_v12 }
0x2fe5   :  { %5014 = vpow2.f32 %v4649_v16 }
0x2ff0   :  { %v5013_v14 = vpop.eup %5012 }
0x2ff1   :  { %1718 = vrot.lane.b32.xlu0 %v5013_v14, %s5512_s11 }
0x2ff2   :  { %v5015_v18 = vpop.eup %5014 }
0x2ff3   :  { %v1709_v20 = vadd.f32 1.0, %v5015_v18 }
0x2ff5   :  { %5016 = vrcp.f32 %v1709_v20 }
0x3002   :  { %v5017_v23 = vpop.eup %5016 }
0x3003   :  { %v1716_v30 = vmul.f32 %v5017_v23, %v1714_v29 }
0x3063   :  { %v1719_v24 = vpop.permute.xlu0 %1718 }
0x3064   :  { %v1721_v28 = vmul.f32 %v5017_v23, %v1719_v24 }
0x3066   :  { %1723 = vrot.lane.b32.xlu1 %v1721_v28, %s5513_s12 }
0x30d8   :  { %v1724_v58 = vpop.permute.xlu1 %1723 }
0x30d9   :  { %v1726_v32 = vadd.f32 %v1724_v58, %v1716_v30 }
0x30db   :  { %5018 = vtanh.f32 %v1726_v32  ;;  %v1765_v44 = vrot.slane %v1726_v32, 7 }
0x30e8   :  { %v5019_v33 = vpop.eup %5018 }
0x30e9   :  { %1729 = vrot.lane.b32.xlu0 %v5019_v33, %s5513_s12 }
0x315b   :  { %v1730_v34 = vpop.permute.xlu0 %1729 }
0x315c   :  { %v6126_v35 = vmul.f32 %v5017_v23, %v1730_v34 }
0x315e   :  { %1743 = vrot.lane.b32.xlu0 %v6126_v35, %s5514_s13  ;;  %1740 = vrot.lane.b32.xlu1 %v6126_v35, %s5515_s14 }
0x3162   :  { %486 = vrot.lane.b32.xlu0 %v463_v38, %s5511_s29  ;;  %1746 = vrot.lane.b32.xlu1 %v6126_v35, %s5513_s12 }
0x31d0   :  { %v1744_v15 = vpop.permute.xlu0 %1743  ;;  %v1741_v26 = vpop.permute.xlu1 %1740 }
0x31d1   :  { %v1749_v45 = vsel %vm565_vm1, %v1741_v26, %v1744_v15 }
0x31d2   :  { %v1750_v46 = vsel %vm567_vm2, %v1749_v45, %v6126_v35 }
0x31d4   :  { %v1747_v47 = vpop.permute.xlu1 %1746  ;;  %v487_v49 = vpop.permute.xlu0 %486 }
0x31d5   :  { %v1751_v48 = vsel %vm569_vm3, %v1750_v46, %v1747_v47  ;;  %v6146_v56 = vsel %vm510_vm0, %v427_v51, %v487_v49 }
0x31d6   :  { %v1752_v50 = vmul.f32 %v1751_v48, %v5698_v43 }
0x31d8   :  { %v1754_v55 = vrot.slane %v1752_v50, 7 }
0x31da   :  { %v1756_v0 = vadd.f32 %v1754_v55, %v6146_v56 }
0x31dc   :  { %5020 = vtanh.f32 %v1756_v0  ;;  %v4650_v4 = vmul.f32 -1.442695, %v1756_v0 }
0x31de   :  { %5022 = vpow2.f32 %v4650_v4 }
0x31e9   :  { %v5021_v1 = vpop.eup %5020 }
0x31ea   :  { %1769 = vrot.lane.b32.xlu1 %v5021_v1, %s5512_s11 }
0x31eb   :  { %v5023_v7 = vpop.eup %5022 }
0x31ec   :  { %v1760_v9 = vadd.f32 1.0, %v5023_v7 }
0x31ee   :  { %5024 = vrcp.f32 %v1760_v9 }
0x31fb   :  { %v5025_v10 = vpop.eup %5024 }
0x31fc   :  { %v1767_v59 = vmul.f32 %v5025_v10, %v1765_v44 }
0x325c   :  { %v1770_v11 = vpop.permute.xlu1 %1769 }
0x325d   :  { %v1772_v12 = vmul.f32 %v5025_v10, %v1770_v11 }
0x325f   :  { %1774 = vrot.lane.b32.xlu0 %v1772_v12, %s5513_s12 }
0x32d1   :  { %v1775_v14 = vpop.permute.xlu0 %1774 }
0x32d2   :  { %v1777_v16 = vadd.f32 %v1775_v14, %v1767_v59 }
0x32d4   :  { %5026 = vtanh.f32 %v1777_v16  ;;  %v1817_v50 = vrot.slane %v1777_v16, 7 }
0x32e1   :  { %v5027_v18 = vpop.eup %5026 }
0x32e2   :  { %1780 = vrot.lane.b32.xlu1 %v5027_v18, %s5513_s12 }
0x3354   :  { %v1781_v20 = vpop.permute.xlu1 %1780 }
0x3355   :  { %v6152_v23 = vmul.f32 %v5025_v10, %v1781_v20 }
0x3357   :  { %1795 = vrot.lane.b32.xlu1 %v6152_v23, %s5514_s13  ;;  %1792 = vrot.lane.b32.xlu0 %v6152_v23, %s5515_s14 }
0x335b   :  { %1798 = vrot.lane.b32.xlu0 %v6152_v23, %s5513_s12 }
0x33c9   :  { %v1796_v24 = vpop.permute.xlu1 %1795  ;;  %v1793_v28 = vpop.permute.xlu0 %1792 }
0x33ca   :  { %v1801_v29 = vsel %vm565_vm1, %v1793_v28, %v1796_v24 }
0x33cb   :  { %v1802_v30 = vsel %vm567_vm2, %v1801_v29, %v6152_v23 }
0x33cd   :  { %v1799_v58 = vpop.permute.xlu0 %1798 }
0x33ce   :  { %v1803_v32 = vsel %vm569_vm3, %v1802_v30, %v1799_v58 }
0x33cf   :  { %v1804_v33 = vmul.f32 %v6017_v6, %v1803_v32 }
0x33d1   :  { %v1806_v34 = vrot.slane %v1804_v33, 7 }
0x33d3   :  { %v1808_v38 = vadd.f32 %v1806_v34, %v6146_v56 }
0x33d5   :  { %5028 = vtanh.f32 %v1808_v38  ;;  %v4651_v26 = vmul.f32 -1.442695, %v1808_v38 }
0x33d7   :  { %5030 = vpow2.f32 %v4651_v26 }
0x33e2   :  { %v5029_v15 = vpop.eup %5028 }
0x33e3   :  { %1821 = vrot.lane.b32.xlu1 %v5029_v15, %s5512_s11 }
0x33e4   :  { %v5031_v45 = vpop.eup %5030 }
0x33e5   :  { %v1812_v46 = vadd.f32 1.0, %v5031_v45 }
0x33e7   :  { %5032 = vrcp.f32 %v1812_v46 }
0x33f4   :  { %v5033_v47 = vpop.eup %5032 }
0x33f5   :  { %v1819_v51 = vmul.f32 %v5033_v47, %v1817_v50 }
0x3455   :  { %v1822_v48 = vpop.permute.xlu1 %1821 }
0x3456   :  { %v1824_v49 = vmul.f32 %v5033_v47, %v1822_v48 }
0x3458   :  { %1826 = vrot.lane.b32.xlu0 %v1824_v49, %s5513_s12 }
0x34ca   :  { %v1827_v6 = vpop.permute.xlu0 %1826 }
0x34cb   :  { %v1829_v55 = vadd.f32 %v1827_v6, %v1819_v51 }
0x34cd   :  { %5034 = vtanh.f32 %v1829_v55  ;;  %v1868_v32 = vrot.slane %v1829_v55, 7 }
0x34da   :  { %v5035_v0 = vpop.eup %5034 }
0x34db   :  { %1832 = vrot.lane.b32.xlu1 %v5035_v0, %s5513_s12 }
0x354d   :  { %v1833_v1 = vpop.permute.xlu1 %1832 }
0x354e   :  { %v6169_v4 = vmul.f32 %v5033_v47, %v1833_v1 }
0x3550   :  { %1846 = vrot.lane.b32.xlu1 %v6169_v4, %s5514_s13  ;;  %1843 = vrot.lane.b32.xlu0 %v6169_v4, %s5515_s14 }
0x3554   :  { %1849 = vrot.lane.b32.xlu0 %v6169_v4, %s5513_s12 }
0x35c2   :  { %v1847_v7 = vpop.permute.xlu1 %1846  ;;  %v1844_v9 = vpop.permute.xlu0 %1843 }
0x35c3   :  { %v1852_v10 = vsel %vm565_vm1, %v1844_v9, %v1847_v7 }
0x35c4   :  { %v1853_v11 = vsel %vm567_vm2, %v1852_v10, %v6169_v4 }
0x35c6   :  { %v1850_v12 = vpop.permute.xlu0 %1849 }
0x35c7   :  { %v1854_v44 = vsel %vm569_vm3, %v1853_v11, %v1850_v12 }
0x35c8   :  { %v1855_v59 = vmul.f32 %v1854_v44, %v5698_v43 }
0x35ca   :  { %v1857_v14 = vrot.slane %v1855_v59, 7 }
0x35cc   :  { %v1859_v16 = vadd.f32 %v1857_v14, %v6146_v56 }
0x35ce   :  { %5036 = vtanh.f32 %v1859_v16  ;;  %v4652_v20 = vmul.f32 -1.442695, %v1859_v16 }
0x35d0   :  { %5038 = vpow2.f32 %v4652_v20 }
0x35db   :  { %v5037_v18 = vpop.eup %5036 }
0x35dc   :  { %1872 = vrot.lane.b32.xlu1 %v5037_v18, %s5512_s11 }
0x35dd   :  { %v5039_v24 = vpop.eup %5038 }
0x35de   :  { %v1863_v28 = vadd.f32 1.0, %v5039_v24 }
0x35e0   :  { %5040 = vrcp.f32 %v1863_v28 }
0x35ed   :  { %v5041_v29 = vpop.eup %5040 }
0x35ee   :  { %v1870_v33 = vmul.f32 %v5041_v29, %v1868_v32 }
0x364e   :  { %v1873_v30 = vpop.permute.xlu1 %1872 }
0x364f   :  { %v1875_v58 = vmul.f32 %v5041_v29, %v1873_v30 }
0x3651   :  { %1877 = vrot.lane.b32.xlu0 %v1875_v58, %s5513_s12 }
0x36c3   :  { %v1878_v34 = vpop.permute.xlu0 %1877 }
0x36c4   :  { %v1880_v38 = vadd.f32 %v1878_v34, %v1870_v33 }
0x36c6   :  { %5042 = vtanh.f32 %v1880_v38  ;;  %v1919_v59 = vrot.slane %v1880_v38, 7 }
0x36d3   :  { %v5043_v15 = vpop.eup %5042 }
0x36d4   :  { %1883 = vrot.lane.b32.xlu1 %v5043_v15, %s5513_s12 }
0x3746   :  { %v1884_v26 = vpop.permute.xlu1 %1883 }
0x3747   :  { %v6186_v45 = vmul.f32 %v5041_v29, %v1884_v26 }
0x3749   :  { %1897 = vrot.lane.b32.xlu1 %v6186_v45, %s5514_s13  ;;  %1894 = vrot.lane.b32.xlu0 %v6186_v45, %s5515_s14 }
0x374d   :  { %1900 = vrot.lane.b32.xlu0 %v6186_v45, %s5513_s12 }
0x37bb   :  { %v1898_v46 = vpop.permute.xlu1 %1897  ;;  %v1895_v47 = vpop.permute.xlu0 %1894 }
0x37bc   :  { %v1903_v48 = vsel %vm565_vm1, %v1895_v47, %v1898_v46 }
0x37bd   :  { %v1904_v49 = vsel %vm567_vm2, %v1903_v48, %v6186_v45 }
0x37bf   :  { %v1901_v50 = vpop.permute.xlu0 %1900 }
0x37c0   :  { %v1905_v51 = vsel %vm569_vm3, %v1904_v49, %v1901_v50 }
0x37c1   :  { %v1906_v6 = vmul.f32 %v1905_v51, %v5698_v43 }
0x37c3   :  { %v1908_v55 = vrot.slane %v1906_v6, 7 }
0x37c5   :  { %v1910_v0 = vadd.f32 %v1908_v55, %v6146_v56 }
0x37c7   :  { %5044 = vtanh.f32 %v1910_v0  ;;  %v4653_v7 = vmul.f32 -1.442695, %v1910_v0 }
0x37c9   :  { %5046 = vpow2.f32 %v4653_v7 }
0x37d4   :  { %v5045_v1 = vpop.eup %5044 }
0x37d5   :  { %1923 = vrot.lane.b32.xlu1 %v5045_v1, %s5512_s11 }
0x37d6   :  { %v5047_v9 = vpop.eup %5046 }
0x37d7   :  { %v1914_v10 = vadd.f32 1.0, %v5047_v9 }
0x37d9   :  { %5048 = vrcp.f32 %v1914_v10 }
0x37e6   :  { %v5049_v11 = vpop.eup %5048 }
0x37e7   :  { %v1921_v14 = vmul.f32 %v5049_v11, %v1919_v59 }
0x3847   :  { %v1924_v12 = vpop.permute.xlu1 %1923 }
0x3848   :  { %v1926_v44 = vmul.f32 %v5049_v11, %v1924_v12 }
0x384a   :  { %1928 = vrot.lane.b32.xlu0 %v1926_v44, %s5513_s12 }
0x38bc   :  { %v1929_v16 = vpop.permute.xlu0 %1928 }
0x38bd   :  { %v1931_v18 = vadd.f32 %v1929_v16, %v1921_v14 }
0x38bf   :  { %5050 = vtanh.f32 %v1931_v18  ;;  %v1970_v55 = vrot.slane %v1931_v18, 7 }
0x38cc   :  { %v5051_v20 = vpop.eup %5050 }
0x38cd   :  { %1934 = vrot.lane.b32.xlu1 %v5051_v20, %s5513_s12 }
0x393f   :  { %v1935_v24 = vpop.permute.xlu1 %1934 }
0x3940   :  { %v6203_v28 = vmul.f32 %v5049_v11, %v1935_v24 }
0x3942   :  { %1948 = vrot.lane.b32.xlu1 %v6203_v28, %s5514_s13  ;;  %1945 = vrot.lane.b32.xlu0 %v6203_v28, %s5515_s14 }
0x3946   :  { %1951 = vrot.lane.b32.xlu0 %v6203_v28, %s5513_s12 }
0x39b4   :  { %v1949_v29 = vpop.permute.xlu1 %1948  ;;  %v1946_v30 = vpop.permute.xlu0 %1945 }
0x39b5   :  { %v1954_v58 = vsel %vm565_vm1, %v1946_v30, %v1949_v29 }
0x39b6   :  { %v1955_v32 = vsel %vm567_vm2, %v1954_v58, %v6203_v28 }
0x39b8   :  { %v1952_v33 = vpop.permute.xlu0 %1951 }
0x39b9   :  { %v1956_v34 = vsel %vm569_vm3, %v1955_v32, %v1952_v33 }
0x39ba   :  { %v1957_v38 = vmul.f32 %v1956_v34, %v5698_v43 }
0x39bc   :  { %v1959_v15 = vrot.slane %v1957_v38, 7 }
0x39be   :  { %v1961_v26 = vadd.f32 %v1959_v15, %v6146_v56 }
0x39c0   :  { %5052 = vtanh.f32 %v1961_v26  ;;  %v4654_v47 = vmul.f32 -1.442695, %v1961_v26 }
0x39c2   :  { %5054 = vpow2.f32 %v4654_v47 }
0x39cd   :  { %v5053_v46 = vpop.eup %5052 }
0x39ce   :  { %1974 = vrot.lane.b32.xlu1 %v5053_v46, %s5512_s11 }
0x39cf   :  { %v5055_v48 = vpop.eup %5054 }
0x39d0   :  { %v1965_v49 = vadd.f32 1.0, %v5055_v48 }
0x39d2   :  { %5056 = vrcp.f32 %v1965_v49 }
0x39df   :  { %v5057_v50 = vpop.eup %5056 }
0x39e0   :  { %v1972_v0 = vmul.f32 %v5057_v50, %v1970_v55 }
0x3a40   :  { %v1975_v51 = vpop.permute.xlu1 %1974 }
0x3a41   :  { %v1977_v6 = vmul.f32 %v5057_v50, %v1975_v51 }
0x3a43   :  { %1979 = vrot.lane.b32.xlu0 %v1977_v6, %s5513_s12 }
0x3ab5   :  { %v1980_v1 = vpop.permute.xlu0 %1979 }
0x3ab6   :  { %v1982_v7 = vadd.f32 %v1980_v1, %v1972_v0 }
0x3ab8   :  { %5058 = vtanh.f32 %v1982_v7  ;;  %v2021_v26 = vrot.slane %v1982_v7, 7 }
0x3ac5   :  { %v5059_v9 = vpop.eup %5058 }
0x3ac6   :  { %1985 = vrot.lane.b32.xlu1 %v5059_v9, %s5513_s12 }
0x3b38   :  { %v1986_v10 = vpop.permute.xlu1 %1985 }
0x3b39   :  { %v6220_v11 = vmul.f32 %v5057_v50, %v1986_v10 }
0x3b3b   :  { %1999 = vrot.lane.b32.xlu1 %v6220_v11, %s5514_s13  ;;  %1996 = vrot.lane.b32.xlu0 %v6220_v11, %s5515_s14 }
0x3b3f   :  { %2002 = vrot.lane.b32.xlu0 %v6220_v11, %s5513_s12 }
0x3bad   :  { %v2000_v12 = vpop.permute.xlu1 %1999  ;;  %v1997_v44 = vpop.permute.xlu0 %1996 }
0x3bae   :  { %v2005_v59 = vsel %vm565_vm1, %v1997_v44, %v2000_v12 }
0x3baf   :  { %v2006_v14 = vsel %vm567_vm2, %v2005_v59, %v6220_v11 }
0x3bb1   :  { %v2003_v16 = vpop.permute.xlu0 %2002 }
0x3bb2   :  { %v2007_v18 = vsel %vm569_vm3, %v2006_v14, %v2003_v16  ;;  %v6255_v14 = vld [vmem:[%s7385_s0 + $0x20] sm:$0xff] }
0x3bb3   :  { %v2008_v20 = vmul.f32 %v2007_v18, %v5698_v43 }
0x3bb5   :  { %v2010_v24 = vrot.slane %v2008_v20, 7 }
0x3bb7   :  { %v2012_v29 = vadd.f32 %v2010_v24, %v6146_v56 }
0x3bb9   :  { %5060 = vtanh.f32 %v2012_v29  ;;  %v4655_v58 = vmul.f32 -1.442695, %v2012_v29 }
0x3bbb   :  { %5062 = vpow2.f32 %v4655_v58  ;;  %v6262_v58 = vld [vmem:[%s7385_s0 + $0x28] sm:$0xff] }
0x3bc6   :  { %v5061_v30 = vpop.eup %5060 }
0x3bc7   :  { %2025 = vrot.lane.b32.xlu1 %v5061_v30, %s5512_s11 }
0x3bc8   :  { %v5063_v32 = vpop.eup %5062 }
0x3bc9   :  { %v2016_v33 = vadd.f32 1.0, %v5063_v32 }
0x3bcb   :  { %5064 = vrcp.f32 %v2016_v33 }
0x3bd8   :  { %v5065_v34 = vpop.eup %5064 }
0x3bd9   :  { %v2023_v46 = vmul.f32 %v5065_v34, %v2021_v26 }
0x3c39   :  { %v2026_v38 = vpop.permute.xlu1 %2025 }
0x3c3a   :  { %v2028_v15 = vmul.f32 %v5065_v34, %v2026_v38 }
0x3c3c   :  { %2030 = vrot.lane.b32.xlu0 %v2028_v15, %s5513_s12 }
0x3cae   :  { %v2031_v47 = vpop.permute.xlu0 %2030 }
0x3caf   :  { %v2033_v48 = vadd.f32 %v2031_v47, %v2023_v46 }
0x3cb1   :  { %5066 = vtanh.f32 %v2033_v48  ;;  %v2072_v15 = vrot.slane %v2033_v48, 7 }
0x3cbe   :  { %v5067_v49 = vpop.eup %5066 }
0x3cbf   :  { %2036 = vrot.lane.b32.xlu1 %v5067_v49, %s5513_s12 }
0x3d31   :  { %v2037_v50 = vpop.permute.xlu1 %2036 }
0x3d32   :  { %v6237_v51 = vmul.f32 %v5065_v34, %v2037_v50 }
0x3d34   :  { %2050 = vrot.lane.b32.xlu1 %v6237_v51, %s5514_s13  ;;  %2047 = vrot.lane.b32.xlu0 %v6237_v51, %s5515_s14 }
0x3d38   :  { %2053 = vrot.lane.b32.xlu0 %v6237_v51, %s5513_s12 }
0x3da6   :  { %v2051_v6 = vpop.permute.xlu1 %2050  ;;  %v2048_v55 = vpop.permute.xlu0 %2047 }
0x3da7   :  { %v2056_v0 = vsel %vm565_vm1, %v2048_v55, %v2051_v6 }
0x3da8   :  { %v2057_v1 = vsel %vm567_vm2, %v2056_v0, %v6237_v51 }
0x3daa   :  { %v2054_v7 = vpop.permute.xlu0 %2053 }
0x3dab   :  { %v2058_v9 = vsel %vm569_vm3, %v2057_v1, %v2054_v7 }
0x3dac   :  { %v2059_v10 = vmul.f32 %v2058_v9, %v5698_v43 }
0x3dae   :  { %v2061_v12 = vrot.slane %v2059_v10, 7  ;;  %v126_v10 = vld [vmem:[%s7386_s1 + $0x20] sm:$0xff] }
0x3db0   :  { %v2063_v44 = vadd.f32 %v2061_v12, %v6146_v56 }
0x3db2   :  { %5068 = vtanh.f32 %v2063_v44  ;;  %v4656_v16 = vmul.f32 -1.442695, %v2063_v44 }
0x3db4   :  { %5070 = vpow2.f32 %v4656_v16 }
0x3dbf   :  { %v5069_v59 = vpop.eup %5068 }
0x3dc0   :  { %2076 = vrot.lane.b32.xlu1 %v5069_v59, %s5512_s11 }
0x3dc1   :  { %v5071_v18 = vpop.eup %5070 }
0x3dc2   :  { %v2067_v20 = vadd.f32 1.0, %v5071_v18  ;;  %v166_v18 = vld [vmem:[%s7387_s2 + $0x20] sm:$0xff] }
0x3dc4   :  { %5072 = vrcp.f32 %v2067_v20 }
0x3dd1   :  { %v5073_v24 = vpop.eup %5072 }
0x3dd2   :  { %v2074_v26 = vmul.f32 %v5073_v24, %v2072_v15 }
0x3de4   :  { %49 = vadd.xlane.f32.xlu1 %v6255_v14 }
0x3e32   :  { %v2077_v29 = vpop.permute.xlu1 %2076 }
0x3e33   :  { %v2079_v30 = vmul.f32 %v5073_v24, %v2077_v29 }
0x3e35   :  { %2081 = vrot.lane.b32.xlu0 %v2079_v30, %s5513_s12 }
0x3e54   :  { %51 = vadd.xlane.f32.xlu0 %v6262_v58 }
0x3e6d   :  { %v50_v32 = vpop.xlane.xlu1 %49 }
0x3e6e   :  { %v66_v33 = vmul.f32 0.0078125, %v50_v32  ;;  %v127_v32 = vld [vmem:[%s7386_s1 + $0x28] sm:$0xff] }
0x3e70   :  { %v76_v34 = vsub.f32 %v6255_v14, %v66_v33 }
0x3e72   :  { %v86_v38 = vmul.f32 %v76_v34, %v76_v34 }
0x3e74   :  { %100 = vadd.xlane.f32.xlu1 %v86_v38  ;;  %v167_v38 = vld [vmem:[%s7387_s2 + $0x28] sm:$0xff] }
0x3ea7   :  { %v2082_v46 = vpop.permute.xlu0 %2081 }
0x3ea8   :  { %v6266_v47 = vadd.f32 %v2082_v46, %v2074_v26 }
0x3eaa   :  { %5074 = vtanh.f32 %v6266_v47 }
0x3eb7   :  { %v5075_v49 = vpop.eup %5074 }
0x3eb8   :  { %2087 = vrot.lane.b32.xlu0 %v5075_v49, %s5513_s12 }
0x3edd   :  { %v52_v50 = vpop.xlane.xlu0 %51 }
0x3ede   :  { %v67_v6 = vmul.f32 0.0078125, %v52_v50 }
0x3ee0   :  { %v77_v55 = vsub.f32 %v6262_v58, %v67_v6 }
0x3ee2   :  { %v87_v0 = vmul.f32 %v77_v55, %v77_v55 }
0x3ee4   :  { %102 = vadd.xlane.f32.xlu1 %v87_v0 }
0x3efd   :  { %v101_v1 = vpop.xlane.xlu1 %100 }
0x3efe   :  { %v116_v7 = vmul.f32 0.0078125, %v101_v1 }
0x3f00   :  { %v136_v9 = vadd.f32 1e-05, %v116_v7 }
0x3f02   :  { %5076 = vrsqrt.f32 %v136_v9 }
0x3f0f   :  { %v5077_v48 = vpop.eup %5076 }
0x3f10   :  { %v156_v59 = vmul.f32 %v5077_v48, %v126_v10 }
0x3f12   :  { %v176_v16 = vmul.f32 %v156_v59, %v66_v33 }
0x3f14   :  { %v186_v20 = vsub.f32 %v166_v18, %v176_v16 }
0x3f2a   :  { %v2088_v12 = vpop.permute.xlu0 %2087 }
0x3f2b   :  { %v6274_v44 = vmul.f32 %v5073_v24, %v2088_v12 }
0x3f2d   :  { %2101 = vrot.lane.b32.xlu0 %v6274_v44, %s5514_s13  ;;  %2098 = vrot.lane.b32.xlu1 %v6274_v44, %s5515_s14 }
0x3f31   :  { %2104 = vrot.lane.b32.xlu0 %v6274_v44, %s5513_s12  ;;  %214 = vperm.xlu1 %4819, %v156_v59  }
0x3f35   :  { %274 = vperm.xlu1 %4819, %v186_v20  }
0x3f6d   :  { %v103_v24 = vpop.xlane.xlu1 %102 }
0x3f6e   :  { %v117_v29 = vmul.f32 0.0078125, %v103_v24 }
0x3f70   :  { %v137_v30 = vadd.f32 1e-05, %v117_v29 }
0x3f72   :  { %5078 = vrsqrt.f32 %v137_v30 }
0x3f7f   :  { %v5079_v34 = vpop.eup %5078 }
0x3f80   :  { %v157_v33 = vmul.f32 %v5079_v34, %v127_v32 }
0x3f82   :  { %219 = vperm.xlu0 %4818, %v157_v33   ;;  %v177_v15 = vmul.f32 %v157_v33, %v67_v6 }
0x3f84   :  { %v187_v26 = vsub.f32 %v167_v38, %v177_v15 }
0x3f86   :  { %279 = vperm.xlu0 %4818, %v187_v26  }
0x3f9f   :  { %v2102_v46 = vpop.permute.xlu0 %2101  ;;  %v2099_v49 = vpop.permute.xlu1 %2098 }
0x3fa0   :  { %v2107_v50 = vsel %vm565_vm1, %v2099_v49, %v2102_v46  ;;  %v2123_v46 = vrot.slane %v6266_v47, 7  ;;  %v464_v47 = vld [vmem:[%s7391_s6 + $0x20] sm:$0xff] }
0x3fa1   :  { %v2108_v0 = vsel %vm567_vm2, %v2107_v50, %v6274_v44 }
0x3fa3   :  { %v2105_v55 = vpop.permute.xlu0 %2104 }
0x3fa4   :  { %v2109_v1 = vsel %vm569_vm3, %v2108_v0, %v2105_v55 }
0x3fa5   :  { %v2110_v7 = vmul.f32 %v2109_v1, %v5698_v43 }
0x3fa7   :  { %v2112_v9 = vrot.slane %v2110_v7, 7 }
0x3fa9   :  { %v2114_v48 = vadd.f32 %v2112_v9, %v6146_v56 }
0x3fab   :  { %5080 = vtanh.f32 %v2114_v48  ;;  %v4657_v34 = vmul.f32 -1.442695, %v2114_v48 }
0x3fac   :  { %v215_v10 = vpop.permute.xlu1 %214 }
0x3fad   :  { %v246_v6 = vmul.f32 %v215_v10, %v6255_v14  ;;  %5082 = vpow2.f32 %v4657_v34 }
0x3fb0   :  { %v275_v12 = vpop.permute.xlu1 %274 }
0x3fb1   :  { %v306_v59 = vadd.f32 %v275_v12, %v246_v6 }
0x3fb3   :  { %v316_v16 = vmax.f32 %v306_v59, 0.0 }
0x3fb5   :  { %4770 = vmatprep.mubr.f32.mxu0 %v316_v16 }
0x3fb8   :  { %v5081_v18 = vpop.eup %5080 }
0x3fb9   :  { %2127 = vrot.lane.b32.xlu1 %v5081_v18, %s5512_s11 }
0x3fba   :  { %v5083_v33 = vpop.eup %5082 }
0x3fbb   :  { %v2118_v38 = vadd.f32 1.0, %v5083_v33 }
0x3fbd   :  { %5084 = vrcp.f32 %v2118_v38 }
0x3fca   :  { %v5085_v14 = vpop.eup %5084 }
0x3fcb   :  { %v2125_v49 = vmul.f32 %v5085_v14, %v2123_v46 }
0x3ffd   :  { %v220_v20 = vpop.permute.xlu0 %219 }
0x3ffe   :  { %v247_v24 = vmul.f32 %v220_v20, %v6262_v58 }
0x4001   :  { %v280_v29 = vpop.permute.xlu0 %279 }
0x4002   :  { %v307_v30 = vadd.f32 %v280_v29, %v247_v24  ;;  %v6325_v24 = vld [vmem:[%s7389_s4] ss:$0 sm:$0xff] }
0x4004   :  { %v317_v32 = vmax.f32 %v307_v30, 0.0 }
0x4006   :  { %4771 = vmatmul.mubr.f32.gmra.mxu0 %v317_v32 }
0x402b   :  { %v2128_v15 = vpop.permute.xlu1 %2127 }
0x402c   :  { %v2130_v26 = vmul.f32 %v5085_v14, %v2128_v15 }
0x402e   :  { %2132 = vrot.lane.b32.xlu0 %v2130_v26, %s5513_s12 }
0x40a0   :  { %v2133_v50 = vpop.permute.xlu0 %2132 }
0x40a1   :  { %v2135_v55 = vadd.f32 %v2133_v50, %v2125_v49 }
0x40a3   :  { %5086 = vtanh.f32 %v2135_v55  ;;  %v2174_v50 = vrot.slane %v2135_v55, 7 }
0x40b0   :  { %v5087_v58 = vpop.eup %5086 }
0x40b1   :  { %2138 = vrot.lane.b32.xlu1 %v5087_v58, %s5513_s12 }
0x40c6   :  { %v6315_v7 = vpop.f32.mrf.mxu0 }
0x40c8   :  { %v431_v6 = vpop.f32.mrf.mxu0 }
0x40c9   :  { %v432_v29 = vadd.f32 %v6325_v24, %v431_v6 }
0x4123   :  { %v2139_v0 = vpop.permute.xlu1 %2138 }
0x4124   :  { %v6303_v1 = vmul.f32 %v5085_v14, %v2139_v0 }
0x4126   :  { %2152 = vrot.lane.b32.xlu1 %v6303_v1, %s5514_s13  ;;  %2149 = vrot.lane.b32.xlu0 %v6303_v1, %s5515_s14 }
0x412a   :  { %488 = vrot.lane.b32.xlu1 %v464_v47, %s5511_s29  ;;  %2155 = vrot.lane.b32.xlu0 %v6303_v1, %s5513_s12 }
0x4198   :  { %v2153_v9 = vpop.permute.xlu1 %2152  ;;  %v2150_v48 = vpop.permute.xlu0 %2149 }
0x4199   :  { %v2158_v10 = vsel %vm565_vm1, %v2150_v48, %v2153_v9 }
0x419a   :  { %v2159_v12 = vsel %vm567_vm2, %v2158_v10, %v6303_v1 }
0x419c   :  { %v2156_v59 = vpop.permute.xlu0 %2155  ;;  %v489_v18 = vpop.permute.xlu1 %488 }
0x419d   :  { %v2160_v16 = vsel %vm569_vm3, %v2159_v12, %v2156_v59  ;;  %v6329_v32 = vsel %vm510_vm0, %v432_v29, %v489_v18 }
0x419e   :  { %v2161_v20 = vmul.f32 %v2160_v16, %v5698_v43 }
0x41a0   :  { %v2163_v30 = vrot.slane %v2161_v20, 7  ;;  %v6350_v20 = vld [vmem:[%s7390_s5] sm:$0x1] }
0x41a2   :  { %v2165_v34 = vadd.f32 %v2163_v30, %v6329_v32 }
0x41a4   :  { %5088 = vtanh.f32 %v2165_v34  ;;  %v4658_v38 = vmul.f32 -1.442695, %v2165_v34 }
0x41a6   :  { %5090 = vpow2.f32 %v4658_v38 }
0x41b1   :  { %v5089_v33 = vpop.eup %5088 }
0x41b2   :  { %2178 = vrot.lane.b32.xlu0 %v5089_v33, %s5512_s11 }
0x41b3   :  { %v5091_v14 = vpop.eup %5090 }
0x41b4   :  { %v2169_v15 = vadd.f32 1.0, %v5091_v14 }
0x41b6   :  { %5092 = vrcp.f32 %v2169_v15 }
0x41c3   :  { %v5093_v26 = vpop.eup %5092 }
0x41c4   :  { %v2176_v58 = vmul.f32 %v5093_v26, %v2174_v50 }
0x4224   :  { %v2179_v46 = vpop.permute.xlu0 %2178 }
0x4225   :  { %v2181_v49 = vmul.f32 %v5093_v26, %v2179_v46 }
0x4227   :  { %2183 = vrot.lane.b32.xlu1 %v2181_v49, %s5513_s12 }
0x4299   :  { %v2184_v0 = vpop.permute.xlu1 %2183 }
0x429a   :  { %v2186_v47 = vadd.f32 %v2184_v0, %v2176_v58 }
0x429c   :  { %5094 = vtanh.f32 %v2186_v47  ;;  %v2226_v50 = vrot.slane %v2186_v47, 7 }
0x42a9   :  { %v5095_v9 = vpop.eup %5094 }
0x42aa   :  { %2189 = vrot.lane.b32.xlu0 %v5095_v9, %s5513_s12 }
0x431c   :  { %v2190_v48 = vpop.permute.xlu0 %2189 }
0x431d   :  { %v6335_v10 = vmul.f32 %v5093_v26, %v2190_v48 }
0x431f   :  { %2204 = vrot.lane.b32.xlu0 %v6335_v10, %s5514_s13  ;;  %2201 = vrot.lane.b32.xlu1 %v6335_v10, %s5515_s14 }
0x4323   :  { %2207 = vrot.lane.b32.xlu1 %v6335_v10, %s5513_s12 }
0x4391   :  { %v2205_v55 = vpop.permute.xlu0 %2204  ;;  %v2202_v6 = vpop.permute.xlu1 %2201 }
0x4392   :  { %v2210_v12 = vsel %vm565_vm1, %v2202_v6, %v2205_v55 }
0x4393   :  { %v2211_v59 = vsel %vm567_vm2, %v2210_v12, %v6335_v10 }
0x4395   :  { %v2208_v16 = vpop.permute.xlu1 %2207 }
0x4396   :  { %v2212_v18 = vsel %vm569_vm3, %v2211_v59, %v2208_v16 }
0x4397   :  { %v2213_v29 = vmul.f32 %v6350_v20, %v2212_v18 }
0x4399   :  { %v2215_v30 = vrot.slane %v2213_v29, 7 }
0x439b   :  { %v2217_v34 = vadd.f32 %v2215_v30, %v6329_v32 }
0x439d   :  { %5096 = vtanh.f32 %v2217_v34  ;;  %v4659_v38 = vmul.f32 -1.442695, %v2217_v34 }
0x439f   :  { %5098 = vpow2.f32 %v4659_v38 }
0x43aa   :  { %v5097_v33 = vpop.eup %5096 }
0x43ab   :  { %2230 = vrot.lane.b32.xlu0 %v5097_v33, %s5512_s11 }
0x43ac   :  { %v5099_v14 = vpop.eup %5098 }
0x43ad   :  { %v2221_v15 = vadd.f32 1.0, %v5099_v14 }
0x43af   :  { %5100 = vrcp.f32 %v2221_v15 }
0x43bc   :  { %v5101_v26 = vpop.eup %5100 }
0x43bd   :  { %v2228_v58 = vmul.f32 %v5101_v26, %v2226_v50 }
0x441d   :  { %v2231_v46 = vpop.permute.xlu0 %2230 }
0x441e   :  { %v2233_v49 = vmul.f32 %v5101_v26, %v2231_v46 }
0x4420   :  { %2235 = vrot.lane.b32.xlu1 %v2233_v49, %s5513_s12 }
0x4492   :  { %v2236_v0 = vpop.permute.xlu1 %2235 }
0x4493   :  { %v2238_v9 = vadd.f32 %v2236_v0, %v2228_v58 }
0x4495   :  { %5102 = vtanh.f32 %v2238_v9  ;;  %v2277_v58 = vrot.slane %v2238_v9, 7 }
0x44a2   :  { %v5103_v48 = vpop.eup %5102 }
0x44a3   :  { %2241 = vrot.lane.b32.xlu0 %v5103_v48, %s5513_s12 }
0x4515   :  { %v2242_v55 = vpop.permute.xlu0 %2241 }
0x4516   :  { %v6357_v6 = vmul.f32 %v5101_v26, %v2242_v55 }
0x4518   :  { %2255 = vrot.lane.b32.xlu0 %v6357_v6, %s5514_s13  ;;  %2252 = vrot.lane.b32.xlu1 %v6357_v6, %s5515_s14 }
0x451c   :  { %2258 = vrot.lane.b32.xlu1 %v6357_v6, %s5513_s12 }
0x458a   :  { %v2256_v47 = vpop.permute.xlu0 %2255  ;;  %v2253_v12 = vpop.permute.xlu1 %2252 }
0x458b   :  { %v2261_v59 = vsel %vm565_vm1, %v2253_v12, %v2256_v47 }
0x458c   :  { %v2262_v16 = vsel %vm567_vm2, %v2261_v59, %v6357_v6 }
0x458e   :  { %v2259_v18 = vpop.permute.xlu1 %2258 }
0x458f   :  { %v2263_v29 = vsel %vm569_vm3, %v2262_v16, %v2259_v18 }
0x4590   :  { %v2264_v30 = vmul.f32 %v2263_v29, %v5698_v43 }
0x4592   :  { %v2266_v34 = vrot.slane %v2264_v30, 7 }
0x4594   :  { %v2268_v33 = vadd.f32 %v2266_v34, %v6329_v32 }
0x4596   :  { %5104 = vtanh.f32 %v2268_v33  ;;  %v4660_v14 = vmul.f32 -1.442695, %v2268_v33 }
0x4598   :  { %5106 = vpow2.f32 %v4660_v14 }
0x45a3   :  { %v5105_v38 = vpop.eup %5104 }
0x45a4   :  { %2281 = vrot.lane.b32.xlu0 %v5105_v38, %s5512_s11 }
0x45a5   :  { %v5107_v15 = vpop.eup %5106 }
0x45a6   :  { %v2272_v26 = vadd.f32 1.0, %v5107_v15 }
0x45a8   :  { %5108 = vrcp.f32 %v2272_v26 }
0x45b5   :  { %v5109_v46 = vpop.eup %5108 }
0x45b6   :  { %v2279_v0 = vmul.f32 %v5109_v46, %v2277_v58 }
0x4616   :  { %v2282_v49 = vpop.permute.xlu0 %2281 }
0x4617   :  { %v2284_v50 = vmul.f32 %v5109_v46, %v2282_v49 }
0x4619   :  { %2286 = vrot.lane.b32.xlu1 %v2284_v50, %s5513_s12 }
0x468b   :  { %v2287_v48 = vpop.permute.xlu1 %2286 }
0x468c   :  { %v2289_v55 = vadd.f32 %v2287_v48, %v2279_v0 }
0x468e   :  { %5110 = vtanh.f32 %v2289_v55  ;;  %v2328_v48 = vrot.slane %v2289_v55, 7 }
0x469b   :  { %v5111_v47 = vpop.eup %5110 }
0x469c   :  { %2292 = vrot.lane.b32.xlu0 %v5111_v47, %s5513_s12 }
0x470e   :  { %v2293_v12 = vpop.permute.xlu0 %2292 }
0x470f   :  { %v6374_v59 = vmul.f32 %v5109_v46, %v2293_v12 }
0x4711   :  { %2306 = vrot.lane.b32.xlu0 %v6374_v59, %s5514_s13  ;;  %2303 = vrot.lane.b32.xlu1 %v6374_v59, %s5515_s14 }
0x4715   :  { %2309 = vrot.lane.b32.xlu1 %v6374_v59, %s5513_s12 }
0x4783   :  { %v2307_v9 = vpop.permute.xlu0 %2306  ;;  %v2304_v16 = vpop.permute.xlu1 %2303 }
0x4784   :  { %v2312_v18 = vsel %vm565_vm1, %v2304_v16, %v2307_v9 }
0x4785   :  { %v2313_v29 = vsel %vm567_vm2, %v2312_v18, %v6374_v59 }
0x4787   :  { %v2310_v30 = vpop.permute.xlu1 %2309 }
0x4788   :  { %v2314_v34 = vsel %vm569_vm3, %v2313_v29, %v2310_v30 }
0x4789   :  { %v2315_v33 = vmul.f32 %v2314_v34, %v5698_v43 }
0x478b   :  { %v2317_v38 = vrot.slane %v2315_v33, 7 }
0x478d   :  { %v2319_v14 = vadd.f32 %v2317_v38, %v6329_v32 }
0x478f   :  { %5112 = vtanh.f32 %v2319_v14  ;;  %v4661_v26 = vmul.f32 -1.442695, %v2319_v14 }
0x4791   :  { %5114 = vpow2.f32 %v4661_v26 }
0x479c   :  { %v5113_v15 = vpop.eup %5112 }
0x479d   :  { %2332 = vrot.lane.b32.xlu0 %v5113_v15, %s5512_s11 }
0x479e   :  { %v5115_v46 = vpop.eup %5114 }
0x479f   :  { %v2323_v49 = vadd.f32 1.0, %v5115_v46 }
0x47a1   :  { %5116 = vrcp.f32 %v2323_v49 }
0x47ae   :  { %v5117_v50 = vpop.eup %5116 }
0x47af   :  { %v2330_v47 = vmul.f32 %v5117_v50, %v2328_v48 }
0x480f   :  { %v2333_v58 = vpop.permute.xlu0 %2332 }
0x4810   :  { %v2335_v0 = vmul.f32 %v5117_v50, %v2333_v58 }
0x4812   :  { %2337 = vrot.lane.b32.xlu1 %v2335_v0, %s5513_s12 }
0x4884   :  { %v2338_v12 = vpop.permute.xlu1 %2337 }
0x4885   :  { %v2340_v9 = vadd.f32 %v2338_v12, %v2330_v47 }
0x4887   :  { %5118 = vtanh.f32 %v2340_v9 }
0x4894   :  { %v5119_v16 = vpop.eup %5118 }
0x4895   :  { %2343 = vrot.lane.b32.xlu0 %v5119_v16, %s5513_s12  ;;  %v2379_v16 = vrot.slane %v2340_v9, 7 }
0x4907   :  { %v2344_v18 = vpop.permute.xlu0 %2343 }
0x4908   :  { %v6391_v29 = vmul.f32 %v5117_v50, %v2344_v18 }
0x490a   :  { %2357 = vrot.lane.b32.xlu0 %v6391_v29, %s5514_s13  ;;  %2354 = vrot.lane.b32.xlu1 %v6391_v29, %s5515_s14 }
0x490e   :  { %2360 = vrot.lane.b32.xlu1 %v6391_v29, %s5513_s12 }
0x497c   :  { %v2358_v55 = vpop.permute.xlu0 %2357  ;;  %v2355_v30 = vpop.permute.xlu1 %2354 }
0x497d   :  { %v2363_v34 = vsel %vm565_vm1, %v2355_v30, %v2358_v55 }
0x497e   :  { %v2364_v33 = vsel %vm567_vm2, %v2363_v34, %v6391_v29 }
0x4980   :  { %v2361_v38 = vpop.permute.xlu1 %2360 }
0x4981   :  { %v2365_v14 = vsel %vm569_vm3, %v2364_v33, %v2361_v38 }
0x4982   :  { %v2366_v15 = vmul.f32 %v2365_v14, %v5698_v43 }
0x4984   :  { %v2368_v26 = vrot.slane %v2366_v15, 7 }
0x4986   :  { %v2370_v46 = vadd.f32 %v2368_v26, %v6329_v32 }
0x4988   :  { %5120 = vtanh.f32 %v2370_v46  ;;  %v4662_v50 = vmul.f32 -1.442695, %v2370_v46 }
0x498a   :  { %5122 = vpow2.f32 %v4662_v50 }
0x4995   :  { %v5121_v49 = vpop.eup %5120 }
0x4996   :  { %2383 = vrot.lane.b32.xlu0 %v5121_v49, %s5512_s11 }
0x4997   :  { %v5123_v58 = vpop.eup %5122 }
0x4998   :  { %v2374_v0 = vadd.f32 1.0, %v5123_v58 }
0x499a   :  { %5124 = vrcp.f32 %v2374_v0 }
0x49a7   :  { %v5125_v48 = vpop.eup %5124 }
0x49a8   :  { %v2381_v18 = vmul.f32 %v5125_v48, %v2379_v16 }
0x4a08   :  { %v2384_v47 = vpop.permute.xlu0 %2383 }
0x4a09   :  { %v2386_v12 = vmul.f32 %v5125_v48, %v2384_v47 }
0x4a0b   :  { %2388 = vrot.lane.b32.xlu1 %v2386_v12, %s5513_s12 }
0x4a7d   :  { %v2389_v55 = vpop.permute.xlu1 %2388 }
0x4a7e   :  { %v2391_v30 = vadd.f32 %v2389_v55, %v2381_v18 }
0x4a80   :  { %5126 = vtanh.f32 %v2391_v30 }
0x4a8d   :  { %v5127_v34 = vpop.eup %5126 }
0x4a8e   :  { %2394 = vrot.lane.b32.xlu0 %v5127_v34, %s5513_s12 }
0x4b00   :  { %v2395_v33 = vpop.permute.xlu0 %2394 }
0x4b01   :  { %v6408_v38 = vmul.f32 %v5125_v48, %v2395_v33  ;;  %v2430_v33 = vrot.slane %v2391_v30, 7 }
0x4b03   :  { %7433 = vst [vmem:[#allocation6_spill] sm:$0xff] %v6408_v38  ;;  %2408 = vrot.lane.b32.xlu0 %v6408_v38, %s5514_s13  ;;  %2405 = vrot.lane.b32.xlu1 %v6408_v38, %s5515_s14 }
0x4b07   :  { %2411 = vrot.lane.b32.xlu1 %v6408_v38, %s5513_s12 }
0x4b75   :  { %v2409_v9 = vpop.permute.xlu0 %2408  ;;  %v2406_v14 = vpop.permute.xlu1 %2405 }
0x4b76   :  { %v2414_v15 = vsel %vm565_vm1, %v2406_v14, %v2409_v9 }
0x4b77   :  { %v2415_v26 = vsel %vm567_vm2, %v2414_v15, %v6408_v38 }
0x4b79   :  { %v2412_v46 = vpop.permute.xlu1 %2411 }
0x4b7a   :  { %v2416_v49 = vsel %vm569_vm3, %v2415_v26, %v2412_v46 }
0x4b7b   :  { %v2417_v50 = vmul.f32 %v2416_v49, %v5698_v43 }
0x4b7d   :  { %v2419_v58 = vrot.slane %v2417_v50, 7 }
0x4b7f   :  { %v2421_v0 = vadd.f32 %v2419_v58, %v6329_v32 }
0x4b81   :  { %5128 = vtanh.f32 %v2421_v0  ;;  %v4663_v47 = vmul.f32 -1.442695, %v2421_v0 }
0x4b83   :  { %5130 = vpow2.f32 %v4663_v47 }
0x4b8e   :  { %v5129_v48 = vpop.eup %5128 }
0x4b8f   :  { %2434 = vrot.lane.b32.xlu0 %v5129_v48, %s5512_s11 }
0x4b90   :  { %v5131_v12 = vpop.eup %5130 }
0x4b91   :  { %v2425_v16 = vadd.f32 1.0, %v5131_v12 }
0x4b93   :  { %5132 = vrcp.f32 %v2425_v16 }
0x4ba0   :  { %v5133_v18 = vpop.eup %5132 }
0x4ba1   :  { %v2432_v9 = vmul.f32 %v5133_v18, %v2430_v33 }
0x4c01   :  { %v2435_v55 = vpop.permute.xlu0 %2434 }
0x4c02   :  { %v2437_v34 = vmul.f32 %v5133_v18, %v2435_v55 }
0x4c04   :  { %2439 = vrot.lane.b32.xlu1 %v2437_v34, %s5513_s12 }
0x4c76   :  { %v2440_v14 = vpop.permute.xlu1 %2439 }
0x4c77   :  { %v2442_v15 = vadd.f32 %v2440_v14, %v2432_v9 }
0x4c79   :  { %5134 = vtanh.f32 %v2442_v15 }
0x4c86   :  { %v5135_v26 = vpop.eup %5134 }
0x4c87   :  { %2445 = vrot.lane.b32.xlu0 %v5135_v26, %s5513_s12 }
0x4cf9   :  { %v2446_v46 = vpop.permute.xlu0 %2445 }
0x4cfa   :  { %v6425_v49 = vmul.f32 %v5133_v18, %v2446_v46 }
0x4cfc   :  { %7434 = vst [vmem:[#allocation7_spill] sm:$0xff] %v6425_v49  ;;  %2459 = vrot.lane.b32.xlu0 %v6425_v49, %s5514_s13  ;;  %2456 = vrot.lane.b32.xlu1 %v6425_v49, %s5515_s14 }
0x4d00   :  { %2462 = vrot.lane.b32.xlu1 %v6425_v49, %s5513_s12 }
0x4d6e   :  { %v2460_v30 = vpop.permute.xlu0 %2459  ;;  %v2457_v50 = vpop.permute.xlu1 %2456 }
0x4d6f   :  { %v2465_v58 = vsel %vm565_vm1, %v2457_v50, %v2460_v30  ;;  %v2481_v30 = vrot.slane %v2442_v15, 7 }
0x4d70   :  { %v2466_v0 = vsel %vm567_vm2, %v2465_v58, %v6425_v49 }
0x4d72   :  { %v2463_v48 = vpop.permute.xlu1 %2462 }
0x4d73   :  { %v2467_v47 = vsel %vm569_vm3, %v2466_v0, %v2463_v48 }
0x4d74   :  { %v2468_v12 = vmul.f32 %v2467_v47, %v5698_v43 }
0x4d76   :  { %v2470_v16 = vrot.slane %v2468_v12, 7 }
0x4d78   :  { %v2472_v18 = vadd.f32 %v2470_v16, %v6329_v32 }
0x4d7a   :  { %5136 = vtanh.f32 %v2472_v18  ;;  %v4664_v34 = vmul.f32 -1.442695, %v2472_v18 }
0x4d7c   :  { %5138 = vpow2.f32 %v4664_v34 }
0x4d87   :  { %v5137_v55 = vpop.eup %5136 }
0x4d88   :  { %2485 = vrot.lane.b32.xlu0 %v5137_v55, %s5512_s11 }
0x4d89   :  { %v5139_v33 = vpop.eup %5138 }
0x4d8a   :  { %v2476_v9 = vadd.f32 1.0, %v5139_v33 }
0x4d8c   :  { %5140 = vrcp.f32 %v2476_v9 }
0x4d99   :  { %v5141_v14 = vpop.eup %5140 }
0x4d9a   :  { %v2483_v50 = vmul.f32 %v5141_v14, %v2481_v30 }
0x4dfa   :  { %v2486_v26 = vpop.permute.xlu0 %2485 }
0x4dfb   :  { %v2488_v46 = vmul.f32 %v5141_v14, %v2486_v26 }
0x4dfd   :  { %2490 = vrot.lane.b32.xlu1 %v2488_v46, %s5513_s12 }
0x4e6f   :  { %v2491_v58 = vpop.permute.xlu1 %2490 }
0x4e70   :  { %v2493_v0 = vadd.f32 %v2491_v58, %v2483_v50 }
0x4e72   :  { %5142 = vtanh.f32 %v2493_v0 }
0x4e7f   :  { %v5143_v48 = vpop.eup %5142 }
0x4e80   :  { %2496 = vrot.lane.b32.xlu0 %v5143_v48, %s5513_s12 }
0x4ef2   :  { %v2497_v47 = vpop.permute.xlu0 %2496 }
0x4ef3   :  { %v6442_v12 = vmul.f32 %v5141_v14, %v2497_v47 }
0x4ef5   :  { %7435 = vst [vmem:[#allocation8_spill] sm:$0xff] %v6442_v12  ;;  %2510 = vrot.lane.b32.xlu0 %v6442_v12, %s5514_s13  ;;  %2507 = vrot.lane.b32.xlu1 %v6442_v12, %s5515_s14 }
0x4ef9   :  { %2513 = vrot.lane.b32.xlu1 %v6442_v12, %s5513_s12 }
0x4f67   :  { %v2511_v15 = vpop.permute.xlu0 %2510  ;;  %v2508_v16 = vpop.permute.xlu1 %2507 }
0x4f68   :  { %v2516_v18 = vsel %vm565_vm1, %v2508_v16, %v2511_v15  ;;  %v2532_v16 = vrot.slane %v2493_v0, 7  ;;  %v465_v0 = vld [vmem:[%s7391_s6 + $0x28] sm:$0xff] }
0x4f69   :  { %v2517_v55 = vsel %vm567_vm2, %v2516_v18, %v6442_v12 }
0x4f6b   :  { %v2514_v34 = vpop.permute.xlu1 %2513 }
0x4f6c   :  { %v2518_v33 = vsel %vm569_vm3, %v2517_v55, %v2514_v34 }
0x4f6d   :  { %v2519_v9 = vmul.f32 %v2518_v33, %v5698_v43 }
0x4f6f   :  { %v2521_v14 = vrot.slane %v2519_v9, 7 }
0x4f71   :  { %v2523_v26 = vadd.f32 %v2521_v14, %v6329_v32 }
0x4f73   :  { %5144 = vtanh.f32 %v2523_v26  ;;  %v4665_v30 = vmul.f32 -1.442695, %v2523_v26 }
0x4f75   :  { %5146 = vpow2.f32 %v4665_v30 }
0x4f80   :  { %v5145_v46 = vpop.eup %5144 }
0x4f81   :  { %2536 = vrot.lane.b32.xlu0 %v5145_v46, %s5512_s11 }
0x4f82   :  { %v5147_v50 = vpop.eup %5146 }
0x4f83   :  { %v2527_v58 = vadd.f32 1.0, %v5147_v50 }
0x4f85   :  { %5148 = vrcp.f32 %v2527_v58 }
0x4f92   :  { %v5149_v48 = vpop.eup %5148 }
0x4f93   :  { %v2534_v18 = vmul.f32 %v5149_v48, %v2532_v16  ;;  %v437_v16 = vadd.f32 %v6325_v24, %v6315_v7 }
0x4ff3   :  { %v2537_v47 = vpop.permute.xlu0 %2536 }
0x4ff4   :  { %v2539_v15 = vmul.f32 %v5149_v48, %v2537_v47 }
0x4ff6   :  { %2541 = vrot.lane.b32.xlu1 %v2539_v15, %s5513_s12 }
0x5068   :  { %v2542_v55 = vpop.permute.xlu1 %2541 }
0x5069   :  { %v2544_v34 = vadd.f32 %v2542_v55, %v2534_v18 }
0x506b   :  { %5150 = vtanh.f32 %v2544_v34  ;;  %v2583_v7 = vrot.slane %v2544_v34, 7 }
0x5078   :  { %v5151_v33 = vpop.eup %5150 }
0x5079   :  { %2547 = vrot.lane.b32.xlu0 %v5151_v33, %s5513_s12 }
0x50eb   :  { %v2548_v9 = vpop.permute.xlu0 %2547 }
0x50ec   :  { %v6459_v14 = vmul.f32 %v5149_v48, %v2548_v9 }
0x50ee   :  { %7436 = vst [vmem:[#allocation9_spill] sm:$0xff] %v6459_v14  ;;  %2561 = vrot.lane.b32.xlu0 %v6459_v14, %s5514_s13  ;;  %2558 = vrot.lane.b32.xlu1 %v6459_v14, %s5515_s14 }
0x50f2   :  { %490 = vrot.lane.b32.xlu0 %v465_v0, %s5511_s29  ;;  %2564 = vrot.lane.b32.xlu1 %v6459_v14, %s5513_s12 }
0x5160   :  { %v2562_v26 = vpop.permute.xlu0 %2561  ;;  %v2559_v46 = vpop.permute.xlu1 %2558 }
0x5161   :  { %v2567_v30 = vsel %vm565_vm1, %v2559_v46, %v2562_v26 }
0x5162   :  { %v2568_v50 = vsel %vm567_vm2, %v2567_v30, %v6459_v14 }
0x5164   :  { %v2565_v58 = vpop.permute.xlu1 %2564  ;;  %v491_v47 = vpop.permute.xlu0 %490 }
0x5165   :  { %v2569_v48 = vsel %vm569_vm3, %v2568_v50, %v2565_v58  ;;  %v6479_v55 = vsel %vm510_vm0, %v437_v16, %v491_v47 }
0x5166   :  { %v2570_v15 = vmul.f32 %v2569_v48, %v5698_v43 }
0x5168   :  { %v2572_v18 = vrot.slane %v2570_v15, 7 }
0x516a   :  { %v2574_v33 = vadd.f32 %v2572_v18, %v6479_v55 }
0x516c   :  { %5152 = vtanh.f32 %v2574_v33  ;;  %v4666_v0 = vmul.f32 -1.442695, %v2574_v33 }
0x516e   :  { %5154 = vpow2.f32 %v4666_v0 }
0x5179   :  { %v5153_v9 = vpop.eup %5152 }
0x517a   :  { %2587 = vrot.lane.b32.xlu1 %v5153_v9, %s5512_s11 }
0x517b   :  { %v5155_v26 = vpop.eup %5154 }
0x517c   :  { %v2578_v46 = vadd.f32 1.0, %v5155_v26 }
0x517e   :  { %5156 = vrcp.f32 %v2578_v46 }
0x518b   :  { %v5157_v30 = vpop.eup %5156 }
0x518c   :  { %v2585_v24 = vmul.f32 %v5157_v30, %v2583_v7 }
0x51ec   :  { %v2588_v50 = vpop.permute.xlu1 %2587 }
0x51ed   :  { %v2590_v58 = vmul.f32 %v5157_v30, %v2588_v50 }
0x51ef   :  { %2592 = vrot.lane.b32.xlu0 %v2590_v58, %s5513_s12 }
0x5261   :  { %v2593_v48 = vpop.permute.xlu0 %2592 }
0x5262   :  { %v2595_v47 = vadd.f32 %v2593_v48, %v2585_v24 }
0x5264   :  { %5158 = vtanh.f32 %v2595_v47 }
0x5271   :  { %v5159_v15 = vpop.eup %5158 }
0x5272   :  { %2598 = vrot.lane.b32.xlu1 %v5159_v15, %s5513_s12 }
0x52e4   :  { %v2599_v16 = vpop.permute.xlu1 %2598 }
0x52e5   :  { %v6485_v18 = vmul.f32 %v5157_v30, %v2599_v16 }
0x52e7   :  { %7437 = vst [vmem:[#allocation10_spill] sm:$0xff] %v6485_v18  ;;  %2613 = vrot.lane.b32.xlu1 %v6485_v18, %s5514_s13  ;;  %2610 = vrot.lane.b32.xlu0 %v6485_v18, %s5515_s14 }
0x52eb   :  { %2616 = vrot.lane.b32.xlu0 %v6485_v18, %s5513_s12 }
0x5359   :  { %v2614_v34 = vpop.permute.xlu1 %2613  ;;  %v2611_v33 = vpop.permute.xlu0 %2610 }
0x535a   :  { %v2619_v9 = vsel %vm565_vm1, %v2611_v33, %v2614_v34 }
0x535b   :  { %v2620_v0 = vsel %vm567_vm2, %v2619_v9, %v6485_v18  ;;  %v2635_v9 = vrot.slane %v2595_v47, 7 }
0x535d   :  { %v2617_v26 = vpop.permute.xlu0 %2616 }
0x535e   :  { %v2621_v46 = vsel %vm569_vm3, %v2620_v0, %v2617_v26 }
0x535f   :  { %v2622_v30 = vmul.f32 %v6350_v20, %v2621_v46 }
0x5361   :  { %v2624_v50 = vrot.slane %v2622_v30, 7 }
0x5363   :  { %v2626_v58 = vadd.f32 %v2624_v50, %v6479_v55 }
0x5365   :  { %5160 = vtanh.f32 %v2626_v58  ;;  %v4667_v24 = vmul.f32 -1.442695, %v2626_v58 }
0x5367   :  { %5162 = vpow2.f32 %v4667_v24 }
0x5372   :  { %v5161_v7 = vpop.eup %5160 }
0x5373   :  { %2639 = vrot.lane.b32.xlu1 %v5161_v7, %s5512_s11 }
0x5374   :  { %v5163_v48 = vpop.eup %5162 }
0x5375   :  { %v2630_v15 = vadd.f32 1.0, %v5163_v48 }
0x5377   :  { %5164 = vrcp.f32 %v2630_v15 }
0x5384   :  { %v5165_v16 = vpop.eup %5164 }
0x5385   :  { %v2637_v0 = vmul.f32 %v5165_v16, %v2635_v9 }
0x53e5   :  { %v2640_v34 = vpop.permute.xlu1 %2639 }
0x53e6   :  { %v2642_v33 = vmul.f32 %v5165_v16, %v2640_v34 }
0x53e8   :  { %2644 = vrot.lane.b32.xlu0 %v2642_v33, %s5513_s12 }
0x545a   :  { %v2645_v20 = vpop.permute.xlu0 %2644 }
0x545b   :  { %v2647_v26 = vadd.f32 %v2645_v20, %v2637_v0 }
0x545d   :  { %5166 = vtanh.f32 %v2647_v26 }
0x546a   :  { %v5167_v46 = vpop.eup %5166 }
0x546b   :  { %2650 = vrot.lane.b32.xlu1 %v5167_v46, %s5513_s12 }
0x54dd   :  { %v2651_v30 = vpop.permute.xlu1 %2650 }
0x54de   :  { %v6502_v50 = vmul.f32 %v5165_v16, %v2651_v30 }
0x54e0   :  { %7438 = vst [vmem:[#allocation11_spill] sm:$0xff] %v6502_v50  ;;  %2664 = vrot.lane.b32.xlu1 %v6502_v50, %s5514_s13  ;;  %2661 = vrot.lane.b32.xlu0 %v6502_v50, %s5515_s14 }
0x54e4   :  { %2667 = vrot.lane.b32.xlu0 %v6502_v50, %s5513_s12 }
0x5552   :  { %v2665_v47 = vpop.permute.xlu1 %2664  ;;  %v2662_v58 = vpop.permute.xlu0 %2661 }
0x5553   :  { %v2670_v7 = vsel %vm565_vm1, %v2662_v58, %v2665_v47 }
0x5554   :  { %v2671_v24 = vsel %vm567_vm2, %v2670_v7, %v6502_v50  ;;  %v2686_v7 = vrot.slane %v2647_v26, 7 }
0x5556   :  { %v2668_v48 = vpop.permute.xlu0 %2667 }
0x5557   :  { %v2672_v15 = vsel %vm569_vm3, %v2671_v24, %v2668_v48 }
0x5558   :  { %v2673_v16 = vmul.f32 %v2672_v15, %v5698_v43 }
0x555a   :  { %v2675_v34 = vrot.slane %v2673_v16, 7 }
0x555c   :  { %v2677_v33 = vadd.f32 %v2675_v34, %v6479_v55 }
0x555e   :  { %5168 = vtanh.f32 %v2677_v33  ;;  %v4668_v0 = vmul.f32 -1.442695, %v2677_v33 }
0x5560   :  { %5170 = vpow2.f32 %v4668_v0 }
0x556b   :  { %v5169_v9 = vpop.eup %5168 }
0x556c   :  { %2690 = vrot.lane.b32.xlu1 %v5169_v9, %s5512_s11 }
0x556d   :  { %v5171_v20 = vpop.eup %5170 }
0x556e   :  { %v2681_v46 = vadd.f32 1.0, %v5171_v20 }
0x5570   :  { %5172 = vrcp.f32 %v2681_v46 }
0x557d   :  { %v5173_v30 = vpop.eup %5172 }
0x557e   :  { %v2688_v24 = vmul.f32 %v5173_v30, %v2686_v7 }
0x55de   :  { %v2691_v47 = vpop.permute.xlu1 %2690 }
0x55df   :  { %v2693_v58 = vmul.f32 %v5173_v30, %v2691_v47 }
0x55e1   :  { %2695 = vrot.lane.b32.xlu0 %v2693_v58, %s5513_s12 }
0x5653   :  { %v2696_v48 = vpop.permute.xlu0 %2695 }
0x5654   :  { %v2698_v15 = vadd.f32 %v2696_v48, %v2688_v24 }
0x5656   :  { %5174 = vtanh.f32 %v2698_v15 }
0x5663   :  { %v5175_v16 = vpop.eup %5174 }
0x5664   :  { %2701 = vrot.lane.b32.xlu1 %v5175_v16, %s5513_s12 }
0x56d6   :  { %v2702_v34 = vpop.permute.xlu1 %2701 }
0x56d7   :  { %v6519_v9 = vmul.f32 %v5173_v30, %v2702_v34 }
0x56d9   :  { %7439 = vst [vmem:[#allocation12_spill] sm:$0xff] %v6519_v9  ;;  %2715 = vrot.lane.b32.xlu1 %v6519_v9, %s5514_s13  ;;  %2712 = vrot.lane.b32.xlu0 %v6519_v9, %s5515_s14 }
0x56dd   :  { %2718 = vrot.lane.b32.xlu0 %v6519_v9, %s5513_s12 }
0x574b   :  { %v2716_v26 = vpop.permute.xlu1 %2715  ;;  %v2713_v33 = vpop.permute.xlu0 %2712 }
0x574c   :  { %v2721_v0 = vsel %vm565_vm1, %v2713_v33, %v2716_v26 }
0x574d   :  { %v2722_v20 = vsel %vm567_vm2, %v2721_v0, %v6519_v9 }
0x574f   :  { %v2719_v46 = vpop.permute.xlu0 %2718 }
0x5750   :  { %v2723_v30 = vsel %vm569_vm3, %v2722_v20, %v2719_v46  ;;  %v2737_v20 = vrot.slane %v2698_v15, 7 }
0x5751   :  { %v2724_v47 = vmul.f32 %v2723_v30, %v5698_v43 }
0x5753   :  { %v2726_v58 = vrot.slane %v2724_v47, 7 }
0x5755   :  { %v2728_v7 = vadd.f32 %v2726_v58, %v6479_v55 }
0x5757   :  { %5176 = vtanh.f32 %v2728_v7  ;;  %v4669_v48 = vmul.f32 -1.442695, %v2728_v7 }
0x5759   :  { %5178 = vpow2.f32 %v4669_v48 }
0x5764   :  { %v5177_v24 = vpop.eup %5176 }
0x5765   :  { %2741 = vrot.lane.b32.xlu1 %v5177_v24, %s5512_s11 }
0x5766   :  { %v5179_v16 = vpop.eup %5178 }
0x5767   :  { %v2732_v34 = vadd.f32 1.0, %v5179_v16 }
0x5769   :  { %5180 = vrcp.f32 %v2732_v34 }
0x5776   :  { %v5181_v26 = vpop.eup %5180 }
0x5777   :  { %v2739_v46 = vmul.f32 %v5181_v26, %v2737_v20 }
0x57d7   :  { %v2742_v33 = vpop.permute.xlu1 %2741 }
0x57d8   :  { %v2744_v0 = vmul.f32 %v5181_v26, %v2742_v33 }
0x57da   :  { %2746 = vrot.lane.b32.xlu0 %v2744_v0, %s5513_s12 }
0x584c   :  { %v2747_v30 = vpop.permute.xlu0 %2746 }
0x584d   :  { %v2749_v47 = vadd.f32 %v2747_v30, %v2739_v46 }
0x584f   :  { %5182 = vtanh.f32 %v2749_v47 }
0x585c   :  { %v5183_v58 = vpop.eup %5182 }
0x585d   :  { %2752 = vrot.lane.b32.xlu1 %v5183_v58, %s5513_s12 }
0x58cf   :  { %v2753_v9 = vpop.permute.xlu1 %2752 }
0x58d0   :  { %v6536_v24 = vmul.f32 %v5181_v26, %v2753_v9 }
0x58d2   :  { %7440 = vst [vmem:[#allocation13_spill] sm:$0xff] %v6536_v24  ;;  %2766 = vrot.lane.b32.xlu1 %v6536_v24, %s5514_s13  ;;  %2763 = vrot.lane.b32.xlu0 %v6536_v24, %s5515_s14 }
0x58d6   :  { %2769 = vrot.lane.b32.xlu0 %v6536_v24, %s5513_s12 }
0x5944   :  { %v2767_v15 = vpop.permute.xlu1 %2766  ;;  %v2764_v7 = vpop.permute.xlu0 %2763 }
0x5945   :  { %v2772_v48 = vsel %vm565_vm1, %v2764_v7, %v2767_v15 }
0x5946   :  { %v2773_v16 = vsel %vm567_vm2, %v2772_v48, %v6536_v24 }
0x5948   :  { %v2770_v34 = vpop.permute.xlu0 %2769 }
0x5949   :  { %v2774_v9 = vsel %vm569_vm3, %v2773_v16, %v2770_v34  ;;  %v2788_v16 = vrot.slane %v2749_v47, 7 }
0x594a   :  { %v2775_v26 = vmul.f32 %v2774_v9, %v5698_v43 }
0x594c   :  { %v2777_v33 = vrot.slane %v2775_v26, 7 }
0x594e   :  { %v2779_v0 = vadd.f32 %v2777_v33, %v6479_v55 }
0x5950   :  { %5184 = vtanh.f32 %v2779_v0  ;;  %v4670_v46 = vmul.f32 -1.442695, %v2779_v0 }
0x5952   :  { %5186 = vpow2.f32 %v4670_v46 }
0x595d   :  { %v5185_v20 = vpop.eup %5184 }
0x595e   :  { %2792 = vrot.lane.b32.xlu1 %v5185_v20, %s5512_s11 }
0x595f   :  { %v5187_v30 = vpop.eup %5186 }
0x5960   :  { %v2783_v58 = vadd.f32 1.0, %v5187_v30 }
0x5962   :  { %5188 = vrcp.f32 %v2783_v58 }
0x596f   :  { %v5189_v15 = vpop.eup %5188 }
0x5970   :  { %v2790_v34 = vmul.f32 %v5189_v15, %v2788_v16 }
0x59d0   :  { %v2793_v7 = vpop.permute.xlu1 %2792 }
0x59d1   :  { %v2795_v48 = vmul.f32 %v5189_v15, %v2793_v7 }
0x59d3   :  { %2797 = vrot.lane.b32.xlu0 %v2795_v48, %s5513_s12 }
0x5a45   :  { %v2798_v9 = vpop.permute.xlu0 %2797 }
0x5a46   :  { %v2800_v26 = vadd.f32 %v2798_v9, %v2790_v34 }
0x5a48   :  { %5190 = vtanh.f32 %v2800_v26 }
0x5a55   :  { %v5191_v33 = vpop.eup %5190 }
0x5a56   :  { %2803 = vrot.lane.b32.xlu1 %v5191_v33, %s5513_s12 }
0x5ac8   :  { %v2804_v24 = vpop.permute.xlu1 %2803 }
0x5ac9   :  { %v6553_v20 = vmul.f32 %v5189_v15, %v2804_v24 }
0x5acb   :  { %7441 = vst [vmem:[#allocation14_spill] sm:$0xff] %v6553_v20  ;;  %2817 = vrot.lane.b32.xlu1 %v6553_v20, %s5514_s13  ;;  %2814 = vrot.lane.b32.xlu0 %v6553_v20, %s5515_s14 }
0x5acf   :  { %2820 = vrot.lane.b32.xlu0 %v6553_v20, %s5513_s12 }
0x5b3d   :  { %v2818_v47 = vpop.permute.xlu1 %2817  ;;  %v2815_v0 = vpop.permute.xlu0 %2814 }
0x5b3e   :  { %v2823_v46 = vsel %vm565_vm1, %v2815_v0, %v2818_v47 }
0x5b3f   :  { %v2824_v30 = vsel %vm567_vm2, %v2823_v46, %v6553_v20 }
0x5b41   :  { %v2821_v58 = vpop.permute.xlu0 %2820 }
0x5b42   :  { %v2825_v24 = vsel %vm569_vm3, %v2824_v30, %v2821_v58  ;;  %v2839_v30 = vrot.slane %v2800_v26, 7 }
0x5b43   :  { %v2826_v15 = vmul.f32 %v2825_v24, %v5698_v43 }
0x5b45   :  { %v2828_v7 = vrot.slane %v2826_v15, 7 }
0x5b47   :  { %v2830_v48 = vadd.f32 %v2828_v7, %v6479_v55 }
0x5b49   :  { %5192 = vtanh.f32 %v2830_v48  ;;  %v4671_v34 = vmul.f32 -1.442695, %v2830_v48 }
0x5b4b   :  { %5194 = vpow2.f32 %v4671_v34 }
0x5b56   :  { %v5193_v16 = vpop.eup %5192 }
0x5b57   :  { %2843 = vrot.lane.b32.xlu1 %v5193_v16, %s5512_s11 }
0x5b58   :  { %v5195_v9 = vpop.eup %5194 }
0x5b59   :  { %v2834_v33 = vadd.f32 1.0, %v5195_v9 }
0x5b5b   :  { %5196 = vrcp.f32 %v2834_v33 }
0x5b68   :  { %v5197_v47 = vpop.eup %5196 }
0x5b69   :  { %v2841_v58 = vmul.f32 %v5197_v47, %v2839_v30 }
0x5bc9   :  { %v2844_v0 = vpop.permute.xlu1 %2843 }
0x5bca   :  { %v2846_v46 = vmul.f32 %v5197_v47, %v2844_v0 }
0x5bcc   :  { %2848 = vrot.lane.b32.xlu0 %v2846_v46, %s5513_s12 }
0x5c3e   :  { %v2849_v24 = vpop.permute.xlu0 %2848 }
0x5c3f   :  { %v2851_v15 = vadd.f32 %v2849_v24, %v2841_v58  ;;  %v6588_v58 = vld [vmem:[%s7385_s0 + $0x30] sm:$0xff] }
0x5c41   :  { %5198 = vtanh.f32 %v2851_v15 }
0x5c4e   :  { %v5199_v7 = vpop.eup %5198 }
0x5c4f   :  { %2854 = vrot.lane.b32.xlu1 %v5199_v7, %s5513_s12 }
0x5cc1   :  { %v2855_v20 = vpop.permute.xlu1 %2854 }
0x5cc2   :  { %v6570_v16 = vmul.f32 %v5197_v47, %v2855_v20 }
0x5cc4   :  { %7442 = vst [vmem:[#allocation15_spill] sm:$0xff] %v6570_v16  ;;  %2868 = vrot.lane.b32.xlu1 %v6570_v16, %s5514_s13  ;;  %2865 = vrot.lane.b32.xlu0 %v6570_v16, %s5515_s14 }
0x5cc8   :  { %2871 = vrot.lane.b32.xlu0 %v6570_v16, %s5513_s12 }
0x5d36   :  { %v2869_v26 = vpop.permute.xlu1 %2868  ;;  %v2866_v48 = vpop.permute.xlu0 %2865 }
0x5d37   :  { %v2874_v34 = vsel %vm565_vm1, %v2866_v48, %v2869_v26 }
0x5d38   :  { %v2875_v9 = vsel %vm567_vm2, %v2874_v34, %v6570_v16 }
0x5d3a   :  { %v2872_v33 = vpop.permute.xlu0 %2871 }
0x5d3b   :  { %v2876_v20 = vsel %vm569_vm3, %v2875_v9, %v2872_v33  ;;  %v6595_v33 = vld [vmem:[%s7385_s0 + $0x38] sm:$0xff] }
0x5d3c   :  { %v2877_v47 = vmul.f32 %v2876_v20, %v5698_v43 }
0x5d3e   :  { %v2879_v0 = vrot.slane %v2877_v47, 7 }
0x5d40   :  { %v2881_v46 = vadd.f32 %v2879_v0, %v6479_v55 }
0x5d42   :  { %5200 = vtanh.f32 %v2881_v46  ;;  %v4672_v24 = vmul.f32 -1.442695, %v2881_v46 }
0x5d44   :  { %5202 = vpow2.f32 %v4672_v24 }
0x5d4f   :  { %v5201_v30 = vpop.eup %5200 }
0x5d50   :  { %2894 = vrot.lane.b32.xlu1 %v5201_v30, %s5512_s11  ;;  %v2890_v30 = vrot.slane %v2851_v15, 7 }
0x5d51   :  { %v5203_v7 = vpop.eup %5202 }
0x5d52   :  { %v2885_v26 = vadd.f32 1.0, %v5203_v7 }
0x5d54   :  { %5204 = vrcp.f32 %v2885_v26 }
0x5d61   :  { %v5205_v48 = vpop.eup %5204 }
0x5d62   :  { %v2892_v24 = vmul.f32 %v5205_v48, %v2890_v30 }
0x5d74   :  { %53 = vadd.xlane.f32.xlu1 %v6588_v58 }
0x5dc2   :  { %v2895_v34 = vpop.permute.xlu1 %2894 }
0x5dc3   :  { %v2897_v9 = vmul.f32 %v5205_v48, %v2895_v34 }
0x5dc5   :  { %2899 = vrot.lane.b32.xlu0 %v2897_v9, %s5513_s12 }
0x5de4   :  { %55 = vadd.xlane.f32.xlu0 %v6595_v33 }
0x5dfd   :  { %v54_v20 = vpop.xlane.xlu1 %53 }
0x5dfe   :  { %v68_v47 = vmul.f32 0.0078125, %v54_v20 }
0x5e00   :  { %v78_v0 = vsub.f32 %v6588_v58, %v68_v47 }
0x5e02   :  { %v88_v46 = vmul.f32 %v78_v0, %v78_v0 }
0x5e04   :  { %104 = vadd.xlane.f32.xlu1 %v88_v46  ;;  %v128_v46 = vld [vmem:[%s7386_s1 + $0x30] sm:$0xff] }
0x5e37   :  { %v2900_v7 = vpop.permute.xlu0 %2899 }
0x5e38   :  { %v6599_v26 = vadd.f32 %v2900_v7, %v2892_v24 }
0x5e3a   :  { %5206 = vtanh.f32 %v6599_v26 }
0x5e47   :  { %v5207_v34 = vpop.eup %5206 }
0x5e48   :  { %2905 = vrot.lane.b32.xlu0 %v5207_v34, %s5513_s12 }
0x5e6d   :  { %v56_v9 = vpop.xlane.xlu0 %55 }
0x5e6e   :  { %v69_v16 = vmul.f32 0.0078125, %v56_v9 }
0x5e70   :  { %v79_v50 = vsub.f32 %v6595_v33, %v69_v16 }
0x5e72   :  { %v89_v18 = vmul.f32 %v79_v50, %v79_v50 }
0x5e74   :  { %106 = vadd.xlane.f32.xlu1 %v89_v18 }
0x5e8d   :  { %v105_v20 = vpop.xlane.xlu1 %104 }
0x5e8e   :  { %v118_v14 = vmul.f32 0.0078125, %v105_v20  ;;  %v129_v20 = vld [vmem:[%s7386_s1 + $0x38] sm:$0xff] }
0x5e90   :  { %v138_v0 = vadd.f32 1e-05, %v118_v14  ;;  %v168_v14 = vld [vmem:[%s7387_s2 + $0x30] sm:$0xff] }
0x5e92   :  { %5208 = vrsqrt.f32 %v138_v0 }
0x5e9f   :  { %v5209_v15 = vpop.eup %5208 }
0x5ea0   :  { %v158_v7 = vmul.f32 %v5209_v15, %v128_v46  ;;  %v169_v15 = vld [vmem:[%s7387_s2 + $0x38] sm:$0xff] }
0x5ea2   :  { %v178_v18 = vmul.f32 %v158_v7, %v68_v47 }
0x5ea4   :  { %v188_v50 = vsub.f32 %v168_v14, %v178_v18 }
0x5eba   :  { %v2906_v30 = vpop.permute.xlu0 %2905 }
0x5ebb   :  { %v6607_v24 = vmul.f32 %v5205_v48, %v2906_v30 }
0x5ebd   :  { %7443 = vst [vmem:[#allocation16_spill] sm:$0xff] %v6607_v24  ;;  %2919 = vrot.lane.b32.xlu0 %v6607_v24, %s5514_s13  ;;  %2916 = vrot.lane.b32.xlu1 %v6607_v24, %s5515_s14 }
0x5ec1   :  { %2922 = vrot.lane.b32.xlu0 %v6607_v24, %s5513_s12  ;;  %224 = vperm.xlu1 %4819, %v158_v7  }
0x5ec5   :  { %284 = vperm.xlu1 %4819, %v188_v50  }
0x5efd   :  { %v107_v48 = vpop.xlane.xlu1 %106 }
0x5efe   :  { %v119_v34 = vmul.f32 0.0078125, %v107_v48 }
0x5f00   :  { %v139_v9 = vadd.f32 1e-05, %v119_v34 }
0x5f02   :  { %5210 = vrsqrt.f32 %v139_v9 }
0x5f0f   :  { %v5211_v0 = vpop.eup %5210 }
0x5f10   :  { %v159_v47 = vmul.f32 %v5211_v0, %v129_v20 }
0x5f12   :  { %229 = vperm.xlu0 %4818, %v159_v47   ;;  %v179_v46 = vmul.f32 %v159_v47, %v69_v16 }
0x5f14   :  { %v189_v30 = vsub.f32 %v169_v15, %v179_v46 }
0x5f16   :  { %289 = vperm.xlu0 %4818, %v189_v30  }
0x5f2f   :  { %v2920_v7 = vpop.permute.xlu0 %2919  ;;  %v2917_v18 = vpop.permute.xlu1 %2916 }
0x5f30   :  { %v2925_v14 = vsel %vm565_vm1, %v2917_v18, %v2920_v7 }
0x5f31   :  { %v2926_v48 = vsel %vm567_vm2, %v2925_v14, %v6607_v24 }
0x5f33   :  { %v2923_v50 = vpop.permute.xlu0 %2922 }
0x5f34   :  { %v2927_v34 = vsel %vm569_vm3, %v2926_v48, %v2923_v50 }
0x5f35   :  { %v2928_v9 = vmul.f32 %v2927_v34, %v5698_v43 }
0x5f37   :  { %v2930_v20 = vrot.slane %v2928_v9, 7 }
0x5f39   :  { %v2932_v0 = vadd.f32 %v2930_v20, %v6479_v55 }
0x5f3b   :  { %5212 = vtanh.f32 %v2932_v0  ;;  %v4673_v34 = vmul.f32 -1.442695, %v2932_v0 }
0x5f3c   :  { %v225_v12 = vpop.permute.xlu1 %224 }
0x5f3d   :  { %v248_v16 = vmul.f32 %v225_v12, %v6588_v58  ;;  %5214 = vpow2.f32 %v4673_v34 }
0x5f40   :  { %v285_v47 = vpop.permute.xlu1 %284 }
0x5f41   :  { %v308_v15 = vadd.f32 %v285_v47, %v248_v16  ;;  %v2941_v47 = vrot.slane %v6599_v26, 7  ;;  %v466_v26 = vld [vmem:[%s7391_s6 + $0x30] sm:$0xff] }
0x5f43   :  { %v318_v46 = vmax.f32 %v308_v15, 0.0 }
0x5f45   :  { %4773 = vmatprep.mubr.f32.mxu1 %v318_v46 }
0x5f48   :  { %v5213_v30 = vpop.eup %5212 }
0x5f49   :  { %2945 = vrot.lane.b32.xlu1 %v5213_v30, %s5512_s11 }
0x5f4a   :  { %v5215_v9 = vpop.eup %5214 }
0x5f4b   :  { %v2936_v20 = vadd.f32 1.0, %v5215_v9 }
0x5f4d   :  { %5216 = vrcp.f32 %v2936_v20 }
0x5f5a   :  { %v5217_v12 = vpop.eup %5216 }
0x5f5b   :  { %v2943_v15 = vmul.f32 %v5217_v12, %v2941_v47  ;;  %v6658_v47 = vld [vmem:[%s7389_s4] ss:$0 sm:$0xff] }
0x5f8d   :  { %v230_v7 = vpop.permute.xlu0 %229 }
0x5f8e   :  { %v249_v18 = vmul.f32 %v230_v7, %v6595_v33 }
0x5f91   :  { %v290_v14 = vpop.permute.xlu0 %289 }
0x5f92   :  { %v309_v50 = vadd.f32 %v290_v14, %v249_v18 }
0x5f94   :  { %v319_v48 = vmax.f32 %v309_v50, 0.0 }
0x5f96   :  { %4774 = vmatmul.mubr.f32.vlgmr.msra.gmra.mxu1 %v319_v48 }
0x5fbb   :  { %v2946_v58 = vpop.permute.xlu1 %2945 }
0x5fbc   :  { %v2948_v16 = vmul.f32 %v5217_v12, %v2946_v58 }
0x5fbe   :  { %2950 = vrot.lane.b32.xlu0 %v2948_v16, %s5513_s12 }
0x6030   :  { %v2951_v46 = vpop.permute.xlu0 %2950 }
0x6031   :  { %v2953_v30 = vadd.f32 %v2951_v46, %v2943_v15 }
0x6033   :  { %5218 = vtanh.f32 %v2953_v30 }
0x6040   :  { %v5219_v33 = vpop.eup %5218 }
0x6041   :  { %2956 = vrot.lane.b32.xlu1 %v5219_v33, %s5513_s12 }
0x6056   :  { %v6648_v18 = vpop.f32.mrf.mxu1 }
0x6058   :  { %v441_v34 = vpop.f32.mrf.mxu1 }
0x6059   :  { %v442_v15 = vadd.f32 %v6658_v47, %v441_v34  ;;  %v2992_v34 = vrot.slane %v2953_v30, 7 }
0x60b3   :  { %v2957_v0 = vpop.permute.xlu1 %2956 }
0x60b4   :  { %v6636_v7 = vmul.f32 %v5217_v12, %v2957_v0 }
0x60b6   :  { %7444 = vst [vmem:[#allocation17_spill] sm:$0xff] %v6636_v7  ;;  %2970 = vrot.lane.b32.xlu1 %v6636_v7, %s5514_s13  ;;  %2967 = vrot.lane.b32.xlu0 %v6636_v7, %s5515_s14 }
0x60ba   :  { %492 = vrot.lane.b32.xlu1 %v466_v26, %s5511_s29  ;;  %2973 = vrot.lane.b32.xlu0 %v6636_v7, %s5513_s12 }
0x6128   :  { %v2971_v14 = vpop.permute.xlu1 %2970  ;;  %v2968_v50 = vpop.permute.xlu0 %2967 }
0x6129   :  { %v2976_v48 = vsel %vm565_vm1, %v2968_v50, %v2971_v14 }
0x612a   :  { %v2977_v9 = vsel %vm567_vm2, %v2976_v48, %v6636_v7 }
0x612c   :  { %v2974_v20 = vpop.permute.xlu0 %2973  ;;  %v493_v58 = vpop.permute.xlu1 %492 }
0x612d   :  { %v2978_v12 = vsel %vm569_vm3, %v2977_v9, %v2974_v20  ;;  %v6662_v33 = vsel %vm510_vm0, %v442_v15, %v493_v58 }
0x612e   :  { %v2979_v16 = vmul.f32 %v2978_v12, %v5698_v43 }
0x6130   :  { %v2981_v46 = vrot.slane %v2979_v16, 7 }
0x6132   :  { %v2983_v0 = vadd.f32 %v2981_v46, %v6662_v33 }
0x6134   :  { %5220 = vtanh.f32 %v2983_v0  ;;  %v4674_v14 = vmul.f32 -1.442695, %v2983_v0 }
0x6136   :  { %5222 = vpow2.f32 %v4674_v14 }
0x6141   :  { %v5221_v26 = vpop.eup %5220 }
0x6142   :  { %2996 = vrot.lane.b32.xlu0 %v5221_v26, %s5512_s11 }
0x6143   :  { %v5223_v50 = vpop.eup %5222 }
0x6144   :  { %v2987_v48 = vadd.f32 1.0, %v5223_v50 }
0x6146   :  { %5224 = vrcp.f32 %v2987_v48 }
0x6153   :  { %v5225_v9 = vpop.eup %5224 }
0x6154   :  { %v2994_v16 = vmul.f32 %v5225_v9, %v2992_v34 }
0x61b4   :  { %v2997_v20 = vpop.permute.xlu0 %2996 }
0x61b5   :  { %v2999_v12 = vmul.f32 %v5225_v9, %v2997_v20 }
0x61b7   :  { %3001 = vrot.lane.b32.xlu1 %v2999_v12, %s5513_s12 }
0x6229   :  { %v3002_v58 = vpop.permute.xlu1 %3001 }
0x622a   :  { %v3004_v15 = vadd.f32 %v3002_v58, %v2994_v16 }
0x622c   :  { %5226 = vtanh.f32 %v3004_v15 }
0x6239   :  { %v5227_v46 = vpop.eup %5226 }
0x623a   :  { %3007 = vrot.lane.b32.xlu0 %v5227_v46, %s5513_s12 }
0x62ac   :  { %v3008_v7 = vpop.permute.xlu0 %3007 }
0x62ad   :  { %v6668_v26 = vmul.f32 %v5225_v9, %v3008_v7  ;;  %v6683_v9 = vld [vmem:[%s7390_s5] sm:$0x1] }
0x62af   :  { %7445 = vst [vmem:[#allocation18_spill] sm:$0xff] %v6668_v26  ;;  %3022 = vrot.lane.b32.xlu0 %v6668_v26, %s5514_s13  ;;  %3019 = vrot.lane.b32.xlu1 %v6668_v26, %s5515_s14 }
0x62b3   :  { %3025 = vrot.lane.b32.xlu1 %v6668_v26, %s5513_s12 }
0x6321   :  { %v3023_v30 = vpop.permute.xlu0 %3022  ;;  %v3020_v0 = vpop.permute.xlu1 %3019 }
0x6322   :  { %v3028_v14 = vsel %vm565_vm1, %v3020_v0, %v3023_v30 }
0x6323   :  { %v3029_v50 = vsel %vm567_vm2, %v3028_v14, %v6668_v26 }
0x6325   :  { %v3026_v48 = vpop.permute.xlu1 %3025 }
0x6326   :  { %v3030_v7 = vsel %vm569_vm3, %v3029_v50, %v3026_v48  ;;  %v3044_v48 = vrot.slane %v3004_v15, 7 }
0x6327   :  { %v3031_v20 = vmul.f32 %v6683_v9, %v3030_v7 }
0x6329   :  { %v3033_v12 = vrot.slane %v3031_v20, 7 }
0x632b   :  { %v3035_v34 = vadd.f32 %v3033_v12, %v6662_v33 }
0x632d   :  { %5228 = vtanh.f32 %v3035_v34  ;;  %v4675_v58 = vmul.f32 -1.442695, %v3035_v34 }
0x632f   :  { %5230 = vpow2.f32 %v4675_v58 }
0x633a   :  { %v5229_v16 = vpop.eup %5228 }
0x633b   :  { %3048 = vrot.lane.b32.xlu0 %v5229_v16, %s5512_s11 }
0x633c   :  { %v5231_v46 = vpop.eup %5230 }
0x633d   :  { %v3039_v30 = vadd.f32 1.0, %v5231_v46 }
0x633f   :  { %5232 = vrcp.f32 %v3039_v30 }
0x634c   :  { %v5233_v0 = vpop.eup %5232 }
0x634d   :  { %v3046_v26 = vmul.f32 %v5233_v0, %v3044_v48 }
0x63ad   :  { %v3049_v14 = vpop.permute.xlu0 %3048 }
0x63ae   :  { %v3051_v50 = vmul.f32 %v5233_v0, %v3049_v14 }
0x63b0   :  { %3053 = vrot.lane.b32.xlu1 %v3051_v50, %s5513_s12 }
0x6422   :  { %v3054_v7 = vpop.permute.xlu1 %3053 }
0x6423   :  { %v3056_v20 = vadd.f32 %v3054_v7, %v3046_v26 }
0x6425   :  { %5234 = vtanh.f32 %v3056_v20 }
0x6432   :  { %v5235_v12 = vpop.eup %5234 }
0x6433   :  { %3059 = vrot.lane.b32.xlu0 %v5235_v12, %s5513_s12 }
0x64a5   :  { %v3060_v24 = vpop.permute.xlu0 %3059 }
0x64a6   :  { %v6690_v16 = vmul.f32 %v5233_v0, %v3060_v24 }
0x64a8   :  { %7446 = vst [vmem:[#allocation19_spill] sm:$0xff] %v6690_v16  ;;  %3073 = vrot.lane.b32.xlu0 %v6690_v16, %s5514_s13  ;;  %3070 = vrot.lane.b32.xlu1 %v6690_v16, %s5515_s14 }
0x64ac   :  { %3076 = vrot.lane.b32.xlu1 %v6690_v16, %s5513_s12 }
0x651a   :  { %v3074_v15 = vpop.permute.xlu0 %3073  ;;  %v3071_v34 = vpop.permute.xlu1 %3070 }
0x651b   :  { %v3079_v26 = vsel %vm565_vm1, %v3071_v34, %v3074_v15 }
0x651c   :  { %v3080_v58 = vsel %vm567_vm2, %v3079_v26, %v6690_v16 }
0x651e   :  { %v3077_v46 = vpop.permute.xlu1 %3076 }
0x651f   :  { %v3081_v24 = vsel %vm569_vm3, %v3080_v58, %v3077_v46  ;;  %v3095_v58 = vrot.slane %v3056_v20, 7 }
0x6520   :  { %v3082_v30 = vmul.f32 %v3081_v24, %v5698_v43 }
0x6522   :  { %v3084_v0 = vrot.slane %v3082_v30, 7 }
0x6524   :  { %v3086_v14 = vadd.f32 %v3084_v0, %v6662_v33 }
0x6526   :  { %5236 = vtanh.f32 %v3086_v14  ;;  %v4676_v48 = vmul.f32 -1.442695, %v3086_v14 }
0x6528   :  { %5238 = vpow2.f32 %v4676_v48 }
0x6533   :  { %v5237_v50 = vpop.eup %5236 }
0x6534   :  { %3099 = vrot.lane.b32.xlu0 %v5237_v50, %s5512_s11 }
0x6535   :  { %v5239_v7 = vpop.eup %5238 }
0x6536   :  { %v3090_v12 = vadd.f32 1.0, %v5239_v7 }
0x6538   :  { %5240 = vrcp.f32 %v3090_v12 }
0x6545   :  { %v5241_v15 = vpop.eup %5240 }
0x6546   :  { %v3097_v46 = vmul.f32 %v5241_v15, %v3095_v58 }
0x65a6   :  { %v3100_v34 = vpop.permute.xlu0 %3099 }
0x65a7   :  { %v3102_v26 = vmul.f32 %v5241_v15, %v3100_v34 }
0x65a9   :  { %3104 = vrot.lane.b32.xlu1 %v3102_v26, %s5513_s12 }
0x661b   :  { %v3105_v24 = vpop.permute.xlu1 %3104 }
0x661c   :  { %v3107_v30 = vadd.f32 %v3105_v24, %v3097_v46 }
0x661e   :  { %5242 = vtanh.f32 %v3107_v30 }
0x662b   :  { %v5243_v0 = vpop.eup %5242 }
0x662c   :  { %3110 = vrot.lane.b32.xlu0 %v5243_v0, %s5513_s12 }
0x669e   :  { %v3111_v16 = vpop.permute.xlu0 %3110 }
0x669f   :  { %v6707_v50 = vmul.f32 %v5241_v15, %v3111_v16 }
0x66a1   :  { %7447 = vst [vmem:[#allocation20_spill] sm:$0xff] %v6707_v50  ;;  %3124 = vrot.lane.b32.xlu0 %v6707_v50, %s5514_s13  ;;  %3121 = vrot.lane.b32.xlu1 %v6707_v50, %s5515_s14 }
0x66a5   :  { %3127 = vrot.lane.b32.xlu1 %v6707_v50, %s5513_s12 }
0x6713   :  { %v3125_v20 = vpop.permute.xlu0 %3124  ;;  %v3122_v14 = vpop.permute.xlu1 %3121 }
0x6714   :  { %v3130_v48 = vsel %vm565_vm1, %v3122_v14, %v3125_v20 }
0x6715   :  { %v3131_v7 = vsel %vm567_vm2, %v3130_v48, %v6707_v50 }
0x6717   :  { %v3128_v12 = vpop.permute.xlu1 %3127 }
0x6718   :  { %v3132_v16 = vsel %vm569_vm3, %v3131_v7, %v3128_v12  ;;  %v3146_v7 = vrot.slane %v3107_v30, 7 }
0x6719   :  { %v3133_v15 = vmul.f32 %v3132_v16, %v5698_v43 }
0x671b   :  { %v3135_v34 = vrot.slane %v3133_v15, 7 }
0x671d   :  { %v3137_v26 = vadd.f32 %v3135_v34, %v6662_v33 }
0x671f   :  { %5244 = vtanh.f32 %v3137_v26  ;;  %v4677_v46 = vmul.f32 -1.442695, %v3137_v26 }
0x6721   :  { %5246 = vpow2.f32 %v4677_v46 }
0x672c   :  { %v5245_v58 = vpop.eup %5244 }
0x672d   :  { %3150 = vrot.lane.b32.xlu0 %v5245_v58, %s5512_s11 }
0x672e   :  { %v5247_v24 = vpop.eup %5246 }
0x672f   :  { %v3141_v0 = vadd.f32 1.0, %v5247_v24 }
0x6731   :  { %5248 = vrcp.f32 %v3141_v0 }
0x673e   :  { %v5249_v20 = vpop.eup %5248 }
0x673f   :  { %v3148_v12 = vmul.f32 %v5249_v20, %v3146_v7 }
0x679f   :  { %v3151_v14 = vpop.permute.xlu0 %3150 }
0x67a0   :  { %v3153_v48 = vmul.f32 %v5249_v20, %v3151_v14 }
0x67a2   :  { %3155 = vrot.lane.b32.xlu1 %v3153_v48, %s5513_s12 }
0x6814   :  { %v3156_v16 = vpop.permute.xlu1 %3155 }
0x6815   :  { %v3158_v15 = vadd.f32 %v3156_v16, %v3148_v12 }
0x6817   :  { %5250 = vtanh.f32 %v3158_v15 }
0x6824   :  { %v5251_v34 = vpop.eup %5250 }
0x6825   :  { %3161 = vrot.lane.b32.xlu0 %v5251_v34, %s5513_s12 }
0x6897   :  { %v3162_v50 = vpop.permute.xlu0 %3161 }
0x6898   :  { %v6724_v58 = vmul.f32 %v5249_v20, %v3162_v50 }
0x689a   :  { %7448 = vst [vmem:[#allocation21_spill] sm:$0xff] %v6724_v58  ;;  %3175 = vrot.lane.b32.xlu0 %v6724_v58, %s5514_s13  ;;  %3172 = vrot.lane.b32.xlu1 %v6724_v58, %s5515_s14 }
0x689e   :  { %3178 = vrot.lane.b32.xlu1 %v6724_v58, %s5513_s12 }
0x690c   :  { %v3176_v30 = vpop.permute.xlu0 %3175  ;;  %v3173_v26 = vpop.permute.xlu1 %3172 }
0x690d   :  { %v3181_v46 = vsel %vm565_vm1, %v3173_v26, %v3176_v30 }
0x690e   :  { %v3182_v24 = vsel %vm567_vm2, %v3181_v46, %v6724_v58 }
0x6910   :  { %v3179_v0 = vpop.permute.xlu1 %3178 }
0x6911   :  { %v3183_v50 = vsel %vm569_vm3, %v3182_v24, %v3179_v0  ;;  %v3197_v24 = vrot.slane %v3158_v15, 7 }
0x6912   :  { %v3184_v20 = vmul.f32 %v3183_v50, %v5698_v43 }
0x6914   :  { %v3186_v14 = vrot.slane %v3184_v20, 7 }
0x6916   :  { %v3188_v48 = vadd.f32 %v3186_v14, %v6662_v33 }
0x6918   :  { %5252 = vtanh.f32 %v3188_v48  ;;  %v4678_v12 = vmul.f32 -1.442695, %v3188_v48 }
0x691a   :  { %5254 = vpow2.f32 %v4678_v12 }
0x6925   :  { %v5253_v7 = vpop.eup %5252 }
0x6926   :  { %3201 = vrot.lane.b32.xlu0 %v5253_v7, %s5512_s11 }
0x6927   :  { %v5255_v16 = vpop.eup %5254 }
0x6928   :  { %v3192_v34 = vadd.f32 1.0, %v5255_v16 }
0x692a   :  { %5256 = vrcp.f32 %v3192_v34 }
0x6937   :  { %v5257_v30 = vpop.eup %5256 }
0x6938   :  { %v3199_v0 = vmul.f32 %v5257_v30, %v3197_v24 }
0x6998   :  { %v3202_v26 = vpop.permute.xlu0 %3201 }
0x6999   :  { %v3204_v46 = vmul.f32 %v5257_v30, %v3202_v26 }
0x699b   :  { %3206 = vrot.lane.b32.xlu1 %v3204_v46, %s5513_s12 }
0x6a0d   :  { %v3207_v50 = vpop.permute.xlu1 %3206 }
0x6a0e   :  { %v3209_v20 = vadd.f32 %v3207_v50, %v3199_v0 }
0x6a10   :  { %5258 = vtanh.f32 %v3209_v20 }
0x6a1d   :  { %v5259_v14 = vpop.eup %5258 }
0x6a1e   :  { %3212 = vrot.lane.b32.xlu0 %v5259_v14, %s5513_s12 }
0x6a90   :  { %v3213_v58 = vpop.permute.xlu0 %3212 }
0x6a91   :  { %v6741_v7 = vmul.f32 %v5257_v30, %v3213_v58 }
0x6a93   :  { %7449 = vst [vmem:[#allocation22_spill] sm:$0xff] %v6741_v7  ;;  %3226 = vrot.lane.b32.xlu0 %v6741_v7, %s5514_s13  ;;  %3223 = vrot.lane.b32.xlu1 %v6741_v7, %s5515_s14 }
0x6a97   :  { %3229 = vrot.lane.b32.xlu1 %v6741_v7, %s5513_s12 }
0x6b05   :  { %v3227_v15 = vpop.permute.xlu0 %3226  ;;  %v3224_v48 = vpop.permute.xlu1 %3223 }
0x6b06   :  { %v3232_v12 = vsel %vm565_vm1, %v3224_v48, %v3227_v15 }
0x6b07   :  { %v3233_v16 = vsel %vm567_vm2, %v3232_v12, %v6741_v7 }
0x6b09   :  { %v3230_v34 = vpop.permute.xlu1 %3229 }
0x6b0a   :  { %v3234_v58 = vsel %vm569_vm3, %v3233_v16, %v3230_v34  ;;  %v3248_v16 = vrot.slane %v3209_v20, 7 }
0x6b0b   :  { %v3235_v30 = vmul.f32 %v3234_v58, %v5698_v43 }
0x6b0d   :  { %v3237_v26 = vrot.slane %v3235_v30, 7 }
0x6b0f   :  { %v3239_v46 = vadd.f32 %v3237_v26, %v6662_v33 }
0x6b11   :  { %5260 = vtanh.f32 %v3239_v46  ;;  %v4679_v0 = vmul.f32 -1.442695, %v3239_v46 }
0x6b13   :  { %5262 = vpow2.f32 %v4679_v0 }
0x6b1e   :  { %v5261_v24 = vpop.eup %5260 }
0x6b1f   :  { %3252 = vrot.lane.b32.xlu0 %v5261_v24, %s5512_s11 }
0x6b20   :  { %v5263_v50 = vpop.eup %5262 }
0x6b21   :  { %v3243_v14 = vadd.f32 1.0, %v5263_v50 }
0x6b23   :  { %5264 = vrcp.f32 %v3243_v14 }
0x6b30   :  { %v5265_v15 = vpop.eup %5264 }
0x6b31   :  { %v3250_v34 = vmul.f32 %v5265_v15, %v3248_v16 }
0x6b91   :  { %v3253_v48 = vpop.permute.xlu0 %3252 }
0x6b92   :  { %v3255_v12 = vmul.f32 %v5265_v15, %v3253_v48 }
0x6b94   :  { %3257 = vrot.lane.b32.xlu1 %v3255_v12, %s5513_s12 }
0x6c06   :  { %v3258_v58 = vpop.permute.xlu1 %3257 }
0x6c07   :  { %v3260_v30 = vadd.f32 %v3258_v58, %v3250_v34 }
0x6c09   :  { %5266 = vtanh.f32 %v3260_v30 }
0x6c16   :  { %v5267_v26 = vpop.eup %5266 }
0x6c17   :  { %3263 = vrot.lane.b32.xlu0 %v5267_v26, %s5513_s12 }
0x6c89   :  { %v3264_v7 = vpop.permute.xlu0 %3263 }
0x6c8a   :  { %v6758_v24 = vmul.f32 %v5265_v15, %v3264_v7 }
0x6c8c   :  { %7450 = vst [vmem:[#allocation23_spill] sm:$0xff] %v6758_v24  ;;  %3277 = vrot.lane.b32.xlu0 %v6758_v24, %s5514_s13  ;;  %3274 = vrot.lane.b32.xlu1 %v6758_v24, %s5515_s14 }
0x6c90   :  { %3280 = vrot.lane.b32.xlu1 %v6758_v24, %s5513_s12 }
0x6cfe   :  { %v3278_v20 = vpop.permute.xlu0 %3277  ;;  %v3275_v46 = vpop.permute.xlu1 %3274 }
0x6cff   :  { %v3283_v0 = vsel %vm565_vm1, %v3275_v46, %v3278_v20 }
0x6d00   :  { %v3284_v50 = vsel %vm567_vm2, %v3283_v0, %v6758_v24 }
0x6d02   :  { %v3281_v14 = vpop.permute.xlu1 %3280 }
0x6d03   :  { %v3285_v7 = vsel %vm569_vm3, %v3284_v50, %v3281_v14  ;;  %v3299_v50 = vrot.slane %v3260_v30, 7 }
0x6d04   :  { %v3286_v15 = vmul.f32 %v3285_v7, %v5698_v43 }
0x6d06   :  { %v3288_v48 = vrot.slane %v3286_v15, 7 }
0x6d08   :  { %v3290_v12 = vadd.f32 %v3288_v48, %v6662_v33 }
0x6d0a   :  { %5268 = vtanh.f32 %v3290_v12  ;;  %v4680_v34 = vmul.f32 -1.442695, %v3290_v12 }
0x6d0c   :  { %5270 = vpow2.f32 %v4680_v34 }
0x6d17   :  { %v5269_v16 = vpop.eup %5268 }
0x6d18   :  { %3303 = vrot.lane.b32.xlu0 %v5269_v16, %s5512_s11 }
0x6d19   :  { %v5271_v58 = vpop.eup %5270 }
0x6d1a   :  { %v3294_v26 = vadd.f32 1.0, %v5271_v58 }
0x6d1c   :  { %5272 = vrcp.f32 %v3294_v26 }
0x6d29   :  { %v5273_v20 = vpop.eup %5272 }
0x6d2a   :  { %v3301_v14 = vmul.f32 %v5273_v20, %v3299_v50 }
0x6d8a   :  { %v3304_v46 = vpop.permute.xlu0 %3303 }
0x6d8b   :  { %v3306_v0 = vmul.f32 %v5273_v20, %v3304_v46 }
0x6d8d   :  { %3308 = vrot.lane.b32.xlu1 %v3306_v0, %s5513_s12 }
0x6dff   :  { %v3309_v7 = vpop.permute.xlu1 %3308 }
0x6e00   :  { %v3311_v15 = vadd.f32 %v3309_v7, %v3301_v14 }
0x6e02   :  { %5274 = vtanh.f32 %v3311_v15 }
0x6e0f   :  { %v5275_v48 = vpop.eup %5274 }
0x6e10   :  { %3314 = vrot.lane.b32.xlu0 %v5275_v48, %s5513_s12 }
0x6e82   :  { %v3315_v24 = vpop.permute.xlu0 %3314 }
0x6e83   :  { %v6775_v16 = vmul.f32 %v5273_v20, %v3315_v24 }
0x6e85   :  { %7451 = vst [vmem:[#allocation24_spill] sm:$0xff] %v6775_v16  ;;  %3328 = vrot.lane.b32.xlu0 %v6775_v16, %s5514_s13  ;;  %3325 = vrot.lane.b32.xlu1 %v6775_v16, %s5515_s14 }
0x6e89   :  { %3331 = vrot.lane.b32.xlu1 %v6775_v16, %s5513_s12 }
0x6ef7   :  { %v3329_v30 = vpop.permute.xlu0 %3328  ;;  %v3326_v12 = vpop.permute.xlu1 %3325 }
0x6ef8   :  { %v3334_v34 = vsel %vm565_vm1, %v3326_v12, %v3329_v30 }
0x6ef9   :  { %v3335_v58 = vsel %vm567_vm2, %v3334_v34, %v6775_v16 }
0x6efb   :  { %v3332_v26 = vpop.permute.xlu1 %3331 }
0x6efc   :  { %v3336_v24 = vsel %vm569_vm3, %v3335_v58, %v3332_v26  ;;  %v3350_v58 = vrot.slane %v3311_v15, 7  ;;  %v467_v15 = vld [vmem:[%s7391_s6 + $0x38] sm:$0xff] }
0x6efd   :  { %v3337_v20 = vmul.f32 %v3336_v24, %v5698_v43 }
0x6eff   :  { %v3339_v46 = vrot.slane %v3337_v20, 7 }
0x6f01   :  { %v3341_v0 = vadd.f32 %v3339_v46, %v6662_v33 }
0x6f03   :  { %5276 = vtanh.f32 %v3341_v0  ;;  %v4681_v14 = vmul.f32 -1.442695, %v3341_v0 }
0x6f05   :  { %5278 = vpow2.f32 %v4681_v14 }
0x6f10   :  { %v5277_v50 = vpop.eup %5276 }
0x6f11   :  { %3354 = vrot.lane.b32.xlu0 %v5277_v50, %s5512_s11 }
0x6f12   :  { %v5279_v7 = vpop.eup %5278 }
0x6f13   :  { %v3345_v48 = vadd.f32 1.0, %v5279_v7 }
0x6f15   :  { %5280 = vrcp.f32 %v3345_v48 }
0x6f22   :  { %v5281_v30 = vpop.eup %5280 }
0x6f23   :  { %v3352_v26 = vmul.f32 %v5281_v30, %v3350_v58  ;;  %v447_v58 = vadd.f32 %v6658_v47, %v6648_v18 }
0x6f83   :  { %v3355_v12 = vpop.permute.xlu0 %3354 }
0x6f84   :  { %v3357_v34 = vmul.f32 %v5281_v30, %v3355_v12 }
0x6f86   :  { %3359 = vrot.lane.b32.xlu1 %v3357_v34, %s5513_s12 }
0x6ff8   :  { %v3360_v24 = vpop.permute.xlu1 %3359 }
0x6ff9   :  { %v3362_v20 = vadd.f32 %v3360_v24, %v3352_v26 }
0x6ffb   :  { %5282 = vtanh.f32 %v3362_v20  ;;  %v3401_v18 = vrot.slane %v3362_v20, 7 }
0x7008   :  { %v5283_v46 = vpop.eup %5282 }
0x7009   :  { %3365 = vrot.lane.b32.xlu0 %v5283_v46, %s5513_s12 }
0x707b   :  { %v3366_v16 = vpop.permute.xlu0 %3365 }
0x707c   :  { %v6792_v50 = vmul.f32 %v5281_v30, %v3366_v16 }
0x707e   :  { %7452 = vst [vmem:[#allocation25_spill] sm:$0xff] %v6792_v50  ;;  %3379 = vrot.lane.b32.xlu0 %v6792_v50, %s5514_s13  ;;  %3376 = vrot.lane.b32.xlu1 %v6792_v50, %s5515_s14 }
0x7082   :  { %494 = vrot.lane.b32.xlu0 %v467_v15, %s5511_s29  ;;  %3382 = vrot.lane.b32.xlu1 %v6792_v50, %s5513_s12 }
0x70f0   :  { %v3380_v0 = vpop.permute.xlu0 %3379  ;;  %v3377_v14 = vpop.permute.xlu1 %3376 }
0x70f1   :  { %v3385_v16 = vsel %vm565_vm1, %v3377_v14, %v3380_v0 }
0x70f2   :  { %v3386_v7 = vsel %vm567_vm2, %v3385_v16, %v6792_v50 }
0x70f4   :  { %v3383_v48 = vpop.permute.xlu1 %3382  ;;  %v495_v12 = vpop.permute.xlu0 %494 }
0x70f5   :  { %v3387_v30 = vsel %vm569_vm3, %v3386_v7, %v3383_v48  ;;  %v6812_v24 = vsel %vm510_vm0, %v447_v58, %v495_v12 }
0x70f6   :  { %v3388_v34 = vmul.f32 %v3387_v30, %v5698_v43 }
0x70f8   :  { %v3390_v26 = vrot.slane %v3388_v34, 7 }
0x70fa   :  { %v3392_v46 = vadd.f32 %v3390_v26, %v6812_v24 }
0x70fc   :  { %5284 = vtanh.f32 %v3392_v46  ;;  %v4682_v0 = vmul.f32 -1.442695, %v3392_v46 }
0x70fe   :  { %5286 = vpow2.f32 %v4682_v0 }
0x7109   :  { %v5285_v15 = vpop.eup %5284 }
0x710a   :  { %3405 = vrot.lane.b32.xlu1 %v5285_v15, %s5512_s11 }
0x710b   :  { %v5287_v14 = vpop.eup %5286 }
0x710c   :  { %v3396_v16 = vadd.f32 1.0, %v5287_v14 }
0x710e   :  { %5288 = vrcp.f32 %v3396_v16 }
0x711b   :  { %v5289_v7 = vpop.eup %5288 }
0x711c   :  { %v3403_v47 = vmul.f32 %v5289_v7, %v3401_v18 }
0x717c   :  { %v3406_v48 = vpop.permute.xlu1 %3405 }
0x717d   :  { %v3408_v30 = vmul.f32 %v5289_v7, %v3406_v48 }
0x717f   :  { %3410 = vrot.lane.b32.xlu0 %v3408_v30, %s5513_s12 }
0x71f1   :  { %v3411_v12 = vpop.permute.xlu0 %3410 }
0x71f2   :  { %v3413_v34 = vadd.f32 %v3411_v12, %v3403_v47 }
0x71f4   :  { %5290 = vtanh.f32 %v3413_v34 }
0x7201   :  { %v5291_v58 = vpop.eup %5290 }
0x7202   :  { %3416 = vrot.lane.b32.xlu1 %v5291_v58, %s5513_s12 }
0x7274   :  { %v3417_v26 = vpop.permute.xlu1 %3416 }
0x7275   :  { %v6818_v15 = vmul.f32 %v5289_v7, %v3417_v26 }
0x7277   :  { %7453 = vst [vmem:[#allocation26_spill] sm:$0xff] %v6818_v15  ;;  %3431 = vrot.lane.b32.xlu1 %v6818_v15, %s5514_s13  ;;  %3428 = vrot.lane.b32.xlu0 %v6818_v15, %s5515_s14 }
0x727b   :  { %3434 = vrot.lane.b32.xlu0 %v6818_v15, %s5513_s12 }
0x72e9   :  { %v3432_v20 = vpop.permute.xlu1 %3431  ;;  %v3429_v46 = vpop.permute.xlu0 %3428 }
0x72ea   :  { %v3437_v0 = vsel %vm565_vm1, %v3429_v46, %v3432_v20 }
0x72eb   :  { %v3438_v14 = vsel %vm567_vm2, %v3437_v0, %v6818_v15 }
0x72ed   :  { %v3435_v16 = vpop.permute.xlu0 %3434 }
0x72ee   :  { %v3439_v7 = vsel %vm569_vm3, %v3438_v14, %v3435_v16  ;;  %v3453_v14 = vrot.slane %v3413_v34, 7 }
0x72ef   :  { %v3440_v48 = vmul.f32 %v6683_v9, %v3439_v7 }
0x72f1   :  { %v3442_v30 = vrot.slane %v3440_v48, 7 }
0x72f3   :  { %v3444_v18 = vadd.f32 %v3442_v30, %v6812_v24 }
0x72f5   :  { %5292 = vtanh.f32 %v3444_v18  ;;  %v4683_v12 = vmul.f32 -1.442695, %v3444_v18 }
0x72f7   :  { %5294 = vpow2.f32 %v4683_v12 }
0x7302   :  { %v5293_v47 = vpop.eup %5292 }
0x7303   :  { %3457 = vrot.lane.b32.xlu1 %v5293_v47, %s5512_s11 }
0x7304   :  { %v5295_v58 = vpop.eup %5294 }
0x7305   :  { %v3448_v26 = vadd.f32 1.0, %v5295_v58 }
0x7307   :  { %5296 = vrcp.f32 %v3448_v26 }
0x7314   :  { %v5297_v20 = vpop.eup %5296 }
0x7315   :  { %v3455_v16 = vmul.f32 %v5297_v20, %v3453_v14 }
0x7375   :  { %v3458_v46 = vpop.permute.xlu1 %3457 }
0x7376   :  { %v3460_v0 = vmul.f32 %v5297_v20, %v3458_v46 }
0x7378   :  { %3462 = vrot.lane.b32.xlu0 %v3460_v0, %s5513_s12 }
0x73ea   :  { %v3463_v9 = vpop.permute.xlu0 %3462 }
0x73eb   :  { %v3465_v7 = vadd.f32 %v3463_v9, %v3455_v16 }
0x73ed   :  { %5298 = vtanh.f32 %v3465_v7 }
0x73fa   :  { %v5299_v48 = vpop.eup %5298 }
0x73fb   :  { %3468 = vrot.lane.b32.xlu1 %v5299_v48, %s5513_s12 }
0x746d   :  { %v3469_v30 = vpop.permute.xlu1 %3468 }
0x746e   :  { %v6835_v47 = vmul.f32 %v5297_v20, %v3469_v30 }
0x7470   :  { %7454 = vst [vmem:[#allocation27_spill] sm:$0xff] %v6835_v47  ;;  %3482 = vrot.lane.b32.xlu1 %v6835_v47, %s5514_s13  ;;  %3479 = vrot.lane.b32.xlu0 %v6835_v47, %s5515_s14 }
0x7474   :  { %3485 = vrot.lane.b32.xlu0 %v6835_v47, %s5513_s12 }
0x74e2   :  { %v3483_v34 = vpop.permute.xlu1 %3482  ;;  %v3480_v18 = vpop.permute.xlu0 %3479 }
0x74e3   :  { %v3488_v12 = vsel %vm565_vm1, %v3480_v18, %v3483_v34 }
0x74e4   :  { %v3489_v58 = vsel %vm567_vm2, %v3488_v12, %v6835_v47 }
0x74e6   :  { %v3486_v26 = vpop.permute.xlu0 %3485 }
0x74e7   :  { %v3490_v20 = vsel %vm569_vm3, %v3489_v58, %v3486_v26  ;;  %v3504_v58 = vrot.slane %v3465_v7, 7 }
0x74e8   :  { %v3491_v46 = vmul.f32 %v3490_v20, %v5698_v43 }
0x74ea   :  { %v3493_v0 = vrot.slane %v3491_v46, 7 }
0x74ec   :  { %v3495_v14 = vadd.f32 %v3493_v0, %v6812_v24 }
0x74ee   :  { %5300 = vtanh.f32 %v3495_v14  ;;  %v4684_v9 = vmul.f32 -1.442695, %v3495_v14 }
0x74f0   :  { %5302 = vpow2.f32 %v4684_v9 }
0x74fb   :  { %v5301_v16 = vpop.eup %5300 }
0x74fc   :  { %3508 = vrot.lane.b32.xlu1 %v5301_v16, %s5512_s11 }
0x74fd   :  { %v5303_v48 = vpop.eup %5302 }
0x74fe   :  { %v3499_v30 = vadd.f32 1.0, %v5303_v48 }
0x7500   :  { %5304 = vrcp.f32 %v3499_v30 }
0x750d   :  { %v5305_v34 = vpop.eup %5304 }
0x750e   :  { %v3506_v26 = vmul.f32 %v5305_v34, %v3504_v58 }
0x756e   :  { %v3509_v18 = vpop.permute.xlu1 %3508 }
0x756f   :  { %v3511_v12 = vmul.f32 %v5305_v34, %v3509_v18 }
0x7571   :  { %3513 = vrot.lane.b32.xlu0 %v3511_v12, %s5513_s12 }
0x75e3   :  { %v3514_v20 = vpop.permute.xlu0 %3513 }
0x75e4   :  { %v3516_v46 = vadd.f32 %v3514_v20, %v3506_v26 }
0x75e6   :  { %5306 = vtanh.f32 %v3516_v46 }
0x75f3   :  { %v5307_v0 = vpop.eup %5306 }
0x75f4   :  { %3519 = vrot.lane.b32.xlu1 %v5307_v0, %s5513_s12 }
0x7666   :  { %v3520_v47 = vpop.permute.xlu1 %3519 }
0x7667   :  { %v6852_v16 = vmul.f32 %v5305_v34, %v3520_v47 }
0x7669   :  { %7455 = vst [vmem:[#allocation28_spill] sm:$0xff] %v6852_v16  ;;  %3533 = vrot.lane.b32.xlu1 %v6852_v16, %s5514_s13  ;;  %3530 = vrot.lane.b32.xlu0 %v6852_v16, %s5515_s14 }
0x766d   :  { %3536 = vrot.lane.b32.xlu0 %v6852_v16, %s5513_s12 }
0x76db   :  { %v3534_v7 = vpop.permute.xlu1 %3533  ;;  %v3531_v14 = vpop.permute.xlu0 %3530 }
0x76dc   :  { %v3539_v9 = vsel %vm565_vm1, %v3531_v14, %v3534_v7 }
0x76dd   :  { %v3540_v48 = vsel %vm567_vm2, %v3539_v9, %v6852_v16 }
0x76df   :  { %v3537_v30 = vpop.permute.xlu0 %3536 }
0x76e0   :  { %v3541_v47 = vsel %vm569_vm3, %v3540_v48, %v3537_v30  ;;  %v3555_v48 = vrot.slane %v3516_v46, 7 }
0x76e1   :  { %v3542_v34 = vmul.f32 %v3541_v47, %v5698_v43 }
0x76e3   :  { %v3544_v18 = vrot.slane %v3542_v34, 7 }
0x76e5   :  { %v3546_v12 = vadd.f32 %v3544_v18, %v6812_v24 }
0x76e7   :  { %5308 = vtanh.f32 %v3546_v12  ;;  %v4685_v26 = vmul.f32 -1.442695, %v3546_v12 }
0x76e9   :  { %5310 = vpow2.f32 %v4685_v26 }
0x76f4   :  { %v5309_v58 = vpop.eup %5308 }
0x76f5   :  { %3559 = vrot.lane.b32.xlu1 %v5309_v58, %s5512_s11 }
0x76f6   :  { %v5311_v20 = vpop.eup %5310 }
0x76f7   :  { %v3550_v0 = vadd.f32 1.0, %v5311_v20 }
0x76f9   :  { %5312 = vrcp.f32 %v3550_v0 }
0x7706   :  { %v5313_v7 = vpop.eup %5312 }
0x7707   :  { %v3557_v30 = vmul.f32 %v5313_v7, %v3555_v48 }
0x7767   :  { %v3560_v14 = vpop.permute.xlu1 %3559 }
0x7768   :  { %v3562_v9 = vmul.f32 %v5313_v7, %v3560_v14 }
0x776a   :  { %3564 = vrot.lane.b32.xlu0 %v3562_v9, %s5513_s12 }
0x77dc   :  { %v3565_v47 = vpop.permute.xlu0 %3564 }
0x77dd   :  { %v3567_v34 = vadd.f32 %v3565_v47, %v3557_v30 }
0x77df   :  { %5314 = vtanh.f32 %v3567_v34 }
0x77ec   :  { %v5315_v18 = vpop.eup %5314 }
0x77ed   :  { %3570 = vrot.lane.b32.xlu1 %v5315_v18, %s5513_s12 }
0x785f   :  { %v3571_v16 = vpop.permute.xlu1 %3570 }
0x7860   :  { %v6869_v58 = vmul.f32 %v5313_v7, %v3571_v16 }
0x7862   :  { %7456 = vst [vmem:[#allocation29_spill] sm:$0xff] %v6869_v58  ;;  %3584 = vrot.lane.b32.xlu1 %v6869_v58, %s5514_s13  ;;  %3581 = vrot.lane.b32.xlu0 %v6869_v58, %s5515_s14 }
0x7866   :  { %3587 = vrot.lane.b32.xlu0 %v6869_v58, %s5513_s12 }
0x78d4   :  { %v3585_v46 = vpop.permute.xlu1 %3584  ;;  %v3582_v12 = vpop.permute.xlu0 %3581 }
0x78d5   :  { %v3590_v26 = vsel %vm565_vm1, %v3582_v12, %v3585_v46 }
0x78d6   :  { %v3591_v20 = vsel %vm567_vm2, %v3590_v26, %v6869_v58 }
0x78d8   :  { %v3588_v0 = vpop.permute.xlu0 %3587 }
0x78d9   :  { %v3592_v16 = vsel %vm569_vm3, %v3591_v20, %v3588_v0  ;;  %v3606_v20 = vrot.slane %v3567_v34, 7 }
0x78da   :  { %v3593_v7 = vmul.f32 %v3592_v16, %v5698_v43 }
0x78dc   :  { %v3595_v14 = vrot.slane %v3593_v7, 7 }
0x78de   :  { %v3597_v9 = vadd.f32 %v3595_v14, %v6812_v24 }
0x78e0   :  { %5316 = vtanh.f32 %v3597_v9  ;;  %v4686_v30 = vmul.f32 -1.442695, %v3597_v9 }
0x78e2   :  { %5318 = vpow2.f32 %v4686_v30 }
0x78ed   :  { %v5317_v48 = vpop.eup %5316 }
0x78ee   :  { %3610 = vrot.lane.b32.xlu1 %v5317_v48, %s5512_s11 }
0x78ef   :  { %v5319_v47 = vpop.eup %5318 }
0x78f0   :  { %v3601_v18 = vadd.f32 1.0, %v5319_v47 }
0x78f2   :  { %5320 = vrcp.f32 %v3601_v18 }
0x78ff   :  { %v5321_v46 = vpop.eup %5320 }
0x7900   :  { %v3608_v0 = vmul.f32 %v5321_v46, %v3606_v20 }
0x7960   :  { %v3611_v12 = vpop.permute.xlu1 %3610 }
0x7961   :  { %v3613_v26 = vmul.f32 %v5321_v46, %v3611_v12 }
0x7963   :  { %3615 = vrot.lane.b32.xlu0 %v3613_v26, %s5513_s12 }
0x79d5   :  { %v3616_v16 = vpop.permute.xlu0 %3615 }
0x79d6   :  { %v3618_v7 = vadd.f32 %v3616_v16, %v3608_v0 }
0x79d8   :  { %5322 = vtanh.f32 %v3618_v7 }
0x79e5   :  { %v5323_v14 = vpop.eup %5322 }
0x79e6   :  { %3621 = vrot.lane.b32.xlu1 %v5323_v14, %s5513_s12 }
0x7a58   :  { %v3622_v58 = vpop.permute.xlu1 %3621 }
0x7a59   :  { %v6886_v48 = vmul.f32 %v5321_v46, %v3622_v58 }
0x7a5b   :  { %7457 = vst [vmem:[#allocation30_spill] sm:$0xff] %v6886_v48  ;;  %3635 = vrot.lane.b32.xlu1 %v6886_v48, %s5514_s13  ;;  %3632 = vrot.lane.b32.xlu0 %v6886_v48, %s5515_s14 }
0x7a5f   :  { %3638 = vrot.lane.b32.xlu0 %v6886_v48, %s5513_s12 }
0x7acd   :  { %v3636_v34 = vpop.permute.xlu1 %3635  ;;  %v3633_v9 = vpop.permute.xlu0 %3632 }
0x7ace   :  { %v3641_v30 = vsel %vm565_vm1, %v3633_v9, %v3636_v34 }
0x7acf   :  { %v3642_v47 = vsel %vm567_vm2, %v3641_v30, %v6886_v48 }
0x7ad1   :  { %v3639_v18 = vpop.permute.xlu0 %3638 }
0x7ad2   :  { %v3643_v58 = vsel %vm569_vm3, %v3642_v47, %v3639_v18  ;;  %v3657_v47 = vrot.slane %v3618_v7, 7 }
0x7ad3   :  { %v3644_v46 = vmul.f32 %v3643_v58, %v5698_v43 }
0x7ad5   :  { %v3646_v12 = vrot.slane %v3644_v46, 7 }
0x7ad7   :  { %v3648_v26 = vadd.f32 %v3646_v12, %v6812_v24 }
0x7ad9   :  { %5324 = vtanh.f32 %v3648_v26  ;;  %v4687_v0 = vmul.f32 -1.442695, %v3648_v26 }
0x7adb   :  { %5326 = vpow2.f32 %v4687_v0 }
0x7ae6   :  { %v5325_v20 = vpop.eup %5324 }
0x7ae7   :  { %3661 = vrot.lane.b32.xlu1 %v5325_v20, %s5512_s11 }
0x7ae8   :  { %v5327_v16 = vpop.eup %5326 }
0x7ae9   :  { %v3652_v14 = vadd.f32 1.0, %v5327_v16 }
0x7aeb   :  { %5328 = vrcp.f32 %v3652_v14 }
0x7af8   :  { %v5329_v34 = vpop.eup %5328 }
0x7af9   :  { %v3659_v18 = vmul.f32 %v5329_v34, %v3657_v47 }
0x7b59   :  { %v3662_v9 = vpop.permute.xlu1 %3661 }
0x7b5a   :  { %v3664_v30 = vmul.f32 %v5329_v34, %v3662_v9 }
0x7b5c   :  { %3666 = vrot.lane.b32.xlu0 %v3664_v30, %s5513_s12 }
0x7bce   :  { %v3667_v58 = vpop.permute.xlu0 %3666 }
0x7bcf   :  { %v3669_v46 = vadd.f32 %v3667_v58, %v3659_v18  ;;  %v6921_v18 = vld [vmem:[%s7385_s0 + $0x40] sm:$0xff] }
0x7bd1   :  { %5330 = vtanh.f32 %v3669_v46 }
0x7bde   :  { %v5331_v12 = vpop.eup %5330 }
0x7bdf   :  { %3672 = vrot.lane.b32.xlu1 %v5331_v12, %s5513_s12 }
0x7c51   :  { %v3673_v48 = vpop.permute.xlu1 %3672 }
0x7c52   :  { %v6903_v20 = vmul.f32 %v5329_v34, %v3673_v48 }
0x7c54   :  { %7458 = vst [vmem:[#allocation31_spill] sm:$0xff] %v6903_v20  ;;  %3686 = vrot.lane.b32.xlu1 %v6903_v20, %s5514_s13  ;;  %3683 = vrot.lane.b32.xlu0 %v6903_v20, %s5515_s14 }
0x7c58   :  { %3689 = vrot.lane.b32.xlu0 %v6903_v20, %s5513_s12 }
0x7cc6   :  { %v3687_v7 = vpop.permute.xlu1 %3686  ;;  %v3684_v26 = vpop.permute.xlu0 %3683 }
0x7cc7   :  { %v3692_v0 = vsel %vm565_vm1, %v3684_v26, %v3687_v7 }
0x7cc8   :  { %v3693_v16 = vsel %vm567_vm2, %v3692_v0, %v6903_v20 }
0x7cca   :  { %v3690_v14 = vpop.permute.xlu0 %3689 }
0x7ccb   :  { %v3694_v48 = vsel %vm569_vm3, %v3693_v16, %v3690_v14  ;;  %v6928_v14 = vld [vmem:[%s7385_s0 + $0x48] sm:$0xff] }
0x7ccc   :  { %v3695_v34 = vmul.f32 %v3694_v48, %v5698_v43 }
0x7cce   :  { %v3697_v9 = vrot.slane %v3695_v34, 7 }
0x7cd0   :  { %v3699_v30 = vadd.f32 %v3697_v9, %v6812_v24 }
0x7cd2   :  { %5332 = vtanh.f32 %v3699_v30  ;;  %v4688_v58 = vmul.f32 -1.442695, %v3699_v30 }
0x7cd4   :  { %5334 = vpow2.f32 %v4688_v58 }
0x7cdf   :  { %v5333_v47 = vpop.eup %5332 }
0x7ce0   :  { %3712 = vrot.lane.b32.xlu1 %v5333_v47, %s5512_s11  ;;  %v3708_v47 = vrot.slane %v3669_v46, 7 }
0x7ce1   :  { %v5335_v12 = vpop.eup %5334 }
0x7ce2   :  { %v3703_v7 = vadd.f32 1.0, %v5335_v12 }
0x7ce4   :  { %5336 = vrcp.f32 %v3703_v7 }
0x7cf1   :  { %v5337_v26 = vpop.eup %5336 }
0x7cf2   :  { %v3710_v58 = vmul.f32 %v5337_v26, %v3708_v47 }
0x7d04   :  { %57 = vadd.xlane.f32.xlu1 %v6921_v18 }
0x7d52   :  { %v3713_v0 = vpop.permute.xlu1 %3712 }
0x7d53   :  { %v3715_v16 = vmul.f32 %v5337_v26, %v3713_v0 }
0x7d55   :  { %3717 = vrot.lane.b32.xlu0 %v3715_v16, %s5513_s12 }
0x7d74   :  { %59 = vadd.xlane.f32.xlu0 %v6928_v14 }
0x7d8d   :  { %v58_v48 = vpop.xlane.xlu1 %57 }
0x7d8e   :  { %v70_v34 = vmul.f32 0.0078125, %v58_v48 }
0x7d90   :  { %v80_v9 = vsub.f32 %v6921_v18, %v70_v34 }
0x7d92   :  { %v90_v30 = vmul.f32 %v80_v9, %v80_v9 }
0x7d94   :  { %108 = vadd.xlane.f32.xlu1 %v90_v30  ;;  %v130_v30 = vld [vmem:[%s7386_s1 + $0x40] sm:$0xff] }
0x7dc7   :  { %v3718_v12 = vpop.permute.xlu0 %3717 }
0x7dc8   :  { %v6932_v7 = vadd.f32 %v3718_v12, %v3710_v58 }
0x7dca   :  { %5338 = vtanh.f32 %v6932_v7 }
0x7dd7   :  { %v5339_v0 = vpop.eup %5338 }
0x7dd8   :  { %3723 = vrot.lane.b32.xlu0 %v5339_v0, %s5513_s12 }
0x7dfd   :  { %v60_v16 = vpop.xlane.xlu0 %59 }
0x7dfe   :  { %v71_v20 = vmul.f32 0.0078125, %v60_v16 }
0x7e00   :  { %v81_v15 = vsub.f32 %v6928_v14, %v71_v20 }
0x7e02   :  { %v91_v50 = vmul.f32 %v81_v15, %v81_v15 }
0x7e04   :  { %110 = vadd.xlane.f32.xlu1 %v91_v50 }
0x7e1d   :  { %v109_v48 = vpop.xlane.xlu1 %108 }
0x7e1e   :  { %v120_v49 = vmul.f32 0.0078125, %v109_v48  ;;  %v131_v48 = vld [vmem:[%s7386_s1 + $0x48] sm:$0xff] }
0x7e20   :  { %v140_v9 = vadd.f32 1e-05, %v120_v49  ;;  %v170_v49 = vld [vmem:[%s7387_s2 + $0x40] sm:$0xff] }
0x7e22   :  { %5340 = vrsqrt.f32 %v140_v9 }
0x7e2f   :  { %v5341_v46 = vpop.eup %5340 }
0x7e30   :  { %v160_v12 = vmul.f32 %v5341_v46, %v130_v30  ;;  %v171_v46 = vld [vmem:[%s7387_s2 + $0x48] sm:$0xff] }
0x7e32   :  { %v180_v50 = vmul.f32 %v160_v12, %v70_v34 }
0x7e34   :  { %v190_v15 = vsub.f32 %v170_v49, %v180_v50 }
0x7e4a   :  { %v3724_v47 = vpop.permute.xlu0 %3723 }
0x7e4b   :  { %v6940_v58 = vmul.f32 %v5337_v26, %v3724_v47 }
0x7e4d   :  { %7459 = vst [vmem:[#allocation32_spill] sm:$0xff] %v6940_v58  ;;  %3737 = vrot.lane.b32.xlu0 %v6940_v58, %s5514_s13  ;;  %3734 = vrot.lane.b32.xlu1 %v6940_v58, %s5515_s14 }
0x7e51   :  { %3740 = vrot.lane.b32.xlu0 %v6940_v58, %s5513_s12  ;;  %234 = vperm.xlu1 %4819, %v160_v12  }
0x7e55   :  { %294 = vperm.xlu1 %4819, %v190_v15  }
0x7e8d   :  { %v111_v26 = vpop.xlane.xlu1 %110 }
0x7e8e   :  { %v121_v0 = vmul.f32 0.0078125, %v111_v26 }
0x7e90   :  { %v141_v16 = vadd.f32 1e-05, %v121_v0 }
0x7e92   :  { %5342 = vrsqrt.f32 %v141_v16 }
0x7e9f   :  { %v5343_v9 = vpop.eup %5342 }
0x7ea0   :  { %v161_v34 = vmul.f32 %v5343_v9, %v131_v48 }
0x7ea2   :  { %239 = vperm.xlu0 %4818, %v161_v34   ;;  %v181_v30 = vmul.f32 %v161_v34, %v71_v20 }
0x7ea4   :  { %v191_v47 = vsub.f32 %v171_v46, %v181_v30 }
0x7ea6   :  { %299 = vperm.xlu0 %4818, %v191_v47  }
0x7ebf   :  { %v3738_v12 = vpop.permute.xlu0 %3737  ;;  %v3735_v50 = vpop.permute.xlu1 %3734 }
0x7ec0   :  { %v3743_v49 = vsel %vm565_vm1, %v3735_v50, %v3738_v12 }
0x7ec1   :  { %v3744_v26 = vsel %vm567_vm2, %v3743_v49, %v6940_v58 }
0x7ec3   :  { %v3741_v15 = vpop.permute.xlu0 %3740 }
0x7ec4   :  { %v3745_v0 = vsel %vm569_vm3, %v3744_v26, %v3741_v15 }
0x7ec5   :  { %v3746_v16 = vmul.f32 %v3745_v0, %v5698_v43 }
0x7ec7   :  { %v3748_v48 = vrot.slane %v3746_v16, 7 }
0x7ec9   :  { %v3750_v9 = vadd.f32 %v3748_v48, %v6812_v24 }
0x7ecb   :  { %5344 = vtanh.f32 %v3750_v9  ;;  %v4689_v0 = vmul.f32 -1.442695, %v3750_v9 }
0x7ecc   :  { %v235_v38 = vpop.permute.xlu1 %234 }
0x7ecd   :  { %v250_v20 = vmul.f32 %v235_v38, %v6921_v18  ;;  %5346 = vpow2.f32 %v4689_v0 }
0x7ed0   :  { %v295_v34 = vpop.permute.xlu1 %294 }
0x7ed1   :  { %v310_v46 = vadd.f32 %v295_v34, %v250_v20  ;;  %v3759_v34 = vrot.slane %v6932_v7, 7  ;;  %v468_v7 = vld [vmem:[%s7391_s6 + $0x40] sm:$0xff] }
0x7ed3   :  { %v320_v30 = vmax.f32 %v310_v46, 0.0 }
0x7ed5   :  { %4776 = vmatprep.mubr.f32.mxu1 %v320_v30 }
0x7ed8   :  { %v5345_v47 = vpop.eup %5344 }
0x7ed9   :  { %3763 = vrot.lane.b32.xlu1 %v5345_v47, %s5512_s11 }
0x7eda   :  { %v5347_v16 = vpop.eup %5346 }
0x7edb   :  { %v3754_v48 = vadd.f32 1.0, %v5347_v16 }
0x7edd   :  { %5348 = vrcp.f32 %v3754_v48 }
0x7eea   :  { %v5349_v38 = vpop.eup %5348 }
0x7eeb   :  { %v3761_v46 = vmul.f32 %v5349_v38, %v3759_v34  ;;  %v6991_v34 = vld [vmem:[%s7389_s4] ss:$0 sm:$0xff] }
0x7f1d   :  { %v240_v12 = vpop.permute.xlu0 %239 }
0x7f1e   :  { %v251_v50 = vmul.f32 %v240_v12, %v6928_v14 }
0x7f21   :  { %v300_v49 = vpop.permute.xlu0 %299 }
0x7f22   :  { %v311_v15 = vadd.f32 %v300_v49, %v251_v50 }
0x7f24   :  { %v321_v26 = vmax.f32 %v311_v15, 0.0 }
0x7f26   :  { %4777 = vmatmul.mubr.f32.gmra.mxu1 %v321_v26 }
0x7f4b   :  { %v3764_v18 = vpop.permute.xlu1 %3763 }
0x7f4c   :  { %v3766_v20 = vmul.f32 %v5349_v38, %v3764_v18 }
0x7f4e   :  { %3768 = vrot.lane.b32.xlu0 %v3766_v20, %s5513_s12 }
0x7fc0   :  { %v3769_v30 = vpop.permute.xlu0 %3768 }
0x7fc1   :  { %v3771_v47 = vadd.f32 %v3769_v30, %v3761_v46 }
0x7fc3   :  { %5350 = vtanh.f32 %v3771_v47 }
0x7fd0   :  { %v5351_v14 = vpop.eup %5350 }
0x7fd1   :  { %3774 = vrot.lane.b32.xlu1 %v5351_v14, %s5513_s12 }
0x7fe6   :  { %v6981_v50 = vpop.f32.mrf.mxu1 }
0x7fe8   :  { %v451_v0 = vpop.f32.mrf.mxu1 }
0x7fe9   :  { %v452_v46 = vadd.f32 %v6991_v34, %v451_v0  ;;  %v3810_v0 = vrot.slane %v3771_v47, 7 }
0x8043   :  { %v3775_v9 = vpop.permute.xlu1 %3774 }
0x8044   :  { %v6969_v12 = vmul.f32 %v5349_v38, %v3775_v9 }
0x8046   :  { %7460 = vst [vmem:[#allocation33_spill] sm:$0xff] %v6969_v12  ;;  %3788 = vrot.lane.b32.xlu1 %v6969_v12, %s5514_s13  ;;  %3785 = vrot.lane.b32.xlu0 %v6969_v12, %s5515_s14 }
0x804a   :  { %496 = vrot.lane.b32.xlu1 %v468_v7, %s5511_s29  ;;  %3791 = vrot.lane.b32.xlu0 %v6969_v12, %s5513_s12 }
0x80b8   :  { %v3789_v49 = vpop.permute.xlu1 %3788  ;;  %v3786_v15 = vpop.permute.xlu0 %3785 }
0x80b9   :  { %v3794_v26 = vsel %vm565_vm1, %v3786_v15, %v3789_v49 }
0x80ba   :  { %v3795_v16 = vsel %vm567_vm2, %v3794_v26, %v6969_v12 }
0x80bc   :  { %v3792_v48 = vpop.permute.xlu0 %3791  ;;  %v497_v18 = vpop.permute.xlu1 %496 }
0x80bd   :  { %v3796_v38 = vsel %vm569_vm3, %v3795_v16, %v3792_v48  ;;  %v6995_v14 = vsel %vm510_vm0, %v452_v46, %v497_v18 }
0x80be   :  { %v3797_v20 = vmul.f32 %v3796_v38, %v5698_v43 }
0x80c0   :  { %v3799_v30 = vrot.slane %v3797_v20, 7 }
0x80c2   :  { %v3801_v9 = vadd.f32 %v3799_v30, %v6995_v14 }
0x80c4   :  { %5352 = vtanh.f32 %v3801_v9  ;;  %v4690_v49 = vmul.f32 -1.442695, %v3801_v9 }
0x80c6   :  { %5354 = vpow2.f32 %v4690_v49 }
0x80d1   :  { %v5353_v7 = vpop.eup %5352 }
0x80d2   :  { %3814 = vrot.lane.b32.xlu0 %v5353_v7, %s5512_s11 }
0x80d3   :  { %v5355_v15 = vpop.eup %5354 }
0x80d4   :  { %v3805_v26 = vadd.f32 1.0, %v5355_v15 }
0x80d6   :  { %5356 = vrcp.f32 %v3805_v26 }
0x80e3   :  { %v5357_v16 = vpop.eup %5356 }
0x80e4   :  { %v3812_v20 = vmul.f32 %v5357_v16, %v3810_v0 }
0x8144   :  { %v3815_v48 = vpop.permute.xlu0 %3814 }
0x8145   :  { %v3817_v38 = vmul.f32 %v5357_v16, %v3815_v48 }
0x8147   :  { %3819 = vrot.lane.b32.xlu1 %v3817_v38, %s5513_s12 }
0x81b9   :  { %v3820_v18 = vpop.permute.xlu1 %3819 }
0x81ba   :  { %v3822_v46 = vadd.f32 %v3820_v18, %v3812_v20 }
0x81bc   :  { %5358 = vtanh.f32 %v3822_v46 }
0x81c9   :  { %v5359_v30 = vpop.eup %5358 }
0x81ca   :  { %3825 = vrot.lane.b32.xlu0 %v5359_v30, %s5513_s12 }
0x823c   :  { %v3826_v12 = vpop.permute.xlu0 %3825 }
0x823d   :  { %v7001_v7 = vmul.f32 %v5357_v16, %v3826_v12  ;;  %v7016_v16 = vld [vmem:[%s7390_s5] sm:$0x1] }
0x823f   :  { %7461 = vst [vmem:[#allocation34_spill] sm:$0xff] %v7001_v7  ;;  %3840 = vrot.lane.b32.xlu0 %v7001_v7, %s5514_s13  ;;  %3837 = vrot.lane.b32.xlu1 %v7001_v7, %s5515_s14 }
0x8243   :  { %3843 = vrot.lane.b32.xlu1 %v7001_v7, %s5513_s12 }
0x82b1   :  { %v3841_v47 = vpop.permute.xlu0 %3840  ;;  %v3838_v9 = vpop.permute.xlu1 %3837 }
0x82b2   :  { %v3846_v49 = vsel %vm565_vm1, %v3838_v9, %v3841_v47 }
0x82b3   :  { %v3847_v15 = vsel %vm567_vm2, %v3846_v49, %v7001_v7 }
0x82b5   :  { %v3844_v26 = vpop.permute.xlu1 %3843 }
0x82b6   :  { %v3848_v12 = vsel %vm569_vm3, %v3847_v15, %v3844_v26  ;;  %v3862_v26 = vrot.slane %v3822_v46, 7 }
0x82b7   :  { %v3849_v48 = vmul.f32 %v7016_v16, %v3848_v12 }
0x82b9   :  { %v3851_v38 = vrot.slane %v3849_v48, 7 }
0x82bb   :  { %v3853_v0 = vadd.f32 %v3851_v38, %v6995_v14 }
0x82bd   :  { %5360 = vtanh.f32 %v3853_v0  ;;  %v4691_v18 = vmul.f32 -1.442695, %v3853_v0 }
0x82bf   :  { %5362 = vpow2.f32 %v4691_v18 }
0x82ca   :  { %v5361_v20 = vpop.eup %5360 }
0x82cb   :  { %3866 = vrot.lane.b32.xlu0 %v5361_v20, %s5512_s11 }
0x82cc   :  { %v5363_v30 = vpop.eup %5362 }
0x82cd   :  { %v3857_v47 = vadd.f32 1.0, %v5363_v30 }
0x82cf   :  { %5364 = vrcp.f32 %v3857_v47 }
0x82dc   :  { %v5365_v9 = vpop.eup %5364 }
0x82dd   :  { %v3864_v7 = vmul.f32 %v5365_v9, %v3862_v26 }
0x833d   :  { %v3867_v49 = vpop.permute.xlu0 %3866 }
0x833e   :  { %v3869_v15 = vmul.f32 %v5365_v9, %v3867_v49 }
0x8340   :  { %3871 = vrot.lane.b32.xlu1 %v3869_v15, %s5513_s12 }
0x83b2   :  { %v3872_v12 = vpop.permute.xlu1 %3871 }
0x83b3   :  { %v3874_v48 = vadd.f32 %v3872_v12, %v3864_v7 }
0x83b5   :  { %5366 = vtanh.f32 %v3874_v48 }
0x83c2   :  { %v5367_v38 = vpop.eup %5366 }
0x83c3   :  { %3877 = vrot.lane.b32.xlu0 %v5367_v38, %s5513_s12 }
0x8435   :  { %v3878_v58 = vpop.permute.xlu0 %3877 }
0x8436   :  { %v7023_v20 = vmul.f32 %v5365_v9, %v3878_v58 }
0x8438   :  { %7462 = vst [vmem:[#allocation35_spill] sm:$0xff] %v7023_v20  ;;  %3891 = vrot.lane.b32.xlu0 %v7023_v20, %s5514_s13  ;;  %3888 = vrot.lane.b32.xlu1 %v7023_v20, %s5515_s14 }
0x843c   :  { %3894 = vrot.lane.b32.xlu1 %v7023_v20, %s5513_s12 }
0x84aa   :  { %v3892_v46 = vpop.permute.xlu0 %3891  ;;  %v3889_v0 = vpop.permute.xlu1 %3888 }
0x84ab   :  { %v3897_v7 = vsel %vm565_vm1, %v3889_v0, %v3892_v46 }
0x84ac   :  { %v3898_v18 = vsel %vm567_vm2, %v3897_v7, %v7023_v20 }
0x84ae   :  { %v3895_v30 = vpop.permute.xlu1 %3894 }
0x84af   :  { %v3899_v58 = vsel %vm569_vm3, %v3898_v18, %v3895_v30  ;;  %v3913_v18 = vrot.slane %v3874_v48, 7 }
0x84b0   :  { %v3900_v47 = vmul.f32 %v3899_v58, %v5698_v43 }
0x84b2   :  { %v3902_v9 = vrot.slane %v3900_v47, 7 }
0x84b4   :  { %v3904_v49 = vadd.f32 %v3902_v9, %v6995_v14 }
0x84b6   :  { %5368 = vtanh.f32 %v3904_v49  ;;  %v4692_v26 = vmul.f32 -1.442695, %v3904_v49 }
0x84b8   :  { %5370 = vpow2.f32 %v4692_v26 }
0x84c3   :  { %v5369_v15 = vpop.eup %5368 }
0x84c4   :  { %3917 = vrot.lane.b32.xlu0 %v5369_v15, %s5512_s11 }
0x84c5   :  { %v5371_v12 = vpop.eup %5370 }
0x84c6   :  { %v3908_v38 = vadd.f32 1.0, %v5371_v12 }
0x84c8   :  { %5372 = vrcp.f32 %v3908_v38 }
0x84d5   :  { %v5373_v46 = vpop.eup %5372 }
0x84d6   :  { %v3915_v30 = vmul.f32 %v5373_v46, %v3913_v18 }
0x8536   :  { %v3918_v0 = vpop.permute.xlu0 %3917 }
0x8537   :  { %v3920_v7 = vmul.f32 %v5373_v46, %v3918_v0 }
0x8539   :  { %3922 = vrot.lane.b32.xlu1 %v3920_v7, %s5513_s12 }
0x85ab   :  { %v3923_v58 = vpop.permute.xlu1 %3922 }
0x85ac   :  { %v3925_v47 = vadd.f32 %v3923_v58, %v3915_v30 }
0x85ae   :  { %5374 = vtanh.f32 %v3925_v47 }
0x85bb   :  { %v5375_v9 = vpop.eup %5374 }
0x85bc   :  { %3928 = vrot.lane.b32.xlu0 %v5375_v9, %s5513_s12 }
0x862e   :  { %v3929_v20 = vpop.permute.xlu0 %3928 }
0x862f   :  { %v7040_v15 = vmul.f32 %v5373_v46, %v3929_v20 }
0x8631   :  { %7463 = vst [vmem:[#allocation36_spill] sm:$0xff] %v7040_v15  ;;  %3942 = vrot.lane.b32.xlu0 %v7040_v15, %s5514_s13  ;;  %3939 = vrot.lane.b32.xlu1 %v7040_v15, %s5515_s14 }
0x8635   :  { %3945 = vrot.lane.b32.xlu1 %v7040_v15, %s5513_s12 }
0x86a3   :  { %v3943_v48 = vpop.permute.xlu0 %3942  ;;  %v3940_v49 = vpop.permute.xlu1 %3939 }
0x86a4   :  { %v3948_v26 = vsel %vm565_vm1, %v3940_v49, %v3943_v48 }
0x86a5   :  { %v3949_v12 = vsel %vm567_vm2, %v3948_v26, %v7040_v15 }
0x86a7   :  { %v3946_v38 = vpop.permute.xlu1 %3945 }
0x86a8   :  { %v3950_v20 = vsel %vm569_vm3, %v3949_v12, %v3946_v38  ;;  %v3964_v12 = vrot.slane %v3925_v47, 7 }
0x86a9   :  { %v3951_v46 = vmul.f32 %v3950_v20, %v5698_v43 }
0x86ab   :  { %v3953_v0 = vrot.slane %v3951_v46, 7 }
0x86ad   :  { %v3955_v7 = vadd.f32 %v3953_v0, %v6995_v14 }
0x86af   :  { %5376 = vtanh.f32 %v3955_v7  ;;  %v4693_v30 = vmul.f32 -1.442695, %v3955_v7 }
0x86b1   :  { %5378 = vpow2.f32 %v4693_v30 }
0x86bc   :  { %v5377_v18 = vpop.eup %5376 }
0x86bd   :  { %3968 = vrot.lane.b32.xlu0 %v5377_v18, %s5512_s11 }
0x86be   :  { %v5379_v58 = vpop.eup %5378 }
0x86bf   :  { %v3959_v9 = vadd.f32 1.0, %v5379_v58 }
0x86c1   :  { %5380 = vrcp.f32 %v3959_v9 }
0x86ce   :  { %v5381_v48 = vpop.eup %5380 }
0x86cf   :  { %v3966_v38 = vmul.f32 %v5381_v48, %v3964_v12 }
0x872f   :  { %v3969_v49 = vpop.permute.xlu0 %3968 }
0x8730   :  { %v3971_v26 = vmul.f32 %v5381_v48, %v3969_v49 }
0x8732   :  { %3973 = vrot.lane.b32.xlu1 %v3971_v26, %s5513_s12 }
0x87a4   :  { %v3974_v20 = vpop.permute.xlu1 %3973 }
0x87a5   :  { %v3976_v46 = vadd.f32 %v3974_v20, %v3966_v38 }
0x87a7   :  { %5382 = vtanh.f32 %v3976_v46 }
0x87b4   :  { %v5383_v0 = vpop.eup %5382 }
0x87b5   :  { %3979 = vrot.lane.b32.xlu0 %v5383_v0, %s5513_s12 }
0x8827   :  { %v3980_v15 = vpop.permute.xlu0 %3979 }
0x8828   :  { %v7057_v18 = vmul.f32 %v5381_v48, %v3980_v15 }
0x882a   :  { %7464 = vst [vmem:[#allocation37_spill] sm:$0xff] %v7057_v18  ;;  %3993 = vrot.lane.b32.xlu0 %v7057_v18, %s5514_s13  ;;  %3990 = vrot.lane.b32.xlu1 %v7057_v18, %s5515_s14 }
0x882e   :  { %3996 = vrot.lane.b32.xlu1 %v7057_v18, %s5513_s12 }
0x889c   :  { %v3994_v47 = vpop.permute.xlu0 %3993  ;;  %v3991_v7 = vpop.permute.xlu1 %3990 }
0x889d   :  { %v3999_v30 = vsel %vm565_vm1, %v3991_v7, %v3994_v47 }
0x889e   :  { %v4000_v58 = vsel %vm567_vm2, %v3999_v30, %v7057_v18 }
0x88a0   :  { %v3997_v9 = vpop.permute.xlu1 %3996 }
0x88a1   :  { %v4001_v15 = vsel %vm569_vm3, %v4000_v58, %v3997_v9  ;;  %v4015_v58 = vrot.slane %v3976_v46, 7 }
0x88a2   :  { %v4002_v48 = vmul.f32 %v4001_v15, %v5698_v43 }
0x88a4   :  { %v4004_v49 = vrot.slane %v4002_v48, 7 }
0x88a6   :  { %v4006_v26 = vadd.f32 %v4004_v49, %v6995_v14 }
0x88a8   :  { %5384 = vtanh.f32 %v4006_v26  ;;  %v4694_v38 = vmul.f32 -1.442695, %v4006_v26 }
0x88aa   :  { %5386 = vpow2.f32 %v4694_v38 }
0x88b5   :  { %v5385_v12 = vpop.eup %5384 }
0x88b6   :  { %4019 = vrot.lane.b32.xlu0 %v5385_v12, %s5512_s11 }
0x88b7   :  { %v5387_v20 = vpop.eup %5386 }
0x88b8   :  { %v4010_v0 = vadd.f32 1.0, %v5387_v20 }
0x88ba   :  { %5388 = vrcp.f32 %v4010_v0 }
0x88c7   :  { %v5389_v47 = vpop.eup %5388 }
0x88c8   :  { %v4017_v9 = vmul.f32 %v5389_v47, %v4015_v58 }
0x8928   :  { %v4020_v7 = vpop.permute.xlu0 %4019 }
0x8929   :  { %v4022_v30 = vmul.f32 %v5389_v47, %v4020_v7 }
0x892b   :  { %4024 = vrot.lane.b32.xlu1 %v4022_v30, %s5513_s12 }
0x899d   :  { %v4025_v15 = vpop.permute.xlu1 %4024 }
0x899e   :  { %v4027_v48 = vadd.f32 %v4025_v15, %v4017_v9 }
0x89a0   :  { %5390 = vtanh.f32 %v4027_v48 }
0x89ad   :  { %v5391_v49 = vpop.eup %5390 }
0x89ae   :  { %4030 = vrot.lane.b32.xlu0 %v5391_v49, %s5513_s12 }
0x8a20   :  { %v4031_v18 = vpop.permute.xlu0 %4030 }
0x8a21   :  { %v7074_v12 = vmul.f32 %v5389_v47, %v4031_v18 }
0x8a23   :  { %7465 = vst [vmem:[#allocation38_spill] sm:$0xff] %v7074_v12  ;;  %4044 = vrot.lane.b32.xlu0 %v7074_v12, %s5514_s13  ;;  %4041 = vrot.lane.b32.xlu1 %v7074_v12, %s5515_s14 }
0x8a27   :  { %4047 = vrot.lane.b32.xlu1 %v7074_v12, %s5513_s12 }
0x8a95   :  { %v4045_v46 = vpop.permute.xlu0 %4044  ;;  %v4042_v26 = vpop.permute.xlu1 %4041 }
0x8a96   :  { %v4050_v38 = vsel %vm565_vm1, %v4042_v26, %v4045_v46 }
0x8a97   :  { %v4051_v20 = vsel %vm567_vm2, %v4050_v38, %v7074_v12 }
0x8a99   :  { %v4048_v0 = vpop.permute.xlu1 %4047 }
0x8a9a   :  { %v4052_v18 = vsel %vm569_vm3, %v4051_v20, %v4048_v0  ;;  %v4066_v20 = vrot.slane %v4027_v48, 7 }
0x8a9b   :  { %v4053_v47 = vmul.f32 %v4052_v18, %v5698_v43 }
0x8a9d   :  { %v4055_v7 = vrot.slane %v4053_v47, 7 }
0x8a9f   :  { %v4057_v30 = vadd.f32 %v4055_v7, %v6995_v14 }
0x8aa1   :  { %5392 = vtanh.f32 %v4057_v30  ;;  %v4695_v9 = vmul.f32 -1.442695, %v4057_v30 }
0x8aa3   :  { %5394 = vpow2.f32 %v4695_v9 }
0x8aae   :  { %v5393_v58 = vpop.eup %5392 }
0x8aaf   :  { %4070 = vrot.lane.b32.xlu0 %v5393_v58, %s5512_s11 }
0x8ab0   :  { %v5395_v15 = vpop.eup %5394 }
0x8ab1   :  { %v4061_v49 = vadd.f32 1.0, %v5395_v15 }
0x8ab3   :  { %5396 = vrcp.f32 %v4061_v49 }
0x8ac0   :  { %v5397_v46 = vpop.eup %5396 }
0x8ac1   :  { %v4068_v0 = vmul.f32 %v5397_v46, %v4066_v20 }
0x8b21   :  { %v4071_v26 = vpop.permute.xlu0 %4070 }
0x8b22   :  { %v4073_v38 = vmul.f32 %v5397_v46, %v4071_v26 }
0x8b24   :  { %4075 = vrot.lane.b32.xlu1 %v4073_v38, %s5513_s12 }
0x8b96   :  { %v4076_v18 = vpop.permute.xlu1 %4075 }
0x8b97   :  { %v4078_v47 = vadd.f32 %v4076_v18, %v4068_v0 }
0x8b99   :  { %5398 = vtanh.f32 %v4078_v47 }
0x8ba6   :  { %v5399_v7 = vpop.eup %5398 }
0x8ba7   :  { %4081 = vrot.lane.b32.xlu0 %v5399_v7, %s5513_s12 }
0x8c19   :  { %v4082_v12 = vpop.permute.xlu0 %4081 }
0x8c1a   :  { %v7091_v58 = vmul.f32 %v5397_v46, %v4082_v12 }
0x8c1c   :  { %7466 = vst [vmem:[#allocation39_spill] sm:$0xff] %v7091_v58  ;;  %4095 = vrot.lane.b32.xlu0 %v7091_v58, %s5514_s13  ;;  %4092 = vrot.lane.b32.xlu1 %v7091_v58, %s5515_s14 }
0x8c20   :  { %4098 = vrot.lane.b32.xlu1 %v7091_v58, %s5513_s12 }
0x8c8e   :  { %v4096_v48 = vpop.permute.xlu0 %4095  ;;  %v4093_v30 = vpop.permute.xlu1 %4092 }
0x8c8f   :  { %v4101_v9 = vsel %vm565_vm1, %v4093_v30, %v4096_v48 }
0x8c90   :  { %v4102_v15 = vsel %vm567_vm2, %v4101_v9, %v7091_v58 }
0x8c92   :  { %v4099_v49 = vpop.permute.xlu1 %4098 }
0x8c93   :  { %v4103_v12 = vsel %vm569_vm3, %v4102_v15, %v4099_v49  ;;  %v4117_v15 = vrot.slane %v4078_v47, 7 }
0x8c94   :  { %v4104_v46 = vmul.f32 %v4103_v12, %v5698_v43 }
0x8c96   :  { %v4106_v26 = vrot.slane %v4104_v46, 7 }
0x8c98   :  { %v4108_v38 = vadd.f32 %v4106_v26, %v6995_v14 }
0x8c9a   :  { %5400 = vtanh.f32 %v4108_v38  ;;  %v4696_v0 = vmul.f32 -1.442695, %v4108_v38 }
0x8c9c   :  { %5402 = vpow2.f32 %v4696_v0 }
0x8ca7   :  { %v5401_v20 = vpop.eup %5400 }
0x8ca8   :  { %4121 = vrot.lane.b32.xlu0 %v5401_v20, %s5512_s11 }
0x8ca9   :  { %v5403_v18 = vpop.eup %5402 }
0x8caa   :  { %v4112_v7 = vadd.f32 1.0, %v5403_v18 }
0x8cac   :  { %5404 = vrcp.f32 %v4112_v7 }
0x8cb9   :  { %v5405_v48 = vpop.eup %5404 }
0x8cba   :  { %v4119_v49 = vmul.f32 %v5405_v48, %v4117_v15 }
0x8d1a   :  { %v4122_v30 = vpop.permute.xlu0 %4121 }
0x8d1b   :  { %v4124_v9 = vmul.f32 %v5405_v48, %v4122_v30 }
0x8d1d   :  { %4126 = vrot.lane.b32.xlu1 %v4124_v9, %s5513_s12 }
0x8d8f   :  { %v4127_v12 = vpop.permute.xlu1 %4126 }
0x8d90   :  { %v4129_v46 = vadd.f32 %v4127_v12, %v4119_v49 }
0x8d92   :  { %5406 = vtanh.f32 %v4129_v46 }
0x8d9f   :  { %v5407_v26 = vpop.eup %5406 }
0x8da0   :  { %4132 = vrot.lane.b32.xlu0 %v5407_v26, %s5513_s12 }
0x8e12   :  { %v4133_v58 = vpop.permute.xlu0 %4132 }
0x8e13   :  { %v7108_v20 = vmul.f32 %v5405_v48, %v4133_v58 }
0x8e15   :  { %7467 = vst [vmem:[#allocation40_spill] sm:$0xff] %v7108_v20  ;;  %4146 = vrot.lane.b32.xlu0 %v7108_v20, %s5514_s13  ;;  %4143 = vrot.lane.b32.xlu1 %v7108_v20, %s5515_s14 }
0x8e19   :  { %4149 = vrot.lane.b32.xlu1 %v7108_v20, %s5513_s12 }
0x8e87   :  { %v4147_v47 = vpop.permute.xlu0 %4146  ;;  %v4144_v38 = vpop.permute.xlu1 %4143 }
0x8e88   :  { %v4152_v0 = vsel %vm565_vm1, %v4144_v38, %v4147_v47 }
0x8e89   :  { %v4153_v18 = vsel %vm567_vm2, %v4152_v0, %v7108_v20 }
0x8e8b   :  { %v4150_v7 = vpop.permute.xlu1 %4149 }
0x8e8c   :  { %v4154_v58 = vsel %vm569_vm3, %v4153_v18, %v4150_v7  ;;  %v4168_v18 = vrot.slane %v4129_v46, 7  ;;  %v469_v46 = vld [vmem:[%s7391_s6 + $0x48] sm:$0xff] }
0x8e8d   :  { %v4155_v48 = vmul.f32 %v4154_v58, %v5698_v43 }
0x8e8f   :  { %v4157_v30 = vrot.slane %v4155_v48, 7 }
0x8e91   :  { %v4159_v9 = vadd.f32 %v4157_v30, %v6995_v14 }
0x8e93   :  { %5408 = vtanh.f32 %v4159_v9  ;;  %v4697_v49 = vmul.f32 -1.442695, %v4159_v9 }
0x8e95   :  { %5410 = vpow2.f32 %v4697_v49 }
0x8ea0   :  { %v5409_v15 = vpop.eup %5408 }
0x8ea1   :  { %4172 = vrot.lane.b32.xlu0 %v5409_v15, %s5512_s11 }
0x8ea2   :  { %v5411_v12 = vpop.eup %5410 }
0x8ea3   :  { %v4163_v26 = vadd.f32 1.0, %v5411_v12 }
0x8ea5   :  { %5412 = vrcp.f32 %v4163_v26 }
0x8eb2   :  { %v5413_v47 = vpop.eup %5412 }
0x8eb3   :  { %v4170_v7 = vmul.f32 %v5413_v47, %v4168_v18  ;;  %v457_v18 = vadd.f32 %v6991_v34, %v6981_v50 }
0x8f13   :  { %v4173_v38 = vpop.permute.xlu0 %4172 }
0x8f14   :  { %v4175_v0 = vmul.f32 %v5413_v47, %v4173_v38 }
0x8f16   :  { %4177 = vrot.lane.b32.xlu1 %v4175_v0, %s5513_s12 }
0x8f88   :  { %v4178_v58 = vpop.permute.xlu1 %4177 }
0x8f89   :  { %v4180_v48 = vadd.f32 %v4178_v58, %v4170_v7 }
0x8f8b   :  { %5414 = vtanh.f32 %v4180_v48  ;;  %v4219_v50 = vrot.slane %v4180_v48, 7 }
0x8f98   :  { %v5415_v30 = vpop.eup %5414 }
0x8f99   :  { %4183 = vrot.lane.b32.xlu0 %v5415_v30, %s5513_s12 }
0x900b   :  { %v4184_v20 = vpop.permute.xlu0 %4183 }
0x900c   :  { %v7125_v15 = vmul.f32 %v5413_v47, %v4184_v20 }
0x900e   :  { %4197 = vrot.lane.b32.xlu0 %v7125_v15, %s5514_s13  ;;  %4194 = vrot.lane.b32.xlu1 %v7125_v15, %s5515_s14 }
0x9012   :  { %498 = vrot.lane.b32.xlu0 %v469_v46, %s5511_s29  ;;  %4200 = vrot.lane.b32.xlu1 %v7125_v15, %s5513_s12 }
0x9080   :  { %v4198_v9 = vpop.permute.xlu0 %4197  ;;  %v4195_v49 = vpop.permute.xlu1 %4194 }
0x9081   :  { %v4203_v20 = vsel %vm565_vm1, %v4195_v49, %v4198_v9 }
0x9082   :  { %v4204_v12 = vsel %vm567_vm2, %v4203_v20, %v7125_v15 }
0x9084   :  { %v4201_v26 = vpop.permute.xlu1 %4200  ;;  %v499_v38 = vpop.permute.xlu0 %498 }
0x9085   :  { %v4205_v47 = vsel %vm569_vm3, %v4204_v12, %v4201_v26  ;;  %v7145_v58 = vsel %vm510_vm0, %v457_v18, %v499_v38 }
0x9086   :  { %v4206_v0 = vmul.f32 %v4205_v47, %v5698_v43 }
0x9088   :  { %v4208_v7 = vrot.slane %v4206_v0, 7 }
0x908a   :  { %v4210_v30 = vadd.f32 %v4208_v7, %v7145_v58 }
0x908c   :  { %5416 = vtanh.f32 %v4210_v30  ;;  %v4698_v9 = vmul.f32 -1.442695, %v4210_v30 }
0x908e   :  { %5418 = vpow2.f32 %v4698_v9 }
0x9099   :  { %v5417_v46 = vpop.eup %5416 }
0x909a   :  { %4223 = vrot.lane.b32.xlu1 %v5417_v46, %s5512_s11 }
0x909b   :  { %v5419_v49 = vpop.eup %5418 }
0x909c   :  { %v4214_v20 = vadd.f32 1.0, %v5419_v49 }
0x909e   :  { %5420 = vrcp.f32 %v4214_v20 }
0x90ab   :  { %v5421_v12 = vpop.eup %5420 }
0x90ac   :  { %v4221_v34 = vmul.f32 %v5421_v12, %v4219_v50 }
0x910c   :  { %v4224_v26 = vpop.permute.xlu1 %4223 }
0x910d   :  { %v4226_v47 = vmul.f32 %v5421_v12, %v4224_v26 }
0x910f   :  { %4228 = vrot.lane.b32.xlu0 %v4226_v47, %s5513_s12 }
0x9181   :  { %v4229_v38 = vpop.permute.xlu0 %4228 }
0x9182   :  { %v4231_v0 = vadd.f32 %v4229_v38, %v4221_v34 }
0x9184   :  { %5422 = vtanh.f32 %v4231_v0 }
0x9191   :  { %v5423_v18 = vpop.eup %5422 }
0x9192   :  { %4234 = vrot.lane.b32.xlu1 %v5423_v18, %s5513_s12 }
0x9204   :  { %v4235_v7 = vpop.permute.xlu1 %4234 }
0x9205   :  { %v7151_v46 = vmul.f32 %v5421_v12, %v4235_v7 }
0x9207   :  { %4249 = vrot.lane.b32.xlu1 %v7151_v46, %s5514_s13  ;;  %4246 = vrot.lane.b32.xlu0 %v7151_v46, %s5515_s14 }
0x920b   :  { %4252 = vrot.lane.b32.xlu0 %v7151_v46, %s5513_s12 }
0x9279   :  { %v4250_v48 = vpop.permute.xlu1 %4249  ;;  %v4247_v30 = vpop.permute.xlu0 %4246 }
0x927a   :  { %v4255_v9 = vsel %vm565_vm1, %v4247_v30, %v4250_v48 }
0x927b   :  { %v4256_v49 = vsel %vm567_vm2, %v4255_v9, %v7151_v46 }
0x927d   :  { %v4253_v20 = vpop.permute.xlu0 %4252 }
0x927e   :  { %v4257_v12 = vsel %vm569_vm3, %v4256_v49, %v4253_v20  ;;  %v4271_v49 = vrot.slane %v4231_v0, 7 }
0x927f   :  { %v4258_v26 = vmul.f32 %v7016_v16, %v4257_v12 }
0x9281   :  { %v4260_v47 = vrot.slane %v4258_v26, 7 }
0x9283   :  { %v4262_v50 = vadd.f32 %v4260_v47, %v7145_v58 }
0x9285   :  { %5424 = vtanh.f32 %v4262_v50  ;;  %v4699_v38 = vmul.f32 -1.442695, %v4262_v50 }
0x9287   :  { %5426 = vpow2.f32 %v4699_v38 }
0x9292   :  { %v5425_v34 = vpop.eup %5424 }
0x9293   :  { %4275 = vrot.lane.b32.xlu1 %v5425_v34, %s5512_s11 }
0x9294   :  { %v5427_v18 = vpop.eup %5426 }
0x9295   :  { %v4266_v7 = vadd.f32 1.0, %v5427_v18 }
0x9297   :  { %5428 = vrcp.f32 %v4266_v7 }
0x92a4   :  { %v5429_v48 = vpop.eup %5428 }
0x92a5   :  { %v4273_v20 = vmul.f32 %v5429_v48, %v4271_v49 }
0x9305   :  { %v4276_v30 = vpop.permute.xlu1 %4275 }
0x9306   :  { %v4278_v9 = vmul.f32 %v5429_v48, %v4276_v30 }
0x9308   :  { %4280 = vrot.lane.b32.xlu0 %v4278_v9, %s5513_s12 }
0x937a   :  { %v4281_v16 = vpop.permute.xlu0 %4280 }
0x937b   :  { %v4283_v12 = vadd.f32 %v4281_v16, %v4273_v20 }
0x937d   :  { %5430 = vtanh.f32 %v4283_v12 }
0x938a   :  { %v5431_v26 = vpop.eup %5430 }
0x938b   :  { %4286 = vrot.lane.b32.xlu1 %v5431_v26, %s5513_s12 }
0x93fd   :  { %v4287_v47 = vpop.permute.xlu1 %4286 }
0x93fe   :  { %v7168_v34 = vmul.f32 %v5429_v48, %v4287_v47 }
0x9400   :  { %7468 = vst [vmem:[#allocation41_spill] sm:$0xff] %v7168_v34  ;;  %4300 = vrot.lane.b32.xlu1 %v7168_v34, %s5514_s13  ;;  %4297 = vrot.lane.b32.xlu0 %v7168_v34, %s5515_s14 }
0x9404   :  { %4303 = vrot.lane.b32.xlu0 %v7168_v34, %s5513_s12 }
0x9472   :  { %v4301_v0 = vpop.permute.xlu1 %4300  ;;  %v4298_v50 = vpop.permute.xlu0 %4297 }
0x9473   :  { %v4306_v38 = vsel %vm565_vm1, %v4298_v50, %v4301_v0 }
0x9474   :  { %v4307_v18 = vsel %vm567_vm2, %v4306_v38, %v7168_v34 }
0x9476   :  { %v4304_v7 = vpop.permute.xlu0 %4303 }
0x9477   :  { %v4308_v48 = vsel %vm569_vm3, %v4307_v18, %v4304_v7  ;;  %v4322_v18 = vrot.slane %v4283_v12, 7 }
0x9478   :  { %v4309_v30 = vmul.f32 %v4308_v48, %v5698_v43 }
0x947a   :  { %v4311_v9 = vrot.slane %v4309_v30, 7 }
0x947c   :  { %v4313_v49 = vadd.f32 %v4311_v9, %v7145_v58 }
0x947e   :  { %5432 = vtanh.f32 %v4313_v49  ;;  %v4700_v16 = vmul.f32 -1.442695, %v4313_v49 }
0x9480   :  { %5434 = vpow2.f32 %v4700_v16 }
0x948b   :  { %v5433_v20 = vpop.eup %5432 }
0x948c   :  { %4326 = vrot.lane.b32.xlu1 %v5433_v20, %s5512_s11 }
0x948d   :  { %v5435_v26 = vpop.eup %5434 }
0x948e   :  { %v4317_v47 = vadd.f32 1.0, %v5435_v26 }
0x9490   :  { %5436 = vrcp.f32 %v4317_v47 }
0x949d   :  { %v5437_v0 = vpop.eup %5436 }
0x949e   :  { %v4324_v7 = vmul.f32 %v5437_v0, %v4322_v18 }
0x94fe   :  { %v4327_v50 = vpop.permute.xlu1 %4326 }
0x94ff   :  { %v4329_v38 = vmul.f32 %v5437_v0, %v4327_v50 }
0x9501   :  { %4331 = vrot.lane.b32.xlu0 %v4329_v38, %s5513_s12 }
0x9573   :  { %v4332_v48 = vpop.permute.xlu0 %4331 }
0x9574   :  { %v4334_v30 = vadd.f32 %v4332_v48, %v4324_v7 }
0x9576   :  { %5438 = vtanh.f32 %v4334_v30 }
0x9583   :  { %v5439_v9 = vpop.eup %5438 }
0x9584   :  { %4337 = vrot.lane.b32.xlu1 %v5439_v9, %s5513_s12 }
0x95f6   :  { %v4338_v34 = vpop.permute.xlu1 %4337 }
0x95f7   :  { %v7185_v20 = vmul.f32 %v5437_v0, %v4338_v34 }
0x95f9   :  { %7469 = vst [vmem:[#allocation42_spill] sm:$0xff] %v7185_v20  ;;  %4351 = vrot.lane.b32.xlu1 %v7185_v20, %s5514_s13  ;;  %4348 = vrot.lane.b32.xlu0 %v7185_v20, %s5515_s14 }
0x95fd   :  { %4354 = vrot.lane.b32.xlu0 %v7185_v20, %s5513_s12 }
0x966b   :  { %v4352_v12 = vpop.permute.xlu1 %4351  ;;  %v4349_v49 = vpop.permute.xlu0 %4348 }
0x966c   :  { %v4357_v16 = vsel %vm565_vm1, %v4349_v49, %v4352_v12 }
0x966d   :  { %v4358_v26 = vsel %vm567_vm2, %v4357_v16, %v7185_v20 }
0x966f   :  { %v4355_v47 = vpop.permute.xlu0 %4354 }
0x9670   :  { %v4359_v34 = vsel %vm569_vm3, %v4358_v26, %v4355_v47  ;;  %v4373_v26 = vrot.slane %v4334_v30, 7 }
0x9671   :  { %v4360_v0 = vmul.f32 %v4359_v34, %v5698_v43 }
0x9673   :  { %v4362_v50 = vrot.slane %v4360_v0, 7 }
0x9675   :  { %v4364_v38 = vadd.f32 %v4362_v50, %v7145_v58 }
0x9677   :  { %5440 = vtanh.f32 %v4364_v38  ;;  %v4701_v7 = vmul.f32 -1.442695, %v4364_v38 }
0x9679   :  { %5442 = vpow2.f32 %v4701_v7 }
0x9684   :  { %v5441_v18 = vpop.eup %5440 }
0x9685   :  { %4377 = vrot.lane.b32.xlu1 %v5441_v18, %s5512_s11 }
0x9686   :  { %v5443_v48 = vpop.eup %5442 }
0x9687   :  { %v4368_v9 = vadd.f32 1.0, %v5443_v48 }
0x9689   :  { %5444 = vrcp.f32 %v4368_v9 }
0x9696   :  { %v5445_v12 = vpop.eup %5444 }
0x9697   :  { %v4375_v47 = vmul.f32 %v5445_v12, %v4373_v26 }
0x96f7   :  { %v4378_v49 = vpop.permute.xlu1 %4377 }
0x96f8   :  { %v4380_v16 = vmul.f32 %v5445_v12, %v4378_v49 }
0x96fa   :  { %4382 = vrot.lane.b32.xlu0 %v4380_v16, %s5513_s12 }
0x976c   :  { %v4383_v34 = vpop.permute.xlu0 %4382 }
0x976d   :  { %v4385_v0 = vadd.f32 %v4383_v34, %v4375_v47 }
0x976f   :  { %5446 = vtanh.f32 %v4385_v0 }
0x977c   :  { %v5447_v50 = vpop.eup %5446 }
0x977d   :  { %4388 = vrot.lane.b32.xlu1 %v5447_v50, %s5513_s12 }
0x97ef   :  { %v4389_v20 = vpop.permute.xlu1 %4388 }
0x97f0   :  { %v7202_v18 = vmul.f32 %v5445_v12, %v4389_v20 }
0x97f2   :  { %7470 = vst [vmem:[#allocation43_spill] sm:$0xff] %v7202_v18  ;;  %4402 = vrot.lane.b32.xlu1 %v7202_v18, %s5514_s13  ;;  %4399 = vrot.lane.b32.xlu0 %v7202_v18, %s5515_s14 }
0x97f6   :  { %4405 = vrot.lane.b32.xlu0 %v7202_v18, %s5513_s12 }
0x9864   :  { %v4403_v30 = vpop.permute.xlu1 %4402  ;;  %v4400_v38 = vpop.permute.xlu0 %4399 }
0x9865   :  { %v4408_v7 = vsel %vm565_vm1, %v4400_v38, %v4403_v30 }
0x9866   :  { %v4409_v48 = vsel %vm567_vm2, %v4408_v7, %v7202_v18 }
0x9868   :  { %v4406_v9 = vpop.permute.xlu0 %4405 }
0x9869   :  { %v4410_v20 = vsel %vm569_vm3, %v4409_v48, %v4406_v9  ;;  %v4424_v48 = vrot.slane %v4385_v0, 7 }
0x986a   :  { %v4411_v12 = vmul.f32 %v4410_v20, %v5698_v43 }
0x986c   :  { %v4413_v49 = vrot.slane %v4411_v12, 7 }
0x986e   :  { %v4415_v16 = vadd.f32 %v4413_v49, %v7145_v58 }
0x9870   :  { %5448 = vtanh.f32 %v4415_v16  ;;  %v4702_v47 = vmul.f32 -1.442695, %v4415_v16 }
0x9872   :  { %5450 = vpow2.f32 %v4702_v47 }
0x987d   :  { %v5449_v26 = vpop.eup %5448 }
0x987e   :  { %4428 = vrot.lane.b32.xlu1 %v5449_v26, %s5512_s11 }
0x987f   :  { %v5451_v34 = vpop.eup %5450 }
0x9880   :  { %v4419_v50 = vadd.f32 1.0, %v5451_v34 }
0x9882   :  { %5452 = vrcp.f32 %v4419_v50 }
0x988f   :  { %v5453_v30 = vpop.eup %5452 }
0x9890   :  { %v4426_v9 = vmul.f32 %v5453_v30, %v4424_v48 }
0x98f0   :  { %v4429_v38 = vpop.permute.xlu1 %4428 }
0x98f1   :  { %v4431_v7 = vmul.f32 %v5453_v30, %v4429_v38 }
0x98f3   :  { %4433 = vrot.lane.b32.xlu0 %v4431_v7, %s5513_s12 }
0x9965   :  { %v4434_v20 = vpop.permute.xlu0 %4433 }
0x9966   :  { %v4436_v12 = vadd.f32 %v4434_v20, %v4426_v9 }
0x9968   :  { %5454 = vtanh.f32 %v4436_v12 }
0x9975   :  { %v5455_v49 = vpop.eup %5454 }
0x9976   :  { %4439 = vrot.lane.b32.xlu1 %v5455_v49, %s5513_s12 }
0x99e8   :  { %v4440_v18 = vpop.permute.xlu1 %4439 }
0x99e9   :  { %v7219_v26 = vmul.f32 %v5453_v30, %v4440_v18 }
0x99eb   :  { %7471 = vst [vmem:[#allocation44_spill] sm:$0xff] %v7219_v26  ;;  %4453 = vrot.lane.b32.xlu1 %v7219_v26, %s5514_s13  ;;  %4450 = vrot.lane.b32.xlu0 %v7219_v26, %s5515_s14 }
0x99ef   :  { %4456 = vrot.lane.b32.xlu0 %v7219_v26, %s5513_s12 }
0x9a5d   :  { %v4454_v0 = vpop.permute.xlu1 %4453  ;;  %v4451_v16 = vpop.permute.xlu0 %4450 }
0x9a5e   :  { %v4459_v47 = vsel %vm565_vm1, %v4451_v16, %v4454_v0 }
0x9a5f   :  { %v4460_v34 = vsel %vm567_vm2, %v4459_v47, %v7219_v26 }
0x9a61   :  { %v4457_v50 = vpop.permute.xlu0 %4456 }
0x9a62   :  { %v4461_v18 = vsel %vm569_vm3, %v4460_v34, %v4457_v50  ;;  %v4475_v34 = vrot.slane %v4436_v12, 7 }
0x9a63   :  { %v4462_v30 = vmul.f32 %v4461_v18, %v5698_v43 }
0x9a65   :  { %v4464_v38 = vrot.slane %v4462_v30, 7 }
0x9a67   :  { %v4466_v7 = vadd.f32 %v4464_v38, %v7145_v58 }
0x9a69   :  { %5456 = vtanh.f32 %v4466_v7  ;;  %v4703_v9 = vmul.f32 -1.442695, %v4466_v7 }
0x9a6b   :  { %5458 = vpow2.f32 %v4703_v9 }
0x9a76   :  { %v5457_v48 = vpop.eup %5456 }
0x9a77   :  { %4479 = vrot.lane.b32.xlu1 %v5457_v48, %s5512_s11 }
0x9a78   :  { %v5459_v20 = vpop.eup %5458 }
0x9a79   :  { %v4470_v49 = vadd.f32 1.0, %v5459_v20 }
0x9a7b   :  { %5460 = vrcp.f32 %v4470_v49 }
0x9a88   :  { %v5461_v0 = vpop.eup %5460 }
0x9a89   :  { %v4477_v50 = vmul.f32 %v5461_v0, %v4475_v34 }
0x9ae9   :  { %v4480_v16 = vpop.permute.xlu1 %4479 }
0x9aea   :  { %v4482_v47 = vmul.f32 %v5461_v0, %v4480_v16 }
0x9aec   :  { %4484 = vrot.lane.b32.xlu0 %v4482_v47, %s5513_s12 }
0x9b5e   :  { %v4485_v18 = vpop.permute.xlu0 %4484 }
0x9b5f   :  { %v4487_v30 = vadd.f32 %v4485_v18, %v4477_v50 }
0x9b61   :  { %5462 = vtanh.f32 %v4487_v30 }
0x9b6e   :  { %v5463_v38 = vpop.eup %5462 }
0x9b6f   :  { %4490 = vrot.lane.b32.xlu1 %v5463_v38, %s5513_s12 }
0x9be1   :  { %v4491_v26 = vpop.permute.xlu1 %4490 }
0x9be2   :  { %v7236_v48 = vmul.f32 %v5461_v0, %v4491_v26 }
0x9be4   :  { %4504 = vrot.lane.b32.xlu1 %v7236_v48, %s5514_s13  ;;  %4501 = vrot.lane.b32.xlu0 %v7236_v48, %s5515_s14 }
0x9be8   :  { %4507 = vrot.lane.b32.xlu0 %v7236_v48, %s5513_s12 }
0x9c56   :  { %v4505_v12 = vpop.permute.xlu1 %4504  ;;  %v4502_v7 = vpop.permute.xlu0 %4501 }
0x9c57   :  { %v4510_v9 = vsel %vm565_vm1, %v4502_v7, %v4505_v12 }
0x9c58   :  { %v4511_v20 = vsel %vm567_vm2, %v4510_v9, %v7236_v48 }
0x9c5a   :  { %v4508_v49 = vpop.permute.xlu0 %4507 }
0x9c5b   :  { %v4512_v26 = vsel %vm569_vm3, %v4511_v20, %v4508_v49  ;;  %v4526_v20 = vrot.slane %v4487_v30, 7 }
0x9c5c   :  { %v4513_v0 = vmul.f32 %v4512_v26, %v5698_v43 }
0x9c5e   :  { %v4515_v16 = vrot.slane %v4513_v0, 7 }
0x9c60   :  { %v4517_v47 = vadd.f32 %v4515_v16, %v7145_v58 }
0x9c62   :  { %5464 = vtanh.f32 %v4517_v47  ;;  %v4704_v50 = vmul.f32 -1.442695, %v4517_v47 }
0x9c64   :  { %5466 = vpow2.f32 %v4704_v50 }
0x9c6f   :  { %v5465_v34 = vpop.eup %5464 }
0x9c70   :  { %4530 = vrot.lane.b32.xlu1 %v5465_v34, %s5512_s11 }
0x9c71   :  { %v5467_v18 = vpop.eup %5466 }
0x9c72   :  { %v4521_v38 = vadd.f32 1.0, %v5467_v18 }
0x9c74   :  { %5468 = vrcp.f32 %v4521_v38 }
0x9c81   :  { %v5469_v12 = vpop.eup %5468 }
0x9c82   :  { %v4528_v49 = vmul.f32 %v5469_v12, %v4526_v20  ;;  %v548_v20 = vmax.f32 %v5671_v13, 0.0 }
0x9ce2   :  { %v4531_v7 = vpop.permute.xlu1 %4530 }
0x9ce3   :  { %v4533_v9 = vmul.f32 %v5469_v12, %v4531_v7  ;;  %v603_v7 = vmax.f32 %v5688_v36, 0.0  ;;  %v813_v36 = vmax.f32 %v5759_v17, 0.0  ;;  %v966_v17 = vmax.f32 %v5819_v37, 0.0 }
0x9ce5   :  { %4535 = vrot.lane.b32.xlu0 %v4533_v9, %s5513_s12 }
0x9d57   :  { %v4536_v26 = vpop.permute.xlu0 %4535 }
0x9d58   :  { %v7252_v0 = vadd.f32 %v4536_v26, %v4528_v49  ;;  %v660_v49 = vmax.f32 %v5708_v3, 0.0  ;;  %v864_v3 = vmax.f32 %v5776_v42, 0.0 }
0x9d5a   :  { %5470 = vtanh.f32 %v7252_v0 }
0x9d67   :  { %v5471_v16 = vpop.eup %5470 }
0x9d68   :  { %4541 = vrot.lane.b32.xlu1 %v5471_v16, %s5513_s12 }
0x9dda   :  { %v4542_v47 = vpop.permute.xlu1 %4541 }
0x9ddb   :  { %v7256_v34 = vmul.f32 %v5469_v12, %v4542_v47 }
0x9ddd   :  { %4555 = vrot.lane.b32.xlu1 %v7256_v34, %s5514_s13  ;;  %4552 = vrot.lane.b32.xlu0 %v7256_v34, %s5515_s14 }
0x9de1   :  { %550 = vrot.lane.b32.xlu1 %v5665_v63, %s5515_s14  ;;  %4558 = vrot.lane.b32.xlu0 %v7256_v34, %s5513_s12 }
0x9de5   :  { %968 = vrot.lane.b32.xlu0 %v5813_v22, %s5515_s14 }
0x9de9   :  { %1377 = vrot.lane.b32.xlu0 %v5996_v62, %s5515_s14 }
0x9ded   :  { %2195 = vrot.lane.b32.xlu0 %v6329_v32, %s5515_s14 }
0x9df1   :  { %2604 = vrot.lane.b32.xlu0 %v6479_v55, %s5515_s14 }
0x9df5   :  { %3422 = vrot.lane.b32.xlu0 %v6812_v24, %s5515_s14 }
0x9df9   :  { %4240 = vrot.lane.b32.xlu0 %v7145_v58, %s5515_s14 }
0x9e4f   :  { %v4556_v63 = vpop.permute.xlu1 %4555  ;;  %v4553_v30 = vpop.permute.xlu0 %4552 }
0x9e50   :  { %v4561_v50 = vsel %vm565_vm1, %v4553_v30, %v4556_v63 }
0x9e51   :  { %v4562_v62 = vsel %vm567_vm2, %v4561_v50, %v7256_v34  ;;  %v762_v50 = vmax.f32 %v5742_v52, 0.0 }
0x9e53   :  { %v4559_v22 = vpop.permute.xlu0 %4558  ;;  %v551_v12 = vpop.permute.xlu1 %550 }
0x9e54   :  { %v4563_v18 = vsel %vm569_vm3, %v4562_v62, %v4559_v22  ;;  %v604_v9 = vmul.f32 %v603_v7, %v551_v12  ;;  %v661_v16 = vmul.f32 %v660_v49, %v551_v12  ;;  %v763_v62 = vmul.f32 %v762_v50, %v551_v12 }
0x9e55   :  { %v4564_v32 = vmul.f32 %v4563_v18, %v5698_v43  ;;  %v553_v43 = vmul.f32 %v551_v12, %v548_v20  ;;  %v814_v13 = vmul.f32 %v813_v36, %v551_v12 }
0x9e56   :  { %v606_v26 = vrot.slane %v604_v9, 1  ;;  %v663_v63 = vrot.slane %v661_v16, 2  ;;  %v865_v9 = vmul.f32 %v864_v3, %v551_v12  ;;  %v1222_v3 = vmax.f32 %v5904_v53, 0.0 }
0x9e57   :  { %v4566_v38 = vrot.slane %v4564_v32, 7  ;;  %v765_v32 = vrot.slane %v763_v62, 4  ;;  %v816_v7 = vrot.slane %v814_v13, 5  ;;  %v969_v16 = vpop.permute.xlu0 %968 }
0x9e58   :  { %v608_v47 = vadd.f32 %v606_v26, %v553_v43  ;;  %v867_v49 = vrot.slane %v865_v9, 6 }
0x9e59   :  { %v4568_v55 = vadd.f32 %v4566_v38, %v7145_v58  ;;  %v711_v58 = vmax.f32 %v5725_v27, 0.0  ;;  %v915_v27 = vmax.f32 %v5793_v8, 0.0 }
0x9e5a   :  { %v665_v22 = vadd.f32 %v663_v63, %v608_v47  ;;  %v971_v63 = vmul.f32 %v969_v16, %v966_v17 }
0x9e5b   :  { %5472 = vtanh.f32 %v4568_v55  ;;  %v712_v30 = vmul.f32 %v711_v58, %v551_v12  ;;  %v916_v52 = vmul.f32 %v915_v27, %v551_v12  ;;  %v1018_v58 = vmax.f32 %v5836_v2, 0.0 }
0x9e5d   :  { %v918_v43 = vrot.slane %v916_v52, 7  ;;  %v1019_v42 = vmul.f32 %v1018_v58, %v969_v16 }
0x9e68   :  { %v5473_v24 = vpop.eup %5472 }
0x9e69   :  { %4581 = vrot.lane.b32.xlu1 %v5473_v24, %s5512_s11  ;;  %v4705_v24 = vmul.f32 -1.442695, %v4568_v55  ;;  %v1069_v55 = vmax.f32 %v5853_v31, 0.0  ;;  %s5516_s11 = smov [#allocation3]  }
0x9e6b   :  { %5474 = vpow2.f32 %v4705_v24  ;;  %v1070_v8 = vmul.f32 %v1069_v55, %v969_v16  ;;  %v1223_v24 = vmul.f32 %v1222_v3, %v969_v16 }
0x9e6d   :  { %1786 = vrot.lane.b32.xlu1 %v6146_v56, %s5515_s14  ;;  %v714_v56 = vrot.slane %v712_v30, 3  ;;  %v1072_v36 = vrot.slane %v1070_v8, 2  ;;  %v1225_v27 = vrot.slane %v1223_v24, 5  ;;  %v1529_v8 = vmax.f32 %v6058_v5, 0.0 }
0x9e6e   :  { %v1733_v5 = vmax.f32 %v6126_v35, 0.0  ;;  %v1938_v35 = vmax.f32 %v6203_v28, 0.0  ;;  %v2142_v28 = vmax.f32 %v6303_v1, 0.0  ;;  %v2347_v1 = vmax.f32 %v6391_v29, 0.0 }
0x9e6f   :  { %v716_v18 = vadd.f32 %v714_v56, %v665_v22  ;;  %v1021_v22 = vrot.slane %v1019_v42, 1  ;;  %v1120_v56 = vmax.f32 %v5870_v60, 0.0 }
0x9e71   :  { %v767_v38 = vadd.f32 %v765_v32, %v716_v18  ;;  %v1121_v18 = vmul.f32 %v1120_v56, %v969_v16  ;;  %v1171_v32 = vmax.f32 %v5887_v25, 0.0 }
0x9e73   :  { %v818_v20 = vadd.f32 %v816_v7, %v767_v38  ;;  %v1123_v2 = vrot.slane %v1121_v18, 3  ;;  %v1172_v13 = vmul.f32 %v1171_v32, %v969_v16  ;;  %v1273_v7 = vmax.f32 %v5941_v40, 0.0 }
0x9e74   :  { %v1375_v40 = vmax.f32 %v6002_v21, 0.0  ;;  %v1631_v18 = vmax.f32 %v6092_v19, 0.0 }
0x9e75   :  { %v869_v26 = vadd.f32 %v867_v49, %v818_v20  ;;  %v1174_v31 = vrot.slane %v1172_v13, 4  ;;  %v1274_v60 = vmul.f32 %v1273_v7, %v969_v16  ;;  %v1324_v20 = vmax.f32 %v5970_v41, 0.0 }
0x9e77   :  { %v920_v47 = vadd.f32 %v918_v43, %v869_v26  ;;  %v1276_v26 = vrot.slane %v1274_v60, 6  ;;  %v1325_v43 = vmul.f32 %v1324_v20, %v969_v16 }
0x9e78   :  { %v5475_v50 = vpop.eup %5474 }
0x9e79   :  { %v972_v30 = vadd.f32 %v971_v63, %v920_v47  ;;  %v4572_v62 = vadd.f32 1.0, %v5475_v50  ;;  %v1327_v53 = vrot.slane %v1325_v43, 7  ;;  %v1378_v47 = vpop.permute.xlu0 %1377  ;;  %v1427_v63 = vmax.f32 %v6024_v54, 0.0 }
0x9e7a   :  { %v1380_v41 = vmul.f32 %v1378_v47, %v1375_v40  ;;  %v1580_v54 = vmax.f32 %v6075_v39, 0.0  ;;  %v1734_v24 = vmul.f32 %v1733_v5, %v1378_v47  ;;  %v1784_v39 = vmax.f32 %v6152_v23, 0.0 }
0x9e7b   :  { %v1023_v12 = vadd.f32 %v1021_v22, %v972_v30  ;;  %5476 = vrcp.f32 %v4572_v62  ;;  %v1428_v55 = vmul.f32 %v1427_v63, %v1378_v47  ;;  %v1478_v30 = vmax.f32 %v6041_v57, 0.0 }
0x9e7c   :  { %v1530_v62 = vmul.f32 %v1529_v8, %v1378_v47  ;;  %v1736_v19 = vrot.slane %v1734_v24, 7  ;;  %v2040_v63 = vmax.f32 %v6237_v51, 0.0  ;;  %v2245_v51 = vmax.f32 %v6357_v6, 0.0 }
0x9e7d   :  { %v1074_v37 = vadd.f32 %v1072_v36, %v1023_v12  ;;  %v1430_v50 = vrot.slane %v1428_v55, 1  ;;  %v1479_v22 = vmul.f32 %v1478_v30, %v1378_v47 }
0x9e7e   :  { %v1532_v36 = vrot.slane %v1530_v62, 3  ;;  %v2196_v62 = vpop.permute.xlu0 %2195 }
0x9e7f   :  { %v1125_v38 = vadd.f32 %v1123_v2, %v1074_v37  ;;  %v1481_v21 = vrot.slane %v1479_v22, 2  ;;  %v1632_v37 = vmul.f32 %v1631_v18, %v1378_v47  ;;  %v1682_v2 = vmax.f32 %v6109_v61, 0.0 }
0x9e80   :  { %v1887_v61 = vmax.f32 %v6186_v45, 0.0  ;;  %v2091_v45 = vmax.f32 %v6274_v44, 0.0  ;;  %v2296_v44 = vmax.f32 %v6374_v59, 0.0 }
0x9e81   :  { %v1176_v9 = vadd.f32 %v1174_v31, %v1125_v38  ;;  %v1634_v13 = vrot.slane %v1632_v37, 5  ;;  %v1683_v3 = vmul.f32 %v1682_v2, %v1378_v47 }
0x9e83   :  { %v1227_v49 = vadd.f32 %v1225_v27, %v1176_v9  ;;  %v1685_v31 = vrot.slane %v1683_v3, 6  ;;  %v1836_v9 = vmax.f32 %v6169_v4, 0.0 }
0x9e85   :  { %v1278_v58 = vadd.f32 %v1276_v26, %v1227_v49 }
0x9e87   :  { %v1329_v42 = vadd.f32 %v1327_v53, %v1278_v58 }
0x9e88   :  { %v7303_v52 = vpop.eup %5476 }
0x9e89   :  { %v1381_v16 = vadd.f32 %v1380_v41, %v1329_v42 }
0x9e8b   :  { %v1432_v56 = vadd.f32 %v1430_v50, %v1381_v16 }
0x9e8d   :  { %v1483_v12 = vadd.f32 %v1481_v21, %v1432_v56 }
0x9e8f   :  { %v1534_v32 = vadd.f32 %v1532_v36, %v1483_v12 }
0x9edb   :  { %v4582_v25 = vpop.permute.xlu1 %4581 }
0x9edc   :  { %v4584_v17 = vmul.f32 %v7303_v52, %v4582_v25 }
0x9ede   :  { %4586 = vrot.lane.b32.xlu1 %v4584_v17, %s5513_s12 }
0x9edf   :  { %v1787_v7 = vpop.permute.xlu1 %1786 }
0x9ee0   :  { %v1789_v60 = vmul.f32 %v1787_v7, %v1784_v39  ;;  %v1837_v20 = vmul.f32 %v1836_v9, %v1787_v7  ;;  %v1888_v43 = vmul.f32 %v1887_v61, %v1787_v7  ;;  %v1939_v53 = vmul.f32 %v1938_v35, %v1787_v7  ;;  %v7474_v9 = vld [vmem:[#allocation8_spill] sm:$0xff]  ;;  %v2605_v35 = vpop.permute.xlu0 %2604 }
0x9ee1   :  { %v2041_v55 = vmul.f32 %v2040_v63, %v1787_v7  ;;  %v2092_v50 = vmul.f32 %v2091_v45, %v1787_v7  ;;  %v2143_v56 = vmul.f32 %v2142_v28, %v1787_v7  ;;  %v2500_v59 = vmax.f32 %v7474_v9, 0.0  ;;  %v7478_v63 = vld [vmem:[#allocation12_spill] sm:$0xff] }
0x9ee2   :  { %3013 = vrot.lane.b32.xlu1 %v6662_v33, %s5515_s14  ;;  %v1581_v33 = vmul.f32 %v1580_v54, %v1378_v47  ;;  %v1839_v26 = vrot.slane %v1837_v20, 1  ;;  %v1890_v58 = vrot.slane %v1888_v43, 2  ;;  %v1989_v47 = vmax.f32 %v6220_v11, 0.0  ;;  %v7475_v20 = vld [vmem:[#allocation9_spill] sm:$0xff] }
0x9ee3   :  { %v1941_v40 = vrot.slane %v1939_v53, 3  ;;  %v2043_v16 = vrot.slane %v2041_v55, 5  ;;  %v2094_v8 = vrot.slane %v2092_v50, 6  ;;  %v2145_v11 = vrot.slane %v2143_v56, 7  ;;  %v7477_v53 = vld [vmem:[#allocation11_spill] sm:$0xff] }
0x9ee4   :  { %v1583_v57 = vrot.slane %v1581_v33, 4  ;;  %v1990_v4 = vmul.f32 %v1989_v47, %v1787_v7  ;;  %v2193_v54 = vmax.f32 %v6335_v10, 0.0  ;;  %v2246_v33 = vmul.f32 %v2245_v51, %v2196_v62 }
0x9ee5   :  { %v2551_v29 = vmax.f32 %v7475_v20, 0.0  ;;  %v2654_v47 = vmax.f32 %v7477_v53, 0.0 }
0x9ee6   :  { %3831 = vrot.lane.b32.xlu1 %v6995_v14, %s5515_s14  ;;  %v1585_v14 = vadd.f32 %v1583_v57, %v1534_v32  ;;  %v1992_v41 = vrot.slane %v1990_v4, 4  ;;  %v2198_v36 = vmul.f32 %v2196_v62, %v2193_v54  ;;  %v2248_v32 = vrot.slane %v2246_v33, 1 }
0x9ee7   :  { %v2297_v57 = vmul.f32 %v2296_v44, %v2196_v62  ;;  %v2655_v4 = vmul.f32 %v2654_v47, %v2605_v35  ;;  %v7488_v47 = vld [vmem:[#allocation22_spill] sm:$0xff] }
0x9ee8   :  { %v1636_v38 = vadd.f32 %v1634_v13, %v1585_v14  ;;  %v2348_v14 = vmul.f32 %v2347_v1, %v2196_v62  ;;  %v7472_v13 = vld [vmem:[#allocation6_spill] sm:$0xff]  ;;  %v7482_v1 = vld [vmem:[#allocation16_spill] sm:$0xff] }
0x9ee9   :  { %v2299_v2 = vrot.slane %v2297_v57, 2  ;;  %v2398_v3 = vmax.f32 %v7472_v13, 0.0  ;;  %v2657_v55 = vrot.slane %v2655_v4, 1 }
0x9eea   :  { %v1687_v27 = vadd.f32 %v1685_v31, %v1636_v38  ;;  %v2350_v38 = vrot.slane %v2348_v14, 3  ;;  %v7473_v31 = vld [vmem:[#allocation7_spill] sm:$0xff] }
0x9eeb   :  { %v2399_v10 = vmul.f32 %v2398_v3, %v2196_v62  ;;  %v2449_v6 = vmax.f32 %v7473_v31, 0.0  ;;  %v7483_v3 = vld [vmem:[#allocation17_spill] sm:$0xff] }
0x9eec   :  { %v1738_v49 = vadd.f32 %v1736_v19, %v1687_v27 }
0x9eed   :  { %v2401_v7 = vrot.slane %v2399_v10, 4  ;;  %v2450_v39 = vmul.f32 %v2449_v6, %v2196_v62  ;;  %v7484_v6 = vld [vmem:[#allocation18_spill] sm:$0xff] }
0x9eee   :  { %v1790_v25 = vadd.f32 %v1789_v60, %v1738_v49  ;;  %v2501_v60 = vmul.f32 %v2500_v59, %v2196_v62 }
0x9eef   :  { %v2452_v19 = vrot.slane %v2450_v39, 5 }
0x9ef0   :  { %v1841_v17 = vadd.f32 %v1839_v26, %v1790_v25  ;;  %v2503_v61 = vrot.slane %v2501_v60, 6  ;;  %v2552_v25 = vmul.f32 %v2551_v29, %v2196_v62  ;;  %v7486_v29 = vld [vmem:[#allocation20_spill] sm:$0xff] }
0x9ef2   :  { %v1892_v23 = vadd.f32 %v1890_v58, %v1841_v17  ;;  %v2554_v43 = vrot.slane %v2552_v25, 7  ;;  %v7476_v17 = vld [vmem:[#allocation10_spill] sm:$0xff] }
0x9ef3   :  { %v2602_v58 = vmax.f32 %v7476_v17, 0.0 }
0x9ef4   :  { %v1943_v42 = vadd.f32 %v1941_v40, %v1892_v23 }
0x9ef5   :  { %v2607_v40 = vmul.f32 %v2605_v35, %v2602_v58 }
0x9ef6   :  { %v1994_v30 = vadd.f32 %v1992_v41, %v1943_v42  ;;  %v2705_v42 = vmax.f32 %v7478_v63, 0.0 }
0x9ef8   :  { %v2045_v22 = vadd.f32 %v2043_v16, %v1994_v30  ;;  %v2706_v45 = vmul.f32 %v2705_v42, %v2605_v35  ;;  %v7479_v30 = vld [vmem:[#allocation13_spill] sm:$0xff]  ;;  %v7489_v42 = vld [vmem:[#allocation23_spill] sm:$0xff] }
0x9ef9   :  { %v2756_v16 = vmax.f32 %v7479_v30, 0.0 }
0x9efa   :  { %v2096_v21 = vadd.f32 %v2094_v8, %v2045_v22  ;;  %v2708_v28 = vrot.slane %v2706_v45, 2  ;;  %v7480_v8 = vld [vmem:[#allocation14_spill] sm:$0xff] }
0x9efb   :  { %v2757_v22 = vmul.f32 %v2756_v16, %v2605_v35  ;;  %v2807_v56 = vmax.f32 %v7480_v8, 0.0  ;;  %v7490_v16 = vld [vmem:[#allocation24_spill] sm:$0xff] }
0x9efc   :  { %v2147_v12 = vadd.f32 %v2145_v11, %v2096_v21  ;;  %v4577_v11 = vrot.slane %v7252_v0, 7 }
0x9efd   :  { %v2759_v62 = vrot.slane %v2757_v22, 3  ;;  %v2808_v54 = vmul.f32 %v2807_v56, %v2605_v35  ;;  %v7491_v56 = vld [vmem:[#allocation25_spill] sm:$0xff] }
0x9efe   :  { %v2199_v18 = vadd.f32 %v2198_v36, %v2147_v12  ;;  %v4579_v51 = vmul.f32 %v7303_v52, %v4577_v11  ;;  %v7481_v12 = vld [vmem:[#allocation15_spill] sm:$0xff] }
0x9eff   :  { %v2858_v36 = vmax.f32 %v7481_v12, 0.0 }
0x9f00   :  { %v2250_v37 = vadd.f32 %v2248_v32, %v2199_v18  ;;  %v2810_v32 = vrot.slane %v2808_v54, 4 }
0x9f01   :  { %v2859_v57 = vmul.f32 %v2858_v36, %v2605_v35  ;;  %v3423_v36 = vpop.permute.xlu0 %3422 }
0x9f02   :  { %v2301_v5 = vadd.f32 %v2299_v2, %v2250_v37  ;;  %v2909_v37 = vmax.f32 %v7482_v1, 0.0 }
0x9f03   :  { %v2861_v14 = vrot.slane %v2859_v57, 5 }
0x9f04   :  { %v2352_v24 = vadd.f32 %v2350_v38, %v2301_v5  ;;  %v2910_v13 = vmul.f32 %v2909_v37, %v2605_v35  ;;  %v2960_v5 = vmax.f32 %v7483_v3, 0.0 }
0x9f06   :  { %v2403_v27 = vadd.f32 %v2401_v7, %v2352_v24  ;;  %v2912_v38 = vrot.slane %v2910_v13, 6  ;;  %v2961_v10 = vmul.f32 %v2960_v5, %v2605_v35  ;;  %v3011_v24 = vmax.f32 %v7484_v6, 0.0  ;;  %v7485_v7 = vld [vmem:[#allocation19_spill] sm:$0xff] }
0x9f07   :  { %v3063_v39 = vmax.f32 %v7485_v7, 0.0 }
0x9f08   :  { %v2454_v49 = vadd.f32 %v2452_v19, %v2403_v27  ;;  %v2963_v59 = vrot.slane %v2961_v10, 7 }
0x9f0a   :  { %v2505_v26 = vadd.f32 %v2503_v61, %v2454_v49  ;;  %v3114_v49 = vmax.f32 %v7486_v29, 0.0 }
0x9f0c   :  { %v2556_v23 = vadd.f32 %v2554_v43, %v2505_v26  ;;  %v7487_v43 = vld [vmem:[#allocation21_spill] sm:$0xff] }
0x9f0d   :  { %v3165_v35 = vmax.f32 %v7487_v43, 0.0 }
0x9f0e   :  { %v2608_v41 = vadd.f32 %v2607_v40, %v2556_v23  ;;  %v3216_v23 = vmax.f32 %v7488_v47, 0.0 }
0x9f10   :  { %v2659_v50 = vadd.f32 %v2657_v55, %v2608_v41  ;;  %v3267_v41 = vmax.f32 %v7489_v42, 0.0 }
0x9f12   :  { %v2710_v21 = vadd.f32 %v2708_v28, %v2659_v50  ;;  %v3318_v50 = vmax.f32 %v7490_v16, 0.0 }
0x9f14   :  { %v2761_v44 = vadd.f32 %v2759_v62, %v2710_v21  ;;  %v3369_v21 = vmax.f32 %v7491_v56, 0.0 }
0x9f16   :  { %v2812_v2 = vadd.f32 %v2810_v32, %v2761_v44 }
0x9f18   :  { %v2863_v0 = vadd.f32 %v2861_v14, %v2812_v2  ;;  %v7494_v2 = vld [vmem:[#allocation28_spill] sm:$0xff] }
0x9f19   :  { %v3523_v14 = vmax.f32 %v7494_v2, 0.0 }
0x9f1a   :  { %v2914_v9 = vadd.f32 %v2912_v38, %v2863_v0  ;;  %v7495_v0 = vld [vmem:[#allocation29_spill] sm:$0xff] }
0x9f1b   :  { %v3524_v5 = vmul.f32 %v3523_v14, %v3423_v36  ;;  %v3574_v38 = vmax.f32 %v7495_v0, 0.0  ;;  %v7506_v14 = vld [vmem:[#allocation40_spill] sm:$0xff] }
0x9f1c   :  { %v2965_v20 = vadd.f32 %v2963_v59, %v2914_v9 }
0x9f1d   :  { %v3526_v6 = vrot.slane %v3524_v5, 2 }
0x9f50   :  { %v4587_v33 = vpop.permute.xlu1 %4586 }
0x9f51   :  { %v4589_v18 = vadd.f32 %v4587_v33, %v4579_v51  ;;  %v7492_v33 = vld [vmem:[#allocation26_spill] sm:$0xff] }
0x9f52   :  { %v3420_v44 = vmax.f32 %v7492_v33, 0.0 }
0x9f53   :  { %5478 = vtanh.f32 %v4589_v18  ;;  %v7493_v18 = vld [vmem:[#allocation27_spill] sm:$0xff] }
0x9f54   :  { %v3014_v31 = vpop.permute.xlu1 %3013  ;;  %v3472_v32 = vmax.f32 %v7493_v18, 0.0  ;;  %v3425_v1 = vmul.f32 %v3423_v36, %v3420_v44 }
0x9f55   :  { %v3016_v27 = vmul.f32 %v3014_v31, %v3011_v24  ;;  %v3064_v19 = vmul.f32 %v3063_v39, %v3014_v31  ;;  %v3115_v26 = vmul.f32 %v3114_v49, %v3014_v31  ;;  %v3166_v53 = vmul.f32 %v3165_v35, %v3014_v31  ;;  %v7496_v24 = vld [vmem:[#allocation30_spill] sm:$0xff]  ;;  %v7498_v49 = vld [vmem:[#allocation32_spill] sm:$0xff]  ;;  %v7499_v35 = vld [vmem:[#allocation33_spill] sm:$0xff] }
0x9f56   :  { %v3217_v63 = vmul.f32 %v3216_v23, %v3014_v31  ;;  %v3268_v30 = vmul.f32 %v3267_v41, %v3014_v31  ;;  %v3319_v8 = vmul.f32 %v3318_v50, %v3014_v31  ;;  %v3370_v54 = vmul.f32 %v3369_v21, %v3014_v31  ;;  %v7501_v41 = vld [vmem:[#allocation35_spill] sm:$0xff]  ;;  %v7502_v50 = vld [vmem:[#allocation36_spill] sm:$0xff]  ;;  %v7503_v21 = vld [vmem:[#allocation37_spill] sm:$0xff] }
0x9f57   :  { %v3017_v61 = vadd.f32 %v3016_v27, %v2965_v20  ;;  %v3066_v25 = vrot.slane %v3064_v19, 1  ;;  %v3117_v58 = vrot.slane %v3115_v26, 2  ;;  %v3168_v4 = vrot.slane %v3166_v53, 3  ;;  %v7497_v27 = vld [vmem:[#allocation31_spill] sm:$0xff] }
0x9f58   :  { %v3219_v45 = vrot.slane %v3217_v63, 4  ;;  %v3270_v22 = vrot.slane %v3268_v30, 5  ;;  %v3321_v62 = vrot.slane %v3319_v8, 6  ;;  %v3372_v12 = vrot.slane %v3370_v54, 7  ;;  %v7500_v63 = vld [vmem:[#allocation34_spill] sm:$0xff] }
0x9f59   :  { %v3068_v17 = vadd.f32 %v3066_v25, %v3017_v61  ;;  %v3473_v37 = vmul.f32 %v3472_v32, %v3423_v36  ;;  %v3575_v31 = vmul.f32 %v3574_v38, %v3423_v36  ;;  %v3625_v7 = vmax.f32 %v7496_v24, 0.0  ;;  %v7505_v32 = vld [vmem:[#allocation39_spill] sm:$0xff] }
0x9f5a   :  { %v3676_v19 = vmax.f32 %v7497_v27, 0.0  ;;  %v3727_v61 = vmax.f32 %v7498_v49, 0.0  ;;  %v3829_v42 = vmax.f32 %v7500_v63, 0.0  ;;  %v4187_v38 = vmax.f32 %v7125_v15, 0.0 }
0x9f5b   :  { %v3119_v40 = vadd.f32 %v3117_v58, %v3068_v17  ;;  %v3475_v3 = vrot.slane %v3473_v37, 1  ;;  %v3577_v9 = vrot.slane %v3575_v31, 3  ;;  %v3626_v59 = vmul.f32 %v3625_v7, %v3423_v36 }
0x9f5c   :  { %v3677_v29 = vmul.f32 %v3676_v19, %v3423_v36  ;;  %v3728_v43 = vmul.f32 %v3727_v61, %v3423_v36  ;;  %v3778_v17 = vmax.f32 %v7499_v35, 0.0 }
0x9f5d   :  { %v3170_v55 = vadd.f32 %v3168_v4, %v3119_v40  ;;  %v3628_v20 = vrot.slane %v3626_v59, 4  ;;  %v3832_v4 = vpop.permute.xlu1 %3831  ;;  %v7507_v59 = vld [vmem:[#allocation41_spill] sm:$0xff] }
0x9f5e   :  { %v3679_v26 = vrot.slane %v3677_v29, 5  ;;  %v3730_v53 = vrot.slane %v3728_v43, 6  ;;  %v3779_v47 = vmul.f32 %v3778_v17, %v3423_v36  ;;  %v3834_v30 = vmul.f32 %v3832_v4, %v3829_v42  ;;  %v7508_v29 = vld [vmem:[#allocation42_spill] sm:$0xff]  ;;  %v7509_v43 = vld [vmem:[#allocation43_spill] sm:$0xff] }
0x9f5f   :  { %v3221_v28 = vadd.f32 %v3219_v45, %v3170_v55  ;;  %v3881_v55 = vmax.f32 %v7501_v41, 0.0  ;;  %v4188_v31 = vmul.f32 %v4187_v38, %v3832_v4  ;;  %v4290_v27 = vmax.f32 %v7507_v59, 0.0 }
0x9f60   :  { %v5479_v60 = vpop.eup %5478  ;;  %v3781_v40 = vrot.slane %v3779_v47, 7  ;;  %v4341_v49 = vmax.f32 %v7508_v29, 0.0  ;;  %v4392_v15 = vmax.f32 %v7509_v43, 0.0 }
0x9f61   :  { %4592 = vrot.lane.b32.xlu1 %v5479_v60, %s5513_s12  ;;  %v3272_v11 = vadd.f32 %v3270_v22, %v3221_v28  ;;  %v3882_v16 = vmul.f32 %v3881_v55, %v3832_v4  ;;  %v3932_v28 = vmax.f32 %v7502_v50, 0.0  ;;  %v4190_v7 = vrot.slane %v4188_v31, 7  ;;  %s4617_s12 = sshll.u32 %s5516_s11, 4  ;;  %s4618_s12 = int_to_ptr.vmem [resolvable:$true] %s4617_s12 }
0x9f62   :  { %s5488_s13 = scalar_lea.vmem %s4618_s12, 16  ;;  %s5492_s20 = scalar_lea.vmem %s4618_s12, 32 }
0x9f63   :  { %v3323_v51 = vadd.f32 %v3321_v62, %v3272_v11  ;;  %v3884_v8 = vrot.slane %v3882_v16, 1  ;;  %v3933_v56 = vmul.f32 %v3932_v28, %v3832_v4  ;;  %v3983_v11 = vmax.f32 %v7503_v21, 0.0  ;;  %p5489_p0 = scmp.ne.s32.totalorder %s4618_s12, %s5488_s13  ;;  %p5493_p1 = scmp.lt.s32.totalorder %s4618_s12, %s4618_s12 }
0x9f64   :  { %p5494_p2 = scmp.lt.s32.totalorder %s5492_s20, %s5488_s13 }
0x9f65   :  { %v3374_v57 = vadd.f32 %v3372_v12, %v3323_v51  ;;  %v3935_v54 = vrot.slane %v3933_v56, 2  ;;  %v3984_v51 = vmul.f32 %v3983_v11, %v3832_v4  ;;  %v7504_v12 = vld [vmem:[#allocation38_spill] sm:$0xff] }
0x9f66   :  { %v4034_v36 = vmax.f32 %v7504_v12, 0.0  ;;  %p5495_p3 = por %p5494_p2, %p5493_p1 }
0x9f67   :  { %v3426_v13 = vadd.f32 %v3425_v1, %v3374_v57  ;;  %v3986_v44 = vrot.slane %v3984_v51, 3  ;;  %v4085_v57 = vmax.f32 %v7505_v32, 0.0 }
0x9f68   :  { %v4035_v18 = vmul.f32 %v4034_v36, %v3832_v4  ;;  %p5496_p4 = pnand %p5495_p3, %p5489_p0 }
0x9f69   :  { %v3477_v10 = vadd.f32 %v3475_v3, %v3426_v13  ;;  %v4086_v2 = vmul.f32 %v4085_v57, %v3832_v4  ;;  %v4136_v13 = vmax.f32 %v7506_v14, 0.0 }
0x9f6a   :  { %v4037_v37 = vrot.slane %v4035_v18, 4 }
0x9f6b   :  { %v3528_v39 = vadd.f32 %v3526_v6, %v3477_v10  ;;  %v4088_v5 = vrot.slane %v4086_v2, 5  ;;  %v4137_v0 = vmul.f32 %v4136_v13, %v3832_v4  ;;  %v4494_v4 = vmax.f32 %v7236_v48, 0.0 }
0x9f6c   :  { %v4603_v48 = vstv %s7392_s7 }
0x9f6d   :  { %v3579_v60 = vadd.f32 %v3577_v9, %v3528_v39  ;;  %v4139_v6 = vrot.slane %v4137_v0, 6  ;;  %v4241_v39 = vpop.permute.xlu0 %4240  ;;  %v4238_v9 = vmax.f32 %v7151_v46, 0.0 }
0x9f6e   :  { %v4495_v41 = vmul.f32 %v4494_v4, %v4241_v39 }
0x9f6f   :  { %v3630_v25 = vadd.f32 %v3628_v20, %v3579_v60  ;;  %v4243_v60 = vmul.f32 %v4241_v39, %v4238_v9  ;;  %v4291_v20 = vmul.f32 %v4290_v27, %v4241_v39 }
0x9f70   :  { %v4497_v16 = vrot.slane %v4495_v41, 5 }
0x9f71   :  { %v3681_v58 = vadd.f32 %v3679_v26, %v3630_v25  ;;  %v4293_v25 = vrot.slane %v4291_v20, 1  ;;  %v4342_v26 = vmul.f32 %v4341_v49, %v4241_v39 }
0x9f73   :  { %v3732_v23 = vadd.f32 %v3730_v53, %v3681_v58  ;;  %v4344_v17 = vrot.slane %v4342_v26, 2  ;;  %v4393_v58 = vmul.f32 %v4392_v15, %v4241_v39  ;;  %v7510_v53 = vld [vmem:[#allocation44_spill] sm:$0xff] }
0x9f74   :  { %v4443_v47 = vmax.f32 %v7510_v53, 0.0 }
0x9f75   :  { %v3783_v45 = vadd.f32 %v3781_v40, %v3732_v23  ;;  %v4395_v40 = vrot.slane %v4393_v58, 3 }
0x9f76   :  { %v4444_v46 = vmul.f32 %v4443_v47, %v4241_v39 }
0x9f77   :  { %v3835_v22 = vadd.f32 %v3834_v30, %v3783_v45  ;;  %v4545_v45 = vmax.f32 %v7256_v34, 0.0 }
0x9f78   :  { %v4446_v42 = vrot.slane %v4444_v46, 4 }
0x9f79   :  { %v3886_v62 = vadd.f32 %v3884_v8, %v3835_v22  ;;  %v4546_v50 = vmul.f32 %v4545_v45, %v4241_v39 }
0x9f7b   :  { %v3937_v33 = vadd.f32 %v3935_v54, %v3886_v62  ;;  %v4548_v56 = vrot.slane %v4546_v50, 6 }
0x9f7d   :  { %v3988_v1 = vadd.f32 %v3986_v44, %v3937_v33 }
0x9f7f   :  { %v4039_v3 = vadd.f32 %v4037_v37, %v3988_v1 }
0x9f81   :  { %v4090_v10 = vadd.f32 %v4088_v5, %v4039_v3 }
0x9f83   :  { %v4141_v24 = vadd.f32 %v4139_v6, %v4090_v10 }
0x9f85   :  { %v4192_v19 = vadd.f32 %v4190_v7, %v4141_v24 }
0x9f87   :  { %v4244_v61 = vadd.f32 %v4243_v60, %v4192_v19 }
0x9f89   :  { %v4295_v35 = vadd.f32 %v4293_v25, %v4244_v61 }
0x9f8b   :  { %v4346_v23 = vadd.f32 %v4344_v17, %v4295_v35 }
0x9f8d   :  { %v4397_v63 = vadd.f32 %v4395_v40, %v4346_v23 }
0x9f8f   :  { %v4448_v55 = vadd.f32 %v4446_v42, %v4397_v63 }
0x9f91   :  { %v4499_v22 = vadd.f32 %v4497_v16, %v4448_v55 }
0x9f93   :  { %v4550_v11 = vadd.f32 %v4548_v56, %v4499_v22 }
0x9fd3   :  { %v4593_v30 = vpop.permute.xlu1 %4592 }
0x9fd4   :  { %v4595_v28 = vmul.f32 %v7303_v52, %v4593_v30 }
0x9fd6   :  { %v4596_v8 = vmax.f32 %v4595_v28, 0.0 }
0x9fd8   :  { %v4597_v21 = vmul.f32 %v4596_v8, %v4241_v39 }
0x9fda   :  { %v4599_v62 = vrot.slane %v4597_v21, 7 }
0x9fdc   :  { %v4601_v54 = vadd.f32 %v4599_v62, %v4550_v11 }
0x9fde   :  { %v4604_v51 = vadd.f32 %v4603_v48, %v4601_v54 }
0x9fe0   :  { %4606 = vrot.lane.b32.xlu0 %v4604_v51, %s5515_s14 }
0xa052   :  { %v4607_v34 = vpop.permute.xlu0 %4606 }
0xa053   :  { %4610 = vst.msk [vmem:[#allocation3] sm:$0x1] %vm4609_vm4, %v4607_v34 }
0xa054   :  { %5499 = shalt.err (!%p5496_p4)
}
0xa055   :  { %4620 = dma.vmem_to_hbm [thread:$0]  %s4618_s12, 16, %s7393_s8, [#allocation4]  }
0xa056   :  { %5508 = dma.done.wait [#allocation4], 16  }
0xa057   :  { %5509 = vsyncadd [#allocation4], 4294967280 }
0xa058   :  { %4624 = vsyncpa [#allocation4], 1 }

</bundles_post_ra>
